<compile_context>
chip_gen: v6e
topology: v6e:2x2x1
jax: 0.10.0
libtpu: 0.0.40
codegen_flags: <defaults>
</compile_context>

<pallas_src>
import functools

import numpy as np
import jax
import jax.numpy as jnp
from jax import lax
from jax.experimental import pallas as pl
from jax.experimental.pallas import tpu as pltpu

LANE = 128                     # all channel dims padded to a multiple of this
ROW_TILE = 512                 # target rows per matmul tile (>=512 ~ roofline)
VMEM_LIMIT = 48 * 1024 * 1024  # explicit scoped-VMEM budget (fits v7x 64 MiB)


def _rup(x, m):
    return (x + m - 1) // m * m


def _pad_ch(x):
    c = x.shape[-1]
    cp = _rup(c, LANE)
    if cp == c:
        return x
    return jnp.pad(x, ((0, 0),) * (x.ndim - 1) + ((0, cp - c),))


# ----------------------------------------------------------------------------
# Pallas kernel: y = act(sum_i A_i @ W_i + bias)   [+ per-tile BN statistics]
# ----------------------------------------------------------------------------
def _fused_mm_kernel(n_ops, act, want_stats, *refs):
    a_refs = refs[:n_ops]
    w_refs = refs[n_ops:2 * n_ops]
    b_ref = refs[2 * n_ops]
    y_ref = refs[2 * n_ops + 1]

    acc = jnp.dot(a_refs[0][...], w_refs[0][...],
                  preferred_element_type=jnp.float32)
    for t in range(1, n_ops):
        acc = acc + jnp.dot(a_refs[t][...], w_refs[t][...],
                            preferred_element_type=jnp.float32)
    y = acc + b_ref[...]
    if act == "relu":
        y = jnp.maximum(y, 0.0)
    elif act == "head":
        # img channels 0:2 stay raw, mask channel 3 gets the sigmoid.
        lane = lax.broadcasted_iota(jnp.int32, y.shape, 1)
        y = jnp.where(lane == 3, 1.0 / (1.0 + jnp.exp(-y)), y)
    y_ref[...] = y.astype(y_ref.dtype)

    if want_stats:
        st_ref = refs[2 * n_ops + 2]
        s = jnp.sum(y, axis=0, keepdims=True)        # (1, Npad)
        ss = jnp.sum(y * y, axis=0, keepdims=True)   # (1, Npad)
        row = lax.broadcasted_iota(jnp.int32, st_ref.shape[1:], 0)  # (8, Npad)
        stats = jnp.where(row == 0, s, jnp.where(row == 1, ss, 0.0))
        st_ref[...] = stats[None]


def fused_matmul(a_list, w_list, bias, *, act="none", want_stats=False,
                 out_dtype=jnp.bfloat16):
    """Tiled y = act(sum_i a_i @ w_i + bias).

    a_i: (M, K_i), K_i a multiple of 128 (zero-padded channels).
    w_i: (K_i, Npad).  bias: (Npad,).
    Returns (y[:M], optional per-channel (sum, sumsq) over the true M rows).
    """
    M = a_list[0].shape[0]
    Npad = w_list[0].shape[1]
    n_ops = len(a_list)

    ntiles = -(-M // ROW_TILE)
    tm = _rup(-(-M // ntiles), 16)
    m_pad = tm * ntiles
    grid_m = ntiles

    a_pad = [jnp.pad(a.astype(jnp.bfloat16), ((0, m_pad - M), (0, 0)))
             for a in a_list]
    w_bf = [w.astype(jnp.bfloat16) for w in w_list]
    bias_f = bias.astype(jnp.float32).reshape(1, Npad)

    in_specs = (
        [pl.BlockSpec((tm, a.shape[1]), lambda i: (i, 0)) for a in a_pad]
        + [pl.BlockSpec((w.shape[0], Npad), lambda i: (0, 0)) for w in w_bf]
        + [pl.BlockSpec((1, Npad), lambda i: (0, 0))]
    )
    out_shape = [jax.ShapeDtypeStruct((m_pad, Npad), out_dtype)]
    out_specs = [pl.BlockSpec((tm, Npad), lambda i: (i, 0))]
    if want_stats:
        out_shape.append(jax.ShapeDtypeStruct((grid_m, 8, Npad), jnp.float32))
        out_specs.append(pl.BlockSpec((1, 8, Npad), lambda i: (i, 0, 0)))

    k_tot = sum(a.shape[1] for a in a_pad)
    out_bytes = m_pad * Npad * (4 if out_dtype == jnp.float32 else 2)
    cost = pl.CostEstimate(
        flops=2 * m_pad * k_tot * Npad,
        transcendentals=0,
        bytes_accessed=(sum(a.size for a in a_pad) * 2
                        + sum(w.size for w in w_bf) * 2 + out_bytes))

    outs = pl.pallas_call(
        functools.partial(_fused_mm_kernel, n_ops, act, want_stats),
        grid=(grid_m,),
        in_specs=in_specs,
        out_specs=tuple(out_specs),
        out_shape=tuple(out_shape),
        compiler_params=pltpu.CompilerParams(
            dimension_semantics=("parallel",),
            vmem_limit_bytes=VMEM_LIMIT),
        cost_estimate=cost,
    )(*a_pad, *w_bf, bias_f)

    y = outs[0][:M]
    if not want_stats:
        return y, None

    stats = outs[1]
    s = jnp.sum(stats[:, 0, :], axis=0)
    ss = jnp.sum(stats[:, 1, :], axis=0)
    # Remove contribution of the zero-padded rows (their value is act(bias)).
    n_pad_rows = m_pad - M
    if n_pad_rows:
        bvec = bias.astype(jnp.float32)
        pad_val = jnp.maximum(bvec, 0.0) if act == "relu" else bvec
        s = s - n_pad_rows * pad_val
        ss = ss - n_pad_rows * pad_val * pad_val
    return y, (s, ss)


# ----------------------------------------------------------------------------
# Convolution wrappers (im2col glue in JAX; the matmul runs in Pallas)
# ----------------------------------------------------------------------------
def _extract_patches(x, kh, kw, stride, pad_h, pad_w):
    N, H, W, C = x.shape
    xp = jnp.pad(x, ((0, 0), (pad_h, pad_h), (pad_w, pad_w), (0, 0)))
    Ho = (H + 2 * pad_h - kh) // stride + 1
    Wo = (W + 2 * pad_w - kw) // stride + 1
    pieces = []
    for i in range(kh):
        for j in range(kw):
            pieces.append(
                xp[:, i:i + stride * Ho:stride, j:j + stride * Wo:stride, :])
    return jnp.concatenate(pieces, axis=-1), Ho, Wo


def conv2d_multi(x_list, cin_list, w_pt, bias, *, stride=1, pad=(0, 0),
                 act="relu", want_stats=False, out_dtype=jnp.bfloat16):
    """Conv2d over channel-padded NHWC inputs, lowered to one fused matmul.

    x_list: list of (N, H, W, Cpad_i); first cin_list[i] channels are real.
    w_pt:   PyTorch layout (Cout, sum(cin_list), kh, kw) — concat is fused by
            splitting the contraction across the operands.
    """
    Cout, cin_tot, kh, kw = w_pt.shape
    assert cin_tot == sum(cin_list)
    Npad = _rup(Cout, LANE)
    N = x_list[0].shape[0]

    a_list, w_list = [], []
    off = 0
    Ho = Wo = None
    for x, cin in zip(x_list, cin_list):
        cpad = x.shape[-1]
        if kh == 1 and kw == 1 and stride == 1 and pad == (0, 0):
            Ho, Wo = x.shape[1], x.shape[2]
            a = x.reshape(N * Ho * Wo, cpad)
        else:
            patches, Ho, Wo = _extract_patches(x, kh, kw, stride, pad[0], pad[1])
            a = patches.reshape(N * Ho * Wo, kh * kw * cpad)
        w4 = jnp.transpose(w_pt[:, off:off + cin].astype(jnp.float32),
                           (2, 3, 1, 0))                     # (kh,kw,cin,Cout)
        w4 = jnp.pad(w4, ((0, 0), (0, 0), (0, cpad - cin), (0, Npad - Cout)))
        a_list.append(a)
        w_list.append(w4.reshape(kh * kw * cpad, Npad))
        off += cin

    bias_p = jnp.pad(bias.astype(jnp.float32), (0, Npad - Cout))
    y, stats = fused_matmul(a_list, w_list, bias_p, act=act,
                            want_stats=want_stats, out_dtype=out_dtype)
    return y.reshape(N, Ho, Wo, Npad), stats


# ConvTranspose2d(k=3, s=2, p=0) sub-pixel phases:
#   (ConvT taps (ky,kx) listed in patch (dy,dx) row-major order,
#    window (wh,ww), spatial pad (ph,pw), output parity (py,px))
_CT_PHASES = (
    (((2, 2), (2, 0), (0, 2), (0, 0)), (2, 2), (1, 1), (0, 0)),
    (((2, 1), (0, 1)),                 (2, 1), (1, 0), (0, 1)),
    (((1, 2), (1, 0)),                 (1, 2), (0, 1), (1, 0)),
    (((1, 1),),                        (1, 1), (0, 0), (1, 1)),
)


def conv_transpose2d_multi(x_list, cin_list, w_pt, bias, *, act="relu",
                           want_stats=False):
    """nn.ConvTranspose2d(kernel=3, stride=2, padding=0), exact, via 4 phases.

    w_pt: PyTorch layout (Cin_total, Cout, 3, 3).
    """
    cin_tot, Cout, kh, kw = w_pt.shape
    assert (kh, kw) == (3, 3) and cin_tot == sum(cin_list)
    N, H, W, _ = x_list[0].shape
    Npad = _rup(Cout, LANE)

    out = jnp.zeros((N, 2 * H + 1, 2 * W + 1, Npad), jnp.bfloat16)
    tot_s = tot_ss = None
    for taps, (wh, ww), (ph, pw), (py, px) in _CT_PHASES:
        # Equivalent ordinary-conv weight for this phase.
        mats = [jnp.transpose(w_pt[:, :, ky, kx], (1, 0)) for ky, kx in taps]
        w_eq = jnp.stack(mats, axis=-1).reshape(Cout, cin_tot, wh, ww)
        y, st = conv2d_multi(x_list, cin_list, w_eq, bias, stride=1,
                             pad=(ph, pw), act=act, want_stats=want_stats)
        out = out.at[:, py::2, px::2, :].set(y)
        if want_stats:
            s, ss = st
            tot_s = s if tot_s is None else tot_s + s
            tot_ss = ss if tot_ss is None else tot_ss + ss
    return out, ((tot_s, tot_ss) if want_stats else None)


# ----------------------------------------------------------------------------
# BatchNorm folding (train-mode batch statistics, eps = 1e-5)
# ----------------------------------------------------------------------------
def _bn_scale_shift(stats, count, gamma, beta, eps=1e-5):
    s, ss = stats
    c = gamma.shape[0]
    mean = s[:c] / count
    var = jnp.maximum(ss[:c] / count - mean * mean, 0.0)   # biased (train mode)
    inv = lax.rsqrt(var + eps)
    scale = gamma * inv
    shift = beta - mean * scale
    return scale, shift


def _fold_bn_into_conv(w_pt, bias, scale, shift):
    """Fold y = conv(x*scale + shift) into the conv's weights / bias."""
    w = w_pt.astype(jnp.float32)
    w_f = w * scale[None, :, None, None]
    b_f = bias.astype(jnp.float32) + jnp.einsum("oikl,i->o", w, shift)
    return w_f, b_f


# ----------------------------------------------------------------------------
# UNet forward
# ----------------------------------------------------------------------------
def unet_forward(params, x_nchw):
    p = params
    x = jnp.transpose(x_nchw, (0, 2, 3, 1)).astype(jnp.bfloat16)  # NHWC
    x = _pad_ch(x)

    def block(x_list, cin_list, w1, b1, gamma, beta, w2, b2,
              *, stride, pad, transpose=False):
        # conv (or convT) -> ReLU with fused BN statistics ...
        if transpose:
            h, st = conv_transpose2d_multi(x_list, cin_list, w1, b1,
                                           act="relu", want_stats=True)
        else:
            h, st = conv2d_multi(x_list, cin_list, w1, b1, stride=stride,
                                 pad=pad, act="relu", want_stats=True)
        count = h.shape[0] * h.shape[1] * h.shape[2]
        scale, shift = _bn_scale_shift(st, count, gamma, beta)
        # ... BN folded into the following conv -> ReLU.
        w2f, b2f = _fold_bn_into_conv(w2, b2, scale, shift)
        y, _ = conv2d_multi([h], [w2.shape[1]], w2f, b2f, stride=1,
                            pad=(0, 0), act="relu")
        return y

    # down1 / down2: conv3x3 s2 (no bias) -> ReLU -> BN -> conv1x1 -> ReLU
    d1 = block([x], [p["d1_w1"].shape[1]], p["d1_w1"], p["d1_b1"],
               p["d1_g"], p["d1_be"], p["d1_w2"], p["d1_b2"],
               stride=2, pad=(1, 1))
    d2 = block([d1], [p["d2_w1"].shape[1]], p["d2_w1"], p["d2_b1"],
               p["d2_g"], p["d2_be"], p["d2_w2"], p["d2_b2"],
               stride=2, pad=(1, 1))

    # mid1: 1x1 (no bias) -> ReLU -> BN -> 1x1 -> ReLU
    m1 = block([d2], [p["m1_w1"].shape[1]], p["m1_w1"], p["m1_b1"],
               p["m1_g"], p["m1_be"], p["m1_w2"], p["m1_b2"],
               stride=1, pad=(0, 0))

    # mid2: cat([m1, d2]) fused as a K-split into the first 1x1
    m2 = block([m1, d2], [p["m1_w2"].shape[0], p["d2_w2"].shape[0]],
               p["m2_w1"], p["m2_b1"], p["m2_g"], p["m2_be"],
               p["m2_w2"], p["m2_b2"], stride=1, pad=(0, 0))

    # up2: cat([m2, d2]) -> ConvT3x3 s2 -> ReLU -> BN -> conv2x2 -> ReLU
    u1 = block([m2, d2], [p["m2_w2"].shape[0], p["d2_w2"].shape[0]],
               p["u2_wt"], p["u2_bt"], p["u2_g"], p["u2_be"],
               p["u2_w2"], p["u2_b2"], stride=2, pad=(0, 0), transpose=True)

    # up1: cat([u1, d1]) -> ConvT3x3 s2 -> ReLU -> BN -> conv2x2 -> ReLU
    u2 = block([u1, d1], [p["u2_w2"].shape[0], p["d1_w2"].shape[0]],
               p["u1_wt"], p["u1_bt"], p["u1_g"], p["u1_be"],
               p["u1_w2"], p["u1_b2"], stride=2, pad=(0, 0), transpose=True)

    # head: 1x1 conv, img = channels 0:3 (raw), mask = sigmoid(channel 3)
    out, _ = conv2d_multi([u2], [p["out_w"].shape[1]], p["out_w"], p["out_b"],
                          stride=1, pad=(0, 0), act="head",
                          out_dtype=jnp.float32)
    img = jnp.transpose(out[..., 0:3], (0, 3, 1, 2))   # back to NCHW
    mask = out[..., 3]
    return img, mask


# ----------------------------------------------------------------------------
# Deterministic parameter initialization (shapes follow UNet.__init__)
# ----------------------------------------------------------------------------
def init_params(key, in_ch, out_ch, mid):
    keys = iter(jax.random.split(key, 64))

    def conv(cout, cin, k, bias):
        w = (jax.random.normal(next(keys), (cout, cin, k, k)) /
             np.sqrt(cin * k * k)).astype(jnp.float32)
        b = ((jax.random.normal(next(keys), (cout,)) * 0.05).astype(jnp.float32)
             if bias else jnp.zeros((cout,), jnp.float32))
        return w, b

    def convT(cin, cout, k):
        w = (jax.random.normal(next(keys), (cin, cout, k, k)) /
             np.sqrt(cin * k * k)).astype(jnp.float32)
        b = (jax.random.normal(next(keys), (cout,)) * 0.05).astype(jnp.float32)
        return w, b

    def bn(c):
        return jnp.ones((c,), jnp.float32), jnp.zeros((c,), jnp.float32)

    p = {}
    # down1
    p["d1_w1"], p["d1_b1"] = conv(mid, in_ch, 3, bias=False)
    p["d1_g"], p["d1_be"] = bn(mid)
    p["d1_w2"], p["d1_b2"] = conv(mid, mid, 1, bias=True)
    # down2
    p["d2_w1"], p["d2_b1"] = conv(2 * mid, mid, 3, bias=False)
    p["d2_g"], p["d2_be"] = bn(2 * mid)
    p["d2_w2"], p["d2_b2"] = conv(2 * mid, 2 * mid, 1, bias=True)
    # mid1
    p["m1_w1"], p["m1_b1"] = conv(8 * mid, 2 * mid, 1, bias=False)
    p["m1_g"], p["m1_be"] = bn(8 * mid)
    p["m1_w2"], p["m1_b2"] = conv(8 * mid, 8 * mid, 1, bias=True)
    # mid2
    p["m2_w1"], p["m2_b1"] = conv(2 * mid, 8 * mid + 2 * mid, 1, bias=False)
    p["m2_g"], p["m2_be"] = bn(2 * mid)
    p["m2_w2"], p["m2_b2"] = conv(2 * mid, 2 * mid, 1, bias=True)
    # up2
    p["u2_wt"], p["u2_bt"] = convT(2 * mid + 2 * mid, mid, 3)
    p["u2_g"], p["u2_be"] = bn(mid)
    p["u2_w2"], p["u2_b2"] = conv(mid, mid, 2, bias=True)
    # up1
    p["u1_wt"], p["u1_bt"] = convT(mid + mid, mid // 2, 3)
    p["u1_g"], p["u1_be"] = bn(mid // 2)
    p["u1_w2"], p["u1_b2"] = conv(mid // 2, mid // 2, 2, bias=True)
    # out
    p["out_w"], p["out_b"] = conv(out_ch, mid // 2, 1, bias=True)
    return p


# ----------------------------------------------------------------------------
if __name__ == "__main__":
    B, IN_CH, OUT_CH, MID, H, W = 2, 4, 4, 16, 16, 16

    key = jax.random.PRNGKey(0)
    k_x, k_p = jax.random.split(key)
    x = jax.random.normal(k_x, (B, IN_CH, H, W), jnp.float32)   # NCHW input
    params = init_params(k_p, IN_CH, OUT_CH, MID)

    fwd = jax.jit(unet_forward)
    img, mask = fwd(params, x)
    jax.block_until_ready((img, mask))

    assert img.shape == (B, 3, H, W), img.shape
    assert mask.shape == (B, H, W), mask.shape
    assert bool(jnp.all(jnp.isfinite(img))) and bool(jnp.all(jnp.isfinite(mask)))
    assert bool(jnp.all((mask >= 0.0) & (mask <= 1.0)))
    print("KERNEL_OK")
</pallas_src>

<mosaic_0001>
module attributes {stable_mosaic.version = 11 : i64} {
  func.func @_fused_mm_kernel(%arg0: i32, %arg1: memref<128x1152xbf16, #tpu.memory_space<vmem>>, %arg2: memref<1152x128xbf16, #tpu.memory_space<vmem>>, %arg3: memref<1x128xf32, #tpu.memory_space<vmem>>, %arg4: memref<128x128xbf16, #tpu.memory_space<vmem>>, %arg5: memref<1x8x128xf32, #tpu.memory_space<vmem>>) attributes {dimension_semantics = [#tpu.dimension_semantics<parallel>], iteration_bounds = array<i64: 1>, scalar_prefetch = 0 : i64, scratch_operands = 0 : i64, tpu.core_type = #tpu.core_type<tc>, window_params = [{transform_indices = @transform_0, window_bounds = array<i64: 128, 1152>}, {pipeline_mode = #tpu.pipeline_mode<synchronous>, transform_indices = @transform_1, window_bounds = array<i64: 1152, 128>}, {pipeline_mode = #tpu.pipeline_mode<synchronous>, transform_indices = @transform_2, window_bounds = array<i64: 1, 128>}, {transform_indices = @transform_3, window_bounds = array<i64: 128, 128>}, {transform_indices = @transform_4, window_bounds = array<i64: 1, 8, 128>}]} {
    %c0 = arith.constant 0 : index
    %c0_0 = arith.constant 0 : index
    %0 = vector.load %arg1[%c0, %c0_0] : memref<128x1152xbf16, #tpu.memory_space<vmem>>, vector<128x1152xbf16>
    %c0_1 = arith.constant 0 : index
    %c0_2 = arith.constant 0 : index
    %1 = vector.load %arg2[%c0_1, %c0_2] : memref<1152x128xbf16, #tpu.memory_space<vmem>>, vector<1152x128xbf16>
    %cst = arith.constant dense<0.000000e+00> : vector<128x128xf32>
    %2 = tpu.matmul %0, %1, %cst {dimension_numbers = #tpu.dot_dimension_numbers<[1], [0], [0], [1], [0, 0, 1, 1], [], []>} : vector<128x1152xbf16>, vector<1152x128xbf16>, vector<128x128xf32> -> vector<128x128xf32>
    %c0_3 = arith.constant 0 : index
    %c0_4 = arith.constant 0 : index
    %3 = vector.load %arg3[%c0_3, %c0_4] : memref<1x128xf32, #tpu.memory_space<vmem>>, vector<1x128xf32>
    %4 = vector.broadcast %3 : vector<1x128xf32> to vector<128x128xf32>
    %5 = arith.addf %2, %4 : vector<128x128xf32>
    %cst_5 = arith.constant 0.000000e+00 : f32
    %6 = vector.broadcast %cst_5 : f32 to vector<128x128xf32>
    %7 = arith.maximumf %5, %6 : vector<128x128xf32>
    %8 = arith.truncf %7 : vector<128x128xf32> to vector<128x128xbf16>
    %c0_6 = arith.constant 0 : index
    %c0_7 = arith.constant 0 : index
    %9 = vector.load %arg4[%c0_6, %c0_7] : memref<128x128xbf16, #tpu.memory_space<vmem>>, vector<128x128xbf16>
    tpu.vector_store %arg4[%c0_6, %c0_7], %8 {strides = array<i32>} : memref<128x128xbf16, #tpu.memory_space<vmem>>, vector<128x128xbf16>,
    %cst_8 = arith.constant dense<0.000000e+00> : vector<128xf32>
    %10 = vector.multi_reduction <add>, %7, %cst_8 [0] : vector<128x128xf32> to vector<128xf32>
    %11 = vector.shape_cast %10 : vector<128xf32> to vector<1x128xf32>
    %12 = arith.mulf %7, %7 : vector<128x128xf32>
    %cst_9 = arith.constant dense<0.000000e+00> : vector<128xf32>
    %13 = vector.multi_reduction <add>, %12, %cst_9 [0] : vector<128x128xf32> to vector<128xf32>
    %14 = vector.shape_cast %13 : vector<128xf32> to vector<1x128xf32>
    %15 = tpu.iota {dimensions = array<i32: 0>} : vector<8x128xi32>
    %c0_i32 = arith.constant 0 : i32
    %16 = vector.broadcast %c0_i32 : i32 to vector<8x128xi32>
    %17 = arith.cmpi eq, %15, %16 : vector<8x128xi32>
    %c1_i32 = arith.constant 1 : i32
    %18 = vector.broadcast %c1_i32 : i32 to vector<8x128xi32>
    %19 = arith.cmpi eq, %15, %18 : vector<8x128xi32>
    %cst_10 = arith.constant 0.000000e+00 : f32
    %20 = vector.shape_cast %14 : vector<1x128xf32> to vector<1x128xf32>
    %21 = vector.broadcast %20 : vector<1x128xf32> to vector<8x128xf32>
    %22 = vector.broadcast %cst_10 : f32 to vector<8x128xf32>
    %23 = arith.select %19, %21, %22 : vector<8x128xi1>, vector<8x128xf32>
    %24 = vector.shape_cast %11 : vector<1x128xf32> to vector<1x128xf32>
    %25 = vector.broadcast %24 : vector<1x128xf32> to vector<8x128xf32>
    %26 = arith.select %17, %25, %23 : vector<8x128xi1>, vector<8x128xf32>
    %27 = vector.shape_cast %26 : vector<8x128xf32> to vector<1x8x128xf32>
    %c0_11 = arith.constant 0 : index
    %c0_12 = arith.constant 0 : index
    %c0_13 = arith.constant 0 : index
    %28 = vector.load %arg5[%c0_11, %c0_12, %c0_13] : memref<1x8x128xf32, #tpu.memory_space<vmem>>, vector<1x8x128xf32>
    tpu.vector_store %arg5[%c0_11, %c0_12, %c0_13], %27 {strides = array<i32>} : memref<1x8x128xf32, #tpu.memory_space<vmem>>, vector<1x8x128xf32>,
    return
  }
  func.func @transform_0(%arg0: i32) -> (i32, i32) {
    %c0_i32 = arith.constant 0 : i32
    %c0_i32_0 = arith.constant 0 : i32
    return %arg0, %c0_i32 : i32, i32
  }
  func.func @transform_1(%arg0: i32) -> (i32, i32) {
    %c0_i32 = arith.constant 0 : i32
    %c0_i32_0 = arith.constant 0 : i32
    %c0_i32_1 = arith.constant 0 : i32
    return %c0_i32, %c0_i32_0 : i32, i32
  }
  func.func @transform_2(%arg0: i32) -> (i32, i32) {
    %c0_i32 = arith.constant 0 : i32
    %c0_i32_0 = arith.constant 0 : i32
    %c0_i32_1 = arith.constant 0 : i32
    return %c0_i32, %c0_i32_0 : i32, i32
  }
  func.func @transform_3(%arg0: i32) -> (i32, i32) {
    %c0_i32 = arith.constant 0 : i32
    %c0_i32_0 = arith.constant 0 : i32
    return %arg0, %c0_i32 : i32, i32
  }
  func.func @transform_4(%arg0: i32) -> (i32, i32, i32) {
    %c0_i32 = arith.constant 0 : i32
    %c0_i32_0 = arith.constant 0 : i32
    %c0_i32_1 = arith.constant 0 : i32
    return %arg0, %c0_i32, %c0_i32_0 : i32, i32, i32
  }
}

module attributes {stable_mosaic.version = 11 : i64} {
  func.func @_fused_mm_kernel(%arg0: i32, %arg1: memref<128x128xbf16, #tpu.memory_space<vmem>>, %arg2: memref<128x128xbf16, #tpu.memory_space<vmem>>, %arg3: memref<1x128xf32, #tpu.memory_space<vmem>>, %arg4: memref<128x128xbf16, #tpu.memory_space<vmem>>) attributes {dimension_semantics = [#tpu.dimension_semantics<parallel>], iteration_bounds = array<i64: 1>, scalar_prefetch = 0 : i64, scratch_operands = 0 : i64, tpu.core_type = #tpu.core_type<tc>, window_params = [{transform_indices = @transform_0, window_bounds = array<i64: 128, 128>}, {pipeline_mode = #tpu.pipeline_mode<synchronous>, transform_indices = @transform_1, window_bounds = array<i64: 128, 128>}, {pipeline_mode = #tpu.pipeline_mode<synchronous>, transform_indices = @transform_2, window_bounds = array<i64: 1, 128>}, {transform_indices = @transform_3, window_bounds = array<i64: 128, 128>}]} {
    %c0 = arith.constant 0 : index
    %c0_0 = arith.constant 0 : index
    %0 = vector.load %arg1[%c0, %c0_0] : memref<128x128xbf16, #tpu.memory_space<vmem>>, vector<128x128xbf16>
    %c0_1 = arith.constant 0 : index
    %c0_2 = arith.constant 0 : index
    %1 = vector.load %arg2[%c0_1, %c0_2] : memref<128x128xbf16, #tpu.memory_space<vmem>>, vector<128x128xbf16>
    %cst = arith.constant dense<0.000000e+00> : vector<128x128xf32>
    %2 = tpu.matmul %0, %1, %cst {dimension_numbers = #tpu.dot_dimension_numbers<[1], [0], [0], [1], [0, 0, 1, 1], [], []>} : vector<128x128xbf16>, vector<128x128xbf16>, vector<128x128xf32> -> vector<128x128xf32>
    %c0_3 = arith.constant 0 : index
    %c0_4 = arith.constant 0 : index
    %3 = vector.load %arg3[%c0_3, %c0_4] : memref<1x128xf32, #tpu.memory_space<vmem>>, vector<1x128xf32>
    %4 = vector.broadcast %3 : vector<1x128xf32> to vector<128x128xf32>
    %5 = arith.addf %2, %4 : vector<128x128xf32>
    %cst_5 = arith.constant 0.000000e+00 : f32
    %6 = vector.broadcast %cst_5 : f32 to vector<128x128xf32>
    %7 = arith.maximumf %5, %6 : vector<128x128xf32>
    %8 = arith.truncf %7 : vector<128x128xf32> to vector<128x128xbf16>
    %c0_6 = arith.constant 0 : index
    %c0_7 = arith.constant 0 : index
    %9 = vector.load %arg4[%c0_6, %c0_7] : memref<128x128xbf16, #tpu.memory_space<vmem>>, vector<128x128xbf16>
    tpu.vector_store %arg4[%c0_6, %c0_7], %8 {strides = array<i32>} : memref<128x128xbf16, #tpu.memory_space<vmem>>, vector<128x128xbf16>,
    return
  }
  func.func @transform_0(%arg0: i32) -> (i32, i32) {
    %c0_i32 = arith.constant 0 : i32
    %c0_i32_0 = arith.constant 0 : i32
    return %arg0, %c0_i32 : i32, i32
  }
  func.func @transform_1(%arg0: i32) -> (i32, i32) {
    %c0_i32 = arith.constant 0 : i32
    %c0_i32_0 = arith.constant 0 : i32
    %c0_i32_1 = arith.constant 0 : i32
    return %c0_i32, %c0_i32_0 : i32, i32
  }
  func.func @transform_2(%arg0: i32) -> (i32, i32) {
    %c0_i32 = arith.constant 0 : i32
    %c0_i32_0 = arith.constant 0 : i32
    %c0_i32_1 = arith.constant 0 : i32
    return %c0_i32, %c0_i32_0 : i32, i32
  }
  func.func @transform_3(%arg0: i32) -> (i32, i32) {
    %c0_i32 = arith.constant 0 : i32
    %c0_i32_0 = arith.constant 0 : i32
    return %arg0, %c0_i32 : i32, i32
  }
}

module attributes {stable_mosaic.version = 11 : i64} {
  func.func @_fused_mm_kernel(%arg0: i32, %arg1: memref<32x1152xbf16, #tpu.memory_space<vmem>>, %arg2: memref<1152x128xbf16, #tpu.memory_space<vmem>>, %arg3: memref<1x128xf32, #tpu.memory_space<vmem>>, %arg4: memref<32x128xbf16, #tpu.memory_space<vmem>>, %arg5: memref<1x8x128xf32, #tpu.memory_space<vmem>>) attributes {dimension_semantics = [#tpu.dimension_semantics<parallel>], iteration_bounds = array<i64: 1>, scalar_prefetch = 0 : i64, scratch_operands = 0 : i64, tpu.core_type = #tpu.core_type<tc>, window_params = [{transform_indices = @transform_0, window_bounds = array<i64: 32, 1152>}, {pipeline_mode = #tpu.pipeline_mode<synchronous>, transform_indices = @transform_1, window_bounds = array<i64: 1152, 128>}, {pipeline_mode = #tpu.pipeline_mode<synchronous>, transform_indices = @transform_2, window_bounds = array<i64: 1, 128>}, {transform_indices = @transform_3, window_bounds = array<i64: 32, 128>}, {transform_indices = @transform_4, window_bounds = array<i64: 1, 8, 128>}]} {
    %c0 = arith.constant 0 : index
    %c0_0 = arith.constant 0 : index
    %0 = vector.load %arg1[%c0, %c0_0] : memref<32x1152xbf16, #tpu.memory_space<vmem>>, vector<32x1152xbf16>
    %c0_1 = arith.constant 0 : index
    %c0_2 = arith.constant 0 : index
    %1 = vector.load %arg2[%c0_1, %c0_2] : memref<1152x128xbf16, #tpu.memory_space<vmem>>, vector<1152x128xbf16>
    %cst = arith.constant dense<0.000000e+00> : vector<32x128xf32>
    %2 = tpu.matmul %0, %1, %cst {dimension_numbers = #tpu.dot_dimension_numbers<[1], [0], [0], [1], [0, 0, 1, 1], [], []>} : vector<32x1152xbf16>, vector<1152x128xbf16>, vector<32x128xf32> -> vector<32x128xf32>
    %c0_3 = arith.constant 0 : index
    %c0_4 = arith.constant 0 : index
    %3 = vector.load %arg3[%c0_3, %c0_4] : memref<1x128xf32, #tpu.memory_space<vmem>>, vector<1x128xf32>
    %4 = vector.broadcast %3 : vector<1x128xf32> to vector<32x128xf32>
    %5 = arith.addf %2, %4 : vector<32x128xf32>
    %cst_5 = arith.constant 0.000000e+00 : f32
    %6 = vector.broadcast %cst_5 : f32 to vector<32x128xf32>
    %7 = arith.maximumf %5, %6 : vector<32x128xf32>
    %8 = arith.truncf %7 : vector<32x128xf32> to vector<32x128xbf16>
    %c0_6 = arith.constant 0 : index
    %c0_7 = arith.constant 0 : index
    %9 = vector.load %arg4[%c0_6, %c0_7] : memref<32x128xbf16, #tpu.memory_space<vmem>>, vector<32x128xbf16>
    tpu.vector_store %arg4[%c0_6, %c0_7], %8 {strides = array<i32>} : memref<32x128xbf16, #tpu.memory_space<vmem>>, vector<32x128xbf16>,
    %cst_8 = arith.constant dense<0.000000e+00> : vector<128xf32>
    %10 = vector.multi_reduction <add>, %7, %cst_8 [0] : vector<32x128xf32> to vector<128xf32>
    %11 = vector.shape_cast %10 : vector<128xf32> to vector<1x128xf32>
    %12 = arith.mulf %7, %7 : vector<32x128xf32>
    %cst_9 = arith.constant dense<0.000000e+00> : vector<128xf32>
    %13 = vector.multi_reduction <add>, %12, %cst_9 [0] : vector<32x128xf32> to vector<128xf32>
    %14 = vector.shape_cast %13 : vector<128xf32> to vector<1x128xf32>
    %15 = tpu.iota {dimensions = array<i32: 0>} : vector<8x128xi32>
    %c0_i32 = arith.constant 0 : i32
    %16 = vector.broadcast %c0_i32 : i32 to vector<8x128xi32>
    %17 = arith.cmpi eq, %15, %16 : vector<8x128xi32>
    %c1_i32 = arith.constant 1 : i32
    %18 = vector.broadcast %c1_i32 : i32 to vector<8x128xi32>
    %19 = arith.cmpi eq, %15, %18 : vector<8x128xi32>
    %cst_10 = arith.constant 0.000000e+00 : f32
    %20 = vector.shape_cast %14 : vector<1x128xf32> to vector<1x128xf32>
    %21 = vector.broadcast %20 : vector<1x128xf32> to vector<8x128xf32>
    %22 = vector.broadcast %cst_10 : f32 to vector<8x128xf32>
    %23 = arith.select %19, %21, %22 : vector<8x128xi1>, vector<8x128xf32>
    %24 = vector.shape_cast %11 : vector<1x128xf32> to vector<1x128xf32>
    %25 = vector.broadcast %24 : vector<1x128xf32> to vector<8x128xf32>
    %26 = arith.select %17, %25, %23 : vector<8x128xi1>, vector<8x128xf32>
    %27 = vector.shape_cast %26 : vector<8x128xf32> to vector<1x8x128xf32>
    %c0_11 = arith.constant 0 : index
    %c0_12 = arith.constant 0 : index
    %c0_13 = arith.constant 0 : index
    %28 = vector.load %arg5[%c0_11, %c0_12, %c0_13] : memref<1x8x128xf32, #tpu.memory_space<vmem>>, vector<1x8x128xf32>
    tpu.vector_store %arg5[%c0_11, %c0_12, %c0_13], %27 {strides = array<i32>} : memref<1x8x128xf32, #tpu.memory_space<vmem>>, vector<1x8x128xf32>,
    return
  }
  func.func @transform_0(%arg0: i32) -> (i32, i32) {
    %c0_i32 = arith.constant 0 : i32
    %c0_i32_0 = arith.constant 0 : i32
    return %arg0, %c0_i32 : i32, i32
  }
  func.func @transform_1(%arg0: i32) -> (i32, i32) {
    %c0_i32 = arith.constant 0 : i32
    %c0_i32_0 = arith.constant 0 : i32
    %c0_i32_1 = arith.constant 0 : i32
    return %c0_i32, %c0_i32_0 : i32, i32
  }
  func.func @transform_2(%arg0: i32) -> (i32, i32) {
    %c0_i32 = arith.constant 0 : i32
    %c0_i32_0 = arith.constant 0 : i32
    %c0_i32_1 = arith.constant 0 : i32
    return %c0_i32, %c0_i32_0 : i32, i32
  }
  func.func @transform_3(%arg0: i32) -> (i32, i32) {
    %c0_i32 = arith.constant 0 : i32
    %c0_i32_0 = arith.constant 0 : i32
    return %arg0, %c0_i32 : i32, i32
  }
  func.func @transform_4(%arg0: i32) -> (i32, i32, i32) {
    %c0_i32 = arith.constant 0 : i32
    %c0_i32_0 = arith.constant 0 : i32
    %c0_i32_1 = arith.constant 0 : i32
    return %arg0, %c0_i32, %c0_i32_0 : i32, i32, i32
  }
}

module attributes {stable_mosaic.version = 11 : i64} {
  func.func @_fused_mm_kernel(%arg0: i32, %arg1: memref<32x128xbf16, #tpu.memory_space<vmem>>, %arg2: memref<128x128xbf16, #tpu.memory_space<vmem>>, %arg3: memref<1x128xf32, #tpu.memory_space<vmem>>, %arg4: memref<32x128xbf16, #tpu.memory_space<vmem>>, %arg5: memref<1x8x128xf32, #tpu.memory_space<vmem>>) attributes {dimension_semantics = [#tpu.dimension_semantics<parallel>], iteration_bounds = array<i64: 1>, scalar_prefetch = 0 : i64, scratch_operands = 0 : i64, tpu.core_type = #tpu.core_type<tc>, window_params = [{transform_indices = @transform_0, window_bounds = array<i64: 32, 128>}, {pipeline_mode = #tpu.pipeline_mode<synchronous>, transform_indices = @transform_1, window_bounds = array<i64: 128, 128>}, {pipeline_mode = #tpu.pipeline_mode<synchronous>, transform_indices = @transform_2, window_bounds = array<i64: 1, 128>}, {transform_indices = @transform_3, window_bounds = array<i64: 32, 128>}, {transform_indices = @transform_4, window_bounds = array<i64: 1, 8, 128>}]} {
    %c0 = arith.constant 0 : index
    %c0_0 = arith.constant 0 : index
    %0 = vector.load %arg1[%c0, %c0_0] : memref<32x128xbf16, #tpu.memory_space<vmem>>, vector<32x128xbf16>
    %c0_1 = arith.constant 0 : index
    %c0_2 = arith.constant 0 : index
    %1 = vector.load %arg2[%c0_1, %c0_2] : memref<128x128xbf16, #tpu.memory_space<vmem>>, vector<128x128xbf16>
    %cst = arith.constant dense<0.000000e+00> : vector<32x128xf32>
    %2 = tpu.matmul %0, %1, %cst {dimension_numbers = #tpu.dot_dimension_numbers<[1], [0], [0], [1], [0, 0, 1, 1], [], []>} : vector<32x128xbf16>, vector<128x128xbf16>, vector<32x128xf32> -> vector<32x128xf32>
    %c0_3 = arith.constant 0 : index
    %c0_4 = arith.constant 0 : index
    %3 = vector.load %arg3[%c0_3, %c0_4] : memref<1x128xf32, #tpu.memory_space<vmem>>, vector<1x128xf32>
    %4 = vector.broadcast %3 : vector<1x128xf32> to vector<32x128xf32>
    %5 = arith.addf %2, %4 : vector<32x128xf32>
    %cst_5 = arith.constant 0.000000e+00 : f32
    %6 = vector.broadcast %cst_5 : f32 to vector<32x128xf32>
    %7 = arith.maximumf %5, %6 : vector<32x128xf32>
    %8 = arith.truncf %7 : vector<32x128xf32> to vector<32x128xbf16>
    %c0_6 = arith.constant 0 : index
    %c0_7 = arith.constant 0 : index
    %9 = vector.load %arg4[%c0_6, %c0_7] : memref<32x128xbf16, #tpu.memory_space<vmem>>, vector<32x128xbf16>
    tpu.vector_store %arg4[%c0_6, %c0_7], %8 {strides = array<i32>} : memref<32x128xbf16, #tpu.memory_space<vmem>>, vector<32x128xbf16>,
    %cst_8 = arith.constant dense<0.000000e+00> : vector<128xf32>
    %10 = vector.multi_reduction <add>, %7, %cst_8 [0] : vector<32x128xf32> to vector<128xf32>
    %11 = vector.shape_cast %10 : vector<128xf32> to vector<1x128xf32>
    %12 = arith.mulf %7, %7 : vector<32x128xf32>
    %cst_9 = arith.constant dense<0.000000e+00> : vector<128xf32>
    %13 = vector.multi_reduction <add>, %12, %cst_9 [0] : vector<32x128xf32> to vector<128xf32>
    %14 = vector.shape_cast %13 : vector<128xf32> to vector<1x128xf32>
    %15 = tpu.iota {dimensions = array<i32: 0>} : vector<8x128xi32>
    %c0_i32 = arith.constant 0 : i32
    %16 = vector.broadcast %c0_i32 : i32 to vector<8x128xi32>
    %17 = arith.cmpi eq, %15, %16 : vector<8x128xi32>
    %c1_i32 = arith.constant 1 : i32
    %18 = vector.broadcast %c1_i32 : i32 to vector<8x128xi32>
    %19 = arith.cmpi eq, %15, %18 : vector<8x128xi32>
    %cst_10 = arith.constant 0.000000e+00 : f32
    %20 = vector.shape_cast %14 : vector<1x128xf32> to vector<1x128xf32>
    %21 = vector.broadcast %20 : vector<1x128xf32> to vector<8x128xf32>
    %22 = vector.broadcast %cst_10 : f32 to vector<8x128xf32>
    %23 = arith.select %19, %21, %22 : vector<8x128xi1>, vector<8x128xf32>
    %24 = vector.shape_cast %11 : vector<1x128xf32> to vector<1x128xf32>
    %25 = vector.broadcast %24 : vector<1x128xf32> to vector<8x128xf32>
    %26 = arith.select %17, %25, %23 : vector<8x128xi1>, vector<8x128xf32>
    %27 = vector.shape_cast %26 : vector<8x128xf32> to vector<1x8x128xf32>
    %c0_11 = arith.constant 0 : index
    %c0_12 = arith.constant 0 : index
    %c0_13 = arith.constant 0 : index
    %28 = vector.load %arg5[%c0_11, %c0_12, %c0_13] : memref<1x8x128xf32, #tpu.memory_space<vmem>>, vector<1x8x128xf32>
    tpu.vector_store %arg5[%c0_11, %c0_12, %c0_13], %27 {strides = array<i32>} : memref<1x8x128xf32, #tpu.memory_space<vmem>>, vector<1x8x128xf32>,
    return
  }
  func.func @transform_0(%arg0: i32) -> (i32, i32) {
    %c0_i32 = arith.constant 0 : i32
    %c0_i32_0 = arith.constant 0 : i32
    return %arg0, %c0_i32 : i32, i32
  }
  func.func @transform_1(%arg0: i32) -> (i32, i32) {
    %c0_i32 = arith.constant 0 : i32
    %c0_i32_0 = arith.constant 0 : i32
    %c0_i32_1 = arith.constant 0 : i32
    return %c0_i32, %c0_i32_0 : i32, i32
  }
  func.func @transform_2(%arg0: i32) -> (i32, i32) {
    %c0_i32 = arith.constant 0 : i32
    %c0_i32_0 = arith.constant 0 : i32
    %c0_i32_1 = arith.constant 0 : i32
    return %c0_i32, %c0_i32_0 : i32, i32
  }
  func.func @transform_3(%arg0: i32) -> (i32, i32) {
    %c0_i32 = arith.constant 0 : i32
    %c0_i32_0 = arith.constant 0 : i32
    return %arg0, %c0_i32 : i32, i32
  }
  func.func @transform_4(%arg0: i32) -> (i32, i32, i32) {
    %c0_i32 = arith.constant 0 : i32
    %c0_i32_0 = arith.constant 0 : i32
    %c0_i32_1 = arith.constant 0 : i32
    return %arg0, %c0_i32, %c0_i32_0 : i32, i32, i32
  }
}

module attributes {stable_mosaic.version = 11 : i64} {
  func.func @_fused_mm_kernel(%arg0: i32, %arg1: memref<32x128xbf16, #tpu.memory_space<vmem>>, %arg2: memref<128x128xbf16, #tpu.memory_space<vmem>>, %arg3: memref<1x128xf32, #tpu.memory_space<vmem>>, %arg4: memref<32x128xbf16, #tpu.memory_space<vmem>>) attributes {dimension_semantics = [#tpu.dimension_semantics<parallel>], iteration_bounds = array<i64: 1>, scalar_prefetch = 0 : i64, scratch_operands = 0 : i64, tpu.core_type = #tpu.core_type<tc>, window_params = [{transform_indices = @transform_0, window_bounds = array<i64: 32, 128>}, {pipeline_mode = #tpu.pipeline_mode<synchronous>, transform_indices = @transform_1, window_bounds = array<i64: 128, 128>}, {pipeline_mode = #tpu.pipeline_mode<synchronous>, transform_indices = @transform_2, window_bounds = array<i64: 1, 128>}, {transform_indices = @transform_3, window_bounds = array<i64: 32, 128>}]} {
    %c0 = arith.constant 0 : index
    %c0_0 = arith.constant 0 : index
    %0 = vector.load %arg1[%c0, %c0_0] : memref<32x128xbf16, #tpu.memory_space<vmem>>, vector<32x128xbf16>
    %c0_1 = arith.constant 0 : index
    %c0_2 = arith.constant 0 : index
    %1 = vector.load %arg2[%c0_1, %c0_2] : memref<128x128xbf16, #tpu.memory_space<vmem>>, vector<128x128xbf16>
    %cst = arith.constant dense<0.000000e+00> : vector<32x128xf32>
    %2 = tpu.matmul %0, %1, %cst {dimension_numbers = #tpu.dot_dimension_numbers<[1], [0], [0], [1], [0, 0, 1, 1], [], []>} : vector<32x128xbf16>, vector<128x128xbf16>, vector<32x128xf32> -> vector<32x128xf32>
    %c0_3 = arith.constant 0 : index
    %c0_4 = arith.constant 0 : index
    %3 = vector.load %arg3[%c0_3, %c0_4] : memref<1x128xf32, #tpu.memory_space<vmem>>, vector<1x128xf32>
    %4 = vector.broadcast %3 : vector<1x128xf32> to vector<32x128xf32>
    %5 = arith.addf %2, %4 : vector<32x128xf32>
    %cst_5 = arith.constant 0.000000e+00 : f32
    %6 = vector.broadcast %cst_5 : f32 to vector<32x128xf32>
    %7 = arith.maximumf %5, %6 : vector<32x128xf32>
    %8 = arith.truncf %7 : vector<32x128xf32> to vector<32x128xbf16>
    %c0_6 = arith.constant 0 : index
    %c0_7 = arith.constant 0 : index
    %9 = vector.load %arg4[%c0_6, %c0_7] : memref<32x128xbf16, #tpu.memory_space<vmem>>, vector<32x128xbf16>
    tpu.vector_store %arg4[%c0_6, %c0_7], %8 {strides = array<i32>} : memref<32x128xbf16, #tpu.memory_space<vmem>>, vector<32x128xbf16>,
    return
  }
  func.func @transform_0(%arg0: i32) -> (i32, i32) {
    %c0_i32 = arith.constant 0 : i32
    %c0_i32_0 = arith.constant 0 : i32
    return %arg0, %c0_i32 : i32, i32
  }
  func.func @transform_1(%arg0: i32) -> (i32, i32) {
    %c0_i32 = arith.constant 0 : i32
    %c0_i32_0 = arith.constant 0 : i32
    %c0_i32_1 = arith.constant 0 : i32
    return %c0_i32, %c0_i32_0 : i32, i32
  }
  func.func @transform_2(%arg0: i32) -> (i32, i32) {
    %c0_i32 = arith.constant 0 : i32
    %c0_i32_0 = arith.constant 0 : i32
    %c0_i32_1 = arith.constant 0 : i32
    return %c0_i32, %c0_i32_0 : i32, i32
  }
  func.func @transform_3(%arg0: i32) -> (i32, i32) {
    %c0_i32 = arith.constant 0 : i32
    %c0_i32_0 = arith.constant 0 : i32
    return %arg0, %c0_i32 : i32, i32
  }
}

module attributes {stable_mosaic.version = 11 : i64} {
  func.func @_fused_mm_kernel(%arg0: i32, %arg1: memref<32x128xbf16, #tpu.memory_space<vmem>>, %arg2: memref<32x128xbf16, #tpu.memory_space<vmem>>, %arg3: memref<128x128xbf16, #tpu.memory_space<vmem>>, %arg4: memref<128x128xbf16, #tpu.memory_space<vmem>>, %arg5: memref<1x128xf32, #tpu.memory_space<vmem>>, %arg6: memref<32x128xbf16, #tpu.memory_space<vmem>>, %arg7: memref<1x8x128xf32, #tpu.memory_space<vmem>>) attributes {dimension_semantics = [#tpu.dimension_semantics<parallel>], iteration_bounds = array<i64: 1>, scalar_prefetch = 0 : i64, scratch_operands = 0 : i64, tpu.core_type = #tpu.core_type<tc>, window_params = [{transform_indices = @transform_0, window_bounds = array<i64: 32, 128>}, {transform_indices = @transform_1, window_bounds = array<i64: 32, 128>}, {pipeline_mode = #tpu.pipeline_mode<synchronous>, transform_indices = @transform_2, window_bounds = array<i64: 128, 128>}, {pipeline_mode = #tpu.pipeline_mode<synchronous>, transform_indices = @transform_3, window_bounds = array<i64: 128, 128>}, {pipeline_mode = #tpu.pipeline_mode<synchronous>, transform_indices = @transform_4, window_bounds = array<i64: 1, 128>}, {transform_indices = @transform_5, window_bounds = array<i64: 32, 128>}, {transform_indices = @transform_6, window_bounds = array<i64: 1, 8, 128>}]} {
    %c0 = arith.constant 0 : index
    %c0_0 = arith.constant 0 : index
    %0 = vector.load %arg1[%c0, %c0_0] : memref<32x128xbf16, #tpu.memory_space<vmem>>, vector<32x128xbf16>
    %c0_1 = arith.constant 0 : index
    %c0_2 = arith.constant 0 : index
    %1 = vector.load %arg3[%c0_1, %c0_2] : memref<128x128xbf16, #tpu.memory_space<vmem>>, vector<128x128xbf16>
    %cst = arith.constant dense<0.000000e+00> : vector<32x128xf32>
    %2 = tpu.matmul %0, %1, %cst {dimension_numbers = #tpu.dot_dimension_numbers<[1], [0], [0], [1], [0, 0, 1, 1], [], []>} : vector<32x128xbf16>, vector<128x128xbf16>, vector<32x128xf32> -> vector<32x128xf32>
    %c0_3 = arith.constant 0 : index
    %c0_4 = arith.constant 0 : index
    %3 = vector.load %arg2[%c0_3, %c0_4] : memref<32x128xbf16, #tpu.memory_space<vmem>>, vector<32x128xbf16>
    %c0_5 = arith.constant 0 : index
    %c0_6 = arith.constant 0 : index
    %4 = vector.load %arg4[%c0_5, %c0_6] : memref<128x128xbf16, #tpu.memory_space<vmem>>, vector<128x128xbf16>
    %cst_7 = arith.constant dense<0.000000e+00> : vector<32x128xf32>
    %5 = tpu.matmul %3, %4, %cst_7 {dimension_numbers = #tpu.dot_dimension_numbers<[1], [0], [0], [1], [0, 0, 1, 1], [], []>} : vector<32x128xbf16>, vector<128x128xbf16>, vector<32x128xf32> -> vector<32x128xf32>
    %6 = arith.addf %2, %5 : vector<32x128xf32>
    %c0_8 = arith.constant 0 : index
    %c0_9 = arith.constant 0 : index
    %7 = vector.load %arg5[%c0_8, %c0_9] : memref<1x128xf32, #tpu.memory_space<vmem>>, vector<1x128xf32>
    %8 = vector.broadcast %7 : vector<1x128xf32> to vector<32x128xf32>
    %9 = arith.addf %6, %8 : vector<32x128xf32>
    %cst_10 = arith.constant 0.000000e+00 : f32
    %10 = vector.broadcast %cst_10 : f32 to vector<32x128xf32>
    %11 = arith.maximumf %9, %10 : vector<32x128xf32>
    %12 = arith.truncf %11 : vector<32x128xf32> to vector<32x128xbf16>
    %c0_11 = arith.constant 0 : index
    %c0_12 = arith.constant 0 : index
    %13 = vector.load %arg6[%c0_11, %c0_12] : memref<32x128xbf16, #tpu.memory_space<vmem>>, vector<32x128xbf16>
    tpu.vector_store %arg6[%c0_11, %c0_12], %12 {strides = array<i32>} : memref<32x128xbf16, #tpu.memory_space<vmem>>, vector<32x128xbf16>,
    %cst_13 = arith.constant dense<0.000000e+00> : vector<128xf32>
    %14 = vector.multi_reduction <add>, %11, %cst_13 [0] : vector<32x128xf32> to vector<128xf32>
    %15 = vector.shape_cast %14 : vector<128xf32> to vector<1x128xf32>
    %16 = arith.mulf %11, %11 : vector<32x128xf32>
    %cst_14 = arith.constant dense<0.000000e+00> : vector<128xf32>
    %17 = vector.multi_reduction <add>, %16, %cst_14 [0] : vector<32x128xf32> to vector<128xf32>
    %18 = vector.shape_cast %17 : vector<128xf32> to vector<1x128xf32>
    %19 = tpu.iota {dimensions = array<i32: 0>} : vector<8x128xi32>
    %c0_i32 = arith.constant 0 : i32
    %20 = vector.broadcast %c0_i32 : i32 to vector<8x128xi32>
    %21 = arith.cmpi eq, %19, %20 : vector<8x128xi32>
    %c1_i32 = arith.constant 1 : i32
    %22 = vector.broadcast %c1_i32 : i32 to vector<8x128xi32>
    %23 = arith.cmpi eq, %19, %22 : vector<8x128xi32>
    %cst_15 = arith.constant 0.000000e+00 : f32
    %24 = vector.shape_cast %18 : vector<1x128xf32> to vector<1x128xf32>
    %25 = vector.broadcast %24 : vector<1x128xf32> to vector<8x128xf32>
    %26 = vector.broadcast %cst_15 : f32 to vector<8x128xf32>
    %27 = arith.select %23, %25, %26 : vector<8x128xi1>, vector<8x128xf32>
    %28 = vector.shape_cast %15 : vector<1x128xf32> to vector<1x128xf32>
    %29 = vector.broadcast %28 : vector<1x128xf32> to vector<8x128xf32>
    %30 = arith.select %21, %29, %27 : vector<8x128xi1>, vector<8x128xf32>
    %31 = vector.shape_cast %30 : vector<8x128xf32> to vector<1x8x128xf32>
    %c0_16 = arith.constant 0 : index
    %c0_17 = arith.constant 0 : index
    %c0_18 = arith.constant 0 : index
    %32 = vector.load %arg7[%c0_16, %c0_17, %c0_18] : memref<1x8x128xf32, #tpu.memory_space<vmem>>, vector<1x8x128xf32>
    tpu.vector_store %arg7[%c0_16, %c0_17, %c0_18], %31 {strides = array<i32>} : memref<1x8x128xf32, #tpu.memory_space<vmem>>, vector<1x8x128xf32>,
    return
  }
  func.func @transform_0(%arg0: i32) -> (i32, i32) {
    %c0_i32 = arith.constant 0 : i32
    %c0_i32_0 = arith.constant 0 : i32
    return %arg0, %c0_i32 : i32, i32
  }
  func.func @transform_1(%arg0: i32) -> (i32, i32) {
    %c0_i32 = arith.constant 0 : i32
    %c0_i32_0 = arith.constant 0 : i32
    return %arg0, %c0_i32 : i32, i32
  }
  func.func @transform_2(%arg0: i32) -> (i32, i32) {
    %c0_i32 = arith.constant 0 : i32
    %c0_i32_0 = arith.constant 0 : i32
    %c0_i32_1 = arith.constant 0 : i32
    return %c0_i32, %c0_i32_0 : i32, i32
  }
  func.func @transform_3(%arg0: i32) -> (i32, i32) {
    %c0_i32 = arith.constant 0 : i32
    %c0_i32_0 = arith.constant 0 : i32
    %c0_i32_1 = arith.constant 0 : i32
    return %c0_i32, %c0_i32_0 : i32, i32
  }
  func.func @transform_4(%arg0: i32) -> (i32, i32) {
    %c0_i32 = arith.constant 0 : i32
    %c0_i32_0 = arith.constant 0 : i32
    %c0_i32_1 = arith.constant 0 : i32
    return %c0_i32, %c0_i32_0 : i32, i32
  }
  func.func @transform_5(%arg0: i32) -> (i32, i32) {
    %c0_i32 = arith.constant 0 : i32
    %c0_i32_0 = arith.constant 0 : i32
    return %arg0, %c0_i32 : i32, i32
  }
  func.func @transform_6(%arg0: i32) -> (i32, i32, i32) {
    %c0_i32 = arith.constant 0 : i32
    %c0_i32_0 = arith.constant 0 : i32
    %c0_i32_1 = arith.constant 0 : i32
    return %arg0, %c0_i32, %c0_i32_0 : i32, i32, i32
  }
}

module attributes {stable_mosaic.version = 11 : i64} {
  func.func @_fused_mm_kernel(%arg0: i32, %arg1: memref<48x256xbf16, #tpu.memory_space<vmem>>, %arg2: memref<48x256xbf16, #tpu.memory_space<vmem>>, %arg3: memref<256x128xbf16, #tpu.memory_space<vmem>>, %arg4: memref<256x128xbf16, #tpu.memory_space<vmem>>, %arg5: memref<1x128xf32, #tpu.memory_space<vmem>>, %arg6: memref<48x128xbf16, #tpu.memory_space<vmem>>, %arg7: memref<1x8x128xf32, #tpu.memory_space<vmem>>) attributes {dimension_semantics = [#tpu.dimension_semantics<parallel>], iteration_bounds = array<i64: 1>, scalar_prefetch = 0 : i64, scratch_operands = 0 : i64, tpu.core_type = #tpu.core_type<tc>, window_params = [{transform_indices = @transform_0, window_bounds = array<i64: 48, 256>}, {transform_indices = @transform_1, window_bounds = array<i64: 48, 256>}, {pipeline_mode = #tpu.pipeline_mode<synchronous>, transform_indices = @transform_2, window_bounds = array<i64: 256, 128>}, {pipeline_mode = #tpu.pipeline_mode<synchronous>, transform_indices = @transform_3, window_bounds = array<i64: 256, 128>}, {pipeline_mode = #tpu.pipeline_mode<synchronous>, transform_indices = @transform_4, window_bounds = array<i64: 1, 128>}, {transform_indices = @transform_5, window_bounds = array<i64: 48, 128>}, {transform_indices = @transform_6, window_bounds = array<i64: 1, 8, 128>}]} {
    %c0 = arith.constant 0 : index
    %c0_0 = arith.constant 0 : index
    %0 = vector.load %arg1[%c0, %c0_0] : memref<48x256xbf16, #tpu.memory_space<vmem>>, vector<48x256xbf16>
    %c0_1 = arith.constant 0 : index
    %c0_2 = arith.constant 0 : index
    %1 = vector.load %arg3[%c0_1, %c0_2] : memref<256x128xbf16, #tpu.memory_space<vmem>>, vector<256x128xbf16>
    %cst = arith.constant dense<0.000000e+00> : vector<48x128xf32>
    %2 = tpu.matmul %0, %1, %cst {dimension_numbers = #tpu.dot_dimension_numbers<[1], [0], [0], [1], [0, 0, 1, 1], [], []>} : vector<48x256xbf16>, vector<256x128xbf16>, vector<48x128xf32> -> vector<48x128xf32>
    %c0_3 = arith.constant 0 : index
    %c0_4 = arith.constant 0 : index
    %3 = vector.load %arg2[%c0_3, %c0_4] : memref<48x256xbf16, #tpu.memory_space<vmem>>, vector<48x256xbf16>
    %c0_5 = arith.constant 0 : index
    %c0_6 = arith.constant 0 : index
    %4 = vector.load %arg4[%c0_5, %c0_6] : memref<256x128xbf16, #tpu.memory_space<vmem>>, vector<256x128xbf16>
    %cst_7 = arith.constant dense<0.000000e+00> : vector<48x128xf32>
    %5 = tpu.matmul %3, %4, %cst_7 {dimension_numbers = #tpu.dot_dimension_numbers<[1], [0], [0], [1], [0, 0, 1, 1], [], []>} : vector<48x256xbf16>, vector<256x128xbf16>, vector<48x128xf32> -> vector<48x128xf32>
    %6 = arith.addf %2, %5 : vector<48x128xf32>
    %c0_8 = arith.constant 0 : index
    %c0_9 = arith.constant 0 : index
    %7 = vector.load %arg5[%c0_8, %c0_9] : memref<1x128xf32, #tpu.memory_space<vmem>>, vector<1x128xf32>
    %8 = vector.broadcast %7 : vector<1x128xf32> to vector<48x128xf32>
    %9 = arith.addf %6, %8 : vector<48x128xf32>
    %cst_10 = arith.constant 0.000000e+00 : f32
    %10 = vector.broadcast %cst_10 : f32 to vector<48x128xf32>
    %11 = arith.maximumf %9, %10 : vector<48x128xf32>
    %12 = arith.truncf %11 : vector<48x128xf32> to vector<48x128xbf16>
    %c0_11 = arith.constant 0 : index
    %c0_12 = arith.constant 0 : index
    %13 = vector.load %arg6[%c0_11, %c0_12] : memref<48x128xbf16, #tpu.memory_space<vmem>>, vector<48x128xbf16>
    tpu.vector_store %arg6[%c0_11, %c0_12], %12 {strides = array<i32>} : memref<48x128xbf16, #tpu.memory_space<vmem>>, vector<48x128xbf16>,
    %cst_13 = arith.constant dense<0.000000e+00> : vector<128xf32>
    %14 = vector.multi_reduction <add>, %11, %cst_13 [0] : vector<48x128xf32> to vector<128xf32>
    %15 = vector.shape_cast %14 : vector<128xf32> to vector<1x128xf32>
    %16 = arith.mulf %11, %11 : vector<48x128xf32>
    %cst_14 = arith.constant dense<0.000000e+00> : vector<128xf32>
    %17 = vector.multi_reduction <add>, %16, %cst_14 [0] : vector<48x128xf32> to vector<128xf32>
    %18 = vector.shape_cast %17 : vector<128xf32> to vector<1x128xf32>
    %19 = tpu.iota {dimensions = array<i32: 0>} : vector<8x128xi32>
    %c0_i32 = arith.constant 0 : i32
    %20 = vector.broadcast %c0_i32 : i32 to vector<8x128xi32>
    %21 = arith.cmpi eq, %19, %20 : vector<8x128xi32>
    %c1_i32 = arith.constant 1 : i32
    %22 = vector.broadcast %c1_i32 : i32 to vector<8x128xi32>
    %23 = arith.cmpi eq, %19, %22 : vector<8x128xi32>
    %cst_15 = arith.constant 0.000000e+00 : f32
    %24 = vector.shape_cast %18 : vector<1x128xf32> to vector<1x128xf32>
    %25 = vector.broadcast %24 : vector<1x128xf32> to vector<8x128xf32>
    %26 = vector.broadcast %cst_15 : f32 to vector<8x128xf32>
    %27 = arith.select %23, %25, %26 : vector<8x128xi1>, vector<8x128xf32>
    %28 = vector.shape_cast %15 : vector<1x128xf32> to vector<1x128xf32>
    %29 = vector.broadcast %28 : vector<1x128xf32> to vector<8x128xf32>
    %30 = arith.select %21, %29, %27 : vector<8x128xi1>, vector<8x128xf32>
    %31 = vector.shape_cast %30 : vector<8x128xf32> to vector<1x8x128xf32>
    %c0_16 = arith.constant 0 : index
    %c0_17 = arith.constant 0 : index
    %c0_18 = arith.constant 0 : index
    %32 = vector.load %arg7[%c0_16, %c0_17, %c0_18] : memref<1x8x128xf32, #tpu.memory_space<vmem>>, vector<1x8x128xf32>
    tpu.vector_store %arg7[%c0_16, %c0_17, %c0_18], %31 {strides = array<i32>} : memref<1x8x128xf32, #tpu.memory_space<vmem>>, vector<1x8x128xf32>,
    return
  }
  func.func @transform_0(%arg0: i32) -> (i32, i32) {
    %c0_i32 = arith.constant 0 : i32
    %c0_i32_0 = arith.constant 0 : i32
    return %arg0, %c0_i32 : i32, i32
  }
  func.func @transform_1(%arg0: i32) -> (i32, i32) {
    %c0_i32 = arith.constant 0 : i32
    %c0_i32_0 = arith.constant 0 : i32
    return %arg0, %c0_i32 : i32, i32
  }
  func.func @transform_2(%arg0: i32) -> (i32, i32) {
    %c0_i32 = arith.constant 0 : i32
    %c0_i32_0 = arith.constant 0 : i32
    %c0_i32_1 = arith.constant 0 : i32
    return %c0_i32, %c0_i32_0 : i32, i32
  }
  func.func @transform_3(%arg0: i32) -> (i32, i32) {
    %c0_i32 = arith.constant 0 : i32
    %c0_i32_0 = arith.constant 0 : i32
    %c0_i32_1 = arith.constant 0 : i32
    return %c0_i32, %c0_i32_0 : i32, i32
  }
  func.func @transform_4(%arg0: i32) -> (i32, i32) {
    %c0_i32 = arith.constant 0 : i32
    %c0_i32_0 = arith.constant 0 : i32
    %c0_i32_1 = arith.constant 0 : i32
    return %c0_i32, %c0_i32_0 : i32, i32
  }
  func.func @transform_5(%arg0: i32) -> (i32, i32) {
    %c0_i32 = arith.constant 0 : i32
    %c0_i32_0 = arith.constant 0 : i32
    return %arg0, %c0_i32 : i32, i32
  }
  func.func @transform_6(%arg0: i32) -> (i32, i32, i32) {
    %c0_i32 = arith.constant 0 : i32
    %c0_i32_0 = arith.constant 0 : i32
    %c0_i32_1 = arith.constant 0 : i32
    return %arg0, %c0_i32, %c0_i32_0 : i32, i32, i32
  }
}

module attributes {stable_mosaic.version = 11 : i64} {
  func.func @_fused_mm_kernel(%arg0: i32, %arg1: memref<64x512xbf16, #tpu.memory_space<vmem>>, %arg2: memref<64x512xbf16, #tpu.memory_space<vmem>>, %arg3: memref<512x128xbf16, #tpu.memory_space<vmem>>, %arg4: memref<512x128xbf16, #tpu.memory_space<vmem>>, %arg5: memref<1x128xf32, #tpu.memory_space<vmem>>, %arg6: memref<64x128xbf16, #tpu.memory_space<vmem>>, %arg7: memref<1x8x128xf32, #tpu.memory_space<vmem>>) attributes {dimension_semantics = [#tpu.dimension_semantics<parallel>], iteration_bounds = array<i64: 1>, scalar_prefetch = 0 : i64, scratch_operands = 0 : i64, tpu.core_type = #tpu.core_type<tc>, window_params = [{transform_indices = @transform_0, window_bounds = array<i64: 64, 512>}, {transform_indices = @transform_1, window_bounds = array<i64: 64, 512>}, {pipeline_mode = #tpu.pipeline_mode<synchronous>, transform_indices = @transform_2, window_bounds = array<i64: 512, 128>}, {pipeline_mode = #tpu.pipeline_mode<synchronous>, transform_indices = @transform_3, window_bounds = array<i64: 512, 128>}, {pipeline_mode = #tpu.pipeline_mode<synchronous>, transform_indices = @transform_4, window_bounds = array<i64: 1, 128>}, {transform_indices = @transform_5, window_bounds = array<i64: 64, 128>}, {transform_indices = @transform_6, window_bounds = array<i64: 1, 8, 128>}]} {
    %c0 = arith.constant 0 : index
    %c0_0 = arith.constant 0 : index
    %0 = vector.load %arg1[%c0, %c0_0] : memref<64x512xbf16, #tpu.memory_space<vmem>>, vector<64x512xbf16>
    %c0_1 = arith.constant 0 : index
    %c0_2 = arith.constant 0 : index
    %1 = vector.load %arg3[%c0_1, %c0_2] : memref<512x128xbf16, #tpu.memory_space<vmem>>, vector<512x128xbf16>
    %cst = arith.constant dense<0.000000e+00> : vector<64x128xf32>
    %2 = tpu.matmul %0, %1, %cst {dimension_numbers = #tpu.dot_dimension_numbers<[1], [0], [0], [1], [0, 0, 1, 1], [], []>} : vector<64x512xbf16>, vector<512x128xbf16>, vector<64x128xf32> -> vector<64x128xf32>
    %c0_3 = arith.constant 0 : index
    %c0_4 = arith.constant 0 : index
    %3 = vector.load %arg2[%c0_3, %c0_4] : memref<64x512xbf16, #tpu.memory_space<vmem>>, vector<64x512xbf16>
    %c0_5 = arith.constant 0 : index
    %c0_6 = arith.constant 0 : index
    %4 = vector.load %arg4[%c0_5, %c0_6] : memref<512x128xbf16, #tpu.memory_space<vmem>>, vector<512x128xbf16>
    %cst_7 = arith.constant dense<0.000000e+00> : vector<64x128xf32>
    %5 = tpu.matmul %3, %4, %cst_7 {dimension_numbers = #tpu.dot_dimension_numbers<[1], [0], [0], [1], [0, 0, 1, 1], [], []>} : vector<64x512xbf16>, vector<512x128xbf16>, vector<64x128xf32> -> vector<64x128xf32>
    %6 = arith.addf %2, %5 : vector<64x128xf32>
    %c0_8 = arith.constant 0 : index
    %c0_9 = arith.constant 0 : index
    %7 = vector.load %arg5[%c0_8, %c0_9] : memref<1x128xf32, #tpu.memory_space<vmem>>, vector<1x128xf32>
    %8 = vector.broadcast %7 : vector<1x128xf32> to vector<64x128xf32>
    %9 = arith.addf %6, %8 : vector<64x128xf32>
    %cst_10 = arith.constant 0.000000e+00 : f32
    %10 = vector.broadcast %cst_10 : f32 to vector<64x128xf32>
    %11 = arith.maximumf %9, %10 : vector<64x128xf32>
    %12 = arith.truncf %11 : vector<64x128xf32> to vector<64x128xbf16>
    %c0_11 = arith.constant 0 : index
    %c0_12 = arith.constant 0 : index
    %13 = vector.load %arg6[%c0_11, %c0_12] : memref<64x128xbf16, #tpu.memory_space<vmem>>, vector<64x128xbf16>
    tpu.vector_store %arg6[%c0_11, %c0_12], %12 {strides = array<i32>} : memref<64x128xbf16, #tpu.memory_space<vmem>>, vector<64x128xbf16>,
    %cst_13 = arith.constant dense<0.000000e+00> : vector<128xf32>
    %14 = vector.multi_reduction <add>, %11, %cst_13 [0] : vector<64x128xf32> to vector<128xf32>
    %15 = vector.shape_cast %14 : vector<128xf32> to vector<1x128xf32>
    %16 = arith.mulf %11, %11 : vector<64x128xf32>
    %cst_14 = arith.constant dense<0.000000e+00> : vector<128xf32>
    %17 = vector.multi_reduction <add>, %16, %cst_14 [0] : vector<64x128xf32> to vector<128xf32>
    %18 = vector.shape_cast %17 : vector<128xf32> to vector<1x128xf32>
    %19 = tpu.iota {dimensions = array<i32: 0>} : vector<8x128xi32>
    %c0_i32 = arith.constant 0 : i32
    %20 = vector.broadcast %c0_i32 : i32 to vector<8x128xi32>
    %21 = arith.cmpi eq, %19, %20 : vector<8x128xi32>
    %c1_i32 = arith.constant 1 : i32
    %22 = vector.broadcast %c1_i32 : i32 to vector<8x128xi32>
    %23 = arith.cmpi eq, %19, %22 : vector<8x128xi32>
    %cst_15 = arith.constant 0.000000e+00 : f32
    %24 = vector.shape_cast %18 : vector<1x128xf32> to vector<1x128xf32>
    %25 = vector.broadcast %24 : vector<1x128xf32> to vector<8x128xf32>
    %26 = vector.broadcast %cst_15 : f32 to vector<8x128xf32>
    %27 = arith.select %23, %25, %26 : vector<8x128xi1>, vector<8x128xf32>
    %28 = vector.shape_cast %15 : vector<1x128xf32> to vector<1x128xf32>
    %29 = vector.broadcast %28 : vector<1x128xf32> to vector<8x128xf32>
    %30 = arith.select %21, %29, %27 : vector<8x128xi1>, vector<8x128xf32>
    %31 = vector.shape_cast %30 : vector<8x128xf32> to vector<1x8x128xf32>
    %c0_16 = arith.constant 0 : index
    %c0_17 = arith.constant 0 : index
    %c0_18 = arith.constant 0 : index
    %32 = vector.load %arg7[%c0_16, %c0_17, %c0_18] : memref<1x8x128xf32, #tpu.memory_space<vmem>>, vector<1x8x128xf32>
    tpu.vector_store %arg7[%c0_16, %c0_17, %c0_18], %31 {strides = array<i32>} : memref<1x8x128xf32, #tpu.memory_space<vmem>>, vector<1x8x128xf32>,
    return
  }
  func.func @transform_0(%arg0: i32) -> (i32, i32) {
    %c0_i32 = arith.constant 0 : i32
    %c0_i32_0 = arith.constant 0 : i32
    return %arg0, %c0_i32 : i32, i32
  }
  func.func @transform_1(%arg0: i32) -> (i32, i32) {
    %c0_i32 = arith.constant 0 : i32
    %c0_i32_0 = arith.constant 0 : i32
    return %arg0, %c0_i32 : i32, i32
  }
  func.func @transform_2(%arg0: i32) -> (i32, i32) {
    %c0_i32 = arith.constant 0 : i32
    %c0_i32_0 = arith.constant 0 : i32
    %c0_i32_1 = arith.constant 0 : i32
    return %c0_i32, %c0_i32_0 : i32, i32
  }
  func.func @transform_3(%arg0: i32) -> (i32, i32) {
    %c0_i32 = arith.constant 0 : i32
    %c0_i32_0 = arith.constant 0 : i32
    %c0_i32_1 = arith.constant 0 : i32
    return %c0_i32, %c0_i32_0 : i32, i32
  }
  func.func @transform_4(%arg0: i32) -> (i32, i32) {
    %c0_i32 = arith.constant 0 : i32
    %c0_i32_0 = arith.constant 0 : i32
    %c0_i32_1 = arith.constant 0 : i32
    return %c0_i32, %c0_i32_0 : i32, i32
  }
  func.func @transform_5(%arg0: i32) -> (i32, i32) {
    %c0_i32 = arith.constant 0 : i32
    %c0_i32_0 = arith.constant 0 : i32
    return %arg0, %c0_i32 : i32, i32
  }
  func.func @transform_6(%arg0: i32) -> (i32, i32, i32) {
    %c0_i32 = arith.constant 0 : i32
    %c0_i32_0 = arith.constant 0 : i32
    %c0_i32_1 = arith.constant 0 : i32
    return %arg0, %c0_i32, %c0_i32_0 : i32, i32, i32
  }
}

module attributes {stable_mosaic.version = 11 : i64} {
  func.func @_fused_mm_kernel(%arg0: i32, %arg1: memref<128x512xbf16, #tpu.memory_space<vmem>>, %arg2: memref<512x128xbf16, #tpu.memory_space<vmem>>, %arg3: memref<1x128xf32, #tpu.memory_space<vmem>>, %arg4: memref<128x128xbf16, #tpu.memory_space<vmem>>) attributes {dimension_semantics = [#tpu.dimension_semantics<parallel>], iteration_bounds = array<i64: 1>, scalar_prefetch = 0 : i64, scratch_operands = 0 : i64, tpu.core_type = #tpu.core_type<tc>, window_params = [{transform_indices = @transform_0, window_bounds = array<i64: 128, 512>}, {pipeline_mode = #tpu.pipeline_mode<synchronous>, transform_indices = @transform_1, window_bounds = array<i64: 512, 128>}, {pipeline_mode = #tpu.pipeline_mode<synchronous>, transform_indices = @transform_2, window_bounds = array<i64: 1, 128>}, {transform_indices = @transform_3, window_bounds = array<i64: 128, 128>}]} {
    %c0 = arith.constant 0 : index
    %c0_0 = arith.constant 0 : index
    %0 = vector.load %arg1[%c0, %c0_0] : memref<128x512xbf16, #tpu.memory_space<vmem>>, vector<128x512xbf16>
    %c0_1 = arith.constant 0 : index
    %c0_2 = arith.constant 0 : index
    %1 = vector.load %arg2[%c0_1, %c0_2] : memref<512x128xbf16, #tpu.memory_space<vmem>>, vector<512x128xbf16>
    %cst = arith.constant dense<0.000000e+00> : vector<128x128xf32>
    %2 = tpu.matmul %0, %1, %cst {dimension_numbers = #tpu.dot_dimension_numbers<[1], [0], [0], [1], [0, 0, 1, 1], [], []>} : vector<128x512xbf16>, vector<512x128xbf16>, vector<128x128xf32> -> vector<128x128xf32>
    %c0_3 = arith.constant 0 : index
    %c0_4 = arith.constant 0 : index
    %3 = vector.load %arg3[%c0_3, %c0_4] : memref<1x128xf32, #tpu.memory_space<vmem>>, vector<1x128xf32>
    %4 = vector.broadcast %3 : vector<1x128xf32> to vector<128x128xf32>
    %5 = arith.addf %2, %4 : vector<128x128xf32>
    %cst_5 = arith.constant 0.000000e+00 : f32
    %6 = vector.broadcast %cst_5 : f32 to vector<128x128xf32>
    %7 = arith.maximumf %5, %6 : vector<128x128xf32>
    %8 = arith.truncf %7 : vector<128x128xf32> to vector<128x128xbf16>
    %c0_6 = arith.constant 0 : index
    %c0_7 = arith.constant 0 : index
    %9 = vector.load %arg4[%c0_6, %c0_7] : memref<128x128xbf16, #tpu.memory_space<vmem>>, vector<128x128xbf16>
    tpu.vector_store %arg4[%c0_6, %c0_7], %8 {strides = array<i32>} : memref<128x128xbf16, #tpu.memory_space<vmem>>, vector<128x128xbf16>,
    return
  }
  func.func @transform_0(%arg0: i32) -> (i32, i32) {
    %c0_i32 = arith.constant 0 : i32
    %c0_i32_0 = arith.constant 0 : i32
    return %arg0, %c0_i32 : i32, i32
  }
  func.func @transform_1(%arg0: i32) -> (i32, i32) {
    %c0_i32 = arith.constant 0 : i32
    %c0_i32_0 = arith.constant 0 : i32
    %c0_i32_1 = arith.constant 0 : i32
    return %c0_i32, %c0_i32_0 : i32, i32
  }
  func.func @transform_2(%arg0: i32) -> (i32, i32) {
    %c0_i32 = arith.constant 0 : i32
    %c0_i32_0 = arith.constant 0 : i32
    %c0_i32_1 = arith.constant 0 : i32
    return %c0_i32, %c0_i32_0 : i32, i32
  }
  func.func @transform_3(%arg0: i32) -> (i32, i32) {
    %c0_i32 = arith.constant 0 : i32
    %c0_i32_0 = arith.constant 0 : i32
    return %arg0, %c0_i32 : i32, i32
  }
}

module attributes {stable_mosaic.version = 11 : i64} {
  func.func @_fused_mm_kernel(%arg0: i32, %arg1: memref<128x128xbf16, #tpu.memory_space<vmem>>, %arg2: memref<128x128xbf16, #tpu.memory_space<vmem>>, %arg3: memref<128x128xbf16, #tpu.memory_space<vmem>>, %arg4: memref<128x128xbf16, #tpu.memory_space<vmem>>, %arg5: memref<1x128xf32, #tpu.memory_space<vmem>>, %arg6: memref<128x128xbf16, #tpu.memory_space<vmem>>, %arg7: memref<1x8x128xf32, #tpu.memory_space<vmem>>) attributes {dimension_semantics = [#tpu.dimension_semantics<parallel>], iteration_bounds = array<i64: 1>, scalar_prefetch = 0 : i64, scratch_operands = 0 : i64, tpu.core_type = #tpu.core_type<tc>, window_params = [{transform_indices = @transform_0, window_bounds = array<i64: 128, 128>}, {transform_indices = @transform_1, window_bounds = array<i64: 128, 128>}, {pipeline_mode = #tpu.pipeline_mode<synchronous>, transform_indices = @transform_2, window_bounds = array<i64: 128, 128>}, {pipeline_mode = #tpu.pipeline_mode<synchronous>, transform_indices = @transform_3, window_bounds = array<i64: 128, 128>}, {pipeline_mode = #tpu.pipeline_mode<synchronous>, transform_indices = @transform_4, window_bounds = array<i64: 1, 128>}, {transform_indices = @transform_5, window_bounds = array<i64: 128, 128>}, {transform_indices = @transform_6, window_bounds = array<i64: 1, 8, 128>}]} {
    %c0 = arith.constant 0 : index
    %c0_0 = arith.constant 0 : index
    %0 = vector.load %arg1[%c0, %c0_0] : memref<128x128xbf16, #tpu.memory_space<vmem>>, vector<128x128xbf16>
    %c0_1 = arith.constant 0 : index
    %c0_2 = arith.constant 0 : index
    %1 = vector.load %arg3[%c0_1, %c0_2] : memref<128x128xbf16, #tpu.memory_space<vmem>>, vector<128x128xbf16>
    %cst = arith.constant dense<0.000000e+00> : vector<128x128xf32>
    %2 = tpu.matmul %0, %1, %cst {dimension_numbers = #tpu.dot_dimension_numbers<[1], [0], [0], [1], [0, 0, 1, 1], [], []>} : vector<128x128xbf16>, vector<128x128xbf16>, vector<128x128xf32> -> vector<128x128xf32>
    %c0_3 = arith.constant 0 : index
    %c0_4 = arith.constant 0 : index
    %3 = vector.load %arg2[%c0_3, %c0_4] : memref<128x128xbf16, #tpu.memory_space<vmem>>, vector<128x128xbf16>
    %c0_5 = arith.constant 0 : index
    %c0_6 = arith.constant 0 : index
    %4 = vector.load %arg4[%c0_5, %c0_6] : memref<128x128xbf16, #tpu.memory_space<vmem>>, vector<128x128xbf16>
    %cst_7 = arith.constant dense<0.000000e+00> : vector<128x128xf32>
    %5 = tpu.matmul %3, %4, %cst_7 {dimension_numbers = #tpu.dot_dimension_numbers<[1], [0], [0], [1], [0, 0, 1, 1], [], []>} : vector<128x128xbf16>, vector<128x128xbf16>, vector<128x128xf32> -> vector<128x128xf32>
    %6 = arith.addf %2, %5 : vector<128x128xf32>
    %c0_8 = arith.constant 0 : index
    %c0_9 = arith.constant 0 : index
    %7 = vector.load %arg5[%c0_8, %c0_9] : memref<1x128xf32, #tpu.memory_space<vmem>>, vector<1x128xf32>
    %8 = vector.broadcast %7 : vector<1x128xf32> to vector<128x128xf32>
    %9 = arith.addf %6, %8 : vector<128x128xf32>
    %cst_10 = arith.constant 0.000000e+00 : f32
    %10 = vector.broadcast %cst_10 : f32 to vector<128x128xf32>
    %11 = arith.maximumf %9, %10 : vector<128x128xf32>
    %12 = arith.truncf %11 : vector<128x128xf32> to vector<128x128xbf16>
    %c0_11 = arith.constant 0 : index
    %c0_12 = arith.constant 0 : index
    %13 = vector.load %arg6[%c0_11, %c0_12] : memref<128x128xbf16, #tpu.memory_space<vmem>>, vector<128x128xbf16>
    tpu.vector_store %arg6[%c0_11, %c0_12], %12 {strides = array<i32>} : memref<128x128xbf16, #tpu.memory_space<vmem>>, vector<128x128xbf16>,
    %cst_13 = arith.constant dense<0.000000e+00> : vector<128xf32>
    %14 = vector.multi_reduction <add>, %11, %cst_13 [0] : vector<128x128xf32> to vector<128xf32>
    %15 = vector.shape_cast %14 : vector<128xf32> to vector<1x128xf32>
    %16 = arith.mulf %11, %11 : vector<128x128xf32>
    %cst_14 = arith.constant dense<0.000000e+00> : vector<128xf32>
    %17 = vector.multi_reduction <add>, %16, %cst_14 [0] : vector<128x128xf32> to vector<128xf32>
    %18 = vector.shape_cast %17 : vector<128xf32> to vector<1x128xf32>
    %19 = tpu.iota {dimensions = array<i32: 0>} : vector<8x128xi32>
    %c0_i32 = arith.constant 0 : i32
    %20 = vector.broadcast %c0_i32 : i32 to vector<8x128xi32>
    %21 = arith.cmpi eq, %19, %20 : vector<8x128xi32>
    %c1_i32 = arith.constant 1 : i32
    %22 = vector.broadcast %c1_i32 : i32 to vector<8x128xi32>
    %23 = arith.cmpi eq, %19, %22 : vector<8x128xi32>
    %cst_15 = arith.constant 0.000000e+00 : f32
    %24 = vector.shape_cast %18 : vector<1x128xf32> to vector<1x128xf32>
    %25 = vector.broadcast %24 : vector<1x128xf32> to vector<8x128xf32>
    %26 = vector.broadcast %cst_15 : f32 to vector<8x128xf32>
    %27 = arith.select %23, %25, %26 : vector<8x128xi1>, vector<8x128xf32>
    %28 = vector.shape_cast %15 : vector<1x128xf32> to vector<1x128xf32>
    %29 = vector.broadcast %28 : vector<1x128xf32> to vector<8x128xf32>
    %30 = arith.select %21, %29, %27 : vector<8x128xi1>, vector<8x128xf32>
    %31 = vector.shape_cast %30 : vector<8x128xf32> to vector<1x8x128xf32>
    %c0_16 = arith.constant 0 : index
    %c0_17 = arith.constant 0 : index
    %c0_18 = arith.constant 0 : index
    %32 = vector.load %arg7[%c0_16, %c0_17, %c0_18] : memref<1x8x128xf32, #tpu.memory_space<vmem>>, vector<1x8x128xf32>
    tpu.vector_store %arg7[%c0_16, %c0_17, %c0_18], %31 {strides = array<i32>} : memref<1x8x128xf32, #tpu.memory_space<vmem>>, vector<1x8x128xf32>,
    return
  }
  func.func @transform_0(%arg0: i32) -> (i32, i32) {
    %c0_i32 = arith.constant 0 : i32
    %c0_i32_0 = arith.constant 0 : i32
    return %arg0, %c0_i32 : i32, i32
  }
  func.func @transform_1(%arg0: i32) -> (i32, i32) {
    %c0_i32 = arith.constant 0 : i32
    %c0_i32_0 = arith.constant 0 : i32
    return %arg0, %c0_i32 : i32, i32
  }
  func.func @transform_2(%arg0: i32) -> (i32, i32) {
    %c0_i32 = arith.constant 0 : i32
    %c0_i32_0 = arith.constant 0 : i32
    %c0_i32_1 = arith.constant 0 : i32
    return %c0_i32, %c0_i32_0 : i32, i32
  }
  func.func @transform_3(%arg0: i32) -> (i32, i32) {
    %c0_i32 = arith.constant 0 : i32
    %c0_i32_0 = arith.constant 0 : i32
    %c0_i32_1 = arith.constant 0 : i32
    return %c0_i32, %c0_i32_0 : i32, i32
  }
  func.func @transform_4(%arg0: i32) -> (i32, i32) {
    %c0_i32 = arith.constant 0 : i32
    %c0_i32_0 = arith.constant 0 : i32
    %c0_i32_1 = arith.constant 0 : i32
    return %c0_i32, %c0_i32_0 : i32, i32
  }
  func.func @transform_5(%arg0: i32) -> (i32, i32) {
    %c0_i32 = arith.constant 0 : i32
    %c0_i32_0 = arith.constant 0 : i32
    return %arg0, %c0_i32 : i32, i32
  }
  func.func @transform_6(%arg0: i32) -> (i32, i32, i32) {
    %c0_i32 = arith.constant 0 : i32
    %c0_i32_0 = arith.constant 0 : i32
    %c0_i32_1 = arith.constant 0 : i32
    return %arg0, %c0_i32, %c0_i32_0 : i32, i32, i32
  }
}

module attributes {stable_mosaic.version = 11 : i64} {
  func.func @_fused_mm_kernel(%arg0: i32, %arg1: memref<144x256xbf16, #tpu.memory_space<vmem>>, %arg2: memref<144x256xbf16, #tpu.memory_space<vmem>>, %arg3: memref<256x128xbf16, #tpu.memory_space<vmem>>, %arg4: memref<256x128xbf16, #tpu.memory_space<vmem>>, %arg5: memref<1x128xf32, #tpu.memory_space<vmem>>, %arg6: memref<144x128xbf16, #tpu.memory_space<vmem>>, %arg7: memref<1x8x128xf32, #tpu.memory_space<vmem>>) attributes {dimension_semantics = [#tpu.dimension_semantics<parallel>], iteration_bounds = array<i64: 1>, scalar_prefetch = 0 : i64, scratch_operands = 0 : i64, tpu.core_type = #tpu.core_type<tc>, window_params = [{transform_indices = @transform_0, window_bounds = array<i64: 144, 256>}, {transform_indices = @transform_1, window_bounds = array<i64: 144, 256>}, {pipeline_mode = #tpu.pipeline_mode<synchronous>, transform_indices = @transform_2, window_bounds = array<i64: 256, 128>}, {pipeline_mode = #tpu.pipeline_mode<synchronous>, transform_indices = @transform_3, window_bounds = array<i64: 256, 128>}, {pipeline_mode = #tpu.pipeline_mode<synchronous>, transform_indices = @transform_4, window_bounds = array<i64: 1, 128>}, {transform_indices = @transform_5, window_bounds = array<i64: 144, 128>}, {transform_indices = @transform_6, window_bounds = array<i64: 1, 8, 128>}]} {
    %c0 = arith.constant 0 : index
    %c0_0 = arith.constant 0 : index
    %0 = vector.load %arg1[%c0, %c0_0] : memref<144x256xbf16, #tpu.memory_space<vmem>>, vector<144x256xbf16>
    %c0_1 = arith.constant 0 : index
    %c0_2 = arith.constant 0 : index
    %1 = vector.load %arg3[%c0_1, %c0_2] : memref<256x128xbf16, #tpu.memory_space<vmem>>, vector<256x128xbf16>
    %cst = arith.constant dense<0.000000e+00> : vector<144x128xf32>
    %2 = tpu.matmul %0, %1, %cst {dimension_numbers = #tpu.dot_dimension_numbers<[1], [0], [0], [1], [0, 0, 1, 1], [], []>} : vector<144x256xbf16>, vector<256x128xbf16>, vector<144x128xf32> -> vector<144x128xf32>
    %c0_3 = arith.constant 0 : index
    %c0_4 = arith.constant 0 : index
    %3 = vector.load %arg2[%c0_3, %c0_4] : memref<144x256xbf16, #tpu.memory_space<vmem>>, vector<144x256xbf16>
    %c0_5 = arith.constant 0 : index
    %c0_6 = arith.constant 0 : index
    %4 = vector.load %arg4[%c0_5, %c0_6] : memref<256x128xbf16, #tpu.memory_space<vmem>>, vector<256x128xbf16>
    %cst_7 = arith.constant dense<0.000000e+00> : vector<144x128xf32>
    %5 = tpu.matmul %3, %4, %cst_7 {dimension_numbers = #tpu.dot_dimension_numbers<[1], [0], [0], [1], [0, 0, 1, 1], [], []>} : vector<144x256xbf16>, vector<256x128xbf16>, vector<144x128xf32> -> vector<144x128xf32>
    %6 = arith.addf %2, %5 : vector<144x128xf32>
    %c0_8 = arith.constant 0 : index
    %c0_9 = arith.constant 0 : index
    %7 = vector.load %arg5[%c0_8, %c0_9] : memref<1x128xf32, #tpu.memory_space<vmem>>, vector<1x128xf32>
    %8 = vector.broadcast %7 : vector<1x128xf32> to vector<144x128xf32>
    %9 = arith.addf %6, %8 : vector<144x128xf32>
    %cst_10 = arith.constant 0.000000e+00 : f32
    %10 = vector.broadcast %cst_10 : f32 to vector<144x128xf32>
    %11 = arith.maximumf %9, %10 : vector<144x128xf32>
    %12 = arith.truncf %11 : vector<144x128xf32> to vector<144x128xbf16>
    %c0_11 = arith.constant 0 : index
    %c0_12 = arith.constant 0 : index
    %13 = vector.load %arg6[%c0_11, %c0_12] : memref<144x128xbf16, #tpu.memory_space<vmem>>, vector<144x128xbf16>
    tpu.vector_store %arg6[%c0_11, %c0_12], %12 {strides = array<i32>} : memref<144x128xbf16, #tpu.memory_space<vmem>>, vector<144x128xbf16>,
    %cst_13 = arith.constant dense<0.000000e+00> : vector<128xf32>
    %14 = vector.multi_reduction <add>, %11, %cst_13 [0] : vector<144x128xf32> to vector<128xf32>
    %15 = vector.shape_cast %14 : vector<128xf32> to vector<1x128xf32>
    %16 = arith.mulf %11, %11 : vector<144x128xf32>
    %cst_14 = arith.constant dense<0.000000e+00> : vector<128xf32>
    %17 = vector.multi_reduction <add>, %16, %cst_14 [0] : vector<144x128xf32> to vector<128xf32>
    %18 = vector.shape_cast %17 : vector<128xf32> to vector<1x128xf32>
    %19 = tpu.iota {dimensions = array<i32: 0>} : vector<8x128xi32>
    %c0_i32 = arith.constant 0 : i32
    %20 = vector.broadcast %c0_i32 : i32 to vector<8x128xi32>
    %21 = arith.cmpi eq, %19, %20 : vector<8x128xi32>
    %c1_i32 = arith.constant 1 : i32
    %22 = vector.broadcast %c1_i32 : i32 to vector<8x128xi32>
    %23 = arith.cmpi eq, %19, %22 : vector<8x128xi32>
    %cst_15 = arith.constant 0.000000e+00 : f32
    %24 = vector.shape_cast %18 : vector<1x128xf32> to vector<1x128xf32>
    %25 = vector.broadcast %24 : vector<1x128xf32> to vector<8x128xf32>
    %26 = vector.broadcast %cst_15 : f32 to vector<8x128xf32>
    %27 = arith.select %23, %25, %26 : vector<8x128xi1>, vector<8x128xf32>
    %28 = vector.shape_cast %15 : vector<1x128xf32> to vector<1x128xf32>
    %29 = vector.broadcast %28 : vector<1x128xf32> to vector<8x128xf32>
    %30 = arith.select %21, %29, %27 : vector<8x128xi1>, vector<8x128xf32>
    %31 = vector.shape_cast %30 : vector<8x128xf32> to vector<1x8x128xf32>
    %c0_16 = arith.constant 0 : index
    %c0_17 = arith.constant 0 : index
    %c0_18 = arith.constant 0 : index
    %32 = vector.load %arg7[%c0_16, %c0_17, %c0_18] : memref<1x8x128xf32, #tpu.memory_space<vmem>>, vector<1x8x128xf32>
    tpu.vector_store %arg7[%c0_16, %c0_17, %c0_18], %31 {strides = array<i32>} : memref<1x8x128xf32, #tpu.memory_space<vmem>>, vector<1x8x128xf32>,
    return
  }
  func.func @transform_0(%arg0: i32) -> (i32, i32) {
    %c0_i32 = arith.constant 0 : i32
    %c0_i32_0 = arith.constant 0 : i32
    return %arg0, %c0_i32 : i32, i32
  }
  func.func @transform_1(%arg0: i32) -> (i32, i32) {
    %c0_i32 = arith.constant 0 : i32
    %c0_i32_0 = arith.constant 0 : i32
    return %arg0, %c0_i32 : i32, i32
  }
  func.func @transform_2(%arg0: i32) -> (i32, i32) {
    %c0_i32 = arith.constant 0 : i32
    %c0_i32_0 = arith.constant 0 : i32
    %c0_i32_1 = arith.constant 0 : i32
    return %c0_i32, %c0_i32_0 : i32, i32
  }
  func.func @transform_3(%arg0: i32) -> (i32, i32) {
    %c0_i32 = arith.constant 0 : i32
    %c0_i32_0 = arith.constant 0 : i32
    %c0_i32_1 = arith.constant 0 : i32
    return %c0_i32, %c0_i32_0 : i32, i32
  }
  func.func @transform_4(%arg0: i32) -> (i32, i32) {
    %c0_i32 = arith.constant 0 : i32
    %c0_i32_0 = arith.constant 0 : i32
    %c0_i32_1 = arith.constant 0 : i32
    return %c0_i32, %c0_i32_0 : i32, i32
  }
  func.func @transform_5(%arg0: i32) -> (i32, i32) {
    %c0_i32 = arith.constant 0 : i32
    %c0_i32_0 = arith.constant 0 : i32
    return %arg0, %c0_i32 : i32, i32
  }
  func.func @transform_6(%arg0: i32) -> (i32, i32, i32) {
    %c0_i32 = arith.constant 0 : i32
    %c0_i32_0 = arith.constant 0 : i32
    %c0_i32_1 = arith.constant 0 : i32
    return %arg0, %c0_i32, %c0_i32_0 : i32, i32, i32
  }
}

module attributes {stable_mosaic.version = 11 : i64} {
  func.func @_fused_mm_kernel(%arg0: i32, %arg1: memref<176x512xbf16, #tpu.memory_space<vmem>>, %arg2: memref<176x512xbf16, #tpu.memory_space<vmem>>, %arg3: memref<512x128xbf16, #tpu.memory_space<vmem>>, %arg4: memref<512x128xbf16, #tpu.memory_space<vmem>>, %arg5: memref<1x128xf32, #tpu.memory_space<vmem>>, %arg6: memref<176x128xbf16, #tpu.memory_space<vmem>>, %arg7: memref<1x8x128xf32, #tpu.memory_space<vmem>>) attributes {dimension_semantics = [#tpu.dimension_semantics<parallel>], iteration_bounds = array<i64: 1>, scalar_prefetch = 0 : i64, scratch_operands = 0 : i64, tpu.core_type = #tpu.core_type<tc>, window_params = [{transform_indices = @transform_0, window_bounds = array<i64: 176, 512>}, {transform_indices = @transform_1, window_bounds = array<i64: 176, 512>}, {pipeline_mode = #tpu.pipeline_mode<synchronous>, transform_indices = @transform_2, window_bounds = array<i64: 512, 128>}, {pipeline_mode = #tpu.pipeline_mode<synchronous>, transform_indices = @transform_3, window_bounds = array<i64: 512, 128>}, {pipeline_mode = #tpu.pipeline_mode<synchronous>, transform_indices = @transform_4, window_bounds = array<i64: 1, 128>}, {transform_indices = @transform_5, window_bounds = array<i64: 176, 128>}, {transform_indices = @transform_6, window_bounds = array<i64: 1, 8, 128>}]} {
    %c0 = arith.constant 0 : index
    %c0_0 = arith.constant 0 : index
    %0 = vector.load %arg1[%c0, %c0_0] : memref<176x512xbf16, #tpu.memory_space<vmem>>, vector<176x512xbf16>
    %c0_1 = arith.constant 0 : index
    %c0_2 = arith.constant 0 : index
    %1 = vector.load %arg3[%c0_1, %c0_2] : memref<512x128xbf16, #tpu.memory_space<vmem>>, vector<512x128xbf16>
    %cst = arith.constant dense<0.000000e+00> : vector<176x128xf32>
    %2 = tpu.matmul %0, %1, %cst {dimension_numbers = #tpu.dot_dimension_numbers<[1], [0], [0], [1], [0, 0, 1, 1], [], []>} : vector<176x512xbf16>, vector<512x128xbf16>, vector<176x128xf32> -> vector<176x128xf32>
    %c0_3 = arith.constant 0 : index
    %c0_4 = arith.constant 0 : index
    %3 = vector.load %arg2[%c0_3, %c0_4] : memref<176x512xbf16, #tpu.memory_space<vmem>>, vector<176x512xbf16>
    %c0_5 = arith.constant 0 : index
    %c0_6 = arith.constant 0 : index
    %4 = vector.load %arg4[%c0_5, %c0_6] : memref<512x128xbf16, #tpu.memory_space<vmem>>, vector<512x128xbf16>
    %cst_7 = arith.constant dense<0.000000e+00> : vector<176x128xf32>
    %5 = tpu.matmul %3, %4, %cst_7 {dimension_numbers = #tpu.dot_dimension_numbers<[1], [0], [0], [1], [0, 0, 1, 1], [], []>} : vector<176x512xbf16>, vector<512x128xbf16>, vector<176x128xf32> -> vector<176x128xf32>
    %6 = arith.addf %2, %5 : vector<176x128xf32>
    %c0_8 = arith.constant 0 : index
    %c0_9 = arith.constant 0 : index
    %7 = vector.load %arg5[%c0_8, %c0_9] : memref<1x128xf32, #tpu.memory_space<vmem>>, vector<1x128xf32>
    %8 = vector.broadcast %7 : vector<1x128xf32> to vector<176x128xf32>
    %9 = arith.addf %6, %8 : vector<176x128xf32>
    %cst_10 = arith.constant 0.000000e+00 : f32
    %10 = vector.broadcast %cst_10 : f32 to vector<176x128xf32>
    %11 = arith.maximumf %9, %10 : vector<176x128xf32>
    %12 = arith.truncf %11 : vector<176x128xf32> to vector<176x128xbf16>
    %c0_11 = arith.constant 0 : index
    %c0_12 = arith.constant 0 : index
    %13 = vector.load %arg6[%c0_11, %c0_12] : memref<176x128xbf16, #tpu.memory_space<vmem>>, vector<176x128xbf16>
    tpu.vector_store %arg6[%c0_11, %c0_12], %12 {strides = array<i32>} : memref<176x128xbf16, #tpu.memory_space<vmem>>, vector<176x128xbf16>,
    %cst_13 = arith.constant dense<0.000000e+00> : vector<128xf32>
    %14 = vector.multi_reduction <add>, %11, %cst_13 [0] : vector<176x128xf32> to vector<128xf32>
    %15 = vector.shape_cast %14 : vector<128xf32> to vector<1x128xf32>
    %16 = arith.mulf %11, %11 : vector<176x128xf32>
    %cst_14 = arith.constant dense<0.000000e+00> : vector<128xf32>
    %17 = vector.multi_reduction <add>, %16, %cst_14 [0] : vector<176x128xf32> to vector<128xf32>
    %18 = vector.shape_cast %17 : vector<128xf32> to vector<1x128xf32>
    %19 = tpu.iota {dimensions = array<i32: 0>} : vector<8x128xi32>
    %c0_i32 = arith.constant 0 : i32
    %20 = vector.broadcast %c0_i32 : i32 to vector<8x128xi32>
    %21 = arith.cmpi eq, %19, %20 : vector<8x128xi32>
    %c1_i32 = arith.constant 1 : i32
    %22 = vector.broadcast %c1_i32 : i32 to vector<8x128xi32>
    %23 = arith.cmpi eq, %19, %22 : vector<8x128xi32>
    %cst_15 = arith.constant 0.000000e+00 : f32
    %24 = vector.shape_cast %18 : vector<1x128xf32> to vector<1x128xf32>
    %25 = vector.broadcast %24 : vector<1x128xf32> to vector<8x128xf32>
    %26 = vector.broadcast %cst_15 : f32 to vector<8x128xf32>
    %27 = arith.select %23, %25, %26 : vector<8x128xi1>, vector<8x128xf32>
    %28 = vector.shape_cast %15 : vector<1x128xf32> to vector<1x128xf32>
    %29 = vector.broadcast %28 : vector<1x128xf32> to vector<8x128xf32>
    %30 = arith.select %21, %29, %27 : vector<8x128xi1>, vector<8x128xf32>
    %31 = vector.shape_cast %30 : vector<8x128xf32> to vector<1x8x128xf32>
    %c0_16 = arith.constant 0 : index
    %c0_17 = arith.constant 0 : index
    %c0_18 = arith.constant 0 : index
    %32 = vector.load %arg7[%c0_16, %c0_17, %c0_18] : memref<1x8x128xf32, #tpu.memory_space<vmem>>, vector<1x8x128xf32>
    tpu.vector_store %arg7[%c0_16, %c0_17, %c0_18], %31 {strides = array<i32>} : memref<1x8x128xf32, #tpu.memory_space<vmem>>, vector<1x8x128xf32>,
    return
  }
  func.func @transform_0(%arg0: i32) -> (i32, i32) {
    %c0_i32 = arith.constant 0 : i32
    %c0_i32_0 = arith.constant 0 : i32
    return %arg0, %c0_i32 : i32, i32
  }
  func.func @transform_1(%arg0: i32) -> (i32, i32) {
    %c0_i32 = arith.constant 0 : i32
    %c0_i32_0 = arith.constant 0 : i32
    return %arg0, %c0_i32 : i32, i32
  }
  func.func @transform_2(%arg0: i32) -> (i32, i32) {
    %c0_i32 = arith.constant 0 : i32
    %c0_i32_0 = arith.constant 0 : i32
    %c0_i32_1 = arith.constant 0 : i32
    return %c0_i32, %c0_i32_0 : i32, i32
  }
  func.func @transform_3(%arg0: i32) -> (i32, i32) {
    %c0_i32 = arith.constant 0 : i32
    %c0_i32_0 = arith.constant 0 : i32
    %c0_i32_1 = arith.constant 0 : i32
    return %c0_i32, %c0_i32_0 : i32, i32
  }
  func.func @transform_4(%arg0: i32) -> (i32, i32) {
    %c0_i32 = arith.constant 0 : i32
    %c0_i32_0 = arith.constant 0 : i32
    %c0_i32_1 = arith.constant 0 : i32
    return %c0_i32, %c0_i32_0 : i32, i32
  }
  func.func @transform_5(%arg0: i32) -> (i32, i32) {
    %c0_i32 = arith.constant 0 : i32
    %c0_i32_0 = arith.constant 0 : i32
    return %arg0, %c0_i32 : i32, i32
  }
  func.func @transform_6(%arg0: i32) -> (i32, i32, i32) {
    %c0_i32 = arith.constant 0 : i32
    %c0_i32_0 = arith.constant 0 : i32
    %c0_i32_1 = arith.constant 0 : i32
    return %arg0, %c0_i32, %c0_i32_0 : i32, i32, i32
  }
}

module attributes {stable_mosaic.version = 11 : i64} {
  func.func @_fused_mm_kernel(%arg0: i32, %arg1: memref<512x512xbf16, #tpu.memory_space<vmem>>, %arg2: memref<512x128xbf16, #tpu.memory_space<vmem>>, %arg3: memref<1x128xf32, #tpu.memory_space<vmem>>, %arg4: memref<512x128xbf16, #tpu.memory_space<vmem>>) attributes {dimension_semantics = [#tpu.dimension_semantics<parallel>], iteration_bounds = array<i64: 1>, scalar_prefetch = 0 : i64, scratch_operands = 0 : i64, tpu.core_type = #tpu.core_type<tc>, window_params = [{transform_indices = @transform_0, window_bounds = array<i64: 512, 512>}, {pipeline_mode = #tpu.pipeline_mode<synchronous>, transform_indices = @transform_1, window_bounds = array<i64: 512, 128>}, {pipeline_mode = #tpu.pipeline_mode<synchronous>, transform_indices = @transform_2, window_bounds = array<i64: 1, 128>}, {transform_indices = @transform_3, window_bounds = array<i64: 512, 128>}]} {
    %c0 = arith.constant 0 : index
    %c0_0 = arith.constant 0 : index
    %0 = vector.load %arg1[%c0, %c0_0] : memref<512x512xbf16, #tpu.memory_space<vmem>>, vector<512x512xbf16>
    %c0_1 = arith.constant 0 : index
    %c0_2 = arith.constant 0 : index
    %1 = vector.load %arg2[%c0_1, %c0_2] : memref<512x128xbf16, #tpu.memory_space<vmem>>, vector<512x128xbf16>
    %cst = arith.constant dense<0.000000e+00> : vector<512x128xf32>
    %2 = tpu.matmul %0, %1, %cst {dimension_numbers = #tpu.dot_dimension_numbers<[1], [0], [0], [1], [0, 0, 1, 1], [], []>} : vector<512x512xbf16>, vector<512x128xbf16>, vector<512x128xf32> -> vector<512x128xf32>
    %c0_3 = arith.constant 0 : index
    %c0_4 = arith.constant 0 : index
    %3 = vector.load %arg3[%c0_3, %c0_4] : memref<1x128xf32, #tpu.memory_space<vmem>>, vector<1x128xf32>
    %4 = vector.broadcast %3 : vector<1x128xf32> to vector<512x128xf32>
    %5 = arith.addf %2, %4 : vector<512x128xf32>
    %cst_5 = arith.constant 0.000000e+00 : f32
    %6 = vector.broadcast %cst_5 : f32 to vector<512x128xf32>
    %7 = arith.maximumf %5, %6 : vector<512x128xf32>
    %8 = arith.truncf %7 : vector<512x128xf32> to vector<512x128xbf16>
    %c0_6 = arith.constant 0 : index
    %c0_7 = arith.constant 0 : index
    %9 = vector.load %arg4[%c0_6, %c0_7] : memref<512x128xbf16, #tpu.memory_space<vmem>>, vector<512x128xbf16>
    tpu.vector_store %arg4[%c0_6, %c0_7], %8 {strides = array<i32>} : memref<512x128xbf16, #tpu.memory_space<vmem>>, vector<512x128xbf16>,
    return
  }
  func.func @transform_0(%arg0: i32) -> (i32, i32) {
    %c0_i32 = arith.constant 0 : i32
    %c0_i32_0 = arith.constant 0 : i32
    return %arg0, %c0_i32 : i32, i32
  }
  func.func @transform_1(%arg0: i32) -> (i32, i32) {
    %c0_i32 = arith.constant 0 : i32
    %c0_i32_0 = arith.constant 0 : i32
    %c0_i32_1 = arith.constant 0 : i32
    return %c0_i32, %c0_i32_0 : i32, i32
  }
  func.func @transform_2(%arg0: i32) -> (i32, i32) {
    %c0_i32 = arith.constant 0 : i32
    %c0_i32_0 = arith.constant 0 : i32
    %c0_i32_1 = arith.constant 0 : i32
    return %c0_i32, %c0_i32_0 : i32, i32
  }
  func.func @transform_3(%arg0: i32) -> (i32, i32) {
    %c0_i32 = arith.constant 0 : i32
    %c0_i32_0 = arith.constant 0 : i32
    return %arg0, %c0_i32 : i32, i32
  }
}

module attributes {stable_mosaic.version = 11 : i64} {
  func.func @_fused_mm_kernel(%arg0: i32, %arg1: memref<512x128xbf16, #tpu.memory_space<vmem>>, %arg2: memref<128x128xbf16, #tpu.memory_space<vmem>>, %arg3: memref<1x128xf32, #tpu.memory_space<vmem>>, %arg4: memref<512x128xf32, #tpu.memory_space<vmem>>) attributes {dimension_semantics = [#tpu.dimension_semantics<parallel>], iteration_bounds = array<i64: 1>, scalar_prefetch = 0 : i64, scratch_operands = 0 : i64, tpu.core_type = #tpu.core_type<tc>, window_params = [{transform_indices = @transform_0, window_bounds = array<i64: 512, 128>}, {pipeline_mode = #tpu.pipeline_mode<synchronous>, transform_indices = @transform_1, window_bounds = array<i64: 128, 128>}, {pipeline_mode = #tpu.pipeline_mode<synchronous>, transform_indices = @transform_2, window_bounds = array<i64: 1, 128>}, {transform_indices = @transform_3, window_bounds = array<i64: 512, 128>}]} {
    %c0 = arith.constant 0 : index
    %c0_0 = arith.constant 0 : index
    %0 = vector.load %arg1[%c0, %c0_0] : memref<512x128xbf16, #tpu.memory_space<vmem>>, vector<512x128xbf16>
    %c0_1 = arith.constant 0 : index
    %c0_2 = arith.constant 0 : index
    %1 = vector.load %arg2[%c0_1, %c0_2] : memref<128x128xbf16, #tpu.memory_space<vmem>>, vector<128x128xbf16>
    %cst = arith.constant dense<0.000000e+00> : vector<512x128xf32>
    %2 = tpu.matmul %0, %1, %cst {dimension_numbers = #tpu.dot_dimension_numbers<[1], [0], [0], [1], [0, 0, 1, 1], [], []>} : vector<512x128xbf16>, vector<128x128xbf16>, vector<512x128xf32> -> vector<512x128xf32>
    %c0_3 = arith.constant 0 : index
    %c0_4 = arith.constant 0 : index
    %3 = vector.load %arg3[%c0_3, %c0_4] : memref<1x128xf32, #tpu.memory_space<vmem>>, vector<1x128xf32>
    %4 = vector.broadcast %3 : vector<1x128xf32> to vector<512x128xf32>
    %5 = arith.addf %2, %4 : vector<512x128xf32>
    %6 = tpu.iota {dimensions = array<i32: 1>} : vector<512x128xi32>
    %c3_i32 = arith.constant 3 : i32
    %7 = vector.broadcast %c3_i32 : i32 to vector<512x128xi32>
    %8 = arith.cmpi eq, %6, %7 : vector<512x128xi32>
    %cst_5 = arith.constant 0.000000e+00 : f32
    %9 = vector.broadcast %cst_5 : f32 to vector<512x128xf32>
    %10 = arith.subf %9, %5 : vector<512x128xf32>
    %11 = math.exp %10 : vector<512x128xf32>
    %cst_6 = arith.constant 1.000000e+00 : f32
    %12 = vector.broadcast %cst_6 : f32 to vector<512x128xf32>
    %13 = arith.addf %12, %11 : vector<512x128xf32>
    %cst_7 = arith.constant 1.000000e+00 : f32
    %14 = vector.broadcast %cst_7 : f32 to vector<512x128xf32>
    %15 = arith.divf %14, %13 : vector<512x128xf32>
    %16 = arith.select %8, %15, %5 : vector<512x128xi1>, vector<512x128xf32>
    %c0_8 = arith.constant 0 : index
    %c0_9 = arith.constant 0 : index
    %17 = vector.load %arg4[%c0_8, %c0_9] : memref<512x128xf32, #tpu.memory_space<vmem>>, vector<512x128xf32>
    tpu.vector_store %arg4[%c0_8, %c0_9], %16 {strides = array<i32>} : memref<512x128xf32, #tpu.memory_space<vmem>>, vector<512x128xf32>,
    return
  }
  func.func @transform_0(%arg0: i32) -> (i32, i32) {
    %c0_i32 = arith.constant 0 : i32
    %c0_i32_0 = arith.constant 0 : i32
    return %arg0, %c0_i32 : i32, i32
  }
  func.func @transform_1(%arg0: i32) -> (i32, i32) {
    %c0_i32 = arith.constant 0 : i32
    %c0_i32_0 = arith.constant 0 : i32
    %c0_i32_1 = arith.constant 0 : i32
    return %c0_i32, %c0_i32_0 : i32, i32
  }
  func.func @transform_2(%arg0: i32) -> (i32, i32) {
    %c0_i32 = arith.constant 0 : i32
    %c0_i32_0 = arith.constant 0 : i32
    %c0_i32_1 = arith.constant 0 : i32
    return %c0_i32, %c0_i32_0 : i32, i32
  }
  func.func @transform_3(%arg0: i32) -> (i32, i32) {
    %c0_i32 = arith.constant 0 : i32
    %c0_i32_0 = arith.constant 0 : i32
    return %arg0, %c0_i32 : i32, i32
  }
}

</mosaic_0001>

<bundles_post_ra>
// kernel: unet_forward.20
= control target key start
LH: loop header
LB: loop body
LE: loop exit
PB: predicated region body
PF: predicated region fallthrough
CT: control target
= control target key end

     0   :  { %s618_s1 = inlined_call_operand.vmem [shape: bf16[128,128], index: 1, kind: input, shape index: {}]   ;;  %s619_s0 = inlined_call_operand.vmem [shape: bf16[128,128], index: 0, kind: input, shape index: {}]   ;;  %s620_s2 = inlined_call_operand.vmem [shape: f32[1,128], index: 2, kind: input, shape index: {}]   ;;  %s621_s3 = inlined_call_operand.vmem [shape: bf16[128,128], index: 3, kind: output, shape index: {}]  }
   0x1   :  { %v507_v0 = vld [vmem:[%s618_s1 + $0x38] sm:$0xff]   ;;  %v508_v1 = vld [vmem:[%s618_s1 + $0x30] sm:$0xff]   ;;  %v509_v2 = vld [vmem:[%s618_s1 + $0x28] sm:$0xff]  }
   0x2   :  { %459 = vmatprep.subr.bf16.mxu0 %v507_v0  ;;  %491 = vmatprep.subr.bf16.mxu1 %v507_v0  ;;  %v510_v3 = vld [vmem:[%s618_s1 + $0x20] sm:$0xff]   ;;  %v511_v6 = vld [vmem:[%s618_s1 + $0x18] sm:$0xff]   ;;  %v512_v7 = vld [vmem:[%s618_s1 + $0x10] sm:$0xff]  }
   0x3   :  { %460 = vmatpush3.bf16.msra.mxu0 %v507_v0  ;;  %499 = vmatpush3.bf16.msra.mxu1 %v507_v0  ;;  %v515_v4 = vld [vmem:[%s619_s0] sm:$0xff]   ;;  %v513_v8 = vld [vmem:[%s618_s1 + $0x8] sm:$0xff]   ;;  %v519_v12 = vld [vmem:[%s619_s0 + $0x10] sm:$0xff]  }
   0x4   :  { %461 = vmatprep.subr.bf16.mxu0 %v508_v1  ;;  %492 = vmatprep.subr.bf16.mxu1 %v508_v1  ;;  %v516_v5 = vld [vmem:[%s619_s0 + $0x20] sm:$0xff]   ;;  %v517_v10 = vld [vmem:[%s619_s0 + $0x8] sm:$0xff]   ;;  %v520_v13 = vld [vmem:[%s619_s0 + $0x30] sm:$0xff]  }
   0x5   :  { %475 = vmatprep.mubr.bf16.mxu0 %v515_v4  ;;  %483 = vmatprep.mubr.bf16.mxu1 %v516_v5  ;;  %v514_v9 = vld [vmem:[%s618_s1] sm:$0xff]   ;;  %v518_v11 = vld [vmem:[%s619_s0 + $0x28] sm:$0xff]   ;;  %v521_v14 = vld [vmem:[%s619_s0 + $0x18] sm:$0xff]  }
   0x6   :  { %v522_v15 = vld [vmem:[%s619_s0 + $0x38] sm:$0xff]   ;;  %v347_v16 = vld [vmem:[%s620_s2] ss:$0 sm:$0xff] }
   0x7   :  { %462 = vmatpush3.bf16.msra.mxu0 %v508_v1  ;;  %500 = vmatpush3.bf16.msra.mxu1 %v508_v1 }
   0x8   :  { %463 = vmatprep.subr.bf16.mxu0 %v509_v2  ;;  %493 = vmatprep.subr.bf16.mxu1 %v509_v2 }
   0xb   :  { %464 = vmatpush3.bf16.msra.mxu0 %v509_v2  ;;  %501 = vmatpush3.bf16.msra.mxu1 %v509_v2 }
   0xc   :  { %465 = vmatprep.subr.bf16.mxu0 %v510_v3  ;;  %494 = vmatprep.subr.bf16.mxu1 %v510_v3 }
   0xf   :  { %466 = vmatpush3.bf16.msra.mxu0 %v510_v3  ;;  %502 = vmatpush3.bf16.msra.mxu1 %v510_v3 }
  0x10   :  { %467 = vmatprep.subr.bf16.mxu0 %v511_v6  ;;  %495 = vmatprep.subr.bf16.mxu1 %v511_v6 }
  0x13   :  { %468 = vmatpush3.bf16.msra.mxu0 %v511_v6  ;;  %503 = vmatpush3.bf16.msra.mxu1 %v511_v6 }
  0x14   :  { %469 = vmatprep.subr.bf16.mxu0 %v512_v7  ;;  %496 = vmatprep.subr.bf16.mxu1 %v512_v7 }
  0x17   :  { %470 = vmatpush3.bf16.msra.mxu0 %v512_v7  ;;  %504 = vmatpush3.bf16.msra.mxu1 %v512_v7 }
  0x18   :  { %471 = vmatprep.subr.bf16.mxu0 %v513_v8  ;;  %497 = vmatprep.subr.bf16.mxu1 %v513_v8 }
  0x1b   :  { %472 = vmatpush3.bf16.msra.mxu0 %v513_v8  ;;  %505 = vmatpush3.bf16.msra.mxu1 %v513_v8 }
  0x1c   :  { %473 = vmatprep.subr.bf16.mxu0 %v514_v9  ;;  %498 = vmatprep.subr.bf16.mxu1 %v514_v9 }
  0x1f   :  { %474 = vmatpush3.bf16.msra.mxu0 %v514_v9  ;;  %506 = vmatpush3.bf16.msra.mxu1 %v514_v9 }
  0x22   :  { %476 = vmatmul.mubr.bf16.vlgmr.msra.gmra.mxu0 %v517_v10  ;;  %484 = vmatmul.mubr.bf16.vlgmr.msra.gmra.mxu1 %v518_v11 }
  0x23   :  { %479 = vmatprep.mubr.bf16.mxu0 %v519_v12  ;;  %487 = vmatprep.mubr.bf16.mxu1 %v520_v13 }
  0x2a   :  { %480 = vmatmul.mubr.bf16.gmra.mxu0 %v521_v14  ;;  %488 = vmatmul.mubr.bf16.gmra.mxu1 %v522_v15 }
  0xe2   :  { %v477_v17 = vpop.f32.mrf.mxu0  ;;  %v485_v18 = vpop.f32.mrf.mxu1 }
  0xe3   :  { %v193_v19 = vadd.f32 %v477_v17, %v347_v16  ;;  %v225_v20 = vadd.f32 %v485_v18, %v347_v16 }
  0xe4   :  { %v184_v21 = vpop.f32.mrf.mxu0  ;;  %v216_v22 = vpop.f32.mrf.mxu1 }
  0xe5   :  { %v185_v23 = vadd.f32 %v347_v16, %v184_v21  ;;  %v217_v24 = vadd.f32 %v347_v16, %v216_v22  ;;  %v249_v29 = vmax.f32 %v193_v19, 0.0  ;;  %v257_v30 = vmax.f32 %v225_v20, 0.0 }
  0xe6   :  { %v478_v25 = vpop.f32.mrf.mxu0  ;;  %v486_v26 = vpop.f32.mrf.mxu1 }
  0xe7   :  { %v196_v27 = vadd.f32 %v478_v25, %v347_v16  ;;  %v228_v28 = vadd.f32 %v486_v26, %v347_v16  ;;  %v247_v37 = vmax.f32 %v185_v23, 0.0  ;;  %v255_v38 = vmax.f32 %v217_v24, 0.0 }
  0xe8   :  { %v187_v31 = vpop.f32.mrf.mxu0  ;;  %v219_v32 = vpop.f32.mrf.mxu1 }
  0xe9   :  { %v250_v33 = vmax.f32 %v196_v27, 0.0  ;;  %v258_v34 = vmax.f32 %v228_v28, 0.0  ;;  %v188_v35 = vadd.f32 %v347_v16, %v187_v31  ;;  %v220_v36 = vadd.f32 %v347_v16, %v219_v32 }
  0xea   :  { %v481_v39 = vpop.f32.mrf.mxu0  ;;  %v489_v40 = vpop.f32.mrf.mxu1 }
  0xeb   :  { %v404_v41 = vpack.c.bf16 %v250_v33, %v249_v29  ;;  %v424_v42 = vpack.c.bf16 %v258_v34, %v257_v30  ;;  %v248_v43 = vmax.f32 %v188_v35, 0.0  ;;  %v256_v44 = vmax.f32 %v220_v36, 0.0 }
  0xec   :  { %v209_v45 = vadd.f32 %v481_v39, %v347_v16  ;;  %v241_v46 = vadd.f32 %v489_v40, %v347_v16  ;;  %v200_v47 = vpop.f32.mrf.mxu0  ;;  %v232_v48 = vpop.f32.mrf.mxu1 }
  0xed   :  { %436 = vst [vmem:[%s621_s3 + $0x8] sm:$0xff] %v404_v41   ;;  %440 = vst [vmem:[%s621_s3 + $0x28] sm:$0xff] %v424_v42   ;;  %v399_v49 = vpack.c.bf16 %v248_v43, %v247_v37  ;;  %v419_v50 = vpack.c.bf16 %v256_v44, %v255_v38  ;;  %v201_v51 = vadd.f32 %v347_v16, %v200_v47 }
  0xee   :  { %v233_v52 = vadd.f32 %v347_v16, %v232_v48  ;;  %v482_v53 = vpop.f32.mrf.mxu0  ;;  %v490_v54 = vpop.f32.mrf.mxu1  ;;  %v253_v57 = vmax.f32 %v209_v45, 0.0  ;;  %v261_v58 = vmax.f32 %v241_v46, 0.0 }
  0xef   :  { %400 = vst [vmem:[%s621_s3] sm:$0xff] %v399_v49   ;;  %439 = vst [vmem:[%s621_s3 + $0x20] sm:$0xff] %v419_v50   ;;  %v212_v55 = vadd.f32 %v482_v53, %v347_v16  ;;  %v244_v56 = vadd.f32 %v490_v54, %v347_v16  ;;  %v251_v1 = vmax.f32 %v201_v51, 0.0 }
  0xf0   :  { %v203_v59 = vpop.f32.mrf.mxu0  ;;  %v235_v60 = vpop.f32.mrf.mxu1  ;;  %v259_v2 = vmax.f32 %v233_v52, 0.0 }
  0xf1   :  { %v254_v61 = vmax.f32 %v212_v55, 0.0  ;;  %v262_v62 = vmax.f32 %v244_v56, 0.0  ;;  %v204_v63 = vadd.f32 %v347_v16, %v203_v59  ;;  %v236_v0 = vadd.f32 %v347_v16, %v235_v60 }
  0xf3   :  { %v414_v3 = vpack.c.bf16 %v254_v61, %v253_v57  ;;  %v434_v4 = vpack.c.bf16 %v262_v62, %v261_v58  ;;  %v252_v5 = vmax.f32 %v204_v63, 0.0  ;;  %v260_v6 = vmax.f32 %v236_v0, 0.0 }
  0xf5   :  { %438 = vst [vmem:[%s621_s3 + $0x18] sm:$0xff] %v414_v3   ;;  %442 = vst [vmem:[%s621_s3 + $0x38] sm:$0xff] %v434_v4   ;;  %v409_v7 = vpack.c.bf16 %v252_v5, %v251_v1  ;;  %v429_v8 = vpack.c.bf16 %v260_v6, %v259_v2 }
  0xf7   :  { %437 = vst [vmem:[%s621_s3 + $0x10] sm:$0xff] %v409_v7   ;;  %441 = vst [vmem:[%s621_s3 + $0x30] sm:$0xff] %v429_v8  }

// kernel: unet_forward.19
= control target key start
LH: loop header
LB: loop body
LE: loop exit
PB: predicated region body
PF: predicated region fallthrough
CT: control target
= control target key end

     0   :  { %s3020_s1 = inlined_call_operand.vmem [shape: bf16[1152,128], index: 1, kind: input, shape index: {}]   ;;  %s3021_s0 = inlined_call_operand.vmem [shape: bf16[128,1152], index: 0, kind: input, shape index: {}]   ;;  %s3022_s2 = inlined_call_operand.vmem [shape: f32[1,128], index: 2, kind: input, shape index: {}]   ;;  %s3023_s3 = inlined_call_operand.vmem [shape: bf16[128,128], index: 3, kind: output, shape index: {0}]   ;;  %s3024_s4 = inlined_call_operand.vmem [shape: f32[1,8,128], index: 4, kind: output, shape index: {1}]  }
   0x1   :  { %v2246_v0 = vld [vmem:[%s3020_s1 + $0x78] sm:$0xff]   ;;  %v2250_v4 = vld [vmem:[%s3020_s1 + $0x70] sm:$0xff]   ;;  %v2254_v8 = vld [vmem:[%s3020_s1 + $0x68] sm:$0xff]  }
   0x2   :  { %v2247_v1 = vld [vmem:[%s3020_s1 + $0xf8] sm:$0xff]   ;;  %1926 = vmatprep.subr.bf16.mxu0 %v2246_v0  ;;  %v2251_v5 = vld [vmem:[%s3020_s1 + $0xf0] sm:$0xff]   ;;  %v2255_v9 = vld [vmem:[%s3020_s1 + $0xe8] sm:$0xff]  }
   0x3   :  { %v2248_v2 = vld [vmem:[%s3020_s1 + $0x38] sm:$0xff]   ;;  %1990 = vmatprep.subr.bf16.mxu1 %v2247_v1  ;;  %v2252_v6 = vld [vmem:[%s3020_s1 + $0x30] sm:$0xff]   ;;  %v2256_v10 = vld [vmem:[%s3020_s1 + $0x28] sm:$0xff]  }
   0x4   :  { %v2249_v3 = vld [vmem:[%s3020_s1 + $0xb8] sm:$0xff]   ;;  %1927 = vmatpush3.bf16.msra.mxu0 %v2248_v2  ;;  %v2253_v7 = vld [vmem:[%s3020_s1 + $0xb0] sm:$0xff]   ;;  %v2257_v11 = vld [vmem:[%s3020_s1 + $0xa8] sm:$0xff]  }
   0x5   :  { %1991 = vmatpush3.bf16.msra.mxu1 %v2249_v3  ;;  %1928 = vmatprep.subr.bf16.mxu0 %v2250_v4  ;;  %v2258_v12 = vld [vmem:[%s3020_s1 + $0x60] sm:$0xff]   ;;  %v2262_v16 = vld [vmem:[%s3020_s1 + $0x58] sm:$0xff]   ;;  %v2266_v20 = vld [vmem:[%s3020_s1 + $0x50] sm:$0xff]  }
   0x6   :  { %1992 = vmatprep.subr.bf16.mxu1 %v2251_v5  ;;  %v2259_v13 = vld [vmem:[%s3020_s1 + $0xe0] sm:$0xff]   ;;  %v2263_v17 = vld [vmem:[%s3020_s1 + $0xd8] sm:$0xff]   ;;  %v2267_v21 = vld [vmem:[%s3020_s1 + $0xd0] sm:$0xff]  }
   0x7   :  { %v2260_v14 = vld [vmem:[%s3020_s1 + $0x20] sm:$0xff]   ;;  %v2264_v18 = vld [vmem:[%s3020_s1 + $0x18] sm:$0xff]   ;;  %v2268_v22 = vld [vmem:[%s3020_s1 + $0x10] sm:$0xff]  }
   0x8   :  { %1929 = vmatpush3.bf16.msra.mxu0 %v2252_v6  ;;  %v2261_v15 = vld [vmem:[%s3020_s1 + $0xa0] sm:$0xff]   ;;  %v2265_v19 = vld [vmem:[%s3020_s1 + $0x98] sm:$0xff]   ;;  %v2269_v23 = vld [vmem:[%s3020_s1 + $0x90] sm:$0xff]  }
   0x9   :  { %1993 = vmatpush3.bf16.msra.mxu1 %v2253_v7  ;;  %1930 = vmatprep.subr.bf16.mxu0 %v2254_v8  ;;  %v2270_v24 = vld [vmem:[%s3020_s1 + $0x48] sm:$0xff]   ;;  %v2274_v28 = vld [vmem:[%s3020_s1 + $0x40] sm:$0xff]   ;;  %v2284_v36 = vld [vmem:[%s3020_s1 + $0x178] sm:$0xff]  }
   0xa   :  { %1994 = vmatprep.subr.bf16.mxu1 %v2255_v9  ;;  %v2271_v25 = vld [vmem:[%s3020_s1 + $0xc8] sm:$0xff]   ;;  %v2275_v29 = vld [vmem:[%s3020_s1 + $0xc0] sm:$0xff]   ;;  %v2285_v37 = vld [vmem:[%s3020_s1 + $0x138] sm:$0xff]  }
   0xb   :  { %v2272_v26 = vld [vmem:[%s3020_s1 + $0x8] sm:$0xff]   ;;  %v2276_v30 = vld [vmem:[%s3020_s1] sm:$0xff]   ;;  %v2288_v39 = vld [vmem:[%s3021_s0 + $0x54] ss:$36 sps:$4 sm:$0xff]  }
   0xc   :  { %1931 = vmatpush3.bf16.msra.mxu0 %v2256_v10  ;;  %v2273_v27 = vld [vmem:[%s3020_s1 + $0x88] sm:$0xff]   ;;  %v2277_v31 = vld [vmem:[%s3020_s1 + $0x80] sm:$0xff]   ;;  %v2291_v41 = vld [vmem:[%s3021_s0 + $0x50] ss:$36 sps:$4 sm:$0xff]  }
   0xd   :  { %1995 = vmatpush3.bf16.msra.mxu1 %v2257_v11  ;;  %1932 = vmatprep.subr.bf16.mxu0 %v2258_v12  ;;  %v2278_v32 = vld [vmem:[%s3021_s0] ss:$36 sps:$4 sm:$0xff]   ;;  %v2281_v34 = vld [vmem:[%s3021_s0 + $0x8] ss:$36 sps:$4 sm:$0xff]   ;;  %v2292_v42 = vld [vmem:[%s3020_s1 + $0x170] sm:$0xff]  }
   0xe   :  { %1996 = vmatprep.subr.bf16.mxu1 %v2259_v13  ;;  %v2280_v33 = vld [vmem:[%s3021_s0 + $0x4] ss:$36 sps:$4 sm:$0xff]   ;;  %v2283_v35 = vld [vmem:[%s3021_s0 + $0xc] ss:$36 sps:$4 sm:$0xff]   ;;  %v2294_v44 = vld [vmem:[%s3021_s0 + $0x94] ss:$36 sps:$4 sm:$0xff]  }
   0xf   :  { %1080 = vmatprep.mubr.bf16.mxu0 %v2280_v33  ;;  %1177 = vmatprep.mubr.bf16.mxu1 %v2283_v35  ;;  %v2286_v38 = vld [vmem:[%s3021_s0 + $0x4c] ss:$36 sps:$4 sm:$0xff]   ;;  %v2296_v45 = vld [vmem:[%s3021_s0 + $0x9c] ss:$36 sps:$4 sm:$0xff]   ;;  %v2306_v53 = vld [vmem:[%s3021_s0 + $0xe4] ss:$36 sps:$4 sm:$0xff]  }
  0x10   :  { %1933 = vmatpush3.bf16.msra.mxu0 %v2260_v14  ;;  %v2290_v40 = vld [vmem:[%s3021_s0 + $0x48] ss:$36 sps:$4 sm:$0xff]   ;;  %v2293_v43 = vld [vmem:[%s3020_s1 + $0x130] sm:$0xff]   ;;  %v2301_v47 = vld [vmem:[%s3020_s1 + $0x1f8] sm:$0xff]  }
  0x11   :  { %1997 = vmatpush3.bf16.msra.mxu1 %v2261_v15  ;;  %1934 = vmatprep.subr.bf16.mxu0 %v2262_v16  ;;  %v2300_v46 = vld [vmem:[%s3020_s1 + $0x168] sm:$0xff]   ;;  %v2298_v48 = vld [vmem:[%s3021_s0 + $0x90] ss:$36 sps:$4 sm:$0xff]   ;;  %v2303_v50 = vld [vmem:[%s3020_s1 + $0x1b8] sm:$0xff]  }
  0x12   :  { %1998 = vmatprep.subr.bf16.mxu1 %v2263_v17  ;;  %v2302_v49 = vld [vmem:[%s3020_s1 + $0x128] sm:$0xff]   ;;  %v2299_v51 = vld [vmem:[%s3021_s0 + $0x98] ss:$36 sps:$4 sm:$0xff]   ;;  %v2310_v54 = vld [vmem:[%s3020_s1 + $0x160] sm:$0xff]  }
  0x13   :  { %v2304_v52 = vld [vmem:[%s3021_s0 + $0xdc] ss:$36 sps:$4 sm:$0xff]   ;;  %v2311_v55 = vld [vmem:[%s3020_s1 + $0x1f0] sm:$0xff]   ;;  %v2314_v60 = vld [vmem:[%s3021_s0 + $0x124] ss:$36 sps:$4 sm:$0xff]  }
  0x14   :  { %1935 = vmatpush3.bf16.msra.mxu0 %v2264_v18  ;;  %v2312_v56 = vld [vmem:[%s3020_s1 + $0x120] sm:$0xff]   ;;  %v2313_v57 = vld [vmem:[%s3020_s1 + $0x1b0] sm:$0xff]   ;;  %v2308_v58 = vld [vmem:[%s3021_s0 + $0xd8] ss:$36 sps:$4 sm:$0xff]  }
  0x15   :  { %1999 = vmatpush3.bf16.msra.mxu1 %v2265_v19  ;;  %1936 = vmatprep.subr.bf16.mxu0 %v2266_v20  ;;  %v2309_v59 = vld [vmem:[%s3021_s0 + $0xe0] ss:$36 sps:$4 sm:$0xff]   ;;  %v2316_v61 = vld [vmem:[%s3021_s0 + $0x12c] ss:$36 sps:$4 sm:$0xff]   ;;  %v2320_v62 = vld [vmem:[%s3020_s1 + $0x158] sm:$0xff]  }
  0x16   :  { %2000 = vmatprep.subr.bf16.mxu1 %v2267_v21  ;;  %v2321_v63 = vld [vmem:[%s3020_s1 + $0x1e8] sm:$0xff]   ;;  %v2322_v0 = vld [vmem:[%s3020_s1 + $0x118] sm:$0xff]   ;;  %v2318_v2 = vld [vmem:[%s3021_s0 + $0x120] ss:$36 sps:$4 sm:$0xff]  }
  0x17   :  { %v2323_v1 = vld [vmem:[%s3020_s1 + $0x1a8] sm:$0xff]   ;;  %v2326_v5 = vld [vmem:[%s3021_s0 + $0x174] ss:$36 sps:$4 sm:$0xff]   ;;  %v2331_v7 = vld [vmem:[%s3020_s1 + $0x1e0] sm:$0xff]  }
  0x18   :  { %1937 = vmatpush3.bf16.msra.mxu0 %v2268_v22  ;;  %v2319_v3 = vld [vmem:[%s3021_s0 + $0x128] ss:$36 sps:$4 sm:$0xff]   ;;  %v2330_v6 = vld [vmem:[%s3020_s1 + $0x150] sm:$0xff]   ;;  %v2333_v9 = vld [vmem:[%s3020_s1 + $0x1a0] sm:$0xff]  }
  0x19   :  { %2001 = vmatpush3.bf16.msra.mxu1 %v2269_v23  ;;  %1938 = vmatprep.subr.bf16.mxu0 %v2270_v24  ;;  %v2324_v4 = vld [vmem:[%s3021_s0 + $0x16c] ss:$36 sps:$4 sm:$0xff]   ;;  %v2334_v12 = vld [vmem:[%s3021_s0 + $0x1b4] ss:$36 sps:$4 sm:$0xff]   ;;  %v2336_v14 = vld [vmem:[%s3021_s0 + $0x1bc] ss:$36 sps:$4 sm:$0xff]  }
  0x1a   :  { %2002 = vmatprep.subr.bf16.mxu1 %v2271_v25  ;;  %v2332_v8 = vld [vmem:[%s3020_s1 + $0x110] sm:$0xff]   ;;  %v2328_v10 = vld [vmem:[%s3021_s0 + $0x168] ss:$36 sps:$4 sm:$0xff]   ;;  %v2341_v15 = vld [vmem:[%s3020_s1 + $0x1d8] sm:$0xff]  }
  0x1b   :  { %v2329_v11 = vld [vmem:[%s3021_s0 + $0x170] ss:$36 sps:$4 sm:$0xff]   ;;  %v2340_v13 = vld [vmem:[%s3020_s1 + $0x148] sm:$0xff]   ;;  %v2343_v17 = vld [vmem:[%s3020_s1 + $0x198] sm:$0xff]  }
  0x1c   :  { %1939 = vmatpush3.bf16.msra.mxu0 %v2272_v26  ;;  %v2342_v16 = vld [vmem:[%s3020_s1 + $0x108] sm:$0xff]   ;;  %v2344_v18 = vld [vmem:[%s3020_s1 + $0x1d0] sm:$0xff]   ;;  %v2339_v21 = vld [vmem:[%s3021_s0 + $0x1b8] ss:$36 sps:$4 sm:$0xff]  }
  0x1d   :  { %2003 = vmatpush3.bf16.msra.mxu1 %v2273_v27  ;;  %1940 = vmatprep.subr.bf16.mxu0 %v2274_v28  ;;  %v2345_v19 = vld [vmem:[%s3020_s1 + $0x190] sm:$0xff]   ;;  %v2346_v22 = vld [vmem:[%s3021_s0 + $0x1fc] ss:$36 sps:$4 sm:$0xff]   ;;  %v2348_v23 = vld [vmem:[%s3021_s0 + $0x204] ss:$36 sps:$4 sm:$0xff]  }
  0x1e   :  { %2004 = vmatprep.subr.bf16.mxu1 %v2275_v29  ;;  %v2338_v20 = vld [vmem:[%s3021_s0 + $0x1b0] ss:$36 sps:$4 sm:$0xff]   ;;  %v2352_v24 = vld [vmem:[%s3020_s1 + $0x140] sm:$0xff]   ;;  %v2353_v25 = vld [vmem:[%s3020_s1 + $0x1c8] sm:$0xff]  }
  0x1f   :  { %v2354_v26 = vld [vmem:[%s3020_s1 + $0x100] sm:$0xff]   ;;  %v2355_v27 = vld [vmem:[%s3020_s1 + $0x188] sm:$0xff]   ;;  %v2350_v29 = vld [vmem:[%s3021_s0 + $0x1f8] ss:$36 sps:$4 sm:$0xff]  }
  0x20   :  { %1941 = vmatpush3.bf16.msra.mxu0 %v2276_v30  ;;  %v2356_v28 = vld [vmem:[%s3020_s1 + $0x1c0] sm:$0xff]   ;;  %v2360_v33 = vld [vmem:[%s3021_s0 + $0x14] ss:$36 sps:$4 sm:$0xff]  }
  0x21   :  { %2005 = vmatpush3.bf16.msra.mxu1 %v2277_v31  ;;  %2054 = vmatprep.subr.bf16.mxu0 %v2284_v36  ;;  %v2351_v30 = vld [vmem:[%s3021_s0 + $0x200] ss:$36 sps:$4 sm:$0xff]   ;;  %v2358_v35 = vld [vmem:[%s3021_s0 + $0x10] ss:$36 sps:$4 sm:$0xff]   ;;  %v2361_v36 = vld [vmem:[%s3021_s0 + $0x18] ss:$36 sps:$4 sm:$0xff]  }
  0x22   :  { %2118 = vmatprep.subr.bf16.mxu1 %v2301_v47  ;;  %v2357_v31 = vld [vmem:[%s3020_s1 + $0x180] sm:$0xff]  }
  0x23   :  { %1081 = vmatmul.mubr.bf16.vlgmr.msra.gmra.mxu0 %v2278_v32  ;;  %v2364_v32 = vld [vmem:[%s3020_s1 + $0x238] sm:$0xff]   ;;  %v2376_v47 = vld [vmem:[%s3021_s0 + $0xa0] ss:$36 sps:$4 sm:$0xff]  }
  0x24   :  { %1178 = vmatmul.mubr.bf16.vlgmr.msra.gmra.mxu1 %v2281_v34  ;;  %2055 = vmatpush3.bf16.msra.mxu0 %v2285_v37  ;;  %v2363_v34 = vld [vmem:[%s3021_s0 + $0x1c] ss:$36 sps:$4 sm:$0xff]  }
  0x25   :  { %1088 = vmatprep.mubr.bf16.mxu0 %v2286_v38  ;;  %1185 = vmatprep.mubr.bf16.mxu1 %v2288_v39  ;;  %v2365_v37 = vld [vmem:[%s3021_s0 + $0x5c] ss:$36 sps:$4 sm:$0xff]   ;;  %v2367_v38 = vld [vmem:[%s3021_s0 + $0x64] ss:$36 sps:$4 sm:$0xff]   ;;  %v2371_v39 = vld [vmem:[%s3020_s1 + $0x230] sm:$0xff]  }
  0x26   :  { %2056 = vmatprep.subr.bf16.mxu0 %v2292_v42  ;;  %2119 = vmatpush3.bf16.msra.mxu1 %v2303_v50  ;;  %v2370_v42 = vld [vmem:[%s3021_s0 + $0x60] ss:$36 sps:$4 sm:$0xff]   ;;  %v2381_v50 = vld [vmem:[%s3021_s0 + $0xf4] ss:$36 sps:$4 sm:$0xff]  }
  0x27   :  { %2120 = vmatprep.subr.bf16.mxu1 %v2311_v55  ;;  %v2386_v55 = vld [vmem:[%s3021_s0 + $0x134] ss:$36 sps:$4 sm:$0xff]  }
  0x28   :  { %2057 = vmatpush3.bf16.msra.mxu0 %v2293_v43  ;;  %v2372_v43 = vld [vmem:[%s3021_s0 + $0xa4] ss:$36 sps:$4 sm:$0xff]  }
  0x29   :  { %2058 = vmatprep.subr.bf16.mxu0 %v2300_v46  ;;  %v2392_v46 = vld [vmem:[%s3020_s1 + $0x218] sm:$0xff]  }
  0x2a   :  { %2121 = vmatpush3.bf16.msra.mxu1 %v2313_v57  ;;  %v2413_v57 = vld [vmem:[%s3020_s1 + $0x200] sm:$0xff]  }
  0x2b   :  { %1089 = vmatmul.mubr.bf16.gmra.mxu0 %v2290_v40  ;;  %2122 = vmatprep.subr.bf16.mxu1 %v2321_v63  ;;  %v2378_v40 = vld [vmem:[%s3020_s1 + $0x228] sm:$0xff]   ;;  %v2398_v63 = vld [vmem:[%s3021_s0 + $0x180] ss:$36 sps:$4 sm:$0xff]  }
  0x2c   :  { %1186 = vmatmul.mubr.bf16.gmra.mxu1 %v2291_v41  ;;  %1096 = vmatprep.mubr.bf16.mxu0 %v2294_v44  ;;  %v2369_v41 = vld [vmem:[%s3021_s0 + $0x58] ss:$36 sps:$4 sm:$0xff]   ;;  %v2374_v44 = vld [vmem:[%s3021_s0 + $0xac] ss:$36 sps:$4 sm:$0xff]  }
  0x2d   :  { %1193 = vmatprep.mubr.bf16.mxu1 %v2296_v45  ;;  %2059 = vmatpush3.bf16.msra.mxu0 %v2302_v49  ;;  %v2385_v45 = vld [vmem:[%s3020_s1 + $0x220] sm:$0xff]   ;;  %v2379_v49 = vld [vmem:[%s3021_s0 + $0xec] ss:$36 sps:$4 sm:$0xff]  }
  0x2e   :  { %2060 = vmatprep.subr.bf16.mxu0 %v2310_v54  ;;  %2123 = vmatpush3.bf16.msra.mxu1 %v2323_v1  ;;  %v2384_v54 = vld [vmem:[%s3021_s0 + $0xf0] ss:$36 sps:$4 sm:$0xff]  }
  0x2f   :  { %2124 = vmatprep.subr.bf16.mxu1 %v2331_v7  ;;  %v2402_v1 = vld [vmem:[%s3021_s0 + $0x1cc] ss:$36 sps:$4 sm:$0xff]  }
  0x30   :  { %v2412_v7 = vld [vmem:[%s3021_s0 + $0x210] ss:$36 sps:$4 sm:$0xff]  }
  0x31   :  { %2061 = vmatpush3.bf16.msra.mxu0 %v2312_v56  ;;  %v2388_v56 = vld [vmem:[%s3021_s0 + $0x13c] ss:$36 sps:$4 sm:$0xff]  }
  0x32   :  { %2062 = vmatprep.subr.bf16.mxu0 %v2320_v62  ;;  %2125 = vmatpush3.bf16.msra.mxu1 %v2333_v9  ;;  %v2397_v62 = vld [vmem:[%s3021_s0 + $0x178] ss:$36 sps:$4 sm:$0xff]   ;;  %v2415_v9 = vld [vmem:[%s3021_s0 + $0x140] ss:$36 sps:$4 sm:$0xff]  }
  0x33   :  { %1097 = vmatmul.mubr.bf16.gmra.mxu0 %v2298_v48  ;;  %2126 = vmatprep.subr.bf16.mxu1 %v2341_v15  ;;  %v2377_v48 = vld [vmem:[%s3021_s0 + $0xa8] ss:$36 sps:$4 sm:$0xff]   ;;  %v2421_v15 = vld [vmem:[%s3021_s0 + $0x218] ss:$36 sps:$4 sm:$0xff]  }
  0x34   :  { %1194 = vmatmul.mubr.bf16.gmra.mxu1 %v2299_v51  ;;  %1104 = vmatprep.mubr.bf16.mxu0 %v2304_v52  ;;  %v2399_v51 = vld [vmem:[%s3020_s1 + $0x210] sm:$0xff]   ;;  %v2383_v52 = vld [vmem:[%s3021_s0 + $0xe8] ss:$36 sps:$4 sm:$0xff]  }
  0x35   :  { %1201 = vmatprep.mubr.bf16.mxu1 %v2306_v53  ;;  %2063 = vmatpush3.bf16.msra.mxu0 %v2322_v0  ;;  %v2406_v53 = vld [vmem:[%s3020_s1 + $0x208] sm:$0xff]  }
  0x36   :  { %2064 = vmatprep.subr.bf16.mxu0 %v2330_v6  ;;  %2127 = vmatpush3.bf16.msra.mxu1 %v2343_v17  ;;  %v2400_v0 = vld [vmem:[%s3021_s0 + $0x1c4] ss:$36 sps:$4 sm:$0xff]  }
  0x37   :  { %2128 = vmatprep.subr.bf16.mxu1 %v2344_v18  ;;  %v2411_v6 = vld [vmem:[%s3021_s0 + $0x208] ss:$36 sps:$4 sm:$0xff]   ;;  %v2882_v18 = vld [vmem:[%s3022_s2] ss:$0 sm:$0xff] }
  0x39   :  { %2065 = vmatpush3.bf16.msra.mxu0 %v2332_v8  ;;  %v2414_v8 = vld [vmem:[%s3021_s0 + $0x20] ss:$36 sps:$4 sm:$0xff]  }
  0x3a   :  { %2066 = vmatprep.subr.bf16.mxu0 %v2340_v13  ;;  %2129 = vmatpush3.bf16.msra.mxu1 %v2345_v19  ;;  %v2419_v13 = vld [vmem:[%s3021_s0 + $0x1d0] ss:$36 sps:$4 sm:$0xff]  }
  0x3b   :  { %1105 = vmatmul.mubr.bf16.gmra.mxu0 %v2308_v58  ;;  %2130 = vmatprep.subr.bf16.mxu1 %v2353_v25  ;;  %v2390_v58 = vld [vmem:[%s3021_s0 + $0x130] ss:$36 sps:$4 sm:$0xff]  }
  0x3c   :  { %1202 = vmatmul.mubr.bf16.gmra.mxu1 %v2309_v59  ;;  %1112 = vmatprep.mubr.bf16.mxu0 %v2314_v60  ;;  %v2391_v59 = vld [vmem:[%s3021_s0 + $0x138] ss:$36 sps:$4 sm:$0xff]  }
  0x3d   :  { %1209 = vmatprep.mubr.bf16.mxu1 %v2316_v61  ;;  %2067 = vmatpush3.bf16.msra.mxu0 %v2342_v16  ;;  %v2393_v60 = vld [vmem:[%s3021_s0 + $0x17c] ss:$36 sps:$4 sm:$0xff]   ;;  %v2395_v61 = vld [vmem:[%s3021_s0 + $0x184] ss:$36 sps:$4 sm:$0xff]  }
  0x3e   :  { %2068 = vmatprep.subr.bf16.mxu0 %v2352_v24  ;;  %2131 = vmatpush3.bf16.msra.mxu1 %v2355_v27 }
  0x3f   :  { %2132 = vmatprep.subr.bf16.mxu1 %v2356_v28 }
  0x41   :  { %2069 = vmatpush3.bf16.msra.mxu0 %v2354_v26 }
  0x42   :  { %2198 = vmatprep.subr.bf16.mxu0 %v2364_v32  ;;  %2133 = vmatpush3.bf16.msra.mxu1 %v2357_v31 }
  0x43   :  { %1113 = vmatmul.mubr.bf16.gmra.mxu0 %v2318_v2  ;;  %2230 = vmatprep.subr.bf16.mxu1 %v2364_v32  ;;  %v2404_v2 = vld [vmem:[%s3021_s0 + $0x1c0] ss:$36 sps:$4 sm:$0xff]  }
  0x44   :  { %1210 = vmatmul.mubr.bf16.gmra.mxu1 %v2319_v3  ;;  %1120 = vmatprep.mubr.bf16.mxu0 %v2324_v4  ;;  %v2405_v3 = vld [vmem:[%s3021_s0 + $0x1c8] ss:$36 sps:$4 sm:$0xff]  }
  0x45   :  { %1217 = vmatprep.mubr.bf16.mxu1 %v2326_v5  ;;  %v2407_v4 = vld [vmem:[%s3021_s0 + $0x20c] ss:$36 sps:$4 sm:$0xff]   ;;  %v2409_v5 = vld [vmem:[%s3021_s0 + $0x214] ss:$36 sps:$4 sm:$0xff]  }
  0x4b   :  { %1121 = vmatmul.mubr.bf16.gmra.mxu0 %v2328_v10  ;;  %v2416_v10 = vld [vmem:[%s3021_s0 + $0x68] ss:$36 sps:$4 sm:$0xff]  }
  0x4c   :  { %1218 = vmatmul.mubr.bf16.gmra.mxu1 %v2329_v11  ;;  %1128 = vmatprep.mubr.bf16.mxu0 %v2334_v12  ;;  %v2417_v11 = vld [vmem:[%s3021_s0 + $0x188] ss:$36 sps:$4 sm:$0xff]   ;;  %v2418_v12 = vld [vmem:[%s3021_s0 + $0xb0] ss:$36 sps:$4 sm:$0xff]  }
  0x4d   :  { %1225 = vmatprep.mubr.bf16.mxu1 %v2336_v14  ;;  %v2420_v14 = vld [vmem:[%s3021_s0 + $0xf8] ss:$36 sps:$4 sm:$0xff]  }
  0x53   :  { %1129 = vmatmul.mubr.bf16.gmra.mxu0 %v2338_v20 }
  0x54   :  { %1226 = vmatmul.mubr.bf16.gmra.mxu1 %v2339_v21  ;;  %1136 = vmatprep.mubr.bf16.mxu0 %v2346_v22 }
  0x55   :  { %1233 = vmatprep.mubr.bf16.mxu1 %v2348_v23 }
  0x5b   :  { %1137 = vmatmul.mubr.bf16.gmra.mxu0 %v2350_v29 }
  0x5c   :  { %1234 = vmatmul.mubr.bf16.gmra.mxu1 %v2351_v30  ;;  %1274 = vmatprep.mubr.bf16.mxu0 %v2360_v33 }
  0x5d   :  { %1371 = vmatprep.mubr.bf16.mxu1 %v2363_v34 }
  0x63   :  { %1275 = vmatmul.mubr.bf16.vlgmr.msra.gmra.mxu0 %v2358_v35 }
  0x64   :  { %1372 = vmatmul.mubr.bf16.vlgmr.msra.gmra.mxu1 %v2361_v36  ;;  %2199 = vmatpush3.bf16.msra.mxu0 %v2364_v32 }
  0x65   :  { %1282 = vmatprep.mubr.bf16.mxu0 %v2365_v37  ;;  %1379 = vmatprep.mubr.bf16.mxu1 %v2367_v38 }
  0x66   :  { %2200 = vmatprep.subr.bf16.mxu0 %v2371_v39  ;;  %2238 = vmatpush3.bf16.msra.mxu1 %v2364_v32 }
  0x67   :  { %2231 = vmatprep.subr.bf16.mxu1 %v2371_v39 }
  0x68   :  { %2201 = vmatpush3.bf16.msra.mxu0 %v2371_v39 }
  0x69   :  { %2202 = vmatprep.subr.bf16.mxu0 %v2378_v40 }
  0x6a   :  { %2239 = vmatpush3.bf16.msra.mxu1 %v2371_v39 }
  0x6b   :  { %1283 = vmatmul.mubr.bf16.gmra.mxu0 %v2369_v41  ;;  %2232 = vmatprep.subr.bf16.mxu1 %v2378_v40 }
  0x6c   :  { %1380 = vmatmul.mubr.bf16.gmra.mxu1 %v2370_v42  ;;  %1290 = vmatprep.mubr.bf16.mxu0 %v2372_v43 }
  0x6d   :  { %1387 = vmatprep.mubr.bf16.mxu1 %v2374_v44  ;;  %2203 = vmatpush3.bf16.msra.mxu0 %v2378_v40 }
  0x6e   :  { %2204 = vmatprep.subr.bf16.mxu0 %v2385_v45  ;;  %2240 = vmatpush3.bf16.msra.mxu1 %v2378_v40 }
  0x6f   :  { %2233 = vmatprep.subr.bf16.mxu1 %v2385_v45 }
  0x71   :  { %2205 = vmatpush3.bf16.msra.mxu0 %v2385_v45 }
  0x72   :  { %2206 = vmatprep.subr.bf16.mxu0 %v2392_v46  ;;  %2241 = vmatpush3.bf16.msra.mxu1 %v2385_v45 }
  0x73   :  { %1291 = vmatmul.mubr.bf16.gmra.mxu0 %v2376_v47  ;;  %2234 = vmatprep.subr.bf16.mxu1 %v2392_v46 }
  0x74   :  { %1388 = vmatmul.mubr.bf16.gmra.mxu1 %v2377_v48  ;;  %1298 = vmatprep.mubr.bf16.mxu0 %v2379_v49 }
  0x75   :  { %1395 = vmatprep.mubr.bf16.mxu1 %v2381_v50  ;;  %2207 = vmatpush3.bf16.msra.mxu0 %v2392_v46 }
  0x76   :  { %2208 = vmatprep.subr.bf16.mxu0 %v2399_v51  ;;  %2242 = vmatpush3.bf16.msra.mxu1 %v2392_v46 }
  0x77   :  { %2235 = vmatprep.subr.bf16.mxu1 %v2399_v51 }
  0x79   :  { %2209 = vmatpush3.bf16.msra.mxu0 %v2399_v51 }
  0x7a   :  { %2210 = vmatprep.subr.bf16.mxu0 %v2406_v53  ;;  %2243 = vmatpush3.bf16.msra.mxu1 %v2399_v51 }
  0x7b   :  { %1299 = vmatmul.mubr.bf16.gmra.mxu0 %v2383_v52  ;;  %2236 = vmatprep.subr.bf16.mxu1 %v2406_v53 }
  0x7c   :  { %1396 = vmatmul.mubr.bf16.gmra.mxu1 %v2384_v54  ;;  %1306 = vmatprep.mubr.bf16.mxu0 %v2386_v55 }
  0x7d   :  { %1403 = vmatprep.mubr.bf16.mxu1 %v2388_v56  ;;  %2211 = vmatpush3.bf16.msra.mxu0 %v2406_v53 }
  0x7e   :  { %2212 = vmatprep.subr.bf16.mxu0 %v2413_v57  ;;  %2244 = vmatpush3.bf16.msra.mxu1 %v2406_v53 }
  0x7f   :  { %2237 = vmatprep.subr.bf16.mxu1 %v2413_v57 }
  0x81   :  { %2213 = vmatpush3.bf16.msra.mxu0 %v2413_v57 }
  0x82   :  { %2245 = vmatpush3.bf16.msra.mxu1 %v2413_v57 }
  0x83   :  { %1307 = vmatmul.mubr.bf16.gmra.mxu0 %v2390_v58 }
  0x84   :  { %1404 = vmatmul.mubr.bf16.gmra.mxu1 %v2391_v59  ;;  %1314 = vmatprep.mubr.bf16.mxu0 %v2393_v60 }
  0x85   :  { %1411 = vmatprep.mubr.bf16.mxu1 %v2395_v61 }
  0x8b   :  { %1315 = vmatmul.mubr.bf16.gmra.mxu0 %v2397_v62 }
  0x8c   :  { %1412 = vmatmul.mubr.bf16.gmra.mxu1 %v2398_v63  ;;  %1322 = vmatprep.mubr.bf16.mxu0 %v2400_v0 }
  0x8d   :  { %1419 = vmatprep.mubr.bf16.mxu1 %v2402_v1 }
  0x93   :  { %1323 = vmatmul.mubr.bf16.gmra.mxu0 %v2404_v2 }
  0x94   :  { %1420 = vmatmul.mubr.bf16.gmra.mxu1 %v2405_v3  ;;  %1330 = vmatprep.mubr.bf16.mxu0 %v2407_v4 }
  0x95   :  { %1427 = vmatprep.mubr.bf16.mxu1 %v2409_v5 }
  0x9b   :  { %1331 = vmatmul.mubr.bf16.gmra.mxu0 %v2411_v6 }
  0x9c   :  { %1428 = vmatmul.mubr.bf16.gmra.mxu1 %v2412_v7  ;;  %2214 = vmatprep.mubr.bf16.mxu0 %v2414_v8 }
  0x9d   :  { %2222 = vmatprep.mubr.bf16.mxu1 %v2415_v9 }
  0xa3   :  { %2215 = vmatmul.mubr.bf16.vlgmr.msra.gmra.mxu0 %v2416_v10 }
  0xa4   :  { %2223 = vmatmul.mubr.bf16.vlgmr.msra.gmra.mxu1 %v2417_v11  ;;  %2218 = vmatprep.mubr.bf16.mxu0 %v2418_v12 }
  0xa5   :  { %2226 = vmatprep.mubr.bf16.mxu1 %v2419_v13 }
  0xab   :  { %2219 = vmatmul.mubr.bf16.gmra.mxu0 %v2420_v14 }
  0xac   :  { %2227 = vmatmul.mubr.bf16.gmra.mxu1 %v2421_v15 }
  0xe3   :  { %v1942_v16 = vpop.f32.mrf.mxu0 }
  0xe4   :  { %v2006_v17 = vpop.f32.mrf.mxu1 }
  0xe5   :  { %v1943_v19 = vpop.f32.mrf.mxu0 }
  0xe6   :  { %v1944_v20 = vadd.f32 %v1943_v19, %v1942_v16  ;;  %v2007_v21 = vpop.f32.mrf.mxu1 }
  0xe7   :  { %v2008_v22 = vadd.f32 %v2007_v21, %v2006_v17  ;;  %v1945_v23 = vpop.f32.mrf.mxu0 }
  0xe8   :  { %v1083_v24 = vadd.f32 %v1944_v20, %v2882_v18  ;;  %v2009_v25 = vpop.f32.mrf.mxu1 }
  0xe9   :  { %v1946_v26 = vpop.f32.mrf.mxu0 }
  0xea   :  { %v2885_v27 = vadd.f32 %v2008_v22, %v1083_v24  ;;  %v1947_v28 = vadd.f32 %v1946_v26, %v1945_v23  ;;  %v2010_v29 = vpop.f32.mrf.mxu1 }
  0xeb   :  { %v2011_v30 = vadd.f32 %v2010_v29, %v2009_v25  ;;  %v1948_v31 = vpop.f32.mrf.mxu0 }
  0xec   :  { %v1086_v32 = vadd.f32 %v1947_v28, %v2882_v18  ;;  %v2012_v33 = vpop.f32.mrf.mxu1 }
  0xed   :  { %v1949_v34 = vpop.f32.mrf.mxu0 }
  0xee   :  { %v2888_v35 = vadd.f32 %v2011_v30, %v1086_v32  ;;  %v1950_v36 = vadd.f32 %v1949_v34, %v1948_v31  ;;  %v2013_v37 = vpop.f32.mrf.mxu1 }
  0xef   :  { %v2014_v38 = vadd.f32 %v2013_v37, %v2012_v33  ;;  %v1951_v39 = vpop.f32.mrf.mxu0 }
  0xf0   :  { %v1091_v40 = vadd.f32 %v1950_v36, %v2882_v18  ;;  %v2015_v41 = vpop.f32.mrf.mxu1 }
  0xf1   :  { %v1952_v42 = vpop.f32.mrf.mxu0 }
  0xf2   :  { %v2891_v43 = vadd.f32 %v2014_v38, %v1091_v40  ;;  %v1953_v44 = vadd.f32 %v1952_v42, %v1951_v39  ;;  %v2016_v45 = vpop.f32.mrf.mxu1 }
  0xf3   :  { %v2017_v46 = vadd.f32 %v2016_v45, %v2015_v41  ;;  %v1954_v47 = vpop.f32.mrf.mxu0 }
  0xf4   :  { %v1094_v48 = vadd.f32 %v1953_v44, %v2882_v18  ;;  %v2018_v49 = vpop.f32.mrf.mxu1 }
  0xf5   :  { %v1955_v50 = vpop.f32.mrf.mxu0 }
  0xf6   :  { %v2894_v51 = vadd.f32 %v2017_v46, %v1094_v48  ;;  %v1956_v52 = vadd.f32 %v1955_v50, %v1954_v47  ;;  %v2019_v53 = vpop.f32.mrf.mxu1 }
  0xf7   :  { %v2020_v54 = vadd.f32 %v2019_v53, %v2018_v49  ;;  %v1957_v55 = vpop.f32.mrf.mxu0 }
  0xf8   :  { %3025 = vst [vmem:[#allocation2_spill] sm:$0xff] %v2894_v51  ;;  %v1099_v56 = vadd.f32 %v1956_v52, %v2882_v18  ;;  %v2021_v57 = vpop.f32.mrf.mxu1 }
  0xf9   :  { %v1958_v58 = vpop.f32.mrf.mxu0 }
  0xfa   :  { %v2897_v59 = vadd.f32 %v2020_v54, %v1099_v56  ;;  %v1959_v60 = vadd.f32 %v1958_v58, %v1957_v55  ;;  %v2022_v61 = vpop.f32.mrf.mxu1 }
  0xfb   :  { %v2023_v62 = vadd.f32 %v2022_v61, %v2021_v57  ;;  %v1960_v63 = vpop.f32.mrf.mxu0 }
  0xfc   :  { %3026 = vst [vmem:[#allocation3_spill] sm:$0xff] %v2897_v59  ;;  %v1102_v0 = vadd.f32 %v1959_v60, %v2882_v18  ;;  %v2024_v1 = vpop.f32.mrf.mxu1 }
  0xfd   :  { %v1961_v2 = vpop.f32.mrf.mxu0 }
  0xfe   :  { %v2900_v3 = vadd.f32 %v2023_v62, %v1102_v0  ;;  %v1962_v4 = vadd.f32 %v1961_v2, %v1960_v63  ;;  %v2025_v5 = vpop.f32.mrf.mxu1 }
  0xff   :  { %v2026_v6 = vadd.f32 %v2025_v5, %v2024_v1  ;;  %v1963_v7 = vpop.f32.mrf.mxu0 }
 0x100   :  { %3027 = vst [vmem:[#allocation4_spill] sm:$0xff] %v2900_v3  ;;  %v1107_v8 = vadd.f32 %v1962_v4, %v2882_v18  ;;  %v2027_v9 = vpop.f32.mrf.mxu1 }
 0x101   :  { %v1964_v10 = vpop.f32.mrf.mxu0 }
 0x102   :  { %v2903_v11 = vadd.f32 %v2026_v6, %v1107_v8  ;;  %v1965_v12 = vadd.f32 %v1964_v10, %v1963_v7  ;;  %v2028_v13 = vpop.f32.mrf.mxu1 }
 0x103   :  { %v2029_v14 = vadd.f32 %v2028_v13, %v2027_v9  ;;  %v1966_v15 = vpop.f32.mrf.mxu0 }
 0x104   :  { %3028 = vst [vmem:[#allocation5_spill] sm:$0xff] %v2903_v11  ;;  %v1110_v16 = vadd.f32 %v1965_v12, %v2882_v18  ;;  %v2030_v17 = vpop.f32.mrf.mxu1 }
 0x105   :  { %v1967_v19 = vpop.f32.mrf.mxu0 }
 0x106   :  { %v2906_v20 = vadd.f32 %v2029_v14, %v1110_v16  ;;  %v1968_v21 = vadd.f32 %v1967_v19, %v1966_v15  ;;  %v2031_v22 = vpop.f32.mrf.mxu1 }
 0x107   :  { %v2032_v23 = vadd.f32 %v2031_v22, %v2030_v17  ;;  %v1969_v24 = vpop.f32.mrf.mxu0 }
 0x108   :  { %3029 = vst [vmem:[#allocation6_spill] sm:$0xff] %v2906_v20  ;;  %v1115_v25 = vadd.f32 %v1968_v21, %v2882_v18  ;;  %v2033_v26 = vpop.f32.mrf.mxu1 }
 0x109   :  { %v1970_v28 = vpop.f32.mrf.mxu0 }
 0x10a   :  { %v2909_v29 = vadd.f32 %v2032_v23, %v1115_v25  ;;  %v1971_v30 = vadd.f32 %v1970_v28, %v1969_v24  ;;  %v2034_v31 = vpop.f32.mrf.mxu1 }
 0x10b   :  { %v2035_v32 = vadd.f32 %v2034_v31, %v2033_v26  ;;  %v1972_v33 = vpop.f32.mrf.mxu0 }
 0x10c   :  { %3030 = vst [vmem:[#allocation7_spill] sm:$0xff] %v2909_v29  ;;  %v1118_v34 = vadd.f32 %v1971_v30, %v2882_v18  ;;  %v2036_v36 = vpop.f32.mrf.mxu1 }
 0x10d   :  { %v1973_v37 = vpop.f32.mrf.mxu0 }
 0x10e   :  { %v2912_v38 = vadd.f32 %v2035_v32, %v1118_v34  ;;  %v1974_v39 = vadd.f32 %v1973_v37, %v1972_v33  ;;  %v2037_v40 = vpop.f32.mrf.mxu1 }
 0x10f   :  { %v2038_v41 = vadd.f32 %v2037_v40, %v2036_v36  ;;  %v1975_v42 = vpop.f32.mrf.mxu0 }
 0x110   :  { %3031 = vst [vmem:[#allocation8_spill] sm:$0xff] %v2912_v38  ;;  %v1123_v44 = vadd.f32 %v1974_v39, %v2882_v18  ;;  %v2039_v45 = vpop.f32.mrf.mxu1 }
 0x111   :  { %v1976_v46 = vpop.f32.mrf.mxu0 }
 0x112   :  { %v2915_v47 = vadd.f32 %v2038_v41, %v1123_v44  ;;  %v1977_v48 = vadd.f32 %v1976_v46, %v1975_v42  ;;  %v2040_v49 = vpop.f32.mrf.mxu1 }
 0x113   :  { %v2041_v50 = vadd.f32 %v2040_v49, %v2039_v45  ;;  %v1978_v52 = vpop.f32.mrf.mxu0 }
 0x114   :  { %3032 = vst [vmem:[#allocation9_spill] sm:$0xff] %v2915_v47  ;;  %v1126_v53 = vadd.f32 %v1977_v48, %v2882_v18  ;;  %v2042_v54 = vpop.f32.mrf.mxu1 }
 0x115   :  { %v1979_v55 = vpop.f32.mrf.mxu0 }
 0x116   :  { %v2918_v56 = vadd.f32 %v2041_v50, %v1126_v53  ;;  %v1980_v57 = vadd.f32 %v1979_v55, %v1978_v52  ;;  %v2043_v58 = vpop.f32.mrf.mxu1 }
 0x117   :  { %v2044_v60 = vadd.f32 %v2043_v58, %v2042_v54  ;;  %v1981_v61 = vpop.f32.mrf.mxu0 }
 0x118   :  { %3033 = vst [vmem:[#allocation10_spill] sm:$0xff] %v2918_v56  ;;  %v1131_v62 = vadd.f32 %v1980_v57, %v2882_v18  ;;  %v2045_v63 = vpop.f32.mrf.mxu1 }
 0x119   :  { %v1982_v0 = vpop.f32.mrf.mxu0 }
 0x11a   :  { %v2921_v1 = vadd.f32 %v2044_v60, %v1131_v62  ;;  %v1983_v2 = vadd.f32 %v1982_v0, %v1981_v61  ;;  %v2046_v4 = vpop.f32.mrf.mxu1 }
 0x11b   :  { %v2047_v5 = vadd.f32 %v2046_v4, %v2045_v63  ;;  %v1984_v6 = vpop.f32.mrf.mxu0 }
 0x11c   :  { %3034 = vst [vmem:[#allocation11_spill] sm:$0xff] %v2921_v1  ;;  %v1134_v7 = vadd.f32 %v1983_v2, %v2882_v18  ;;  %v2048_v8 = vpop.f32.mrf.mxu1 }
 0x11d   :  { %v1985_v9 = vpop.f32.mrf.mxu0 }
 0x11e   :  { %v2924_v10 = vadd.f32 %v2047_v5, %v1134_v7  ;;  %v1986_v12 = vadd.f32 %v1985_v9, %v1984_v6  ;;  %v2049_v13 = vpop.f32.mrf.mxu1 }
 0x11f   :  { %v2050_v14 = vadd.f32 %v2049_v13, %v2048_v8  ;;  %v1987_v15 = vpop.f32.mrf.mxu0 }
 0x120   :  { %3035 = vst [vmem:[#allocation12_spill] sm:$0xff] %v2924_v10  ;;  %v1139_v16 = vadd.f32 %v1986_v12, %v2882_v18  ;;  %v2051_v17 = vpop.f32.mrf.mxu1 }
 0x121   :  { %v1988_v19 = vpop.f32.mrf.mxu0 }
 0x122   :  { %v2927_v21 = vadd.f32 %v2050_v14, %v1139_v16  ;;  %v1989_v22 = vadd.f32 %v1988_v19, %v1987_v15  ;;  %v2052_v23 = vpop.f32.mrf.mxu1 }
 0x123   :  { %v2053_v24 = vadd.f32 %v2052_v23, %v2051_v17  ;;  %v2070_v25 = vpop.f32.mrf.mxu0 }
 0x124   :  { %3036 = vst [vmem:[#allocation13_spill] sm:$0xff] %v2927_v21  ;;  %v1142_v26 = vadd.f32 %v1989_v22, %v2882_v18  ;;  %v2134_v28 = vpop.f32.mrf.mxu1 }
 0x125   :  { %v2071_v30 = vpop.f32.mrf.mxu0 }
 0x126   :  { %v2930_v31 = vadd.f32 %v2053_v24, %v1142_v26  ;;  %v2072_v32 = vadd.f32 %v2071_v30, %v2070_v25  ;;  %v2135_v33 = vpop.f32.mrf.mxu1 }
 0x127   :  { %v2136_v34 = vadd.f32 %v2135_v33, %v2134_v28  ;;  %v2073_v36 = vpop.f32.mrf.mxu0 }
 0x128   :  { %3037 = vst [vmem:[#allocation14_spill] sm:$0xff] %v2930_v31  ;;  %v1277_v37 = vadd.f32 %v2072_v32, %v2885_v27  ;;  %v2137_v39 = vpop.f32.mrf.mxu1 }
 0x129   :  { %v2074_v40 = vpop.f32.mrf.mxu0 }
 0x12a   :  { %v2138_v41 = vpop.f32.mrf.mxu1  ;;  %v2933_v42 = vadd.f32 %v2136_v34, %v1277_v37  ;;  %v2075_v34 = vadd.f32 %v2074_v40, %v2073_v36 }
 0x12b   :  { %v2076_v44 = vpop.f32.mrf.mxu0  ;;  %v2139_v56 = vadd.f32 %v2138_v41, %v2137_v39 }
 0x12c   :  { %3038 = vst [vmem:[#allocation15_spill] sm:$0xff] %v2933_v42  ;;  %v2140_v45 = vpop.f32.mrf.mxu1  ;;  %v1280_v1 = vadd.f32 %v2075_v34, %v2888_v35  ;;  %v3041_v35 = vld [vmem:[#allocation2_spill] sm:$0xff] }
 0x12d   :  { %v2077_v46 = vpop.f32.mrf.mxu0 }
 0x12e   :  { %v2141_v48 = vpop.f32.mrf.mxu1  ;;  %v2078_v37 = vadd.f32 %v2077_v46, %v2076_v44  ;;  %v2943_v34 = vadd.f32 %v2139_v56, %v1280_v1  ;;  %v3046_v1 = vld [vmem:[#allocation6_spill] sm:$0xff] }
 0x12f   :  { %v2079_v18 = vpop.f32.mrf.mxu0  ;;  %v2142_v29 = vadd.f32 %v2141_v48, %v2140_v45 }
 0x130   :  { %v2143_v49 = vpop.f32.mrf.mxu1  ;;  %v1285_v38 = vadd.f32 %v2078_v37, %v2891_v43 }
 0x131   :  { %v2080_v50 = vpop.f32.mrf.mxu0 }
 0x132   :  { %v2144_v52 = vpop.f32.mrf.mxu1  ;;  %v2081_v20 = vadd.f32 %v2080_v50, %v2079_v18  ;;  %v3042_v18 = vld [vmem:[#allocation3_spill] sm:$0xff] }
 0x133   :  { %v2082_v53 = vpop.f32.mrf.mxu0  ;;  %v2145_v41 = vadd.f32 %v2144_v52, %v2143_v49  ;;  %v3047_v52 = vld [vmem:[#allocation9_spill] sm:$0xff] }
 0x134   :  { %v2146_v54 = vpop.f32.mrf.mxu1  ;;  %v1288_v39 = vadd.f32 %v2081_v20, %v3041_v35 }
 0x135   :  { %v2083_v55 = vpop.f32.mrf.mxu0 }
 0x136   :  { %v2147_v57 = vpop.f32.mrf.mxu1 }
 0x137   :  { %v2085_v58 = vpop.f32.mrf.mxu0  ;;  %v2148_v37 = vadd.f32 %v2147_v57, %v2146_v54 }
 0x138   :  { %v2935_v60 = vpop.f32.mrf.mxu1 }
 0x139   :  { %3039 = vst [vmem:[#allocation16_spill] sm:$0xff] %v2935_v60  ;;  %v2086_v27 = vpop.f32.mrf.mxu0  ;;  %v2084_v60 = vadd.f32 %v2083_v55, %v2082_v53 }
 0x13a   :  { %v2150_v61 = vpop.f32.mrf.mxu1  ;;  %v2087_v59 = vadd.f32 %v2086_v27, %v2085_v58  ;;  %v3043_v27 = vld [vmem:[#allocation4_spill] sm:$0xff] }
 0x13b   :  { %v2088_v62 = vpop.f32.mrf.mxu0  ;;  %v1293_v50 = vadd.f32 %v2084_v60, %v3042_v18  ;;  %v3048_v60 = vld [vmem:[#allocation7_spill] sm:$0xff] }
 0x13c   :  { %v2152_v63 = vpop.f32.mrf.mxu1 }
 0x13d   :  { %v2089_v0 = vpop.f32.mrf.mxu0 }
 0x13e   :  { %v2153_v2 = vpop.f32.mrf.mxu1  ;;  %v2090_v36 = vadd.f32 %v2089_v0, %v2088_v62  ;;  %v1296_v62 = vadd.f32 %v2087_v59, %v3043_v27 }
 0x13f   :  { %v2091_v4 = vpop.f32.mrf.mxu0 }
 0x140   :  { %v2155_v5 = vpop.f32.mrf.mxu1  ;;  %v3044_v0 = vld [vmem:[#allocation16_spill] sm:$0xff] }
 0x141   :  { %v2092_v6 = vpop.f32.mrf.mxu0 }
 0x142   :  { %v2156_v7 = vpop.f32.mrf.mxu1  ;;  %v2093_v44 = vadd.f32 %v2092_v6, %v2091_v4  ;;  %v2151_v4 = vadd.f32 %v2150_v61, %v3044_v0  ;;  %v3045_v6 = vld [vmem:[#allocation5_spill] sm:$0xff] }
 0x143   :  { %v2094_v8 = vpop.f32.mrf.mxu0  ;;  %v2157_v49 = vadd.f32 %v2156_v7, %v2155_v5  ;;  %v1385_v7 = vadd.f32 %v2145_v41, %v1288_v39  ;;  %v3053_v41 = vld [vmem:[#allocation13_spill] sm:$0xff] }
 0x144   :  { %v2158_v9 = vpop.f32.mrf.mxu1  ;;  %v1304_v20 = vadd.f32 %v2093_v44, %v3046_v1  ;;  %v1390_v44 = vadd.f32 %v2148_v37, %v1293_v50 }
 0x145   :  { %v2095_v12 = vpop.f32.mrf.mxu0 }
 0x146   :  { %v2159_v13 = vpop.f32.mrf.mxu1  ;;  %v2096_v43 = vadd.f32 %v2095_v12, %v2094_v8  ;;  %v2958_v35 = vadd.f32 %v2157_v49, %v1304_v20  ;;  %v3056_v20 = vld [vmem:[#allocation14_spill] sm:$0xff] }
 0x147   :  { %v2097_v14 = vpop.f32.mrf.mxu0  ;;  %v2160_v57 = vadd.f32 %v2159_v13, %v2158_v9 }
 0x148   :  { %v2161_v15 = vpop.f32.mrf.mxu1  ;;  %v1309_v54 = vadd.f32 %v2096_v43, %v3048_v60 }
 0x149   :  { %v2098_v16 = vpop.f32.mrf.mxu0 }
 0x14a   :  { %v2162_v17 = vpop.f32.mrf.mxu1  ;;  %v2099_v45 = vadd.f32 %v2098_v16, %v2097_v14 }
 0x14b   :  { %v2100_v19 = vpop.f32.mrf.mxu0 }
 0x14c   :  { %v2164_v22 = vpop.f32.mrf.mxu1 }
 0x14d   :  { %v2101_v23 = vpop.f32.mrf.mxu0 }
 0x14e   :  { %v2165_v24 = vpop.f32.mrf.mxu1  ;;  %v2102_v46 = vadd.f32 %v2101_v23, %v2100_v19  ;;  %v2163_v19 = vadd.f32 %v2162_v17, %v2161_v15  ;;  %v3050_v23 = vld [vmem:[#allocation10_spill] sm:$0xff]  ;;  %v3052_v17 = vld [vmem:[#allocation15_spill] sm:$0xff] }
 0x14f   :  { %v2103_v25 = vpop.f32.mrf.mxu0  ;;  %v2166_v12 = vadd.f32 %v2165_v24, %v2164_v22  ;;  %v2956_v22 = vadd.f32 %v2151_v4, %v1296_v62 }
 0x150   :  { %v2167_v26 = vpop.f32.mrf.mxu1  ;;  %v1317_v8 = vadd.f32 %v2102_v46, %v3047_v52 }
 0x151   :  { %v2104_v28 = vpop.f32.mrf.mxu0 }
 0x152   :  { %v2168_v30 = vpop.f32.mrf.mxu1  ;;  %v2105_v53 = vadd.f32 %v2104_v28, %v2103_v25  ;;  %v3051_v28 = vld [vmem:[#allocation11_spill] sm:$0xff]  ;;  %v1414_v46 = vadd.f32 %v2166_v12, %v1317_v8 }
 0x153   :  { %v2106_v32 = vpop.f32.mrf.mxu0  ;;  %v2169_v25 = vadd.f32 %v2168_v30, %v2167_v26  ;;  %v1406_v26 = vadd.f32 %v2160_v57, %v1309_v54 }
 0x154   :  { %v2170_v33 = vpop.f32.mrf.mxu1  ;;  %v1320_v61 = vadd.f32 %v2105_v53, %v3050_v23  ;;  %v3054_v53 = vld [vmem:[#allocation12_spill] sm:$0xff] }
 0x155   :  { %v2107_v31 = vpop.f32.mrf.mxu0 }
 0x156   :  { %v2171_v10 = vpop.f32.mrf.mxu1  ;;  %v2108_v55 = vadd.f32 %v2107_v31, %v2106_v32  ;;  %v3049_v31 = vld [vmem:[#allocation8_spill] sm:$0xff] }
 0x157   :  { %v2109_v21 = vpop.f32.mrf.mxu0  ;;  %v1312_v16 = vadd.f32 %v2099_v45, %v3049_v31 }
 0x158   :  { %v2937_v42 = vpop.f32.mrf.mxu1 }
 0x159   :  { %3040 = vst [vmem:[#allocation17_spill] sm:$0xff] %v2937_v42  ;;  %v2110_v47 = vpop.f32.mrf.mxu0  ;;  %v1382_v42 = vadd.f32 %v2142_v29, %v1285_v38  ;;  %v1301_v29 = vadd.f32 %v2090_v36, %v3045_v6  ;;  %v2154_v38 = vadd.f32 %v2153_v2, %v2152_v63  ;;  %v1325_v63 = vadd.f32 %v2108_v55, %v3051_v28 }
 0x15a   :  { %v2941_v11 = vpop.f32.mrf.mxu1  ;;  %v2172_v2 = vadd.f32 %v2171_v10, %v2170_v33  ;;  %v2111_v24 = vadd.f32 %v2110_v47, %v2109_v21  ;;  %v1409_v45 = vadd.f32 %v2163_v19, %v1312_v16 }
 0x15b   :  { %v2112_v3 = vpop.f32.mrf.mxu0  ;;  %v1398_v13 = vadd.f32 %v2154_v38, %v1301_v29 }
 0x15c   :  { %v2176_v40 = vpop.f32.mrf.mxu1  ;;  %v1422_v39 = vadd.f32 %v2172_v2, %v1325_v63  ;;  %v1328_v55 = vadd.f32 %v2111_v24, %v3054_v53 }
 0x15d   :  { %v2113_v51 = vpop.f32.mrf.mxu0 }
 0x15e   :  { %v2177_v48 = vpop.f32.mrf.mxu1  ;;  %v2114_v36 = vadd.f32 %v2113_v51, %v2112_v3  ;;  %v1417_v3 = vadd.f32 %v2169_v25, %v1320_v61 }
 0x15f   :  { %v2115_v58 = vpop.f32.mrf.mxu0  ;;  %v2178_v50 = vadd.f32 %v2177_v48, %v2176_v40 }
 0x160   :  { %v2179_v56 = vpop.f32.mrf.mxu1  ;;  %v1333_v18 = vadd.f32 %v2114_v36, %v3053_v41  ;;  %v3055_v27 = vld [vmem:[#allocation17_spill] sm:$0xff] }
 0x161   :  { %v2116_v14 = vpop.f32.mrf.mxu0 }
 0x162   :  { %v2180_v59 = vpop.f32.mrf.mxu1  ;;  %v2117_v10 = vadd.f32 %v2116_v14, %v2115_v58  ;;  %v1430_v60 = vadd.f32 %v2178_v50, %v1333_v18 }
 0x163   :  { %v2216_v32 = vpop.f32.mrf.mxu0  ;;  %v2181_v6 = vadd.f32 %v2180_v59, %v2179_v56 }
 0x164   :  { %v2224_v5 = vpop.f32.mrf.mxu1  ;;  %v1479_v15 = vadd.f32 %v2216_v32, %v1382_v42  ;;  %v2175_v42 = vadd.f32 %v2941_v11, %v3055_v27  ;;  %v1336_v49 = vadd.f32 %v2117_v10, %v3056_v20 }
 0x165   :  { %v1470_v9 = vpop.f32.mrf.mxu0  ;;  %v1511_v33 = vadd.f32 %v2224_v5, %v1414_v46 }
 0x166   :  { %v1471_v43 = vadd.f32 %v1470_v9, %v3052_v17  ;;  %v1502_v30 = vpop.f32.mrf.mxu1  ;;  %v1535_v58 = vmax.f32 %v1479_v15, 0.0  ;;  %v1433_v32 = vadd.f32 %v2181_v6, %v1336_v49  ;;  %v1425_v36 = vadd.f32 %v2175_v42, %v1328_v55 }
 0x167   :  { %v2217_v51 = vpop.f32.mrf.mxu0  ;;  %v1503_v47 = vadd.f32 %v1502_v30, %v1406_v26  ;;  %v2967_v40 = vmax.f32 %v1511_v33, 0.0 }
 0x168   :  { %v1482_v21 = vadd.f32 %v2217_v51, %v1385_v7  ;;  %v2225_v37 = vpop.f32.mrf.mxu1  ;;  %v1533_v62 = vmax.f32 %v1471_v43, 0.0  ;;  %v1652_v5 = vmul.f32 %v1535_v58, %v1535_v58 }
 0x169   :  { %v1514_v0 = vadd.f32 %v2225_v37, %v1417_v3  ;;  %v1473_v4 = vpop.f32.mrf.mxu0  ;;  %v2971_v12 = vmax.f32 %v1503_v47, 0.0 }
 0x16a   :  { %v1536_v29 = vmax.f32 %v1482_v21, 0.0  ;;  %v1474_v38 = vadd.f32 %v1473_v4, %v2943_v34  ;;  %v1505_v1 = vpop.f32.mrf.mxu1  ;;  %v1650_v56 = vmul.f32 %v1533_v62, %v1533_v62 }
 0x16b   :  { %v2969_v48 = vmax.f32 %v1514_v0, 0.0  ;;  %v1506_v52 = vadd.f32 %v1505_v1, %v1409_v45  ;;  %v2220_v8 = vpop.f32.mrf.mxu0  ;;  %v1658_v20 = vmul.f32 %v2971_v12, %v2971_v12 }
 0x16c   :  { %v1887_v11 = vpack.c.bf16 %v1536_v29, %v1535_v58  ;;  %v1534_v14 = vmax.f32 %v1474_v38, 0.0  ;;  %v2228_v54 = vpop.f32.mrf.mxu1  ;;  %v1495_v31 = vadd.f32 %v2220_v8, %v1398_v13  ;;  %v1653_v7 = vmul.f32 %v1536_v29, %v1536_v29 }
 0x16d   :  { %v1907_v57 = vpack.c.bf16 %v2969_v48, %v2967_v40  ;;  %v2975_v34 = vmax.f32 %v1506_v52, 0.0  ;;  %v1486_v16 = vpop.f32.mrf.mxu0  ;;  %v1527_v61 = vadd.f32 %v2228_v54, %v1430_v60  ;;  %v1660_v60 = vmul.f32 %v2967_v40, %v2967_v40 }
 0x16e   :  { %1919 = vst [vmem:[%s3023_s3 + $0x8] sm:$0xff] %v1887_v11   ;;  %v1882_v19 = vpack.c.bf16 %v1534_v14, %v1533_v62  ;;  %v1629_v59 = vadd.f32 %v1534_v14, %v1533_v62  ;;  %v1651_v23 = vmul.f32 %v1534_v14, %v1534_v14  ;;  %v1518_v25 = vpop.f32.mrf.mxu1  ;;  %v1487_v63 = vadd.f32 %v1486_v16, %v1390_v44 }
 0x16f   :  { %1923 = vst [vmem:[%s3023_s3 + $0x28] sm:$0xff] %v1907_v57   ;;  %v1902_v28 = vpack.c.bf16 %v2975_v34, %v2971_v12  ;;  %v2221_v2 = vpop.f32.mrf.mxu0  ;;  %v1539_v13 = vmax.f32 %v1495_v31, 0.0  ;;  %v1547_v30 = vmax.f32 %v1527_v61, 0.0  ;;  %v1519_v51 = vadd.f32 %v1518_v25, %v1422_v39 }
 0x170   :  { %1883 = vst [vmem:[%s3023_s3] sm:$0xff] %v1882_v19   ;;  %v1630_v24 = vadd.f32 %v1629_v59, %v1535_v58  ;;  %v1666_v46 = vadd.f32 %v1651_v23, %v1650_v56  ;;  %v2229_v9 = vpop.f32.mrf.mxu1  ;;  %v1537_v15 = vmax.f32 %v1487_v63, 0.0  ;;  %v1498_v44 = vadd.f32 %v2221_v2, %v2958_v35 }
 0x171   :  { %1922 = vst [vmem:[%s3023_s3 + $0x20] sm:$0xff] %v1902_v28   ;;  %v1530_v17 = vadd.f32 %v2229_v9, %v1433_v32  ;;  %v1489_v43 = vpop.f32.mrf.mxu0  ;;  %v1545_v0 = vmax.f32 %v1519_v51, 0.0  ;;  %v1656_v39 = vmul.f32 %v1539_v13, %v1539_v13  ;;  %v1659_v8 = vmul.f32 %v2975_v34, %v2975_v34 }
 0x172   :  { %v1667_v26 = vadd.f32 %v1666_v46, %v1652_v5  ;;  %v1631_v45 = vadd.f32 %v1630_v24, %v1536_v29  ;;  %v1490_v10 = vadd.f32 %v1489_v43, %v2956_v22  ;;  %v1521_v33 = vpop.f32.mrf.mxu1  ;;  %v1540_v3 = vmax.f32 %v1498_v44, 0.0 }
 0x173   :  { %v1548_v41 = vmax.f32 %v1530_v17, 0.0  ;;  %v1522_v18 = vadd.f32 %v1521_v33, %v1425_v36  ;;  %v1654_v47 = vmul.f32 %v1537_v15, %v1537_v15  ;;  %v1661_v57 = vmul.f32 %v2969_v48, %v2969_v48 }
 0x174   :  { %v1632_v50 = vadd.f32 %v1631_v45, %v1537_v15  ;;  %v1668_v21 = vadd.f32 %v1667_v26, %v1653_v7  ;;  %v1538_v37 = vmax.f32 %v1490_v10, 0.0  ;;  %v1897_v53 = vpack.c.bf16 %v1540_v3, %v1539_v13 }
 0x175   :  { %v1917_v55 = vpack.c.bf16 %v1548_v41, %v1547_v30  ;;  %v1546_v22 = vmax.f32 %v1522_v18, 0.0  ;;  %v1657_v29 = vmul.f32 %v1540_v3, %v1540_v3  ;;  %v1664_v28 = vmul.f32 %v1547_v30, %v1547_v30 }
 0x176   :  { %v1669_v27 = vadd.f32 %v1668_v21, %v1654_v47  ;;  %v1892_v35 = vpack.c.bf16 %v1538_v37, %v1537_v15  ;;  %v1633_v42 = vadd.f32 %v1632_v50, %v1538_v37  ;;  %v1655_v62 = vmul.f32 %v1538_v37, %v1538_v37  ;;  %1921 = vst [vmem:[%s3023_s3 + $0x18] sm:$0xff] %v1897_v53  }
 0x177   :  { %1925 = vst [vmem:[%s3023_s3 + $0x38] sm:$0xff] %v1917_v55   ;;  %v1912_v58 = vpack.c.bf16 %v1546_v22, %v1545_v0  ;;  %v1663_v61 = vmul.f32 %v1546_v22, %v1546_v22  ;;  %v1665_v2 = vmul.f32 %v1548_v41, %v1548_v41  ;;  %v1687_v46 = vlaneseq }
 0x178   :  { %1920 = vst [vmem:[%s3023_s3 + $0x10] sm:$0xff] %v1892_v35   ;;  %v1634_v4 = vadd.f32 %v1633_v42, %v1539_v13  ;;  %v1670_v6 = vadd.f32 %v1669_v27, %v1655_v62 }
 0x179   :  { %1924 = vst [vmem:[%s3023_s3 + $0x30] sm:$0xff] %v1912_v58   ;;  %v1688_v44 = vshrl.u32 %v1687_v46, 7 }
 0x17a   :  { %v1635_v38 = vadd.f32 %v1634_v4, %v1540_v3  ;;  %v1671_v1 = vadd.f32 %v1670_v6, %v1656_v39 }
 0x17b   :  { %vm1690_vm0 = vcmp.eq.s32.totalorder %v1688_v44, 1  ;;  %vm1689_vm1 = vcmp.eq.s32.totalorder %v1688_v44, 0 }
 0x17c   :  { %v1636_v49 = vadd.f32 %v1635_v38, %v2971_v12  ;;  %v1672_v52 = vadd.f32 %v1671_v1, %v1657_v29  ;;  %v1662_v12 = vmul.f32 %v1545_v0, %v1545_v0 }
 0x17e   :  { %v1673_v11 = vadd.f32 %v1672_v52, %v1658_v20  ;;  %v1637_v14 = vadd.f32 %v1636_v49, %v2975_v34 }
 0x180   :  { %v1638_v54 = vadd.f32 %v1637_v14, %v2967_v40  ;;  %v1674_v56 = vadd.f32 %v1673_v11, %v1659_v8 }
 0x182   :  { %v1639_v31 = vadd.f32 %v1638_v54, %v2969_v48  ;;  %v1675_v16 = vadd.f32 %v1674_v56, %v1660_v60 }
 0x184   :  { %v1640_v19 = vadd.f32 %v1639_v31, %v1545_v0  ;;  %v1676_v59 = vadd.f32 %v1675_v16, %v1661_v57 }
 0x186   :  { %v1641_v23 = vadd.f32 %v1640_v19, %v1546_v22  ;;  %v1677_v25 = vadd.f32 %v1676_v59, %v1662_v12 }
 0x188   :  { %v1642_v34 = vadd.f32 %v1641_v23, %v1547_v30  ;;  %v1678_v63 = vadd.f32 %v1677_v25, %v1663_v61 }
 0x18a   :  { %v1643_v32 = vadd.f32 %v1642_v34, %v1548_v41  ;;  %v1679_v36 = vadd.f32 %v1678_v63, %v1664_v28 }
 0x18c   :  { %v1644_v40 = vrot.slane %v1643_v32, 4  ;;  %v1680_v5 = vadd.f32 %v1679_v36, %v1665_v2 }
 0x18e   :  { %v1645_v7 = vadd.f32 %v1644_v40, %v1643_v32  ;;  %v1681_v24 = vrot.slane %v1680_v5, 4 }
 0x190   :  { %v1646_v9 = vrot.slane %v1645_v7, 2  ;;  %v1682_v48 = vadd.f32 %v1681_v24, %v1680_v5 }
 0x192   :  { %v1647_v13 = vadd.f32 %v1646_v9, %v1645_v7  ;;  %v1683_v15 = vrot.slane %v1682_v48, 2 }
 0x194   :  { %v1684_v17 = vadd.f32 %v1683_v15, %v1682_v48  ;;  %v1648_v43 = vrot.slane %v1647_v13, 1 }
 0x196   :  { %v1685_v26 = vrot.slane %v1684_v17, 1  ;;  %v1649_v30 = vadd.f32 %v1648_v43, %v1647_v13 }
 0x198   :  { %v1686_v45 = vadd.f32 %v1685_v26, %v1684_v17 }
 0x19a   :  { %v1691_v10 = vsel %vm1690_vm0, %v1686_v45, 0.0 }
 0x19b   :  { %v1692_v33 = vsel %vm1689_vm1, %v1649_v30, %v1691_v10 }
 0x19c   :  { %1693 = vst [vmem:[%s3024_s4] sm:$0xff] %v1692_v33 }

// kernel: unet_forward.23
= control target key start
LH: loop header
LB: loop body
LE: loop exit
PB: predicated region body
PF: predicated region fallthrough
CT: control target
= control target key end

     0   :  { %v199_v38 = vlaneseq  ;;  %s351_s1 = inlined_call_operand.vmem [shape: bf16[128,128], index: 1, kind: input, shape index: {}]   ;;  %s352_s0 = inlined_call_operand.vmem [shape: bf16[32,128], index: 0, kind: input, shape index: {}]   ;;  %s353_s2 = inlined_call_operand.vmem [shape: f32[1,128], index: 2, kind: input, shape index: {}]   ;;  %s354_s3 = inlined_call_operand.vmem [shape: bf16[32,128], index: 3, kind: output, shape index: {0}]   ;;  %s355_s4 = inlined_call_operand.vmem [shape: f32[1,8,128], index: 4, kind: output, shape index: {1}]  }
   0x1   :  { %v274_v0 = vld [vmem:[%s351_s1 + $0x38] sm:$0xff]   ;;  %v275_v1 = vld [vmem:[%s351_s1 + $0x30] sm:$0xff]   ;;  %v276_v2 = vld [vmem:[%s351_s1 + $0x28] sm:$0xff]  }
   0x2   :  { %254 = vmatprep.subr.bf16.mxu0 %v274_v0  ;;  %v277_v3 = vld [vmem:[%s351_s1 + $0x20] sm:$0xff]   ;;  %v278_v5 = vld [vmem:[%s351_s1 + $0x18] sm:$0xff]   ;;  %v279_v6 = vld [vmem:[%s351_s1 + $0x10] sm:$0xff]   ;;  %v200_v43 = vshrl.u32 %v199_v38, 7 }
   0x3   :  { %255 = vmatpush3.bf16.msra.mxu0 %v274_v0  ;;  %v282_v4 = vld [vmem:[%s352_s0] sm:$0xff]   ;;  %v280_v7 = vld [vmem:[%s351_s1 + $0x8] sm:$0xff]  }
   0x4   :  { %256 = vmatprep.subr.bf16.mxu0 %v275_v1  ;;  %270 = vmatprep.mubr.bf16.mxu0 %v282_v4  ;;  %v281_v8 = vld [vmem:[%s351_s1] sm:$0xff]   ;;  %v283_v9 = vld [vmem:[%s352_s0 + $0x8] sm:$0xff]   ;;  %vm202_vm0 = vcmp.eq.s32.totalorder %v200_v43, 1  ;;  %vm201_vm1 = vcmp.eq.s32.totalorder %v200_v43, 0 }
   0x5   :  { %v214_v11 = vld [vmem:[%s353_s2] ss:$0 sm:$0xff] }
   0x7   :  { %257 = vmatpush3.bf16.msra.mxu0 %v275_v1 }
   0x8   :  { %258 = vmatprep.subr.bf16.mxu0 %v276_v2 }
   0xb   :  { %259 = vmatpush3.bf16.msra.mxu0 %v276_v2 }
   0xc   :  { %260 = vmatprep.subr.bf16.mxu0 %v277_v3 }
   0xf   :  { %261 = vmatpush3.bf16.msra.mxu0 %v277_v3 }
  0x10   :  { %262 = vmatprep.subr.bf16.mxu0 %v278_v5 }
  0x13   :  { %263 = vmatpush3.bf16.msra.mxu0 %v278_v5 }
  0x14   :  { %264 = vmatprep.subr.bf16.mxu0 %v279_v6 }
  0x17   :  { %265 = vmatpush3.bf16.msra.mxu0 %v279_v6 }
  0x18   :  { %266 = vmatprep.subr.bf16.mxu0 %v280_v7 }
  0x1b   :  { %267 = vmatpush3.bf16.msra.mxu0 %v280_v7 }
  0x1c   :  { %268 = vmatprep.subr.bf16.mxu0 %v281_v8 }
  0x1f   :  { %269 = vmatpush3.bf16.msra.mxu0 %v281_v8 }
  0x22   :  { %271 = vmatmul.mubr.bf16.vlgmr.msra.gmra.mxu0 %v283_v9 }
  0xe2   :  { %v272_v10 = vpop.f32.mrf.mxu0 }
  0xe3   :  { %v147_v13 = vadd.f32 %v272_v10, %v214_v11 }
  0xe4   :  { %v138_v12 = vpop.f32.mrf.mxu0 }
  0xe5   :  { %v139_v14 = vadd.f32 %v214_v11, %v138_v12  ;;  %v155_v18 = vmax.f32 %v147_v13, 0.0 }
  0xe6   :  { %v273_v15 = vpop.f32.mrf.mxu0 }
  0xe7   :  { %v150_v16 = vadd.f32 %v273_v15, %v214_v11  ;;  %v153_v19 = vmax.f32 %v139_v14, 0.0  ;;  %v188_v28 = vmul.f32 %v155_v18, %v155_v18 }
  0xe8   :  { %v141_v17 = vpop.f32.mrf.mxu0 }
  0xe9   :  { %v156_v20 = vmax.f32 %v150_v16, 0.0  ;;  %v142_v21 = vadd.f32 %v214_v11, %v141_v17  ;;  %v186_v24 = vmul.f32 %v153_v19, %v153_v19 }
  0xeb   :  { %v241_v22 = vpack.c.bf16 %v156_v20, %v155_v18  ;;  %v154_v23 = vmax.f32 %v142_v21, 0.0  ;;  %v189_v31 = vmul.f32 %v156_v20, %v156_v20 }
  0xed   :  { %243 = vst [vmem:[%s354_s3 + $0x8] sm:$0xff] %v241_v22   ;;  %v236_v25 = vpack.c.bf16 %v154_v23, %v153_v19  ;;  %v177_v26 = vadd.f32 %v154_v23, %v153_v19  ;;  %v187_v27 = vmul.f32 %v154_v23, %v154_v23 }
  0xef   :  { %237 = vst [vmem:[%s354_s3] sm:$0xff] %v236_v25   ;;  %v178_v29 = vadd.f32 %v177_v26, %v155_v18  ;;  %v190_v30 = vadd.f32 %v187_v27, %v186_v24 }
  0xf1   :  { %v179_v32 = vadd.f32 %v178_v29, %v156_v20  ;;  %v191_v33 = vadd.f32 %v190_v30, %v188_v28 }
  0xf3   :  { %v180_v34 = vrot.slane %v179_v32, 4  ;;  %v192_v35 = vadd.f32 %v191_v33, %v189_v31 }
  0xf5   :  { %v181_v36 = vadd.f32 %v180_v34, %v179_v32  ;;  %v193_v37 = vrot.slane %v192_v35, 4 }
  0xf7   :  { %v182_v39 = vrot.slane %v181_v36, 2  ;;  %v194_v40 = vadd.f32 %v193_v37, %v192_v35 }
  0xf9   :  { %v183_v41 = vadd.f32 %v182_v39, %v181_v36  ;;  %v195_v42 = vrot.slane %v194_v40, 2 }
  0xfb   :  { %v196_v44 = vadd.f32 %v195_v42, %v194_v40  ;;  %v184_v45 = vrot.slane %v183_v41, 1 }
  0xfd   :  { %v197_v46 = vrot.slane %v196_v44, 1  ;;  %v185_v48 = vadd.f32 %v184_v45, %v183_v41 }
  0xff   :  { %v198_v47 = vadd.f32 %v197_v46, %v196_v44 }
 0x101   :  { %v203_v49 = vsel %vm202_vm0, %v198_v47, 0.0 }
 0x102   :  { %v204_v50 = vsel %vm201_vm1, %v185_v48, %v203_v49 }
 0x103   :  { %205 = vst [vmem:[%s355_s4] sm:$0xff] %v204_v50 }

// kernel: unet_forward.22
= control target key start
LH: loop header
LB: loop body
LE: loop exit
PB: predicated region body
PF: predicated region fallthrough
CT: control target
= control target key end

     0   :  { %s308_s1 = inlined_call_operand.vmem [shape: bf16[128,128], index: 1, kind: input, shape index: {}]   ;;  %s309_s0 = inlined_call_operand.vmem [shape: bf16[32,128], index: 0, kind: input, shape index: {}]   ;;  %s310_s2 = inlined_call_operand.vmem [shape: f32[1,128], index: 2, kind: input, shape index: {}]   ;;  %s311_s3 = inlined_call_operand.vmem [shape: bf16[32,128], index: 3, kind: output, shape index: {}]  }
   0x1   :  { %v239_v0 = vld [vmem:[%s308_s1 + $0x38] sm:$0xff]   ;;  %v240_v1 = vld [vmem:[%s308_s1 + $0x30] sm:$0xff]   ;;  %v241_v2 = vld [vmem:[%s308_s1 + $0x28] sm:$0xff]  }
   0x2   :  { %219 = vmatprep.subr.bf16.mxu0 %v239_v0  ;;  %v242_v3 = vld [vmem:[%s308_s1 + $0x20] sm:$0xff]   ;;  %v243_v5 = vld [vmem:[%s308_s1 + $0x18] sm:$0xff]   ;;  %v244_v6 = vld [vmem:[%s308_s1 + $0x10] sm:$0xff]  }
   0x3   :  { %220 = vmatpush3.bf16.msra.mxu0 %v239_v0  ;;  %v247_v4 = vld [vmem:[%s309_s0] sm:$0xff]   ;;  %v245_v7 = vld [vmem:[%s308_s1 + $0x8] sm:$0xff]  }
   0x4   :  { %221 = vmatprep.subr.bf16.mxu0 %v240_v1  ;;  %235 = vmatprep.mubr.bf16.mxu0 %v247_v4  ;;  %v246_v8 = vld [vmem:[%s308_s1] sm:$0xff]   ;;  %v248_v9 = vld [vmem:[%s309_s0 + $0x8] sm:$0xff]  }
   0x5   :  { %v179_v11 = vld [vmem:[%s310_s2] ss:$0 sm:$0xff] }
   0x7   :  { %222 = vmatpush3.bf16.msra.mxu0 %v240_v1 }
   0x8   :  { %223 = vmatprep.subr.bf16.mxu0 %v241_v2 }
   0xb   :  { %224 = vmatpush3.bf16.msra.mxu0 %v241_v2 }
   0xc   :  { %225 = vmatprep.subr.bf16.mxu0 %v242_v3 }
   0xf   :  { %226 = vmatpush3.bf16.msra.mxu0 %v242_v3 }
  0x10   :  { %227 = vmatprep.subr.bf16.mxu0 %v243_v5 }
  0x13   :  { %228 = vmatpush3.bf16.msra.mxu0 %v243_v5 }
  0x14   :  { %229 = vmatprep.subr.bf16.mxu0 %v244_v6 }
  0x17   :  { %230 = vmatpush3.bf16.msra.mxu0 %v244_v6 }
  0x18   :  { %231 = vmatprep.subr.bf16.mxu0 %v245_v7 }
  0x1b   :  { %232 = vmatpush3.bf16.msra.mxu0 %v245_v7 }
  0x1c   :  { %233 = vmatprep.subr.bf16.mxu0 %v246_v8 }
  0x1f   :  { %234 = vmatpush3.bf16.msra.mxu0 %v246_v8 }
  0x22   :  { %236 = vmatmul.mubr.bf16.vlgmr.msra.gmra.mxu0 %v248_v9 }
  0xe2   :  { %v237_v10 = vpop.f32.mrf.mxu0 }
  0xe3   :  { %v145_v13 = vadd.f32 %v237_v10, %v179_v11 }
  0xe4   :  { %v136_v12 = vpop.f32.mrf.mxu0 }
  0xe5   :  { %v137_v15 = vadd.f32 %v179_v11, %v136_v12  ;;  %v153_v18 = vmax.f32 %v145_v13, 0.0 }
  0xe6   :  { %v238_v14 = vpop.f32.mrf.mxu0 }
  0xe7   :  { %v148_v16 = vadd.f32 %v238_v14, %v179_v11  ;;  %v151_v21 = vmax.f32 %v137_v15, 0.0 }
  0xe8   :  { %v139_v17 = vpop.f32.mrf.mxu0 }
  0xe9   :  { %v154_v19 = vmax.f32 %v148_v16, 0.0  ;;  %v140_v20 = vadd.f32 %v179_v11, %v139_v17 }
  0xeb   :  { %v206_v22 = vpack.c.bf16 %v154_v19, %v153_v18  ;;  %v152_v23 = vmax.f32 %v140_v20, 0.0 }
  0xed   :  { %208 = vst [vmem:[%s311_s3 + $0x8] sm:$0xff] %v206_v22   ;;  %v201_v24 = vpack.c.bf16 %v152_v23, %v151_v21 }
  0xef   :  { %202 = vst [vmem:[%s311_s3] sm:$0xff] %v201_v24  }

// kernel: unet_forward.21
= control target key start
LH: loop header
LB: loop body
LE: loop exit
PB: predicated region body
PF: predicated region fallthrough
CT: control target
= control target key end

     0   :  { %s1675_s1 = inlined_call_operand.vmem [shape: bf16[1152,128], index: 1, kind: input, shape index: {}]   ;;  %s1676_s0 = inlined_call_operand.vmem [shape: bf16[32,1152], index: 0, kind: input, shape index: {}]   ;;  %s1677_s2 = inlined_call_operand.vmem [shape: f32[1,128], index: 2, kind: input, shape index: {}]   ;;  %s1678_s3 = inlined_call_operand.vmem [shape: bf16[32,128], index: 3, kind: output, shape index: {0}]   ;;  %s1679_s4 = inlined_call_operand.vmem [shape: f32[1,8,128], index: 4, kind: output, shape index: {1}]  }
   0x1   :  { %v1270_v0 = vld [vmem:[%s1675_s1 + $0x78] sm:$0xff]   ;;  %v1274_v4 = vld [vmem:[%s1675_s1 + $0x70] sm:$0xff]   ;;  %v1278_v8 = vld [vmem:[%s1675_s1 + $0x68] sm:$0xff]  }
   0x2   :  { %v1271_v1 = vld [vmem:[%s1675_s1 + $0x38] sm:$0xff]   ;;  %1128 = vmatprep.subr.bf16.mxu0 %v1270_v0  ;;  %v1275_v5 = vld [vmem:[%s1675_s1 + $0x30] sm:$0xff]   ;;  %v1279_v9 = vld [vmem:[%s1675_s1 + $0x28] sm:$0xff]  }
   0x3   :  { %v1272_v2 = vld [vmem:[%s1675_s1 + $0xf8] sm:$0xff]   ;;  %1129 = vmatpush3.bf16.msra.mxu0 %v1271_v1  ;;  %v1276_v6 = vld [vmem:[%s1675_s1 + $0xf0] sm:$0xff]   ;;  %v1280_v10 = vld [vmem:[%s1675_s1 + $0xe8] sm:$0xff]  }
   0x4   :  { %v1273_v3 = vld [vmem:[%s1675_s1 + $0xb8] sm:$0xff]   ;;  %1156 = vmatprep.subr.bf16.mxu1 %v1272_v2  ;;  %1130 = vmatprep.subr.bf16.mxu0 %v1274_v4  ;;  %v1277_v7 = vld [vmem:[%s1675_s1 + $0xb0] sm:$0xff]   ;;  %v1281_v11 = vld [vmem:[%s1675_s1 + $0xa8] sm:$0xff]  }
   0x5   :  { %1157 = vmatpush3.bf16.msra.mxu1 %v1273_v3  ;;  %v1282_v12 = vld [vmem:[%s1675_s1 + $0x60] sm:$0xff]   ;;  %v1286_v16 = vld [vmem:[%s1675_s1 + $0x58] sm:$0xff]   ;;  %v1290_v20 = vld [vmem:[%s1675_s1 + $0x50] sm:$0xff]  }
   0x6   :  { %1158 = vmatprep.subr.bf16.mxu1 %v1276_v6  ;;  %v1283_v13 = vld [vmem:[%s1675_s1 + $0x20] sm:$0xff]   ;;  %v1287_v17 = vld [vmem:[%s1675_s1 + $0x18] sm:$0xff]   ;;  %v1291_v21 = vld [vmem:[%s1675_s1 + $0x10] sm:$0xff]  }
   0x7   :  { %1131 = vmatpush3.bf16.msra.mxu0 %v1275_v5  ;;  %v1284_v14 = vld [vmem:[%s1675_s1 + $0xe0] sm:$0xff]   ;;  %v1288_v18 = vld [vmem:[%s1675_s1 + $0xd8] sm:$0xff]   ;;  %v1292_v22 = vld [vmem:[%s1675_s1 + $0xd0] sm:$0xff]  }
   0x8   :  { %1132 = vmatprep.subr.bf16.mxu0 %v1278_v8  ;;  %v1285_v15 = vld [vmem:[%s1675_s1 + $0xa0] sm:$0xff]   ;;  %v1289_v19 = vld [vmem:[%s1675_s1 + $0x98] sm:$0xff]   ;;  %v1293_v23 = vld [vmem:[%s1675_s1 + $0x90] sm:$0xff]  }
   0x9   :  { %1159 = vmatpush3.bf16.msra.mxu1 %v1277_v7  ;;  %v1294_v24 = vld [vmem:[%s1675_s1 + $0x48] sm:$0xff]   ;;  %v1298_v28 = vld [vmem:[%s1675_s1 + $0x40] sm:$0xff]   ;;  %v1305_v34 = vld [vmem:[%s1675_s1 + $0x178] sm:$0xff]  }
   0xa   :  { %1160 = vmatprep.subr.bf16.mxu1 %v1280_v10  ;;  %v1295_v25 = vld [vmem:[%s1675_s1 + $0x8] sm:$0xff]   ;;  %v1299_v29 = vld [vmem:[%s1675_s1] sm:$0xff]   ;;  %v1309_v37 = vld [vmem:[%s1675_s1 + $0x138] sm:$0xff]  }
   0xb   :  { %1133 = vmatpush3.bf16.msra.mxu0 %v1279_v9  ;;  %v1296_v26 = vld [vmem:[%s1675_s1 + $0xc8] sm:$0xff]   ;;  %v1300_v30 = vld [vmem:[%s1675_s1 + $0xc0] sm:$0xff]   ;;  %v1310_v38 = vld [vmem:[%s1675_s1 + $0x1f8] sm:$0xff]  }
   0xc   :  { %1134 = vmatprep.subr.bf16.mxu0 %v1282_v12  ;;  %v1297_v27 = vld [vmem:[%s1675_s1 + $0x88] sm:$0xff]   ;;  %v1301_v31 = vld [vmem:[%s1676_s0] ss:$36 sps:$4 sm:$0xff]   ;;  %v1311_v39 = vld [vmem:[%s1675_s1 + $0x1b8] sm:$0xff]  }
   0xd   :  { %1161 = vmatpush3.bf16.msra.mxu1 %v1281_v11  ;;  %v1303_v32 = vld [vmem:[%s1676_s0 + $0x4] ss:$36 sps:$4 sm:$0xff]   ;;  %v1308_v36 = vld [vmem:[%s1676_s0 + $0xc] ss:$36 sps:$4 sm:$0xff]   ;;  %v1324_v52 = vld [vmem:[%s1675_s1 + $0x158] sm:$0xff]  }
   0xe   :  { %1162 = vmatprep.subr.bf16.mxu1 %v1284_v14  ;;  %v1304_v33 = vld [vmem:[%s1675_s1 + $0x80] sm:$0xff]   ;;  %744 = vmatprep.mubr.bf16.mxu0 %v1303_v32  ;;  %v1306_v35 = vld [vmem:[%s1676_s0 + $0x8] ss:$36 sps:$4 sm:$0xff]   ;;  %v1312_v40 = vld [vmem:[%s1675_s1 + $0x170] sm:$0xff]  }
   0xf   :  { %1135 = vmatpush3.bf16.msra.mxu0 %v1283_v13  ;;  %793 = vmatprep.mubr.bf16.mxu1 %v1308_v36  ;;  %v1313_v41 = vld [vmem:[%s1675_s1 + $0x130] sm:$0xff]   ;;  %v1316_v44 = vld [vmem:[%s1675_s1 + $0x168] sm:$0xff]   ;;  %v1320_v48 = vld [vmem:[%s1675_s1 + $0x160] sm:$0xff]  }
  0x10   :  { %1136 = vmatprep.subr.bf16.mxu0 %v1286_v16  ;;  %v1314_v42 = vld [vmem:[%s1675_s1 + $0x1f0] sm:$0xff]   ;;  %v1317_v45 = vld [vmem:[%s1675_s1 + $0x128] sm:$0xff]   ;;  %v1321_v49 = vld [vmem:[%s1675_s1 + $0x120] sm:$0xff]  }
  0x11   :  { %1163 = vmatpush3.bf16.msra.mxu1 %v1285_v15  ;;  %v1315_v43 = vld [vmem:[%s1675_s1 + $0x1b0] sm:$0xff]   ;;  %v1318_v46 = vld [vmem:[%s1675_s1 + $0x1e8] sm:$0xff]   ;;  %v1322_v50 = vld [vmem:[%s1675_s1 + $0x1e0] sm:$0xff]  }
  0x12   :  { %1164 = vmatprep.subr.bf16.mxu1 %v1288_v18  ;;  %v1319_v47 = vld [vmem:[%s1675_s1 + $0x1a8] sm:$0xff]   ;;  %v1323_v51 = vld [vmem:[%s1675_s1 + $0x1a0] sm:$0xff]   ;;  %v1325_v53 = vld [vmem:[%s1675_s1 + $0x118] sm:$0xff]  }
  0x13   :  { %1137 = vmatpush3.bf16.msra.mxu0 %v1287_v17  ;;  %v1326_v54 = vld [vmem:[%s1676_s0 + $0x4c] ss:$36 sps:$4 sm:$0xff]   ;;  %v1328_v55 = vld [vmem:[%s1675_s1 + $0x1d8] sm:$0xff]   ;;  %v1342_v4 = vld [vmem:[%s1675_s1 + $0x140] sm:$0xff]  }
  0x14   :  { %1138 = vmatprep.subr.bf16.mxu0 %v1290_v20  ;;  %v1329_v56 = vld [vmem:[%s1676_s0 + $0x48] ss:$36 sps:$4 sm:$0xff]   ;;  %v1330_v57 = vld [vmem:[%s1675_s1 + $0x198] sm:$0xff]   ;;  %v1333_v59 = vld [vmem:[%s1675_s1 + $0x150] sm:$0xff]  }
  0x15   :  { %1165 = vmatpush3.bf16.msra.mxu1 %v1289_v19  ;;  %v1331_v58 = vld [vmem:[%s1676_s0 + $0x54] ss:$36 sps:$4 sm:$0xff]   ;;  %v1338_v0 = vld [vmem:[%s1675_s1 + $0x148] sm:$0xff]   ;;  %v1343_v5 = vld [vmem:[%s1675_s1 + $0x100] sm:$0xff]  }
  0x16   :  { %1166 = vmatprep.subr.bf16.mxu1 %v1292_v22  ;;  %v1334_v60 = vld [vmem:[%s1676_s0 + $0x50] ss:$36 sps:$4 sm:$0xff]   ;;  %v1339_v1 = vld [vmem:[%s1675_s1 + $0x108] sm:$0xff]   ;;  %v1344_v6 = vld [vmem:[%s1675_s1 + $0x1c0] sm:$0xff]  }
  0x17   :  { %1139 = vmatpush3.bf16.msra.mxu0 %v1291_v21  ;;  %v1335_v61 = vld [vmem:[%s1675_s1 + $0x110] sm:$0xff]   ;;  %v1340_v2 = vld [vmem:[%s1675_s1 + $0x1c8] sm:$0xff]   ;;  %v1348_v9 = vld [vmem:[%s1675_s1 + $0x180] sm:$0xff]  }
  0x18   :  { %1140 = vmatprep.subr.bf16.mxu0 %v1294_v24  ;;  %v1336_v62 = vld [vmem:[%s1675_s1 + $0x1d0] sm:$0xff]   ;;  %v1341_v3 = vld [vmem:[%s1675_s1 + $0x188] sm:$0xff]   ;;  %v1349_v10 = vld [vmem:[%s1675_s1 + $0x238] sm:$0xff]  }
  0x19   :  { %1167 = vmatpush3.bf16.msra.mxu1 %v1293_v23  ;;  %v1337_v63 = vld [vmem:[%s1675_s1 + $0x190] sm:$0xff]   ;;  %v1350_v11 = vld [vmem:[%s1676_s0 + $0x18] ss:$36 sps:$4 sm:$0xff]   ;;  %v1357_v16 = vld [vmem:[%s1675_s1 + $0x228] sm:$0xff]  }
  0x1a   :  { %1168 = vmatprep.subr.bf16.mxu1 %v1296_v26  ;;  %v1345_v7 = vld [vmem:[%s1676_s0 + $0x10] ss:$36 sps:$4 sm:$0xff]   ;;  %v1352_v12 = vld [vmem:[%s1676_s0 + $0x1c] ss:$36 sps:$4 sm:$0xff]   ;;  %v1358_v17 = vld [vmem:[%s1676_s0 + $0x64] ss:$36 sps:$4 sm:$0xff]  }
  0x1b   :  { %1141 = vmatpush3.bf16.msra.mxu0 %v1295_v25  ;;  %v1347_v8 = vld [vmem:[%s1676_s0 + $0x14] ss:$36 sps:$4 sm:$0xff]   ;;  %v1354_v14 = vld [vmem:[%s1676_s0 + $0x5c] ss:$36 sps:$4 sm:$0xff]   ;;  %v1364_v23 = vld [vmem:[%s1675_s1 + $0x208] sm:$0xff]  }
  0x1c   :  { %1142 = vmatprep.subr.bf16.mxu0 %v1298_v28  ;;  %v1353_v13 = vld [vmem:[%s1675_s1 + $0x230] sm:$0xff]   ;;  %v1356_v15 = vld [vmem:[%s1676_s0 + $0x58] ss:$36 sps:$4 sm:$0xff]   ;;  %v1360_v18 = vld [vmem:[%s1676_s0 + $0x60] ss:$36 sps:$4 sm:$0xff]  }
  0x1d   :  { %1169 = vmatpush3.bf16.msra.mxu1 %v1297_v27  ;;  %v1361_v19 = vld [vmem:[%s1675_s1 + $0x220] sm:$0xff]   ;;  %v1362_v20 = vld [vmem:[%s1675_s1 + $0x218] sm:$0xff]   ;;  %v1363_v22 = vld [vmem:[%s1675_s1 + $0x210] sm:$0xff]  }
  0x1e   :  { %1170 = vmatprep.subr.bf16.mxu1 %v1300_v30  ;;  %v1366_v21 = vld [vmem:[%s1676_s0 + $0x20] ss:$36 sps:$4 sm:$0xff]   ;;  %v1367_v25 = vld [vmem:[%s1676_s0 + $0x68] ss:$36 sps:$4 sm:$0xff]  }
  0x1f   :  { %1143 = vmatpush3.bf16.msra.mxu0 %v1299_v29  ;;  %v1365_v24 = vld [vmem:[%s1675_s1 + $0x200] sm:$0xff]  }
  0x20   :  { %1184 = vmatprep.subr.bf16.mxu0 %v1305_v34 }
  0x21   :  { %1171 = vmatpush3.bf16.msra.mxu1 %v1304_v33 }
  0x22   :  { %745 = vmatmul.mubr.bf16.vlgmr.msra.gmra.mxu0 %v1301_v31  ;;  %1212 = vmatprep.subr.bf16.mxu1 %v1310_v38 }
  0x23   :  { %1185 = vmatpush3.bf16.msra.mxu0 %v1309_v37  ;;  %752 = vmatprep.mubr.bf16.mxu0 %v1326_v54  ;;  %v1018_v54 = vld [vmem:[%s1677_s2] ss:$0 sm:$0xff] }
  0x24   :  { %794 = vmatmul.mubr.bf16.vlgmr.msra.gmra.mxu1 %v1306_v35  ;;  %1186 = vmatprep.subr.bf16.mxu0 %v1312_v40 }
  0x25   :  { %1213 = vmatpush3.bf16.msra.mxu1 %v1311_v39  ;;  %801 = vmatprep.mubr.bf16.mxu1 %v1331_v58 }
  0x26   :  { %1214 = vmatprep.subr.bf16.mxu1 %v1314_v42 }
  0x27   :  { %1187 = vmatpush3.bf16.msra.mxu0 %v1313_v41 }
  0x28   :  { %1188 = vmatprep.subr.bf16.mxu0 %v1316_v44 }
  0x29   :  { %1215 = vmatpush3.bf16.msra.mxu1 %v1315_v43 }
  0x2a   :  { %1216 = vmatprep.subr.bf16.mxu1 %v1318_v46  ;;  %753 = vmatmul.mubr.bf16.gmra.mxu0 %v1329_v56 }
  0x2b   :  { %1189 = vmatpush3.bf16.msra.mxu0 %v1317_v45  ;;  %842 = vmatprep.mubr.bf16.mxu0 %v1347_v8 }
  0x2c   :  { %1190 = vmatprep.subr.bf16.mxu0 %v1320_v48  ;;  %802 = vmatmul.mubr.bf16.gmra.mxu1 %v1334_v60 }
  0x2d   :  { %1217 = vmatpush3.bf16.msra.mxu1 %v1319_v47  ;;  %891 = vmatprep.mubr.bf16.mxu1 %v1352_v12 }
  0x2e   :  { %1218 = vmatprep.subr.bf16.mxu1 %v1322_v50 }
  0x2f   :  { %1191 = vmatpush3.bf16.msra.mxu0 %v1321_v49 }
  0x30   :  { %1192 = vmatprep.subr.bf16.mxu0 %v1324_v52 }
  0x31   :  { %1219 = vmatpush3.bf16.msra.mxu1 %v1323_v51 }
  0x32   :  { %1220 = vmatprep.subr.bf16.mxu1 %v1328_v55 }
  0x33   :  { %1193 = vmatpush3.bf16.msra.mxu0 %v1325_v53 }
  0x34   :  { %1194 = vmatprep.subr.bf16.mxu0 %v1333_v59 }
  0x35   :  { %1221 = vmatpush3.bf16.msra.mxu1 %v1330_v57 }
  0x36   :  { %1222 = vmatprep.subr.bf16.mxu1 %v1336_v62 }
  0x37   :  { %1195 = vmatpush3.bf16.msra.mxu0 %v1335_v61 }
  0x38   :  { %1196 = vmatprep.subr.bf16.mxu0 %v1338_v0 }
  0x39   :  { %1223 = vmatpush3.bf16.msra.mxu1 %v1337_v63 }
  0x3a   :  { %1224 = vmatprep.subr.bf16.mxu1 %v1340_v2 }
  0x3b   :  { %1197 = vmatpush3.bf16.msra.mxu0 %v1339_v1 }
  0x3c   :  { %1198 = vmatprep.subr.bf16.mxu0 %v1342_v4 }
  0x3d   :  { %1225 = vmatpush3.bf16.msra.mxu1 %v1341_v3 }
  0x3e   :  { %1226 = vmatprep.subr.bf16.mxu1 %v1344_v6 }
  0x3f   :  { %1199 = vmatpush3.bf16.msra.mxu0 %v1343_v5 }
  0x40   :  { %1250 = vmatprep.subr.bf16.mxu0 %v1349_v10 }
  0x41   :  { %1227 = vmatpush3.bf16.msra.mxu1 %v1348_v9 }
  0x42   :  { %843 = vmatmul.mubr.bf16.vlgmr.msra.gmra.mxu0 %v1345_v7 }
  0x43   :  { %1251 = vmatpush3.bf16.msra.mxu0 %v1349_v10  ;;  %850 = vmatprep.mubr.bf16.mxu0 %v1354_v14 }
  0x44   :  { %892 = vmatmul.mubr.bf16.vlgmr.msra.gmra.mxu1 %v1350_v11  ;;  %1252 = vmatprep.subr.bf16.mxu0 %v1353_v13 }
  0x45   :  { %899 = vmatprep.mubr.bf16.mxu1 %v1358_v17 }
  0x47   :  { %1253 = vmatpush3.bf16.msra.mxu0 %v1353_v13 }
  0x48   :  { %1254 = vmatprep.subr.bf16.mxu0 %v1357_v16 }
  0x4a   :  { %851 = vmatmul.mubr.bf16.gmra.mxu0 %v1356_v15 }
  0x4b   :  { %1255 = vmatpush3.bf16.msra.mxu0 %v1357_v16  ;;  %1266 = vmatprep.mubr.bf16.mxu0 %v1366_v21 }
  0x4c   :  { %900 = vmatmul.mubr.bf16.gmra.mxu1 %v1360_v18  ;;  %1256 = vmatprep.subr.bf16.mxu0 %v1361_v19 }
  0x4f   :  { %1257 = vmatpush3.bf16.msra.mxu0 %v1361_v19 }
  0x50   :  { %1258 = vmatprep.subr.bf16.mxu0 %v1362_v20 }
  0x53   :  { %1259 = vmatpush3.bf16.msra.mxu0 %v1362_v20 }
  0x54   :  { %1260 = vmatprep.subr.bf16.mxu0 %v1363_v22 }
  0x57   :  { %1261 = vmatpush3.bf16.msra.mxu0 %v1363_v22 }
  0x58   :  { %1262 = vmatprep.subr.bf16.mxu0 %v1364_v23 }
  0x5b   :  { %1263 = vmatpush3.bf16.msra.mxu0 %v1364_v23 }
  0x5c   :  { %1264 = vmatprep.subr.bf16.mxu0 %v1365_v24 }
  0x5f   :  { %1265 = vmatpush3.bf16.msra.mxu0 %v1365_v24 }
  0x62   :  { %1267 = vmatmul.mubr.bf16.vlgmr.msra.gmra.mxu0 %v1367_v25 }
  0xe2   :  { %v1144_v26 = vpop.f32.mrf.mxu0 }
  0xe4   :  { %v1172_v27 = vpop.f32.mrf.mxu1  ;;  %v1145_v28 = vpop.f32.mrf.mxu0 }
  0xe5   :  { %v1146_v53 = vadd.f32 %v1145_v28, %v1144_v26 }
  0xe6   :  { %v1173_v29 = vpop.f32.mrf.mxu1  ;;  %v1147_v30 = vpop.f32.mrf.mxu0 }
  0xe7   :  { %v747_v59 = vadd.f32 %v1146_v53, %v1018_v54  ;;  %v1174_v60 = vadd.f32 %v1173_v29, %v1172_v27 }
  0xe8   :  { %v1175_v31 = vpop.f32.mrf.mxu1  ;;  %v1148_v32 = vpop.f32.mrf.mxu0 }
  0xe9   :  { %v1149_v61 = vadd.f32 %v1148_v32, %v1147_v30  ;;  %v796_v6 = vadd.f32 %v1174_v60, %v747_v59 }
  0xea   :  { %v1150_v33 = vpop.f32.mrf.mxu0  ;;  %v1176_v34 = vpop.f32.mrf.mxu1 }
  0xeb   :  { %v750_v7 = vadd.f32 %v1149_v61, %v1018_v54  ;;  %v1177_v8 = vadd.f32 %v1176_v34, %v1175_v31 }
  0xec   :  { %v1178_v35 = vpop.f32.mrf.mxu1  ;;  %v1151_v36 = vpop.f32.mrf.mxu0 }
  0xed   :  { %v1152_v55 = vadd.f32 %v1151_v36, %v1150_v33  ;;  %v799_v18 = vadd.f32 %v1177_v8, %v750_v7 }
  0xee   :  { %v1179_v37 = vpop.f32.mrf.mxu1  ;;  %v1153_v38 = vpop.f32.mrf.mxu0 }
  0xef   :  { %v755_v62 = vadd.f32 %v1152_v55, %v1018_v54  ;;  %v1180_v63 = vadd.f32 %v1179_v37, %v1178_v35 }
  0xf0   :  { %v1181_v39 = vpop.f32.mrf.mxu1  ;;  %v1154_v40 = vpop.f32.mrf.mxu0 }
  0xf1   :  { %v1155_v56 = vadd.f32 %v1154_v40, %v1153_v38  ;;  %v804_v9 = vadd.f32 %v1180_v63, %v755_v62 }
  0xf2   :  { %v1182_v42 = vpop.f32.mrf.mxu1 }
  0xf3   :  { %v758_v0 = vadd.f32 %v1155_v56, %v1018_v54  ;;  %v1183_v1 = vadd.f32 %v1182_v42, %v1181_v39  ;;  %v1003_v54 = vlaneseq }
  0xf5   :  { %v807_v11 = vadd.f32 %v1183_v1, %v758_v0  ;;  %v1004_v59 = vshrl.u32 %v1003_v54, 7 }
  0xf7   :  { %vm1006_vm0 = vcmp.eq.s32.totalorder %v1004_v59, 1  ;;  %vm1005_vm1 = vcmp.eq.s32.totalorder %v1004_v59, 0 }
 0x102   :  { %v1200_v41 = vpop.f32.mrf.mxu0 }
 0x104   :  { %v1201_v43 = vpop.f32.mrf.mxu0  ;;  %v1228_v44 = vpop.f32.mrf.mxu1 }
 0x105   :  { %v1202_v2 = vadd.f32 %v1201_v43, %v1200_v41 }
 0x106   :  { %v1203_v45 = vpop.f32.mrf.mxu0  ;;  %v1229_v46 = vpop.f32.mrf.mxu1 }
 0x107   :  { %v845_v12 = vadd.f32 %v1202_v2, %v796_v6  ;;  %v1230_v14 = vadd.f32 %v1229_v46, %v1228_v44 }
 0x108   :  { %v1204_v47 = vpop.f32.mrf.mxu0  ;;  %v1231_v48 = vpop.f32.mrf.mxu1 }
 0x109   :  { %v1205_v15 = vadd.f32 %v1204_v47, %v1203_v45  ;;  %v894_v25 = vadd.f32 %v1230_v14, %v845_v12 }
 0x10a   :  { %v1206_v49 = vpop.f32.mrf.mxu0  ;;  %v1232_v50 = vpop.f32.mrf.mxu1 }
 0x10b   :  { %v848_v22 = vadd.f32 %v1205_v15, %v799_v18  ;;  %v1233_v23 = vadd.f32 %v1232_v50, %v1231_v48 }
 0x10c   :  { %v1207_v51 = vpop.f32.mrf.mxu0  ;;  %v1234_v52 = vpop.f32.mrf.mxu1 }
 0x10d   :  { %v1208_v5 = vadd.f32 %v1207_v51, %v1206_v49  ;;  %v897_v32 = vadd.f32 %v1233_v23, %v848_v22 }
 0x10e   :  { %v1209_v57 = vpop.f32.mrf.mxu0  ;;  %v1235_v58 = vpop.f32.mrf.mxu1 }
 0x10f   :  { %v853_v16 = vadd.f32 %v1208_v5, %v804_v9  ;;  %v1236_v17 = vadd.f32 %v1235_v58, %v1234_v52 }
 0x110   :  { %v1210_v3 = vpop.f32.mrf.mxu0  ;;  %v1237_v4 = vpop.f32.mrf.mxu1 }
 0x111   :  { %v1211_v10 = vadd.f32 %v1210_v3, %v1209_v57  ;;  %v902_v24 = vadd.f32 %v1236_v17, %v853_v16 }
 0x112   :  { %v1238_v13 = vpop.f32.mrf.mxu1 }
 0x113   :  { %v856_v19 = vadd.f32 %v1211_v10, %v807_v11  ;;  %v1239_v20 = vadd.f32 %v1238_v13, %v1237_v4 }
 0x115   :  { %v905_v29 = vadd.f32 %v1239_v20, %v856_v19 }
 0x122   :  { %v1268_v21 = vpop.f32.mrf.mxu0 }
 0x123   :  { %v951_v27 = vadd.f32 %v1268_v21, %v902_v24 }
 0x124   :  { %v942_v26 = vpop.f32.mrf.mxu0 }
 0x125   :  { %v943_v28 = vadd.f32 %v942_v26, %v894_v25  ;;  %v959_v34 = vmax.f32 %v951_v27, 0.0 }
 0x126   :  { %v1269_v30 = vpop.f32.mrf.mxu0 }
 0x127   :  { %v954_v31 = vadd.f32 %v1269_v30, %v905_v29  ;;  %v957_v35 = vmax.f32 %v943_v28, 0.0  ;;  %v992_v44 = vmul.f32 %v959_v34, %v959_v34 }
 0x128   :  { %v945_v33 = vpop.f32.mrf.mxu0 }
 0x129   :  { %v960_v36 = vmax.f32 %v954_v31, 0.0  ;;  %v946_v37 = vadd.f32 %v945_v33, %v897_v32  ;;  %v990_v40 = vmul.f32 %v957_v35, %v957_v35 }
 0x12b   :  { %v1125_v38 = vpack.c.bf16 %v960_v36, %v959_v34  ;;  %v958_v39 = vmax.f32 %v946_v37, 0.0  ;;  %v993_v47 = vmul.f32 %v960_v36, %v960_v36 }
 0x12d   :  { %1127 = vst [vmem:[%s1678_s3 + $0x8] sm:$0xff] %v1125_v38   ;;  %v1120_v41 = vpack.c.bf16 %v958_v39, %v957_v35  ;;  %v981_v42 = vadd.f32 %v958_v39, %v957_v35  ;;  %v991_v43 = vmul.f32 %v958_v39, %v958_v39 }
 0x12f   :  { %1121 = vst [vmem:[%s1678_s3] sm:$0xff] %v1120_v41   ;;  %v982_v45 = vadd.f32 %v981_v42, %v959_v34  ;;  %v994_v46 = vadd.f32 %v991_v43, %v990_v40 }
 0x131   :  { %v983_v48 = vadd.f32 %v982_v45, %v960_v36  ;;  %v995_v49 = vadd.f32 %v994_v46, %v992_v44 }
 0x133   :  { %v984_v50 = vrot.slane %v983_v48, 4  ;;  %v996_v51 = vadd.f32 %v995_v49, %v993_v47 }
 0x135   :  { %v985_v52 = vadd.f32 %v984_v50, %v983_v48  ;;  %v997_v53 = vrot.slane %v996_v51, 4 }
 0x137   :  { %v986_v55 = vrot.slane %v985_v52, 2  ;;  %v998_v56 = vadd.f32 %v997_v53, %v996_v51 }
 0x139   :  { %v987_v57 = vadd.f32 %v986_v55, %v985_v52  ;;  %v999_v58 = vrot.slane %v998_v56, 2 }
 0x13b   :  { %v1000_v60 = vadd.f32 %v999_v58, %v998_v56  ;;  %v988_v61 = vrot.slane %v987_v57, 1 }
 0x13d   :  { %v1001_v62 = vrot.slane %v1000_v60, 1  ;;  %v989_v0 = vadd.f32 %v988_v61, %v987_v57 }
 0x13f   :  { %v1002_v63 = vadd.f32 %v1001_v62, %v1000_v60 }
 0x141   :  { %v1007_v1 = vsel %vm1006_vm0, %v1002_v63, 0.0 }
 0x142   :  { %v1008_v2 = vsel %vm1005_vm1, %v989_v0, %v1007_v1 }
 0x143   :  { %1009 = vst [vmem:[%s1679_s4] sm:$0xff] %v1008_v2 }

// kernel: unet_forward.25
= control target key start
LH: loop header
LB: loop body
LE: loop exit
PB: predicated region body
PF: predicated region fallthrough
CT: control target
= control target key end

     0   :  { %v338_v56 = vlaneseq  ;;  %s580_s3 = inlined_call_operand.vmem [shape: bf16[128,128], index: 3, kind: input, shape index: {}]   ;;  %s581_s2 = inlined_call_operand.vmem [shape: bf16[128,128], index: 2, kind: input, shape index: {}]   ;;  %s582_s1 = inlined_call_operand.vmem [shape: bf16[32,128], index: 1, kind: input, shape index: {}]   ;;  %s583_s0 = inlined_call_operand.vmem [shape: bf16[32,128], index: 0, kind: input, shape index: {}]   ;;  %s584_s4 = inlined_call_operand.vmem [shape: f32[1,128], index: 4, kind: input, shape index: {}]   ;;  %s585_s5 = inlined_call_operand.vmem [shape: bf16[32,128], index: 5, kind: output, shape index: {0}]   ;;  %s586_s6 = inlined_call_operand.vmem [shape: f32[1,8,128], index: 6, kind: output, shape index: {1}]  }
   0x1   :  { %v453_v0 = vld [vmem:[%s580_s3 + $0x38] sm:$0xff]   ;;  %v455_v2 = vld [vmem:[%s580_s3 + $0x30] sm:$0xff]   ;;  %v457_v4 = vld [vmem:[%s580_s3 + $0x28] sm:$0xff]  }
   0x2   :  { %v454_v1 = vld [vmem:[%s581_s2 + $0x38] sm:$0xff]   ;;  %413 = vmatprep.subr.bf16.mxu0 %v453_v0  ;;  %v456_v3 = vld [vmem:[%s581_s2 + $0x30] sm:$0xff]   ;;  %v458_v5 = vld [vmem:[%s581_s2 + $0x28] sm:$0xff]   ;;  %v339_v61 = vshrl.u32 %v338_v56, 7 }
   0x3   :  { %433 = vmatprep.subr.bf16.mxu1 %v454_v1  ;;  %414 = vmatpush3.bf16.msra.mxu0 %v453_v0  ;;  %v459_v6 = vld [vmem:[%s580_s3 + $0x20] sm:$0xff]   ;;  %v461_v8 = vld [vmem:[%s580_s3 + $0x18] sm:$0xff]   ;;  %v463_v10 = vld [vmem:[%s580_s3 + $0x10] sm:$0xff]  }
   0x4   :  { %434 = vmatpush3.bf16.msra.mxu1 %v454_v1  ;;  %415 = vmatprep.subr.bf16.mxu0 %v455_v2  ;;  %v460_v7 = vld [vmem:[%s581_s2 + $0x20] sm:$0xff]   ;;  %v462_v9 = vld [vmem:[%s581_s2 + $0x18] sm:$0xff]   ;;  %v464_v11 = vld [vmem:[%s581_s2 + $0x10] sm:$0xff]   ;;  %vm341_vm0 = vcmp.eq.s32.totalorder %v339_v61, 1  ;;  %vm340_vm1 = vcmp.eq.s32.totalorder %v339_v61, 0 }
   0x5   :  { %435 = vmatprep.subr.bf16.mxu1 %v456_v3  ;;  %v469_v12 = vld [vmem:[%s582_s1] sm:$0xff]   ;;  %v465_v14 = vld [vmem:[%s580_s3 + $0x8] sm:$0xff]  }
   0x6   :  { %v470_v13 = vld [vmem:[%s583_s0] sm:$0xff]   ;;  %429 = vmatprep.mubr.bf16.mxu0 %v469_v12  ;;  %v466_v15 = vld [vmem:[%s581_s2 + $0x8] sm:$0xff]  }
   0x7   :  { %416 = vmatpush3.bf16.msra.mxu0 %v455_v2  ;;  %449 = vmatprep.mubr.bf16.mxu1 %v470_v13  ;;  %v467_v16 = vld [vmem:[%s580_s3] sm:$0xff]   ;;  %v471_v18 = vld [vmem:[%s582_s1 + $0x8] sm:$0xff]  }
   0x8   :  { %436 = vmatpush3.bf16.msra.mxu1 %v456_v3  ;;  %417 = vmatprep.subr.bf16.mxu0 %v457_v4  ;;  %v468_v17 = vld [vmem:[%s581_s2] sm:$0xff]   ;;  %v472_v19 = vld [vmem:[%s583_s0 + $0x8] sm:$0xff]  }
   0x9   :  { %437 = vmatprep.subr.bf16.mxu1 %v458_v5  ;;  %v373_v24 = vld [vmem:[%s584_s4] ss:$0 sm:$0xff] }
   0xb   :  { %418 = vmatpush3.bf16.msra.mxu0 %v457_v4 }
   0xc   :  { %438 = vmatpush3.bf16.msra.mxu1 %v458_v5  ;;  %419 = vmatprep.subr.bf16.mxu0 %v459_v6 }
   0xd   :  { %439 = vmatprep.subr.bf16.mxu1 %v460_v7 }
   0xf   :  { %420 = vmatpush3.bf16.msra.mxu0 %v459_v6 }
  0x10   :  { %440 = vmatpush3.bf16.msra.mxu1 %v460_v7  ;;  %421 = vmatprep.subr.bf16.mxu0 %v461_v8 }
  0x11   :  { %441 = vmatprep.subr.bf16.mxu1 %v462_v9 }
  0x13   :  { %422 = vmatpush3.bf16.msra.mxu0 %v461_v8 }
  0x14   :  { %442 = vmatpush3.bf16.msra.mxu1 %v462_v9  ;;  %423 = vmatprep.subr.bf16.mxu0 %v463_v10 }
  0x15   :  { %443 = vmatprep.subr.bf16.mxu1 %v464_v11 }
  0x17   :  { %424 = vmatpush3.bf16.msra.mxu0 %v463_v10 }
  0x18   :  { %444 = vmatpush3.bf16.msra.mxu1 %v464_v11  ;;  %425 = vmatprep.subr.bf16.mxu0 %v465_v14 }
  0x19   :  { %445 = vmatprep.subr.bf16.mxu1 %v466_v15 }
  0x1b   :  { %426 = vmatpush3.bf16.msra.mxu0 %v465_v14 }
  0x1c   :  { %446 = vmatpush3.bf16.msra.mxu1 %v466_v15  ;;  %427 = vmatprep.subr.bf16.mxu0 %v467_v16 }
  0x1d   :  { %447 = vmatprep.subr.bf16.mxu1 %v468_v17 }
  0x1f   :  { %428 = vmatpush3.bf16.msra.mxu0 %v467_v16 }
  0x20   :  { %448 = vmatpush3.bf16.msra.mxu1 %v468_v17 }
  0x22   :  { %430 = vmatmul.mubr.bf16.vlgmr.msra.gmra.mxu0 %v471_v18 }
  0x23   :  { %450 = vmatmul.mubr.bf16.vlgmr.msra.gmra.mxu1 %v472_v19 }
  0xe2   :  { %v431_v20 = vpop.f32.mrf.mxu0 }
  0xe3   :  { %v451_v21 = vpop.f32.mrf.mxu1 }
  0xe4   :  { %v275_v22 = vadd.f32 %v451_v21, %v431_v20  ;;  %v157_v23 = vpop.f32.mrf.mxu0 }
  0xe5   :  { %v266_v25 = vpop.f32.mrf.mxu1 }
  0xe6   :  { %v267_v26 = vadd.f32 %v266_v25, %v157_v23  ;;  %v432_v27 = vpop.f32.mrf.mxu0  ;;  %v290_v29 = vadd.f32 %v373_v24, %v275_v22 }
  0xe7   :  { %v452_v28 = vpop.f32.mrf.mxu1 }
  0xe8   :  { %v288_v30 = vadd.f32 %v373_v24, %v267_v26  ;;  %v278_v31 = vadd.f32 %v452_v28, %v432_v27  ;;  %v160_v32 = vpop.f32.mrf.mxu0  ;;  %v294_v36 = vmax.f32 %v290_v29, 0.0 }
  0xe9   :  { %v269_v33 = vpop.f32.mrf.mxu1 }
  0xea   :  { %v291_v34 = vadd.f32 %v373_v24, %v278_v31  ;;  %v270_v35 = vadd.f32 %v269_v33, %v160_v32  ;;  %v292_v37 = vmax.f32 %v288_v30, 0.0  ;;  %v327_v46 = vmul.f32 %v294_v36, %v294_v36 }
  0xec   :  { %v295_v38 = vmax.f32 %v291_v34, 0.0  ;;  %v289_v39 = vadd.f32 %v373_v24, %v270_v35  ;;  %v325_v42 = vmul.f32 %v292_v37, %v292_v37 }
  0xee   :  { %v390_v40 = vpack.c.bf16 %v295_v38, %v294_v36  ;;  %v293_v41 = vmax.f32 %v289_v39, 0.0  ;;  %v328_v49 = vmul.f32 %v295_v38, %v295_v38 }
  0xf0   :  { %392 = vst [vmem:[%s585_s5 + $0x8] sm:$0xff] %v390_v40   ;;  %v385_v43 = vpack.c.bf16 %v293_v41, %v292_v37  ;;  %v316_v44 = vadd.f32 %v293_v41, %v292_v37  ;;  %v326_v45 = vmul.f32 %v293_v41, %v293_v41 }
  0xf2   :  { %386 = vst [vmem:[%s585_s5] sm:$0xff] %v385_v43   ;;  %v317_v47 = vadd.f32 %v316_v44, %v294_v36  ;;  %v329_v48 = vadd.f32 %v326_v45, %v325_v42 }
  0xf4   :  { %v318_v50 = vadd.f32 %v317_v47, %v295_v38  ;;  %v330_v51 = vadd.f32 %v329_v48, %v327_v46 }
  0xf6   :  { %v319_v52 = vrot.slane %v318_v50, 4  ;;  %v331_v53 = vadd.f32 %v330_v51, %v328_v49 }
  0xf8   :  { %v320_v54 = vadd.f32 %v319_v52, %v318_v50  ;;  %v332_v55 = vrot.slane %v331_v53, 4 }
  0xfa   :  { %v321_v57 = vrot.slane %v320_v54, 2  ;;  %v333_v58 = vadd.f32 %v332_v55, %v331_v53 }
  0xfc   :  { %v322_v59 = vadd.f32 %v321_v57, %v320_v54  ;;  %v334_v60 = vrot.slane %v333_v58, 2 }
  0xfe   :  { %v335_v62 = vadd.f32 %v334_v60, %v333_v58  ;;  %v323_v63 = vrot.slane %v322_v59, 1 }
 0x100   :  { %v336_v0 = vrot.slane %v335_v62, 1  ;;  %v324_v2 = vadd.f32 %v323_v63, %v322_v59 }
 0x102   :  { %v337_v1 = vadd.f32 %v336_v0, %v335_v62 }
 0x104   :  { %v342_v3 = vsel %vm341_vm0, %v337_v1, 0.0 }
 0x105   :  { %v343_v4 = vsel %vm340_vm1, %v324_v2, %v342_v3 }
 0x106   :  { %344 = vst [vmem:[%s586_s6] sm:$0xff] %v343_v4 }

// kernel: unet_forward.29
= control target key start
LH: loop header
LB: loop body
LE: loop exit
PB: predicated region body
PF: predicated region fallthrough
CT: control target
= control target key end

     0   :  { %s931_s3 = inlined_call_operand.vmem [shape: bf16[256,128], index: 3, kind: input, shape index: {}]   ;;  %s932_s2 = inlined_call_operand.vmem [shape: bf16[256,128], index: 2, kind: input, shape index: {}]   ;;  %s933_s1 = inlined_call_operand.vmem [shape: bf16[48,256], index: 1, kind: input, shape index: {}]   ;;  %s934_s0 = inlined_call_operand.vmem [shape: bf16[48,256], index: 0, kind: input, shape index: {}]   ;;  %s935_s4 = inlined_call_operand.vmem [shape: f32[1,128], index: 4, kind: input, shape index: {}]   ;;  %s936_s5 = inlined_call_operand.vmem [shape: bf16[48,128], index: 5, kind: output, shape index: {0}]   ;;  %s937_s6 = inlined_call_operand.vmem [shape: f32[1,8,128], index: 6, kind: output, shape index: {1}]  }
   0x1   :  { %v699_v0 = vld [vmem:[%s931_s3 + $0x78] sm:$0xff]   ;;  %v703_v4 = vld [vmem:[%s931_s3 + $0x70] sm:$0xff]   ;;  %v707_v8 = vld [vmem:[%s931_s3 + $0x68] sm:$0xff]  }
   0x2   :  { %v700_v1 = vld [vmem:[%s932_s2 + $0x78] sm:$0xff]   ;;  %631 = vmatprep.subr.bf16.mxu0 %v699_v0  ;;  %v704_v5 = vld [vmem:[%s932_s2 + $0x70] sm:$0xff]   ;;  %v708_v9 = vld [vmem:[%s932_s2 + $0x68] sm:$0xff]  }
   0x3   :  { %v701_v2 = vld [vmem:[%s931_s3 + $0x38] sm:$0xff]   ;;  %665 = vmatprep.subr.bf16.mxu1 %v700_v1  ;;  %v705_v6 = vld [vmem:[%s931_s3 + $0x30] sm:$0xff]   ;;  %v709_v10 = vld [vmem:[%s931_s3 + $0x28] sm:$0xff]  }
   0x4   :  { %v702_v3 = vld [vmem:[%s932_s2 + $0x38] sm:$0xff]   ;;  %632 = vmatpush3.bf16.msra.mxu0 %v701_v2  ;;  %v706_v7 = vld [vmem:[%s932_s2 + $0x30] sm:$0xff]   ;;  %v710_v11 = vld [vmem:[%s932_s2 + $0x28] sm:$0xff]  }
   0x5   :  { %666 = vmatpush3.bf16.msra.mxu1 %v702_v3  ;;  %633 = vmatprep.subr.bf16.mxu0 %v703_v4  ;;  %v711_v12 = vld [vmem:[%s931_s3 + $0x60] sm:$0xff]   ;;  %v715_v16 = vld [vmem:[%s931_s3 + $0x58] sm:$0xff]   ;;  %v719_v20 = vld [vmem:[%s931_s3 + $0x50] sm:$0xff]  }
   0x6   :  { %667 = vmatprep.subr.bf16.mxu1 %v704_v5  ;;  %v712_v13 = vld [vmem:[%s932_s2 + $0x60] sm:$0xff]   ;;  %v716_v17 = vld [vmem:[%s932_s2 + $0x58] sm:$0xff]   ;;  %v720_v21 = vld [vmem:[%s932_s2 + $0x50] sm:$0xff]  }
   0x7   :  { %v713_v14 = vld [vmem:[%s931_s3 + $0x20] sm:$0xff]   ;;  %v717_v18 = vld [vmem:[%s931_s3 + $0x18] sm:$0xff]   ;;  %v721_v22 = vld [vmem:[%s931_s3 + $0x10] sm:$0xff]  }
   0x8   :  { %634 = vmatpush3.bf16.msra.mxu0 %v705_v6  ;;  %v714_v15 = vld [vmem:[%s932_s2 + $0x20] sm:$0xff]   ;;  %v718_v19 = vld [vmem:[%s932_s2 + $0x18] sm:$0xff]   ;;  %v722_v23 = vld [vmem:[%s932_s2 + $0x10] sm:$0xff]  }
   0x9   :  { %668 = vmatpush3.bf16.msra.mxu1 %v706_v7  ;;  %635 = vmatprep.subr.bf16.mxu0 %v707_v8  ;;  %v723_v24 = vld [vmem:[%s931_s3 + $0x48] sm:$0xff]   ;;  %v727_v28 = vld [vmem:[%s931_s3 + $0x40] sm:$0xff]   ;;  %v737_v36 = vld [vmem:[%s933_s1 + $0x14] ss:$8 sps:$4 sm:$0xff]  }
   0xa   :  { %669 = vmatprep.subr.bf16.mxu1 %v708_v9  ;;  %v724_v25 = vld [vmem:[%s932_s2 + $0x48] sm:$0xff]   ;;  %v728_v29 = vld [vmem:[%s932_s2 + $0x40] sm:$0xff]   ;;  %v739_v37 = vld [vmem:[%s934_s0 + $0x14] ss:$8 sps:$4 sm:$0xff]  }
   0xb   :  { %v725_v26 = vld [vmem:[%s931_s3 + $0x8] sm:$0xff]   ;;  %v729_v30 = vld [vmem:[%s931_s3] sm:$0xff]   ;;  %v741_v38 = vld [vmem:[%s933_s1 + $0x10] ss:$8 sps:$4 sm:$0xff]  }
   0xc   :  { %636 = vmatpush3.bf16.msra.mxu0 %v709_v10  ;;  %v726_v27 = vld [vmem:[%s932_s2 + $0x8] sm:$0xff]   ;;  %v730_v31 = vld [vmem:[%s932_s2] sm:$0xff]   ;;  %v742_v39 = vld [vmem:[%s934_s0 + $0x10] ss:$8 sps:$4 sm:$0xff]  }
   0xd   :  { %670 = vmatpush3.bf16.msra.mxu1 %v710_v11  ;;  %637 = vmatprep.subr.bf16.mxu0 %v711_v12  ;;  %v731_v32 = vld [vmem:[%s933_s1] ss:$8 sps:$4 sm:$0xff]   ;;  %v733_v33 = vld [vmem:[%s933_s1 + $0x4] ss:$8 sps:$4 sm:$0xff]  }
   0xe   :  { %671 = vmatprep.subr.bf16.mxu1 %v712_v13  ;;  %v734_v34 = vld [vmem:[%s934_s0] ss:$8 sps:$4 sm:$0xff]   ;;  %v736_v35 = vld [vmem:[%s934_s0 + $0x4] ss:$8 sps:$4 sm:$0xff]   ;;  %257 = vmatprep.mubr.bf16.mxu0 %v733_v33 }
   0xf   :  { %440 = vmatprep.mubr.bf16.mxu1 %v736_v35  ;;  %v743_v40 = vld [vmem:[%s933_s1 + $0x24] ss:$8 sps:$4 sm:$0xff]   ;;  %v747_v42 = vld [vmem:[%s933_s1 + $0x20] ss:$8 sps:$4 sm:$0xff]  }
  0x10   :  { %638 = vmatpush3.bf16.msra.mxu0 %v713_v14  ;;  %v745_v41 = vld [vmem:[%s934_s0 + $0x24] ss:$8 sps:$4 sm:$0xff]   ;;  %v748_v43 = vld [vmem:[%s934_s0 + $0x20] ss:$8 sps:$4 sm:$0xff]  }
  0x11   :  { %672 = vmatpush3.bf16.msra.mxu1 %v714_v15  ;;  %639 = vmatprep.subr.bf16.mxu0 %v715_v16  ;;  %v601_v54 = vld [vmem:[%s935_s4] ss:$0 sm:$0xff] }
  0x12   :  { %673 = vmatprep.subr.bf16.mxu1 %v716_v17 }
  0x14   :  { %640 = vmatpush3.bf16.msra.mxu0 %v717_v18 }
  0x15   :  { %674 = vmatpush3.bf16.msra.mxu1 %v718_v19  ;;  %641 = vmatprep.subr.bf16.mxu0 %v719_v20 }
  0x16   :  { %675 = vmatprep.subr.bf16.mxu1 %v720_v21 }
  0x18   :  { %642 = vmatpush3.bf16.msra.mxu0 %v721_v22 }
  0x19   :  { %676 = vmatpush3.bf16.msra.mxu1 %v722_v23  ;;  %643 = vmatprep.subr.bf16.mxu0 %v723_v24 }
  0x1a   :  { %677 = vmatprep.subr.bf16.mxu1 %v724_v25 }
  0x1c   :  { %644 = vmatpush3.bf16.msra.mxu0 %v725_v26 }
  0x1d   :  { %678 = vmatpush3.bf16.msra.mxu1 %v726_v27  ;;  %645 = vmatprep.subr.bf16.mxu0 %v727_v28 }
  0x1e   :  { %679 = vmatprep.subr.bf16.mxu1 %v728_v29 }
  0x20   :  { %646 = vmatpush3.bf16.msra.mxu0 %v729_v30 }
  0x21   :  { %680 = vmatpush3.bf16.msra.mxu1 %v730_v31 }
  0x23   :  { %258 = vmatmul.mubr.bf16.vlgmr.msra.gmra.mxu0 %v731_v32 }
  0x24   :  { %441 = vmatmul.mubr.bf16.vlgmr.msra.gmra.mxu1 %v734_v34  ;;  %265 = vmatprep.mubr.bf16.mxu0 %v737_v36 }
  0x25   :  { %448 = vmatprep.mubr.bf16.mxu1 %v739_v37 }
  0x2b   :  { %266 = vmatmul.mubr.bf16.gmra.mxu0 %v741_v38 }
  0x2c   :  { %449 = vmatmul.mubr.bf16.gmra.mxu1 %v742_v39  ;;  %273 = vmatprep.mubr.bf16.mxu0 %v743_v40 }
  0x2d   :  { %456 = vmatprep.mubr.bf16.mxu1 %v745_v41 }
  0x33   :  { %274 = vmatmul.mubr.bf16.gmra.mxu0 %v747_v42 }
  0x34   :  { %457 = vmatmul.mubr.bf16.gmra.mxu1 %v748_v43 }
  0xe3   :  { %v647_v44 = vpop.f32.mrf.mxu0 }
  0xe4   :  { %v681_v45 = vpop.f32.mrf.mxu1 }
  0xe5   :  { %v648_v46 = vpop.f32.mrf.mxu0 }
  0xe6   :  { %v649_v47 = vadd.f32 %v648_v46, %v647_v44  ;;  %v682_v48 = vpop.f32.mrf.mxu1 }
  0xe7   :  { %v683_v49 = vadd.f32 %v682_v48, %v681_v45  ;;  %v650_v50 = vpop.f32.mrf.mxu0 }
  0xe8   :  { %v684_v51 = vpop.f32.mrf.mxu1 }
  0xe9   :  { %v443_v52 = vadd.f32 %v683_v49, %v649_v47  ;;  %v651_v53 = vpop.f32.mrf.mxu0 }
  0xea   :  { %v652_v55 = vadd.f32 %v651_v53, %v650_v50  ;;  %v685_v56 = vpop.f32.mrf.mxu1 }
  0xeb   :  { %v686_v57 = vadd.f32 %v685_v56, %v684_v51  ;;  %v653_v58 = vpop.f32.mrf.mxu0  ;;  %v472_v60 = vadd.f32 %v601_v54, %v443_v52 }
  0xec   :  { %v687_v59 = vpop.f32.mrf.mxu1 }
  0xed   :  { %v446_v61 = vadd.f32 %v686_v57, %v652_v55  ;;  %v654_v62 = vpop.f32.mrf.mxu0  ;;  %v478_v5 = vmax.f32 %v472_v60, 0.0 }
  0xee   :  { %v655_v63 = vadd.f32 %v654_v62, %v653_v58  ;;  %v688_v0 = vpop.f32.mrf.mxu1  ;;  %v542_v58 = vlaneseq }
  0xef   :  { %v473_v1 = vadd.f32 %v601_v54, %v446_v61  ;;  %v689_v2 = vadd.f32 %v688_v0, %v687_v59  ;;  %v656_v3 = vpop.f32.mrf.mxu0  ;;  %v525_v28 = vmul.f32 %v478_v5, %v478_v5 }
  0xf0   :  { %v690_v4 = vpop.f32.mrf.mxu1  ;;  %v543_v62 = vshrl.u32 %v542_v58, 7 }
  0xf1   :  { %v479_v6 = vmax.f32 %v473_v1, 0.0  ;;  %v451_v7 = vadd.f32 %v689_v2, %v655_v63  ;;  %v657_v8 = vpop.f32.mrf.mxu0 }
  0xf2   :  { %v658_v9 = vadd.f32 %v657_v8, %v656_v3  ;;  %v691_v10 = vpop.f32.mrf.mxu1  ;;  %vm545_vm0 = vcmp.eq.s32.totalorder %v543_v62, 1  ;;  %vm544_vm1 = vcmp.eq.s32.totalorder %v543_v62, 0 }
  0xf3   :  { %v617_v11 = vpack.c.bf16 %v479_v6, %v478_v5  ;;  %v474_v12 = vadd.f32 %v601_v54, %v451_v7  ;;  %v659_v13 = vpop.f32.mrf.mxu0  ;;  %v692_v14 = vadd.f32 %v691_v10, %v690_v4  ;;  %v526_v23 = vmul.f32 %v479_v6, %v479_v6 }
  0xf4   :  { %v693_v15 = vpop.f32.mrf.mxu1  ;;  %v514_v32 = vadd.f32 %v479_v6, %v478_v5 }
  0xf5   :  { %618 = vst [vmem:[%s936_s5] sm:$0xff] %v617_v11   ;;  %v660_v16 = vpop.f32.mrf.mxu0  ;;  %v454_v17 = vadd.f32 %v692_v14, %v658_v9  ;;  %v480_v20 = vmax.f32 %v474_v12, 0.0  ;;  %v531_v36 = vadd.f32 %v526_v23, %v525_v28 }
  0xf6   :  { %v661_v18 = vadd.f32 %v660_v16, %v659_v13  ;;  %v694_v19 = vpop.f32.mrf.mxu1 }
  0xf7   :  { %v695_v21 = vadd.f32 %v694_v19, %v693_v15  ;;  %v662_v22 = vpop.f32.mrf.mxu0  ;;  %v475_v24 = vadd.f32 %v601_v54, %v454_v17  ;;  %v527_v33 = vmul.f32 %v480_v20, %v480_v20  ;;  %v515_v38 = vadd.f32 %v514_v32, %v480_v20 }
  0xf8   :  { %v696_v25 = vpop.f32.mrf.mxu1 }
  0xf9   :  { %v459_v26 = vadd.f32 %v695_v21, %v661_v18  ;;  %v663_v27 = vpop.f32.mrf.mxu0  ;;  %v481_v29 = vmax.f32 %v475_v24, 0.0  ;;  %v532_v42 = vadd.f32 %v531_v36, %v527_v33 }
  0xfa   :  { %v664_v30 = vadd.f32 %v663_v27, %v662_v22  ;;  %v697_v31 = vpop.f32.mrf.mxu1 }
  0xfb   :  { %v476_v34 = vadd.f32 %v601_v54, %v459_v26  ;;  %v698_v35 = vadd.f32 %v697_v31, %v696_v25  ;;  %v622_v37 = vpack.c.bf16 %v481_v29, %v480_v20  ;;  %v528_v39 = vmul.f32 %v481_v29, %v481_v29 }
  0xfc   :  { %v516_v43 = vadd.f32 %v515_v38, %v481_v29 }
  0xfd   :  { %v482_v40 = vmax.f32 %v476_v34, 0.0  ;;  %v462_v41 = vadd.f32 %v698_v35, %v664_v30  ;;  %629 = vst [vmem:[%s936_s5 + $0x8] sm:$0xff] %v622_v37   ;;  %v533_v46 = vadd.f32 %v532_v42, %v528_v39 }
  0xff   :  { %v529_v44 = vmul.f32 %v482_v40, %v482_v40  ;;  %v477_v45 = vadd.f32 %v601_v54, %v462_v41  ;;  %v517_v47 = vadd.f32 %v516_v43, %v482_v40 }
 0x101   :  { %v483_v48 = vmax.f32 %v477_v45, 0.0  ;;  %v534_v49 = vadd.f32 %v533_v46, %v529_v44 }
 0x103   :  { %v627_v50 = vpack.c.bf16 %v483_v48, %v482_v40  ;;  %v518_v51 = vadd.f32 %v517_v47, %v483_v48  ;;  %v530_v52 = vmul.f32 %v483_v48, %v483_v48 }
 0x105   :  { %630 = vst [vmem:[%s936_s5 + $0x10] sm:$0xff] %v627_v50   ;;  %v519_v53 = vrot.slane %v518_v51, 4  ;;  %v535_v55 = vadd.f32 %v534_v49, %v530_v52 }
 0x107   :  { %v520_v56 = vadd.f32 %v519_v53, %v518_v51  ;;  %v536_v57 = vrot.slane %v535_v55, 4 }
 0x109   :  { %v521_v59 = vrot.slane %v520_v56, 2  ;;  %v537_v60 = vadd.f32 %v536_v57, %v535_v55 }
 0x10b   :  { %v522_v61 = vadd.f32 %v521_v59, %v520_v56  ;;  %v538_v54 = vrot.slane %v537_v60, 2 }
 0x10d   :  { %v539_v63 = vadd.f32 %v538_v54, %v537_v60  ;;  %v523_v0 = vrot.slane %v522_v61, 1 }
 0x10f   :  { %v540_v1 = vrot.slane %v539_v63, 1  ;;  %v524_v3 = vadd.f32 %v523_v0, %v522_v61 }
 0x111   :  { %v541_v2 = vadd.f32 %v540_v1, %v539_v63 }
 0x113   :  { %v546_v4 = vsel %vm545_vm0, %v541_v2, 0.0 }
 0x114   :  { %v547_v5 = vsel %vm544_vm1, %v524_v3, %v546_v4 }
 0x115   :  { %548 = vst [vmem:[%s937_s6] sm:$0xff] %v547_v5 }

// kernel: unet_forward.27
= control target key start
LH: loop header
LB: loop body
LE: loop exit
PB: predicated region body
PF: predicated region fallthrough
CT: control target
= control target key end

     0   :  { %s1888_s3 = inlined_call_operand.vmem [shape: bf16[512,128], index: 3, kind: input, shape index: {}]   ;;  %s1889_s1 = inlined_call_operand.vmem [shape: bf16[64,512], index: 1, kind: input, shape index: {}]   ;;  %s1890_s2 = inlined_call_operand.vmem [shape: bf16[512,128], index: 2, kind: input, shape index: {}]   ;;  %s1891_s0 = inlined_call_operand.vmem [shape: bf16[64,512], index: 0, kind: input, shape index: {}]   ;;  %s1892_s4 = inlined_call_operand.vmem [shape: f32[1,128], index: 4, kind: input, shape index: {}]   ;;  %s1893_s5 = inlined_call_operand.vmem [shape: bf16[64,128], index: 5, kind: output, shape index: {0}]   ;;  %s1894_s6 = inlined_call_operand.vmem [shape: f32[1,8,128], index: 6, kind: output, shape index: {1}]  }
   0x1   :  { %v1395_v0 = vld [vmem:[%s1888_s3 + $0x78] sm:$0xff]   ;;  %v1399_v4 = vld [vmem:[%s1888_s3 + $0x70] sm:$0xff]   ;;  %v1403_v8 = vld [vmem:[%s1888_s3 + $0x68] sm:$0xff]  }
   0x2   :  { %v1396_v1 = vld [vmem:[%s1888_s3 + $0xf8] sm:$0xff]   ;;  %1235 = vmatprep.subr.bf16.mxu0 %v1395_v0  ;;  %v1400_v5 = vld [vmem:[%s1888_s3 + $0xf0] sm:$0xff]   ;;  %v1404_v9 = vld [vmem:[%s1888_s3 + $0xe8] sm:$0xff]  }
   0x3   :  { %v1397_v2 = vld [vmem:[%s1888_s3 + $0x38] sm:$0xff]   ;;  %1275 = vmatprep.subr.bf16.mxu1 %v1396_v1  ;;  %v1401_v6 = vld [vmem:[%s1888_s3 + $0x30] sm:$0xff]   ;;  %v1405_v10 = vld [vmem:[%s1888_s3 + $0x28] sm:$0xff]  }
   0x4   :  { %v1398_v3 = vld [vmem:[%s1888_s3 + $0xb8] sm:$0xff]   ;;  %1236 = vmatpush3.bf16.msra.mxu0 %v1397_v2  ;;  %v1402_v7 = vld [vmem:[%s1888_s3 + $0xb0] sm:$0xff]   ;;  %v1406_v11 = vld [vmem:[%s1888_s3 + $0xa8] sm:$0xff]  }
   0x5   :  { %1276 = vmatpush3.bf16.msra.mxu1 %v1398_v3  ;;  %1237 = vmatprep.subr.bf16.mxu0 %v1399_v4  ;;  %v1407_v12 = vld [vmem:[%s1888_s3 + $0x60] sm:$0xff]   ;;  %v1411_v16 = vld [vmem:[%s1888_s3 + $0x58] sm:$0xff]   ;;  %v1415_v20 = vld [vmem:[%s1888_s3 + $0x50] sm:$0xff]  }
   0x6   :  { %1277 = vmatprep.subr.bf16.mxu1 %v1400_v5  ;;  %v1408_v13 = vld [vmem:[%s1888_s3 + $0xe0] sm:$0xff]   ;;  %v1412_v17 = vld [vmem:[%s1888_s3 + $0xd8] sm:$0xff]   ;;  %v1416_v21 = vld [vmem:[%s1888_s3 + $0xd0] sm:$0xff]  }
   0x7   :  { %v1409_v14 = vld [vmem:[%s1888_s3 + $0x20] sm:$0xff]   ;;  %v1413_v18 = vld [vmem:[%s1888_s3 + $0x18] sm:$0xff]   ;;  %v1417_v22 = vld [vmem:[%s1888_s3 + $0x10] sm:$0xff]  }
   0x8   :  { %1238 = vmatpush3.bf16.msra.mxu0 %v1401_v6  ;;  %v1410_v15 = vld [vmem:[%s1888_s3 + $0xa0] sm:$0xff]   ;;  %v1414_v19 = vld [vmem:[%s1888_s3 + $0x98] sm:$0xff]   ;;  %v1418_v23 = vld [vmem:[%s1888_s3 + $0x90] sm:$0xff]  }
   0x9   :  { %1278 = vmatpush3.bf16.msra.mxu1 %v1402_v7  ;;  %1239 = vmatprep.subr.bf16.mxu0 %v1403_v8  ;;  %v1419_v24 = vld [vmem:[%s1888_s3 + $0x48] sm:$0xff]   ;;  %v1423_v28 = vld [vmem:[%s1888_s3 + $0x40] sm:$0xff]   ;;  %v1433_v36 = vld [vmem:[%s1890_s2 + $0x78] sm:$0xff]  }
   0xa   :  { %1279 = vmatprep.subr.bf16.mxu1 %v1404_v9  ;;  %v1420_v25 = vld [vmem:[%s1888_s3 + $0xc8] sm:$0xff]   ;;  %v1424_v29 = vld [vmem:[%s1888_s3 + $0xc0] sm:$0xff]   ;;  %v1434_v37 = vld [vmem:[%s1890_s2 + $0xf8] sm:$0xff]  }
   0xb   :  { %v1421_v26 = vld [vmem:[%s1888_s3 + $0x8] sm:$0xff]   ;;  %v1425_v30 = vld [vmem:[%s1888_s3] sm:$0xff]   ;;  %v1435_v38 = vld [vmem:[%s1890_s2 + $0x38] sm:$0xff]  }
   0xc   :  { %1240 = vmatpush3.bf16.msra.mxu0 %v1405_v10  ;;  %v1422_v27 = vld [vmem:[%s1888_s3 + $0x88] sm:$0xff]   ;;  %v1426_v31 = vld [vmem:[%s1888_s3 + $0x80] sm:$0xff]   ;;  %v1436_v39 = vld [vmem:[%s1890_s2 + $0xb8] sm:$0xff]  }
   0xd   :  { %1280 = vmatpush3.bf16.msra.mxu1 %v1406_v11  ;;  %1241 = vmatprep.subr.bf16.mxu0 %v1407_v12  ;;  %v1427_v32 = vld [vmem:[%s1889_s1] ss:$16 sps:$4 sm:$0xff]   ;;  %v1429_v33 = vld [vmem:[%s1889_s1 + $0x4] ss:$16 sps:$4 sm:$0xff]   ;;  %v1430_v34 = vld [vmem:[%s1889_s1 + $0x8] ss:$16 sps:$4 sm:$0xff]  }
   0xe   :  { %1281 = vmatprep.subr.bf16.mxu1 %v1408_v13  ;;  %v1432_v35 = vld [vmem:[%s1889_s1 + $0xc] ss:$16 sps:$4 sm:$0xff]   ;;  %487 = vmatprep.mubr.bf16.mxu0 %v1429_v33  ;;  %v1437_v40 = vld [vmem:[%s1890_s2 + $0x70] sm:$0xff]   ;;  %v1446_v47 = vld [vmem:[%s1889_s1 + $0x28] ss:$16 sps:$4 sm:$0xff]  }
   0xf   :  { %552 = vmatprep.mubr.bf16.mxu1 %v1432_v35  ;;  %v1438_v41 = vld [vmem:[%s1890_s2 + $0xf0] sm:$0xff]   ;;  %v1443_v45 = vld [vmem:[%s1889_s1 + $0x2c] ss:$16 sps:$4 sm:$0xff]   ;;  %v1451_v52 = vld [vmem:[%s1890_s2 + $0x60] sm:$0xff]  }
  0x10   :  { %1242 = vmatpush3.bf16.msra.mxu0 %v1409_v14  ;;  %v1439_v42 = vld [vmem:[%s1890_s2 + $0x30] sm:$0xff]   ;;  %v1447_v48 = vld [vmem:[%s1890_s2 + $0x68] sm:$0xff]   ;;  %v1452_v53 = vld [vmem:[%s1890_s2 + $0xe0] sm:$0xff]  }
  0x11   :  { %1282 = vmatpush3.bf16.msra.mxu1 %v1410_v15  ;;  %1243 = vmatprep.subr.bf16.mxu0 %v1411_v16  ;;  %v1440_v43 = vld [vmem:[%s1890_s2 + $0xb0] sm:$0xff]   ;;  %v1448_v49 = vld [vmem:[%s1890_s2 + $0xe8] sm:$0xff]   ;;  %v1453_v54 = vld [vmem:[%s1890_s2 + $0x20] sm:$0xff]  }
  0x12   :  { %1283 = vmatprep.subr.bf16.mxu1 %v1412_v17  ;;  %v1441_v44 = vld [vmem:[%s1889_s1 + $0x24] ss:$16 sps:$4 sm:$0xff]   ;;  %v1445_v46 = vld [vmem:[%s1889_s1 + $0x20] ss:$16 sps:$4 sm:$0xff]   ;;  %v1449_v50 = vld [vmem:[%s1890_s2 + $0x28] sm:$0xff]  }
  0x13   :  { %v1450_v51 = vld [vmem:[%s1890_s2 + $0xa8] sm:$0xff]   ;;  %v1454_v55 = vld [vmem:[%s1890_s2 + $0xa0] sm:$0xff]   ;;  %v1461_v60 = vld [vmem:[%s1890_s2 + $0x58] sm:$0xff]  }
  0x14   :  { %1244 = vmatpush3.bf16.msra.mxu0 %v1413_v18  ;;  %v1455_v56 = vld [vmem:[%s1889_s1 + $0x44] ss:$16 sps:$4 sm:$0xff]   ;;  %v1457_v57 = vld [vmem:[%s1889_s1 + $0x4c] ss:$16 sps:$4 sm:$0xff]   ;;  %v1459_v58 = vld [vmem:[%s1889_s1 + $0x40] ss:$16 sps:$4 sm:$0xff]  }
  0x15   :  { %1284 = vmatpush3.bf16.msra.mxu1 %v1414_v19  ;;  %1245 = vmatprep.subr.bf16.mxu0 %v1415_v20  ;;  %v1460_v59 = vld [vmem:[%s1889_s1 + $0x48] ss:$16 sps:$4 sm:$0xff]   ;;  %v1465_v0 = vld [vmem:[%s1890_s2 + $0x50] sm:$0xff]   ;;  %v1471_v5 = vld [vmem:[%s1889_s1 + $0x6c] ss:$16 sps:$4 sm:$0xff]  }
  0x16   :  { %1285 = vmatprep.subr.bf16.mxu1 %v1416_v21  ;;  %v1462_v61 = vld [vmem:[%s1890_s2 + $0xd8] sm:$0xff]   ;;  %v1466_v1 = vld [vmem:[%s1890_s2 + $0xd0] sm:$0xff]   ;;  %v1475_v8 = vld [vmem:[%s1890_s2 + $0x48] sm:$0xff]  }
  0x17   :  { %v1463_v62 = vld [vmem:[%s1890_s2 + $0x18] sm:$0xff]   ;;  %v1467_v2 = vld [vmem:[%s1890_s2 + $0x10] sm:$0xff]   ;;  %v1476_v9 = vld [vmem:[%s1890_s2 + $0xc8] sm:$0xff]  }
  0x18   :  { %1246 = vmatpush3.bf16.msra.mxu0 %v1417_v22  ;;  %v1464_v63 = vld [vmem:[%s1890_s2 + $0x98] sm:$0xff]   ;;  %v1468_v3 = vld [vmem:[%s1890_s2 + $0x90] sm:$0xff]   ;;  %v1477_v10 = vld [vmem:[%s1890_s2 + $0x8] sm:$0xff]  }
  0x19   :  { %1286 = vmatpush3.bf16.msra.mxu1 %v1418_v23  ;;  %1247 = vmatprep.subr.bf16.mxu0 %v1419_v24  ;;  %v1469_v4 = vld [vmem:[%s1889_s1 + $0x64] ss:$16 sps:$4 sm:$0xff]   ;;  %v1473_v6 = vld [vmem:[%s1889_s1 + $0x60] ss:$16 sps:$4 sm:$0xff]   ;;  %v1474_v7 = vld [vmem:[%s1889_s1 + $0x68] ss:$16 sps:$4 sm:$0xff]  }
  0x1a   :  { %1287 = vmatprep.subr.bf16.mxu1 %v1420_v25  ;;  %v1478_v11 = vld [vmem:[%s1890_s2 + $0x88] sm:$0xff]   ;;  %v1479_v12 = vld [vmem:[%s1890_s2 + $0x40] sm:$0xff]  }
  0x1b   :  { %v1480_v13 = vld [vmem:[%s1890_s2 + $0xc0] sm:$0xff]   ;;  %v1486_v18 = vld [vmem:[%s1891_s0 + $0x8] ss:$16 sps:$4 sm:$0xff]   ;;  %v1488_v19 = vld [vmem:[%s1891_s0 + $0xc] ss:$16 sps:$4 sm:$0xff]  }
  0x1c   :  { %1248 = vmatpush3.bf16.msra.mxu0 %v1421_v26  ;;  %v1481_v14 = vld [vmem:[%s1890_s2] sm:$0xff]   ;;  %v1491_v21 = vld [vmem:[%s1891_s0 + $0x2c] ss:$16 sps:$4 sm:$0xff]   ;;  %v1494_v24 = vld [vmem:[%s1891_s0 + $0x28] ss:$16 sps:$4 sm:$0xff]  }
  0x1d   :  { %1288 = vmatpush3.bf16.msra.mxu1 %v1422_v27  ;;  %1249 = vmatprep.subr.bf16.mxu0 %v1423_v28  ;;  %v1482_v15 = vld [vmem:[%s1890_s2 + $0x80] sm:$0xff]   ;;  %v1497_v25 = vld [vmem:[%s1891_s0 + $0x4c] ss:$16 sps:$4 sm:$0xff]   ;;  %v1500_v28 = vld [vmem:[%s1891_s0 + $0x48] ss:$16 sps:$4 sm:$0xff]  }
  0x1e   :  { %1289 = vmatprep.subr.bf16.mxu1 %v1424_v29  ;;  %v1483_v16 = vld [vmem:[%s1891_s0] ss:$16 sps:$4 sm:$0xff]   ;;  %v1485_v17 = vld [vmem:[%s1891_s0 + $0x4] ss:$16 sps:$4 sm:$0xff]   ;;  %v1503_v29 = vld [vmem:[%s1891_s0 + $0x6c] ss:$16 sps:$4 sm:$0xff]  }
  0x1f   :  { %v1489_v20 = vld [vmem:[%s1891_s0 + $0x24] ss:$16 sps:$4 sm:$0xff]   ;;  %v1493_v22 = vld [vmem:[%s1891_s0 + $0x20] ss:$16 sps:$4 sm:$0xff]  }
  0x20   :  { %1250 = vmatpush3.bf16.msra.mxu0 %v1425_v30  ;;  %v1495_v23 = vld [vmem:[%s1891_s0 + $0x44] ss:$16 sps:$4 sm:$0xff]   ;;  %v1499_v26 = vld [vmem:[%s1891_s0 + $0x40] ss:$16 sps:$4 sm:$0xff]  }
  0x21   :  { %1290 = vmatpush3.bf16.msra.mxu1 %v1426_v31  ;;  %1315 = vmatprep.subr.bf16.mxu0 %v1433_v36  ;;  %v1501_v27 = vld [vmem:[%s1891_s0 + $0x64] ss:$16 sps:$4 sm:$0xff]   ;;  %v1505_v30 = vld [vmem:[%s1891_s0 + $0x60] ss:$16 sps:$4 sm:$0xff]   ;;  %v1506_v31 = vld [vmem:[%s1891_s0 + $0x68] ss:$16 sps:$4 sm:$0xff]  }
  0x22   :  { %1355 = vmatprep.subr.bf16.mxu1 %v1434_v37 }
  0x23   :  { %488 = vmatmul.mubr.bf16.vlgmr.msra.gmra.mxu0 %v1427_v32 }
  0x24   :  { %553 = vmatmul.mubr.bf16.vlgmr.msra.gmra.mxu1 %v1430_v34  ;;  %1316 = vmatpush3.bf16.msra.mxu0 %v1435_v38 }
  0x25   :  { %1356 = vmatpush3.bf16.msra.mxu1 %v1436_v39  ;;  %1317 = vmatprep.subr.bf16.mxu0 %v1437_v40 }
  0x26   :  { %1357 = vmatprep.subr.bf16.mxu1 %v1438_v41  ;;  %495 = vmatprep.mubr.bf16.mxu0 %v1441_v44 }
  0x27   :  { %560 = vmatprep.mubr.bf16.mxu1 %v1443_v45 }
  0x28   :  { %1318 = vmatpush3.bf16.msra.mxu0 %v1439_v42 }
  0x29   :  { %1358 = vmatpush3.bf16.msra.mxu1 %v1440_v43  ;;  %1319 = vmatprep.subr.bf16.mxu0 %v1447_v48 }
  0x2a   :  { %1359 = vmatprep.subr.bf16.mxu1 %v1448_v49 }
  0x2b   :  { %496 = vmatmul.mubr.bf16.gmra.mxu0 %v1445_v46 }
  0x2c   :  { %561 = vmatmul.mubr.bf16.gmra.mxu1 %v1446_v47  ;;  %1320 = vmatpush3.bf16.msra.mxu0 %v1449_v50 }
  0x2d   :  { %1360 = vmatpush3.bf16.msra.mxu1 %v1450_v51  ;;  %1321 = vmatprep.subr.bf16.mxu0 %v1451_v52 }
  0x2e   :  { %1361 = vmatprep.subr.bf16.mxu1 %v1452_v53  ;;  %503 = vmatprep.mubr.bf16.mxu0 %v1455_v56 }
  0x2f   :  { %568 = vmatprep.mubr.bf16.mxu1 %v1457_v57 }
  0x30   :  { %1322 = vmatpush3.bf16.msra.mxu0 %v1453_v54 }
  0x31   :  { %1362 = vmatpush3.bf16.msra.mxu1 %v1454_v55  ;;  %1323 = vmatprep.subr.bf16.mxu0 %v1461_v60 }
  0x32   :  { %1363 = vmatprep.subr.bf16.mxu1 %v1462_v61 }
  0x33   :  { %504 = vmatmul.mubr.bf16.gmra.mxu0 %v1459_v58 }
  0x34   :  { %569 = vmatmul.mubr.bf16.gmra.mxu1 %v1460_v59  ;;  %1324 = vmatpush3.bf16.msra.mxu0 %v1463_v62 }
  0x35   :  { %1364 = vmatpush3.bf16.msra.mxu1 %v1464_v63  ;;  %1325 = vmatprep.subr.bf16.mxu0 %v1465_v0 }
  0x36   :  { %1365 = vmatprep.subr.bf16.mxu1 %v1466_v1  ;;  %511 = vmatprep.mubr.bf16.mxu0 %v1469_v4 }
  0x37   :  { %576 = vmatprep.mubr.bf16.mxu1 %v1471_v5 }
  0x38   :  { %1326 = vmatpush3.bf16.msra.mxu0 %v1467_v2 }
  0x39   :  { %1366 = vmatpush3.bf16.msra.mxu1 %v1468_v3  ;;  %1327 = vmatprep.subr.bf16.mxu0 %v1475_v8 }
  0x3a   :  { %1367 = vmatprep.subr.bf16.mxu1 %v1476_v9 }
  0x3b   :  { %512 = vmatmul.mubr.bf16.gmra.mxu0 %v1473_v6 }
  0x3c   :  { %577 = vmatmul.mubr.bf16.gmra.mxu1 %v1474_v7  ;;  %1328 = vmatpush3.bf16.msra.mxu0 %v1477_v10 }
  0x3d   :  { %1368 = vmatpush3.bf16.msra.mxu1 %v1478_v11  ;;  %1329 = vmatprep.subr.bf16.mxu0 %v1479_v12 }
  0x3e   :  { %1369 = vmatprep.subr.bf16.mxu1 %v1480_v13  ;;  %889 = vmatprep.mubr.bf16.mxu0 %v1485_v17 }
  0x3f   :  { %954 = vmatprep.mubr.bf16.mxu1 %v1488_v19 }
  0x40   :  { %1330 = vmatpush3.bf16.msra.mxu0 %v1481_v14 }
  0x41   :  { %1370 = vmatpush3.bf16.msra.mxu1 %v1482_v15 }
  0x43   :  { %890 = vmatmul.mubr.bf16.vlgmr.msra.gmra.mxu0 %v1483_v16 }
  0x44   :  { %955 = vmatmul.mubr.bf16.vlgmr.msra.gmra.mxu1 %v1486_v18  ;;  %897 = vmatprep.mubr.bf16.mxu0 %v1489_v20  ;;  %v1853_v20 = vld [vmem:[%s1892_s4] ss:$0 sm:$0xff] }
  0x45   :  { %962 = vmatprep.mubr.bf16.mxu1 %v1491_v21 }
  0x4b   :  { %898 = vmatmul.mubr.bf16.gmra.mxu0 %v1493_v22 }
  0x4c   :  { %905 = vmatprep.mubr.bf16.mxu0 %v1495_v23  ;;  %963 = vmatmul.mubr.bf16.gmra.mxu1 %v1494_v24 }
  0x4d   :  { %970 = vmatprep.mubr.bf16.mxu1 %v1497_v25 }
  0x53   :  { %906 = vmatmul.mubr.bf16.gmra.mxu0 %v1499_v26 }
  0x54   :  { %913 = vmatprep.mubr.bf16.mxu0 %v1501_v27  ;;  %971 = vmatmul.mubr.bf16.gmra.mxu1 %v1500_v28 }
  0x55   :  { %978 = vmatprep.mubr.bf16.mxu1 %v1503_v29 }
  0x5b   :  { %914 = vmatmul.mubr.bf16.gmra.mxu0 %v1505_v30 }
  0x5c   :  { %979 = vmatmul.mubr.bf16.gmra.mxu1 %v1506_v31 }
  0xe3   :  { %v1251_v32 = vpop.f32.mrf.mxu0 }
  0xe4   :  { %v1291_v33 = vpop.f32.mrf.mxu1 }
  0xe5   :  { %v1252_v34 = vpop.f32.mrf.mxu0 }
  0xe6   :  { %v1292_v35 = vpop.f32.mrf.mxu1  ;;  %v1253_v0 = vadd.f32 %v1252_v34, %v1251_v32 }
  0xe7   :  { %v1254_v36 = vpop.f32.mrf.mxu0  ;;  %v1293_v1 = vadd.f32 %v1292_v35, %v1291_v33 }
  0xe8   :  { %v1294_v37 = vpop.f32.mrf.mxu1 }
  0xe9   :  { %v1255_v38 = vpop.f32.mrf.mxu0  ;;  %v555_v7 = vadd.f32 %v1293_v1, %v1253_v0 }
  0xea   :  { %v1295_v39 = vpop.f32.mrf.mxu1  ;;  %v1256_v3 = vadd.f32 %v1255_v38, %v1254_v36 }
  0xeb   :  { %v1257_v40 = vpop.f32.mrf.mxu0  ;;  %v1296_v4 = vadd.f32 %v1295_v39, %v1294_v37 }
  0xec   :  { %v1297_v41 = vpop.f32.mrf.mxu1 }
  0xed   :  { %v1258_v42 = vpop.f32.mrf.mxu0  ;;  %v558_v13 = vadd.f32 %v1296_v4, %v1256_v3 }
  0xee   :  { %v1298_v43 = vpop.f32.mrf.mxu1  ;;  %v1259_v16 = vadd.f32 %v1258_v42, %v1257_v40 }
  0xef   :  { %v1260_v44 = vpop.f32.mrf.mxu0  ;;  %v1299_v17 = vadd.f32 %v1298_v43, %v1297_v41 }
  0xf0   :  { %v1300_v45 = vpop.f32.mrf.mxu1 }
  0xf1   :  { %v1261_v46 = vpop.f32.mrf.mxu0  ;;  %v563_v27 = vadd.f32 %v1299_v17, %v1259_v16 }
  0xf2   :  { %v1301_v47 = vpop.f32.mrf.mxu1  ;;  %v1262_v31 = vadd.f32 %v1261_v46, %v1260_v44 }
  0xf3   :  { %v1263_v48 = vpop.f32.mrf.mxu0  ;;  %v1302_v32 = vadd.f32 %v1301_v47, %v1300_v45 }
  0xf4   :  { %v1303_v49 = vpop.f32.mrf.mxu1 }
  0xf5   :  { %v1264_v50 = vpop.f32.mrf.mxu0  ;;  %v566_v1 = vadd.f32 %v1302_v32, %v1262_v31 }
  0xf6   :  { %v1304_v51 = vpop.f32.mrf.mxu1  ;;  %v1265_v37 = vadd.f32 %v1264_v50, %v1263_v48 }
  0xf7   :  { %v1830_v52 = vpop.f32.mrf.mxu0  ;;  %v1305_v41 = vadd.f32 %v1304_v51, %v1303_v49 }
  0xf8   :  { %v1832_v53 = vpop.f32.mrf.mxu1 }
  0xf9   :  { %v1267_v54 = vpop.f32.mrf.mxu0  ;;  %v571_v50 = vadd.f32 %v1305_v41, %v1265_v37 }
  0xfa   :  { %v1307_v55 = vpop.f32.mrf.mxu1  ;;  %v1268_v44 = vadd.f32 %v1267_v54, %v1830_v52 }
  0xfb   :  { %v1834_v56 = vpop.f32.mrf.mxu0  ;;  %v1308_v45 = vadd.f32 %v1307_v55, %v1832_v53 }
  0xfc   :  { %v1836_v57 = vpop.f32.mrf.mxu1 }
  0xfd   :  { %v1838_v58 = vpop.f32.mrf.mxu0  ;;  %v574_v52 = vadd.f32 %v1308_v45, %v1268_v44 }
  0xfe   :  { %v1840_v59 = vpop.f32.mrf.mxu1 }
  0xff   :  { %v1842_v60 = vpop.f32.mrf.mxu0 }
 0x100   :  { %v1844_v61 = vpop.f32.mrf.mxu1 }
 0x101   :  { %v1846_v62 = vpop.f32.mrf.mxu0 }
 0x102   :  { %v1848_v63 = vpop.f32.mrf.mxu1 }
 0x103   :  { %v1331_v2 = vpop.f32.mrf.mxu0 }
 0x104   :  { %v1371_v5 = vpop.f32.mrf.mxu1 }
 0x105   :  { %v1332_v6 = vpop.f32.mrf.mxu0 }
 0x106   :  { %v1333_v8 = vadd.f32 %v1332_v6, %v1331_v2  ;;  %v1372_v9 = vpop.f32.mrf.mxu1 }
 0x107   :  { %v1334_v10 = vpop.f32.mrf.mxu0  ;;  %v1373_v12 = vadd.f32 %v1372_v9, %v1371_v5 }
 0x108   :  { %v892_v11 = vadd.f32 %v1333_v8, %v555_v7  ;;  %v1374_v14 = vpop.f32.mrf.mxu1 }
 0x109   :  { %v1335_v15 = vpop.f32.mrf.mxu0 }
 0x10a   :  { %v957_v18 = vadd.f32 %v1373_v12, %v892_v11  ;;  %v1336_v19 = vadd.f32 %v1335_v15, %v1334_v10  ;;  %v1375_v21 = vpop.f32.mrf.mxu1  ;;  %v1271_v12 = vadd.f32 %v1838_v58, %v1834_v56 }
 0x10b   :  { %v1337_v22 = vpop.f32.mrf.mxu0  ;;  %v1376_v24 = vadd.f32 %v1375_v21, %v1374_v14 }
 0x10c   :  { %v895_v23 = vadd.f32 %v1336_v19, %v558_v13  ;;  %v1377_v25 = vpop.f32.mrf.mxu1  ;;  %v994_v28 = vadd.f32 %v1853_v20, %v957_v18  ;;  %v1311_v13 = vadd.f32 %v1840_v59, %v1836_v57 }
 0x10d   :  { %v1338_v26 = vpop.f32.mrf.mxu0 }
 0x10e   :  { %v960_v29 = vadd.f32 %v1376_v24, %v895_v23  ;;  %v1339_v30 = vadd.f32 %v1338_v26, %v1337_v22  ;;  %v1378_v33 = vpop.f32.mrf.mxu1  ;;  %v1002_v42 = vmax.f32 %v994_v28, 0.0  ;;  %v1274_v23 = vadd.f32 %v1846_v62, %v1842_v60 }
 0x10f   :  { %v1340_v34 = vpop.f32.mrf.mxu0  ;;  %v1379_v38 = vadd.f32 %v1378_v33, %v1377_v25  ;;  %v1314_v24 = vadd.f32 %v1848_v63, %v1844_v61  ;;  %v579_v57 = vadd.f32 %v1311_v13, %v1271_v12 }
 0x110   :  { %v995_v35 = vadd.f32 %v1853_v20, %v960_v29  ;;  %v900_v36 = vadd.f32 %v1339_v30, %v563_v27  ;;  %v1380_v39 = vpop.f32.mrf.mxu1  ;;  %v1063_v31 = vmul.f32 %v1002_v42, %v1002_v42 }
 0x111   :  { %v1341_v40 = vpop.f32.mrf.mxu0  ;;  %v582_v63 = vadd.f32 %v1314_v24, %v1274_v23 }
 0x112   :  { %v1003_v43 = vmax.f32 %v995_v35, 0.0  ;;  %v1342_v0 = vadd.f32 %v1341_v40, %v1340_v34  ;;  %v965_v2 = vadd.f32 %v1379_v38, %v900_v36  ;;  %v1381_v3 = vpop.f32.mrf.mxu1 }
 0x113   :  { %v1343_v4 = vpop.f32.mrf.mxu0  ;;  %v1382_v47 = vadd.f32 %v1381_v3, %v1380_v39 }
 0x114   :  { %v1215_v5 = vpack.c.bf16 %v1003_v43, %v1002_v42  ;;  %v903_v46 = vadd.f32 %v1342_v0, %v566_v1  ;;  %v1383_v6 = vpop.f32.mrf.mxu1  ;;  %v996_v51 = vadd.f32 %v1853_v20, %v965_v2  ;;  %v1064_v59 = vmul.f32 %v1003_v43, %v1003_v43 }
 0x115   :  { %v1344_v48 = vpop.f32.mrf.mxu0  ;;  %v1050_v32 = vadd.f32 %v1003_v43, %v1002_v42 }
 0x116   :  { %1216 = vst [vmem:[%s1893_s5] sm:$0xff] %v1215_v5   ;;  %v1345_v49 = vadd.f32 %v1344_v48, %v1343_v4  ;;  %v968_v7 = vadd.f32 %v1382_v47, %v903_v46  ;;  %v1384_v8 = vpop.f32.mrf.mxu1  ;;  %v1004_v16 = vmax.f32 %v996_v51, 0.0  ;;  %v1071_v37 = vadd.f32 %v1064_v59, %v1063_v31 }
 0x117   :  { %v1346_v9 = vpop.f32.mrf.mxu0  ;;  %v1385_v11 = vadd.f32 %v1384_v8, %v1383_v6 }
 0x118   :  { %v908_v10 = vadd.f32 %v1345_v49, %v571_v50  ;;  %v997_v53 = vadd.f32 %v1853_v20, %v968_v7  ;;  %v1386_v54 = vpop.f32.mrf.mxu1  ;;  %v1065_v60 = vmul.f32 %v1004_v16, %v1004_v16  ;;  %v1051_v41 = vadd.f32 %v1050_v32, %v1004_v16 }
 0x119   :  { %v1347_v55 = vpop.f32.mrf.mxu0 }
 0x11a   :  { %v973_v14 = vadd.f32 %v1385_v11, %v908_v10  ;;  %v1348_v15 = vadd.f32 %v1347_v55, %v1346_v9  ;;  %v1005_v17 = vmax.f32 %v997_v53, 0.0  ;;  %v1387_v18 = vpop.f32.mrf.mxu1  ;;  %v1072_v2 = vadd.f32 %v1071_v37, %v1065_v60 }
 0x11b   :  { %v1349_v19 = vpop.f32.mrf.mxu0  ;;  %v1388_v22 = vadd.f32 %v1387_v18, %v1386_v54 }
 0x11c   :  { %v911_v21 = vadd.f32 %v1348_v15, %v574_v52  ;;  %v1220_v25 = vpack.c.bf16 %v1005_v17, %v1004_v16  ;;  %v998_v56 = vadd.f32 %v1853_v20, %v973_v14  ;;  %v1389_v58 = vpop.f32.mrf.mxu1  ;;  %v1066_v38 = vmul.f32 %v1005_v17, %v1005_v17 }
 0x11d   :  { %v1350_v26 = vpop.f32.mrf.mxu0  ;;  %v1052_v5 = vadd.f32 %v1051_v41, %v1005_v17  ;;  %v1084_v15 = vlaneseq }
 0x11e   :  { %v976_v27 = vadd.f32 %v1388_v22, %v911_v21  ;;  %v1351_v28 = vadd.f32 %v1350_v26, %v1349_v19  ;;  %1232 = vst [vmem:[%s1893_s5 + $0x8] sm:$0xff] %v1220_v25   ;;  %v1390_v29 = vpop.f32.mrf.mxu1  ;;  %v1006_v33 = vmax.f32 %v998_v56, 0.0  ;;  %v1073_v42 = vadd.f32 %v1072_v2, %v1066_v38 }
 0x11f   :  { %v1352_v30 = vpop.f32.mrf.mxu0  ;;  %v1391_v34 = vadd.f32 %v1390_v29, %v1389_v58  ;;  %v1085_v19 = vshrl.u32 %v1084_v15, 7 }
 0x120   :  { %v999_v62 = vadd.f32 %v1853_v20, %v976_v27  ;;  %v916_v61 = vadd.f32 %v1351_v28, %v579_v57  ;;  %v1392_v35 = vpop.f32.mrf.mxu1  ;;  %v1067_v44 = vmul.f32 %v1006_v33, %v1006_v33  ;;  %v1053_v43 = vadd.f32 %v1052_v5, %v1006_v33 }
 0x121   :  { %v1353_v36 = vpop.f32.mrf.mxu0  ;;  %vm1087_vm0 = vcmp.eq.s32.totalorder %v1085_v19, 1  ;;  %vm1086_vm1 = vcmp.eq.s32.totalorder %v1085_v19, 0 }
 0x122   :  { %v1007_v39 = vmax.f32 %v999_v62, 0.0  ;;  %v1354_v40 = vadd.f32 %v1353_v36, %v1352_v30  ;;  %v981_v0 = vadd.f32 %v1391_v34, %v916_v61  ;;  %v1393_v1 = vpop.f32.mrf.mxu1  ;;  %v1074_v50 = vadd.f32 %v1073_v42, %v1067_v44 }
 0x123   :  { %v1394_v46 = vadd.f32 %v1393_v1, %v1392_v35 }
 0x124   :  { %v1225_v3 = vpack.c.bf16 %v1007_v39, %v1006_v33  ;;  %v919_v4 = vadd.f32 %v1354_v40, %v582_v63  ;;  %v1000_v45 = vadd.f32 %v1853_v20, %v981_v0  ;;  %v1068_v47 = vmul.f32 %v1007_v39, %v1007_v39 }
 0x125   :  { %v1054_v49 = vadd.f32 %v1053_v43, %v1007_v39 }
 0x126   :  { %1233 = vst [vmem:[%s1893_s5 + $0x10] sm:$0xff] %v1225_v3   ;;  %v1008_v6 = vmax.f32 %v1000_v45, 0.0  ;;  %v984_v48 = vadd.f32 %v1394_v46, %v919_v4  ;;  %v1075_v8 = vadd.f32 %v1074_v50, %v1068_v47 }
 0x128   :  { %v1069_v51 = vmul.f32 %v1008_v6, %v1008_v6  ;;  %v1001_v7 = vadd.f32 %v1853_v20, %v984_v48  ;;  %v1055_v9 = vadd.f32 %v1054_v49, %v1008_v6 }
 0x12a   :  { %v1009_v10 = vmax.f32 %v1001_v7, 0.0  ;;  %v1076_v11 = vadd.f32 %v1075_v8, %v1069_v51 }
 0x12c   :  { %v1230_v52 = vpack.c.bf16 %v1009_v10, %v1008_v6  ;;  %v1056_v53 = vadd.f32 %v1055_v9, %v1009_v10  ;;  %v1070_v54 = vmul.f32 %v1009_v10, %v1009_v10 }
 0x12e   :  { %1234 = vst [vmem:[%s1893_s5 + $0x18] sm:$0xff] %v1230_v52   ;;  %v1057_v55 = vrot.slane %v1056_v53, 4  ;;  %v1077_v12 = vadd.f32 %v1076_v11, %v1070_v54 }
 0x130   :  { %v1058_v13 = vadd.f32 %v1057_v55, %v1056_v53  ;;  %v1078_v14 = vrot.slane %v1077_v12, 4 }
 0x132   :  { %v1059_v16 = vrot.slane %v1058_v13, 2  ;;  %v1079_v17 = vadd.f32 %v1078_v14, %v1077_v12 }
 0x134   :  { %v1060_v18 = vadd.f32 %v1059_v16, %v1058_v13  ;;  %v1080_v20 = vrot.slane %v1079_v17, 2 }
 0x136   :  { %v1081_v21 = vadd.f32 %v1080_v20, %v1079_v17  ;;  %v1061_v22 = vrot.slane %v1060_v18, 1 }
 0x138   :  { %v1082_v23 = vrot.slane %v1081_v21, 1  ;;  %v1062_v25 = vadd.f32 %v1061_v22, %v1060_v18 }
 0x13a   :  { %v1083_v24 = vadd.f32 %v1082_v23, %v1081_v21 }
 0x13c   :  { %v1088_v56 = vsel %vm1087_vm0, %v1083_v24, 0.0 }
 0x13d   :  { %v1089_v58 = vsel %vm1086_vm1, %v1062_v25, %v1088_v56 }
 0x13e   :  { %1090 = vst [vmem:[%s1894_s6] sm:$0xff] %v1089_v58 }

// kernel: unet_forward.31
= control target key start
LH: loop header
LB: loop body
LE: loop exit
PB: predicated region body
PF: predicated region fallthrough
CT: control target
= control target key end

     0   :  { %s1373_s1 = inlined_call_operand.vmem [shape: bf16[512,128], index: 1, kind: input, shape index: {}]   ;;  %s1374_s0 = inlined_call_operand.vmem [shape: bf16[128,512], index: 0, kind: input, shape index: {}]   ;;  %s1375_s2 = inlined_call_operand.vmem [shape: f32[1,128], index: 2, kind: input, shape index: {}]   ;;  %s1376_s3 = inlined_call_operand.vmem [shape: bf16[128,128], index: 3, kind: output, shape index: {}]  }
   0x1   :  { %v1036_v0 = vld [vmem:[%s1373_s1 + $0x78] sm:$0xff]   ;;  %v1040_v4 = vld [vmem:[%s1373_s1 + $0x70] sm:$0xff]   ;;  %v1044_v8 = vld [vmem:[%s1373_s1 + $0x68] sm:$0xff]  }
   0x2   :  { %v1037_v1 = vld [vmem:[%s1373_s1 + $0xf8] sm:$0xff]   ;;  %908 = vmatprep.subr.bf16.mxu0 %v1036_v0  ;;  %v1041_v5 = vld [vmem:[%s1373_s1 + $0xf0] sm:$0xff]   ;;  %v1045_v9 = vld [vmem:[%s1373_s1 + $0xe8] sm:$0xff]  }
   0x3   :  { %v1038_v2 = vld [vmem:[%s1373_s1 + $0x38] sm:$0xff]   ;;  %972 = vmatprep.subr.bf16.mxu1 %v1037_v1  ;;  %v1042_v6 = vld [vmem:[%s1373_s1 + $0x30] sm:$0xff]   ;;  %v1046_v10 = vld [vmem:[%s1373_s1 + $0x28] sm:$0xff]  }
   0x4   :  { %v1039_v3 = vld [vmem:[%s1373_s1 + $0xb8] sm:$0xff]   ;;  %909 = vmatpush3.bf16.msra.mxu0 %v1038_v2  ;;  %v1043_v7 = vld [vmem:[%s1373_s1 + $0xb0] sm:$0xff]   ;;  %v1047_v11 = vld [vmem:[%s1373_s1 + $0xa8] sm:$0xff]  }
   0x5   :  { %973 = vmatpush3.bf16.msra.mxu1 %v1039_v3  ;;  %910 = vmatprep.subr.bf16.mxu0 %v1040_v4  ;;  %v1048_v12 = vld [vmem:[%s1373_s1 + $0x60] sm:$0xff]   ;;  %v1052_v16 = vld [vmem:[%s1373_s1 + $0x58] sm:$0xff]   ;;  %v1056_v20 = vld [vmem:[%s1373_s1 + $0x50] sm:$0xff]  }
   0x6   :  { %974 = vmatprep.subr.bf16.mxu1 %v1041_v5  ;;  %v1049_v13 = vld [vmem:[%s1373_s1 + $0xe0] sm:$0xff]   ;;  %v1053_v17 = vld [vmem:[%s1373_s1 + $0xd8] sm:$0xff]   ;;  %v1057_v21 = vld [vmem:[%s1373_s1 + $0xd0] sm:$0xff]  }
   0x7   :  { %v1050_v14 = vld [vmem:[%s1373_s1 + $0x20] sm:$0xff]   ;;  %v1054_v18 = vld [vmem:[%s1373_s1 + $0x18] sm:$0xff]   ;;  %v1058_v22 = vld [vmem:[%s1373_s1 + $0x10] sm:$0xff]  }
   0x8   :  { %911 = vmatpush3.bf16.msra.mxu0 %v1042_v6  ;;  %v1051_v15 = vld [vmem:[%s1373_s1 + $0xa0] sm:$0xff]   ;;  %v1055_v19 = vld [vmem:[%s1373_s1 + $0x98] sm:$0xff]   ;;  %v1059_v23 = vld [vmem:[%s1373_s1 + $0x90] sm:$0xff]  }
   0x9   :  { %975 = vmatpush3.bf16.msra.mxu1 %v1043_v7  ;;  %912 = vmatprep.subr.bf16.mxu0 %v1044_v8  ;;  %v1060_v24 = vld [vmem:[%s1373_s1 + $0x48] sm:$0xff]   ;;  %v1064_v28 = vld [vmem:[%s1373_s1 + $0x40] sm:$0xff]  }
   0xa   :  { %976 = vmatprep.subr.bf16.mxu1 %v1045_v9  ;;  %v1061_v25 = vld [vmem:[%s1373_s1 + $0xc8] sm:$0xff]   ;;  %v1065_v29 = vld [vmem:[%s1373_s1 + $0xc0] sm:$0xff]  }
   0xb   :  { %v1062_v26 = vld [vmem:[%s1373_s1 + $0x8] sm:$0xff]   ;;  %v1066_v30 = vld [vmem:[%s1373_s1] sm:$0xff]  }
   0xc   :  { %913 = vmatpush3.bf16.msra.mxu0 %v1046_v10  ;;  %v1063_v27 = vld [vmem:[%s1373_s1 + $0x88] sm:$0xff]   ;;  %v1067_v31 = vld [vmem:[%s1373_s1 + $0x80] sm:$0xff]  }
   0xd   :  { %977 = vmatpush3.bf16.msra.mxu1 %v1047_v11  ;;  %914 = vmatprep.subr.bf16.mxu0 %v1048_v12  ;;  %v1068_v32 = vld [vmem:[%s1374_s0] ss:$16 sps:$4 sm:$0xff]   ;;  %v1070_v33 = vld [vmem:[%s1374_s0 + $0x4] ss:$16 sps:$4 sm:$0xff]   ;;  %v1071_v34 = vld [vmem:[%s1374_s0 + $0x8] ss:$16 sps:$4 sm:$0xff]  }
   0xe   :  { %978 = vmatprep.subr.bf16.mxu1 %v1049_v13  ;;  %v1073_v35 = vld [vmem:[%s1374_s0 + $0xc] ss:$16 sps:$4 sm:$0xff]   ;;  %502 = vmatprep.mubr.bf16.mxu0 %v1070_v33  ;;  %v1074_v36 = vld [vmem:[%s1374_s0 + $0x24] ss:$16 sps:$4 sm:$0xff]   ;;  %v1078_v38 = vld [vmem:[%s1374_s0 + $0x20] ss:$16 sps:$4 sm:$0xff]  }
   0xf   :  { %599 = vmatprep.mubr.bf16.mxu1 %v1073_v35  ;;  %v1076_v37 = vld [vmem:[%s1374_s0 + $0x2c] ss:$16 sps:$4 sm:$0xff]   ;;  %v1079_v39 = vld [vmem:[%s1374_s0 + $0x28] ss:$16 sps:$4 sm:$0xff]   ;;  %v1080_v40 = vld [vmem:[%s1374_s0 + $0x44] ss:$16 sps:$4 sm:$0xff]  }
  0x10   :  { %915 = vmatpush3.bf16.msra.mxu0 %v1050_v14  ;;  %v1082_v41 = vld [vmem:[%s1374_s0 + $0x4c] ss:$16 sps:$4 sm:$0xff]   ;;  %v1084_v42 = vld [vmem:[%s1374_s0 + $0x40] ss:$16 sps:$4 sm:$0xff]   ;;  %v1085_v43 = vld [vmem:[%s1374_s0 + $0x48] ss:$16 sps:$4 sm:$0xff]  }
  0x11   :  { %979 = vmatpush3.bf16.msra.mxu1 %v1051_v15  ;;  %916 = vmatprep.subr.bf16.mxu0 %v1052_v16  ;;  %v1086_v44 = vld [vmem:[%s1374_s0 + $0x64] ss:$16 sps:$4 sm:$0xff]   ;;  %v1088_v45 = vld [vmem:[%s1374_s0 + $0x6c] ss:$16 sps:$4 sm:$0xff]   ;;  %v1090_v46 = vld [vmem:[%s1374_s0 + $0x60] ss:$16 sps:$4 sm:$0xff]  }
  0x12   :  { %980 = vmatprep.subr.bf16.mxu1 %v1053_v17  ;;  %v1091_v47 = vld [vmem:[%s1374_s0 + $0x68] ss:$16 sps:$4 sm:$0xff]   ;;  %v1092_v48 = vld [vmem:[%s1374_s0 + $0x84] ss:$16 sps:$4 sm:$0xff]   ;;  %v1094_v49 = vld [vmem:[%s1374_s0 + $0x8c] ss:$16 sps:$4 sm:$0xff]  }
  0x13   :  { %v1096_v50 = vld [vmem:[%s1374_s0 + $0x80] ss:$16 sps:$4 sm:$0xff]   ;;  %v1097_v51 = vld [vmem:[%s1374_s0 + $0x88] ss:$16 sps:$4 sm:$0xff]   ;;  %v1098_v52 = vld [vmem:[%s1374_s0 + $0xa4] ss:$16 sps:$4 sm:$0xff]  }
  0x14   :  { %917 = vmatpush3.bf16.msra.mxu0 %v1054_v18  ;;  %v1100_v53 = vld [vmem:[%s1374_s0 + $0xac] ss:$16 sps:$4 sm:$0xff]   ;;  %v1102_v54 = vld [vmem:[%s1374_s0 + $0xa0] ss:$16 sps:$4 sm:$0xff]   ;;  %v1103_v55 = vld [vmem:[%s1374_s0 + $0xa8] ss:$16 sps:$4 sm:$0xff]  }
  0x15   :  { %981 = vmatpush3.bf16.msra.mxu1 %v1055_v19  ;;  %918 = vmatprep.subr.bf16.mxu0 %v1056_v20  ;;  %v1104_v56 = vld [vmem:[%s1374_s0 + $0xc4] ss:$16 sps:$4 sm:$0xff]   ;;  %v1106_v57 = vld [vmem:[%s1374_s0 + $0xcc] ss:$16 sps:$4 sm:$0xff]   ;;  %v1108_v58 = vld [vmem:[%s1374_s0 + $0xc0] ss:$16 sps:$4 sm:$0xff]  }
  0x16   :  { %982 = vmatprep.subr.bf16.mxu1 %v1057_v21  ;;  %v1109_v59 = vld [vmem:[%s1374_s0 + $0xc8] ss:$16 sps:$4 sm:$0xff]   ;;  %v1110_v60 = vld [vmem:[%s1374_s0 + $0xe4] ss:$16 sps:$4 sm:$0xff]   ;;  %v1112_v61 = vld [vmem:[%s1374_s0 + $0xec] ss:$16 sps:$4 sm:$0xff]  }
  0x17   :  { %v1114_v62 = vld [vmem:[%s1374_s0 + $0xe0] ss:$16 sps:$4 sm:$0xff]   ;;  %v1115_v63 = vld [vmem:[%s1374_s0 + $0xe8] ss:$16 sps:$4 sm:$0xff]  }
  0x18   :  { %919 = vmatpush3.bf16.msra.mxu0 %v1058_v22  ;;  %v1331_v2 = vld [vmem:[%s1375_s2] ss:$0 sm:$0xff] }
  0x19   :  { %983 = vmatpush3.bf16.msra.mxu1 %v1059_v23  ;;  %920 = vmatprep.subr.bf16.mxu0 %v1060_v24 }
  0x1a   :  { %984 = vmatprep.subr.bf16.mxu1 %v1061_v25 }
  0x1c   :  { %921 = vmatpush3.bf16.msra.mxu0 %v1062_v26 }
  0x1d   :  { %985 = vmatpush3.bf16.msra.mxu1 %v1063_v27  ;;  %922 = vmatprep.subr.bf16.mxu0 %v1064_v28 }
  0x1e   :  { %986 = vmatprep.subr.bf16.mxu1 %v1065_v29 }
  0x20   :  { %923 = vmatpush3.bf16.msra.mxu0 %v1066_v30 }
  0x21   :  { %987 = vmatpush3.bf16.msra.mxu1 %v1067_v31 }
  0x23   :  { %503 = vmatmul.mubr.bf16.vlgmr.msra.gmra.mxu0 %v1068_v32 }
  0x24   :  { %600 = vmatmul.mubr.bf16.vlgmr.msra.gmra.mxu1 %v1071_v34  ;;  %510 = vmatprep.mubr.bf16.mxu0 %v1074_v36 }
  0x25   :  { %607 = vmatprep.mubr.bf16.mxu1 %v1076_v37 }
  0x2b   :  { %511 = vmatmul.mubr.bf16.gmra.mxu0 %v1078_v38 }
  0x2c   :  { %608 = vmatmul.mubr.bf16.gmra.mxu1 %v1079_v39  ;;  %518 = vmatprep.mubr.bf16.mxu0 %v1080_v40 }
  0x2d   :  { %615 = vmatprep.mubr.bf16.mxu1 %v1082_v41 }
  0x33   :  { %519 = vmatmul.mubr.bf16.gmra.mxu0 %v1084_v42 }
  0x34   :  { %616 = vmatmul.mubr.bf16.gmra.mxu1 %v1085_v43  ;;  %526 = vmatprep.mubr.bf16.mxu0 %v1086_v44 }
  0x35   :  { %623 = vmatprep.mubr.bf16.mxu1 %v1088_v45 }
  0x3b   :  { %527 = vmatmul.mubr.bf16.gmra.mxu0 %v1090_v46 }
  0x3c   :  { %624 = vmatmul.mubr.bf16.gmra.mxu1 %v1091_v47  ;;  %534 = vmatprep.mubr.bf16.mxu0 %v1092_v48 }
  0x3d   :  { %631 = vmatprep.mubr.bf16.mxu1 %v1094_v49 }
  0x43   :  { %535 = vmatmul.mubr.bf16.gmra.mxu0 %v1096_v50 }
  0x44   :  { %632 = vmatmul.mubr.bf16.gmra.mxu1 %v1097_v51  ;;  %542 = vmatprep.mubr.bf16.mxu0 %v1098_v52 }
  0x45   :  { %639 = vmatprep.mubr.bf16.mxu1 %v1100_v53 }
  0x4b   :  { %543 = vmatmul.mubr.bf16.gmra.mxu0 %v1102_v54 }
  0x4c   :  { %640 = vmatmul.mubr.bf16.gmra.mxu1 %v1103_v55  ;;  %550 = vmatprep.mubr.bf16.mxu0 %v1104_v56 }
  0x4d   :  { %647 = vmatprep.mubr.bf16.mxu1 %v1106_v57 }
  0x53   :  { %551 = vmatmul.mubr.bf16.gmra.mxu0 %v1108_v58 }
  0x54   :  { %648 = vmatmul.mubr.bf16.gmra.mxu1 %v1109_v59  ;;  %558 = vmatprep.mubr.bf16.mxu0 %v1110_v60 }
  0x55   :  { %655 = vmatprep.mubr.bf16.mxu1 %v1112_v61 }
  0x5b   :  { %559 = vmatmul.mubr.bf16.gmra.mxu0 %v1114_v62 }
  0x5c   :  { %656 = vmatmul.mubr.bf16.gmra.mxu1 %v1115_v63 }
  0xe3   :  { %v924_v0 = vpop.f32.mrf.mxu0 }
  0xe4   :  { %v988_v1 = vpop.f32.mrf.mxu1 }
  0xe5   :  { %v925_v3 = vpop.f32.mrf.mxu0 }
  0xe6   :  { %v926_v4 = vadd.f32 %v925_v3, %v924_v0  ;;  %v989_v5 = vpop.f32.mrf.mxu1 }
  0xe7   :  { %v927_v6 = vpop.f32.mrf.mxu0  ;;  %v990_v10 = vadd.f32 %v989_v5, %v988_v1 }
  0xe8   :  { %v505_v7 = vadd.f32 %v926_v4, %v1331_v2  ;;  %v991_v8 = vpop.f32.mrf.mxu1 }
  0xe9   :  { %v928_v9 = vpop.f32.mrf.mxu0 }
  0xea   :  { %v929_v11 = vadd.f32 %v928_v9, %v927_v6  ;;  %v992_v12 = vpop.f32.mrf.mxu1  ;;  %v602_v14 = vadd.f32 %v990_v10, %v505_v7 }
  0xeb   :  { %v930_v13 = vpop.f32.mrf.mxu0  ;;  %v993_v16 = vadd.f32 %v992_v12, %v991_v8 }
  0xec   :  { %v508_v15 = vadd.f32 %v929_v11, %v1331_v2  ;;  %v994_v17 = vpop.f32.mrf.mxu1  ;;  %v664_v23 = vmax.f32 %v602_v14, 0.0 }
  0xed   :  { %v931_v18 = vpop.f32.mrf.mxu0 }
  0xee   :  { %v605_v19 = vadd.f32 %v993_v16, %v508_v15  ;;  %v932_v20 = vadd.f32 %v931_v18, %v930_v13  ;;  %v995_v21 = vpop.f32.mrf.mxu1 }
  0xef   :  { %v933_v22 = vpop.f32.mrf.mxu0  ;;  %v996_v29 = vadd.f32 %v995_v21, %v994_v17 }
  0xf0   :  { %v665_v24 = vmax.f32 %v605_v19, 0.0  ;;  %v513_v25 = vadd.f32 %v932_v20, %v1331_v2  ;;  %v997_v26 = vpop.f32.mrf.mxu1 }
  0xf1   :  { %v934_v27 = vpop.f32.mrf.mxu0 }
  0xf2   :  { %v864_v28 = vpack.c.bf16 %v665_v24, %v664_v23  ;;  %v935_v30 = vadd.f32 %v934_v27, %v933_v22  ;;  %v998_v31 = vpop.f32.mrf.mxu1  ;;  %v610_v33 = vadd.f32 %v996_v29, %v513_v25 }
  0xf3   :  { %v936_v32 = vpop.f32.mrf.mxu0  ;;  %v999_v35 = vadd.f32 %v998_v31, %v997_v26 }
  0xf4   :  { %865 = vst [vmem:[%s1376_s3] sm:$0xff] %v864_v28   ;;  %v516_v34 = vadd.f32 %v935_v30, %v1331_v2  ;;  %v1000_v36 = vpop.f32.mrf.mxu1  ;;  %v666_v42 = vmax.f32 %v610_v33, 0.0 }
  0xf5   :  { %v937_v37 = vpop.f32.mrf.mxu0 }
  0xf6   :  { %v613_v38 = vadd.f32 %v999_v35, %v516_v34  ;;  %v938_v39 = vadd.f32 %v937_v37, %v936_v32  ;;  %v1001_v40 = vpop.f32.mrf.mxu1 }
  0xf7   :  { %v939_v41 = vpop.f32.mrf.mxu0  ;;  %v1002_v48 = vadd.f32 %v1001_v40, %v1000_v36 }
  0xf8   :  { %v667_v43 = vmax.f32 %v613_v38, 0.0  ;;  %v521_v44 = vadd.f32 %v938_v39, %v1331_v2  ;;  %v1003_v45 = vpop.f32.mrf.mxu1 }
  0xf9   :  { %v940_v46 = vpop.f32.mrf.mxu0 }
  0xfa   :  { %v869_v47 = vpack.c.bf16 %v667_v43, %v666_v42  ;;  %v941_v49 = vadd.f32 %v940_v46, %v939_v41  ;;  %v1004_v50 = vpop.f32.mrf.mxu1  ;;  %v618_v52 = vadd.f32 %v1002_v48, %v521_v44 }
  0xfb   :  { %v942_v51 = vpop.f32.mrf.mxu0  ;;  %v1005_v54 = vadd.f32 %v1004_v50, %v1003_v45 }
  0xfc   :  { %901 = vst [vmem:[%s1376_s3 + $0x8] sm:$0xff] %v869_v47   ;;  %v524_v53 = vadd.f32 %v941_v49, %v1331_v2  ;;  %v1006_v55 = vpop.f32.mrf.mxu1  ;;  %v668_v61 = vmax.f32 %v618_v52, 0.0 }
  0xfd   :  { %v943_v56 = vpop.f32.mrf.mxu0 }
  0xfe   :  { %v621_v57 = vadd.f32 %v1005_v54, %v524_v53  ;;  %v944_v58 = vadd.f32 %v943_v56, %v942_v51  ;;  %v1007_v59 = vpop.f32.mrf.mxu1 }
  0xff   :  { %v945_v60 = vpop.f32.mrf.mxu0  ;;  %v1008_v4 = vadd.f32 %v1007_v59, %v1006_v55 }
 0x100   :  { %v669_v62 = vmax.f32 %v621_v57, 0.0  ;;  %v529_v63 = vadd.f32 %v944_v58, %v1331_v2  ;;  %v1009_v0 = vpop.f32.mrf.mxu1 }
 0x101   :  { %v946_v1 = vpop.f32.mrf.mxu0 }
 0x102   :  { %v874_v3 = vpack.c.bf16 %v669_v62, %v668_v61  ;;  %v947_v5 = vadd.f32 %v946_v1, %v945_v60  ;;  %v1010_v6 = vpop.f32.mrf.mxu1  ;;  %v626_v8 = vadd.f32 %v1008_v4, %v529_v63 }
 0x103   :  { %v948_v7 = vpop.f32.mrf.mxu0  ;;  %v1011_v10 = vadd.f32 %v1010_v6, %v1009_v0 }
 0x104   :  { %902 = vst [vmem:[%s1376_s3 + $0x10] sm:$0xff] %v874_v3   ;;  %v532_v9 = vadd.f32 %v947_v5, %v1331_v2  ;;  %v1012_v11 = vpop.f32.mrf.mxu1  ;;  %v670_v17 = vmax.f32 %v626_v8, 0.0 }
 0x105   :  { %v949_v12 = vpop.f32.mrf.mxu0 }
 0x106   :  { %v629_v13 = vadd.f32 %v1011_v10, %v532_v9  ;;  %v950_v14 = vadd.f32 %v949_v12, %v948_v7  ;;  %v1013_v15 = vpop.f32.mrf.mxu1 }
 0x107   :  { %v951_v16 = vpop.f32.mrf.mxu0  ;;  %v1014_v23 = vadd.f32 %v1013_v15, %v1012_v11 }
 0x108   :  { %v671_v18 = vmax.f32 %v629_v13, 0.0  ;;  %v537_v19 = vadd.f32 %v950_v14, %v1331_v2  ;;  %v1015_v20 = vpop.f32.mrf.mxu1 }
 0x109   :  { %v952_v21 = vpop.f32.mrf.mxu0 }
 0x10a   :  { %v879_v22 = vpack.c.bf16 %v671_v18, %v670_v17  ;;  %v953_v24 = vadd.f32 %v952_v21, %v951_v16  ;;  %v1016_v25 = vpop.f32.mrf.mxu1  ;;  %v634_v27 = vadd.f32 %v1014_v23, %v537_v19 }
 0x10b   :  { %v954_v26 = vpop.f32.mrf.mxu0  ;;  %v1017_v29 = vadd.f32 %v1016_v25, %v1015_v20 }
 0x10c   :  { %903 = vst [vmem:[%s1376_s3 + $0x18] sm:$0xff] %v879_v22   ;;  %v540_v28 = vadd.f32 %v953_v24, %v1331_v2  ;;  %v1018_v30 = vpop.f32.mrf.mxu1  ;;  %v672_v36 = vmax.f32 %v634_v27, 0.0 }
 0x10d   :  { %v955_v31 = vpop.f32.mrf.mxu0 }
 0x10e   :  { %v637_v32 = vadd.f32 %v1017_v29, %v540_v28  ;;  %v956_v33 = vadd.f32 %v955_v31, %v954_v26  ;;  %v1019_v34 = vpop.f32.mrf.mxu1 }
 0x10f   :  { %v957_v35 = vpop.f32.mrf.mxu0  ;;  %v1020_v42 = vadd.f32 %v1019_v34, %v1018_v30 }
 0x110   :  { %v673_v37 = vmax.f32 %v637_v32, 0.0  ;;  %v545_v38 = vadd.f32 %v956_v33, %v1331_v2  ;;  %v1021_v39 = vpop.f32.mrf.mxu1 }
 0x111   :  { %v958_v40 = vpop.f32.mrf.mxu0 }
 0x112   :  { %v884_v41 = vpack.c.bf16 %v673_v37, %v672_v36  ;;  %v959_v43 = vadd.f32 %v958_v40, %v957_v35  ;;  %v1022_v44 = vpop.f32.mrf.mxu1  ;;  %v642_v46 = vadd.f32 %v1020_v42, %v545_v38 }
 0x113   :  { %v960_v45 = vpop.f32.mrf.mxu0  ;;  %v1023_v48 = vadd.f32 %v1022_v44, %v1021_v39 }
 0x114   :  { %904 = vst [vmem:[%s1376_s3 + $0x20] sm:$0xff] %v884_v41   ;;  %v548_v47 = vadd.f32 %v959_v43, %v1331_v2  ;;  %v1024_v49 = vpop.f32.mrf.mxu1  ;;  %v674_v55 = vmax.f32 %v642_v46, 0.0 }
 0x115   :  { %v961_v50 = vpop.f32.mrf.mxu0 }
 0x116   :  { %v645_v51 = vadd.f32 %v1023_v48, %v548_v47  ;;  %v962_v52 = vadd.f32 %v961_v50, %v960_v45  ;;  %v1025_v53 = vpop.f32.mrf.mxu1 }
 0x117   :  { %v963_v54 = vpop.f32.mrf.mxu0  ;;  %v1026_v61 = vadd.f32 %v1025_v53, %v1024_v49 }
 0x118   :  { %v675_v56 = vmax.f32 %v645_v51, 0.0  ;;  %v553_v57 = vadd.f32 %v962_v52, %v1331_v2  ;;  %v1027_v58 = vpop.f32.mrf.mxu1 }
 0x119   :  { %v964_v59 = vpop.f32.mrf.mxu0 }
 0x11a   :  { %v889_v60 = vpack.c.bf16 %v675_v56, %v674_v55  ;;  %v965_v62 = vadd.f32 %v964_v59, %v963_v54  ;;  %v1028_v63 = vpop.f32.mrf.mxu1  ;;  %v650_v1 = vadd.f32 %v1026_v61, %v553_v57 }
 0x11b   :  { %v966_v0 = vpop.f32.mrf.mxu0  ;;  %v1029_v4 = vadd.f32 %v1028_v63, %v1027_v58 }
 0x11c   :  { %905 = vst [vmem:[%s1376_s3 + $0x28] sm:$0xff] %v889_v60   ;;  %v556_v3 = vadd.f32 %v965_v62, %v1331_v2  ;;  %v1030_v5 = vpop.f32.mrf.mxu1  ;;  %v676_v11 = vmax.f32 %v650_v1, 0.0 }
 0x11d   :  { %v967_v6 = vpop.f32.mrf.mxu0 }
 0x11e   :  { %v653_v7 = vadd.f32 %v1029_v4, %v556_v3  ;;  %v968_v8 = vadd.f32 %v967_v6, %v966_v0  ;;  %v1031_v9 = vpop.f32.mrf.mxu1 }
 0x11f   :  { %v969_v10 = vpop.f32.mrf.mxu0  ;;  %v1032_v17 = vadd.f32 %v1031_v9, %v1030_v5 }
 0x120   :  { %v677_v12 = vmax.f32 %v653_v7, 0.0  ;;  %v561_v13 = vadd.f32 %v968_v8, %v1331_v2  ;;  %v1033_v14 = vpop.f32.mrf.mxu1 }
 0x121   :  { %v970_v15 = vpop.f32.mrf.mxu0 }
 0x122   :  { %v894_v16 = vpack.c.bf16 %v677_v12, %v676_v11  ;;  %v971_v18 = vadd.f32 %v970_v15, %v969_v10  ;;  %v1034_v19 = vpop.f32.mrf.mxu1  ;;  %v658_v20 = vadd.f32 %v1032_v17, %v561_v13 }
 0x123   :  { %v1035_v22 = vadd.f32 %v1034_v19, %v1033_v14 }
 0x124   :  { %906 = vst [vmem:[%s1376_s3 + $0x30] sm:$0xff] %v894_v16   ;;  %v564_v21 = vadd.f32 %v971_v18, %v1331_v2  ;;  %v678_v24 = vmax.f32 %v658_v20, 0.0 }
 0x126   :  { %v661_v23 = vadd.f32 %v1035_v22, %v564_v21 }
 0x128   :  { %v679_v25 = vmax.f32 %v661_v23, 0.0 }
 0x12a   :  { %v899_v26 = vpack.c.bf16 %v679_v25, %v678_v24 }
 0x12c   :  { %907 = vst [vmem:[%s1376_s3 + $0x38] sm:$0xff] %v899_v26  }

// kernel: unet_forward.35
= control target key start
LH: loop header
LB: loop body
LE: loop exit
PB: predicated region body
PF: predicated region fallthrough
CT: control target
= control target key end

     0   :  { %s1084_s3 = inlined_call_operand.vmem [shape: bf16[128,128], index: 3, kind: input, shape index: {}]   ;;  %s1085_s2 = inlined_call_operand.vmem [shape: bf16[128,128], index: 2, kind: input, shape index: {}]   ;;  %s1086_s1 = inlined_call_operand.vmem [shape: bf16[128,128], index: 1, kind: input, shape index: {}]   ;;  %s1087_s0 = inlined_call_operand.vmem [shape: bf16[128,128], index: 0, kind: input, shape index: {}]   ;;  %s1088_s4 = inlined_call_operand.vmem [shape: f32[1,128], index: 4, kind: input, shape index: {}]   ;;  %s1089_s5 = inlined_call_operand.vmem [shape: bf16[128,128], index: 5, kind: output, shape index: {0}]   ;;  %s1090_s6 = inlined_call_operand.vmem [shape: f32[1,8,128], index: 6, kind: output, shape index: {1}]  }
   0x1   :  { %v873_v0 = vld [vmem:[%s1084_s3 + $0x38] sm:$0xff]   ;;  %v875_v2 = vld [vmem:[%s1084_s3 + $0x30] sm:$0xff]   ;;  %v877_v4 = vld [vmem:[%s1084_s3 + $0x28] sm:$0xff]  }
   0x2   :  { %v874_v1 = vld [vmem:[%s1085_s2 + $0x38] sm:$0xff]   ;;  %809 = vmatprep.subr.bf16.mxu0 %v873_v0  ;;  %v876_v3 = vld [vmem:[%s1085_s2 + $0x30] sm:$0xff]   ;;  %v878_v5 = vld [vmem:[%s1085_s2 + $0x28] sm:$0xff]  }
   0x3   :  { %841 = vmatprep.subr.bf16.mxu1 %v874_v1  ;;  %810 = vmatpush3.bf16.msra.mxu0 %v873_v0  ;;  %v879_v6 = vld [vmem:[%s1084_s3 + $0x20] sm:$0xff]   ;;  %v881_v8 = vld [vmem:[%s1084_s3 + $0x18] sm:$0xff]   ;;  %v883_v10 = vld [vmem:[%s1084_s3 + $0x10] sm:$0xff]  }
   0x4   :  { %842 = vmatpush3.bf16.msra.mxu1 %v874_v1  ;;  %811 = vmatprep.subr.bf16.mxu0 %v875_v2  ;;  %v880_v7 = vld [vmem:[%s1085_s2 + $0x20] sm:$0xff]   ;;  %v882_v9 = vld [vmem:[%s1085_s2 + $0x18] sm:$0xff]   ;;  %v884_v11 = vld [vmem:[%s1085_s2 + $0x10] sm:$0xff]  }
   0x5   :  { %843 = vmatprep.subr.bf16.mxu1 %v876_v3  ;;  %v889_v12 = vld [vmem:[%s1086_s1] sm:$0xff]   ;;  %v885_v14 = vld [vmem:[%s1084_s3 + $0x8] sm:$0xff]   ;;  %v893_v20 = vld [vmem:[%s1086_s1 + $0x10] sm:$0xff]  }
   0x6   :  { %v890_v13 = vld [vmem:[%s1087_s0] sm:$0xff]   ;;  %825 = vmatprep.mubr.bf16.mxu0 %v889_v12  ;;  %v886_v15 = vld [vmem:[%s1085_s2 + $0x8] sm:$0xff]   ;;  %v894_v21 = vld [vmem:[%s1087_s0 + $0x10] sm:$0xff]  }
   0x7   :  { %812 = vmatpush3.bf16.msra.mxu0 %v875_v2  ;;  %857 = vmatprep.mubr.bf16.mxu1 %v890_v13  ;;  %v887_v16 = vld [vmem:[%s1084_s3] sm:$0xff]   ;;  %v891_v18 = vld [vmem:[%s1086_s1 + $0x8] sm:$0xff]   ;;  %v895_v22 = vld [vmem:[%s1086_s1 + $0x18] sm:$0xff]  }
   0x8   :  { %844 = vmatpush3.bf16.msra.mxu1 %v876_v3  ;;  %813 = vmatprep.subr.bf16.mxu0 %v877_v4  ;;  %v888_v17 = vld [vmem:[%s1085_s2] sm:$0xff]   ;;  %v892_v19 = vld [vmem:[%s1087_s0 + $0x8] sm:$0xff]   ;;  %v896_v23 = vld [vmem:[%s1087_s0 + $0x18] sm:$0xff]  }
   0x9   :  { %845 = vmatprep.subr.bf16.mxu1 %v878_v5  ;;  %v897_v24 = vld [vmem:[%s1086_s1 + $0x20] sm:$0xff]   ;;  %v899_v26 = vld [vmem:[%s1086_s1 + $0x28] sm:$0xff]   ;;  %v901_v28 = vld [vmem:[%s1086_s1 + $0x30] sm:$0xff]  }
   0xa   :  { %v898_v25 = vld [vmem:[%s1087_s0 + $0x20] sm:$0xff]   ;;  %v900_v27 = vld [vmem:[%s1087_s0 + $0x28] sm:$0xff]   ;;  %v902_v29 = vld [vmem:[%s1087_s0 + $0x30] sm:$0xff]  }
   0xb   :  { %814 = vmatpush3.bf16.msra.mxu0 %v877_v4  ;;  %v903_v30 = vld [vmem:[%s1086_s1 + $0x38] sm:$0xff]   ;;  %v1039_v36 = vld [vmem:[%s1088_s4] ss:$0 sm:$0xff] }
   0xc   :  { %846 = vmatpush3.bf16.msra.mxu1 %v878_v5  ;;  %815 = vmatprep.subr.bf16.mxu0 %v879_v6  ;;  %v904_v31 = vld [vmem:[%s1087_s0 + $0x38] sm:$0xff]  }
   0xd   :  { %847 = vmatprep.subr.bf16.mxu1 %v880_v7 }
   0xf   :  { %816 = vmatpush3.bf16.msra.mxu0 %v879_v6 }
  0x10   :  { %848 = vmatpush3.bf16.msra.mxu1 %v880_v7  ;;  %817 = vmatprep.subr.bf16.mxu0 %v881_v8 }
  0x11   :  { %849 = vmatprep.subr.bf16.mxu1 %v882_v9 }
  0x13   :  { %818 = vmatpush3.bf16.msra.mxu0 %v881_v8 }
  0x14   :  { %850 = vmatpush3.bf16.msra.mxu1 %v882_v9  ;;  %819 = vmatprep.subr.bf16.mxu0 %v883_v10 }
  0x15   :  { %851 = vmatprep.subr.bf16.mxu1 %v884_v11 }
  0x17   :  { %820 = vmatpush3.bf16.msra.mxu0 %v883_v10 }
  0x18   :  { %852 = vmatpush3.bf16.msra.mxu1 %v884_v11  ;;  %821 = vmatprep.subr.bf16.mxu0 %v885_v14 }
  0x19   :  { %853 = vmatprep.subr.bf16.mxu1 %v886_v15 }
  0x1b   :  { %822 = vmatpush3.bf16.msra.mxu0 %v885_v14 }
  0x1c   :  { %854 = vmatpush3.bf16.msra.mxu1 %v886_v15  ;;  %823 = vmatprep.subr.bf16.mxu0 %v887_v16 }
  0x1d   :  { %855 = vmatprep.subr.bf16.mxu1 %v888_v17 }
  0x1f   :  { %824 = vmatpush3.bf16.msra.mxu0 %v887_v16 }
  0x20   :  { %856 = vmatpush3.bf16.msra.mxu1 %v888_v17 }
  0x22   :  { %826 = vmatmul.mubr.bf16.vlgmr.msra.gmra.mxu0 %v891_v18 }
  0x23   :  { %858 = vmatmul.mubr.bf16.vlgmr.msra.gmra.mxu1 %v892_v19  ;;  %829 = vmatprep.mubr.bf16.mxu0 %v893_v20 }
  0x24   :  { %861 = vmatprep.mubr.bf16.mxu1 %v894_v21 }
  0x2a   :  { %830 = vmatmul.mubr.bf16.gmra.mxu0 %v895_v22 }
  0x2b   :  { %862 = vmatmul.mubr.bf16.gmra.mxu1 %v896_v23  ;;  %833 = vmatprep.mubr.bf16.mxu0 %v897_v24 }
  0x2c   :  { %865 = vmatprep.mubr.bf16.mxu1 %v898_v25 }
  0x32   :  { %834 = vmatmul.mubr.bf16.gmra.mxu0 %v899_v26 }
  0x33   :  { %866 = vmatmul.mubr.bf16.gmra.mxu1 %v900_v27  ;;  %837 = vmatprep.mubr.bf16.mxu0 %v901_v28 }
  0x34   :  { %869 = vmatprep.mubr.bf16.mxu1 %v902_v29 }
  0x3a   :  { %838 = vmatmul.mubr.bf16.gmra.mxu0 %v903_v30 }
  0x3b   :  { %870 = vmatmul.mubr.bf16.gmra.mxu1 %v904_v31 }
  0xe2   :  { %v827_v32 = vpop.f32.mrf.mxu0 }
  0xe3   :  { %v859_v33 = vpop.f32.mrf.mxu1 }
  0xe4   :  { %v419_v34 = vadd.f32 %v859_v33, %v827_v32  ;;  %v217_v35 = vpop.f32.mrf.mxu0 }
  0xe5   :  { %v410_v37 = vpop.f32.mrf.mxu1 }
  0xe6   :  { %v411_v38 = vadd.f32 %v410_v37, %v217_v35  ;;  %v828_v39 = vpop.f32.mrf.mxu0  ;;  %v482_v41 = vadd.f32 %v1039_v36, %v419_v34 }
  0xe7   :  { %v860_v40 = vpop.f32.mrf.mxu1 }
  0xe8   :  { %v480_v42 = vadd.f32 %v1039_v36, %v411_v38  ;;  %v422_v43 = vadd.f32 %v860_v40, %v828_v39  ;;  %v220_v44 = vpop.f32.mrf.mxu0  ;;  %v498_v50 = vmax.f32 %v482_v41, 0.0 }
  0xe9   :  { %v413_v45 = vpop.f32.mrf.mxu1 }
  0xea   :  { %v483_v46 = vadd.f32 %v1039_v36, %v422_v43  ;;  %v414_v47 = vadd.f32 %v413_v45, %v220_v44  ;;  %v831_v48 = vpop.f32.mrf.mxu0  ;;  %v496_v51 = vmax.f32 %v480_v42, 0.0  ;;  %v615_v7 = vmul.f32 %v498_v50, %v498_v50 }
  0xeb   :  { %v863_v49 = vpop.f32.mrf.mxu1 }
  0xec   :  { %v499_v52 = vmax.f32 %v483_v46, 0.0  ;;  %v481_v53 = vadd.f32 %v1039_v36, %v414_v47  ;;  %v233_v54 = vpop.f32.mrf.mxu0  ;;  %v435_v55 = vadd.f32 %v863_v49, %v831_v48  ;;  %v613_v62 = vmul.f32 %v496_v51, %v496_v51 }
  0xed   :  { %v426_v56 = vpop.f32.mrf.mxu1 }
  0xee   :  { %v738_v57 = vpack.c.bf16 %v499_v52, %v498_v50  ;;  %v497_v58 = vmax.f32 %v481_v53, 0.0  ;;  %v832_v59 = vpop.f32.mrf.mxu0  ;;  %v427_v60 = vadd.f32 %v426_v56, %v233_v54  ;;  %v486_v3 = vadd.f32 %v1039_v36, %v435_v55 }
  0xef   :  { %v864_v61 = vpop.f32.mrf.mxu1  ;;  %v616_v15 = vmul.f32 %v499_v52, %v499_v52 }
  0xf0   :  { %770 = vst [vmem:[%s1089_s5 + $0x8] sm:$0xff] %v738_v57   ;;  %v733_v63 = vpack.c.bf16 %v497_v58, %v496_v51  ;;  %v592_v0 = vadd.f32 %v497_v58, %v496_v51  ;;  %v614_v1 = vmul.f32 %v497_v58, %v497_v58  ;;  %v236_v2 = vpop.f32.mrf.mxu0  ;;  %v484_v4 = vadd.f32 %v1039_v36, %v427_v60 }
  0xf1   :  { %v438_v5 = vadd.f32 %v864_v61, %v832_v59  ;;  %v429_v6 = vpop.f32.mrf.mxu1  ;;  %v502_v20 = vmax.f32 %v486_v3, 0.0 }
  0xf2   :  { %734 = vst [vmem:[%s1089_s5] sm:$0xff] %v733_v63   ;;  %v593_v8 = vadd.f32 %v592_v0, %v498_v50  ;;  %v629_v9 = vadd.f32 %v614_v1, %v613_v62  ;;  %v430_v10 = vadd.f32 %v429_v6, %v236_v2  ;;  %v835_v11 = vpop.f32.mrf.mxu0  ;;  %v500_v12 = vmax.f32 %v484_v4, 0.0 }
  0xf3   :  { %v487_v13 = vadd.f32 %v1039_v36, %v438_v5  ;;  %v867_v14 = vpop.f32.mrf.mxu1  ;;  %v619_v42 = vmul.f32 %v502_v20, %v502_v20 }
  0xf4   :  { %v630_v16 = vadd.f32 %v629_v9, %v615_v7  ;;  %v594_v17 = vadd.f32 %v593_v8, %v499_v52  ;;  %v485_v18 = vadd.f32 %v1039_v36, %v430_v10  ;;  %v249_v19 = vpop.f32.mrf.mxu0  ;;  %v451_v22 = vadd.f32 %v867_v14, %v835_v11 }
  0xf5   :  { %v503_v21 = vmax.f32 %v487_v13, 0.0  ;;  %v442_v23 = vpop.f32.mrf.mxu1  ;;  %v617_v25 = vmul.f32 %v500_v12, %v500_v12 }
  0xf6   :  { %v595_v24 = vadd.f32 %v594_v17, %v500_v12  ;;  %v631_v26 = vadd.f32 %v630_v16, %v616_v15  ;;  %v501_v27 = vmax.f32 %v485_v18, 0.0  ;;  %v836_v28 = vpop.f32.mrf.mxu0  ;;  %v443_v30 = vadd.f32 %v442_v23, %v249_v19 }
  0xf7   :  { %v748_v29 = vpack.c.bf16 %v503_v21, %v502_v20  ;;  %v868_v31 = vpop.f32.mrf.mxu1  ;;  %v490_v38 = vadd.f32 %v1039_v36, %v451_v22  ;;  %v620_v50 = vmul.f32 %v503_v21, %v503_v21 }
  0xf8   :  { %v632_v32 = vadd.f32 %v631_v26, %v617_v25  ;;  %v743_v33 = vpack.c.bf16 %v501_v27, %v500_v12  ;;  %v596_v34 = vadd.f32 %v595_v24, %v501_v27  ;;  %v618_v35 = vmul.f32 %v501_v27, %v501_v27  ;;  %v252_v37 = vpop.f32.mrf.mxu0 }
  0xf9   :  { %772 = vst [vmem:[%s1089_s5 + $0x18] sm:$0xff] %v748_v29   ;;  %v488_v39 = vadd.f32 %v1039_v36, %v443_v30  ;;  %v454_v40 = vadd.f32 %v868_v31, %v836_v28  ;;  %v445_v41 = vpop.f32.mrf.mxu1  ;;  %v506_v55 = vmax.f32 %v490_v38, 0.0 }
  0xfa   :  { %771 = vst [vmem:[%s1089_s5 + $0x10] sm:$0xff] %v743_v33   ;;  %v597_v43 = vadd.f32 %v596_v34, %v502_v20  ;;  %v633_v44 = vadd.f32 %v632_v32, %v618_v35  ;;  %v446_v45 = vadd.f32 %v445_v41, %v252_v37  ;;  %v839_v46 = vpop.f32.mrf.mxu0 }
  0xfb   :  { %v504_v47 = vmax.f32 %v488_v39, 0.0  ;;  %v491_v48 = vadd.f32 %v1039_v36, %v454_v40  ;;  %v871_v49 = vpop.f32.mrf.mxu1  ;;  %v623_v12 = vmul.f32 %v506_v55, %v506_v55 }
  0xfc   :  { %v634_v51 = vadd.f32 %v633_v44, %v619_v42  ;;  %v598_v52 = vadd.f32 %v597_v43, %v503_v21  ;;  %v489_v53 = vadd.f32 %v1039_v36, %v446_v45  ;;  %v265_v54 = vpop.f32.mrf.mxu0  ;;  %v467_v57 = vadd.f32 %v871_v49, %v839_v46 }
  0xfd   :  { %v507_v56 = vmax.f32 %v491_v48, 0.0  ;;  %v458_v58 = vpop.f32.mrf.mxu1  ;;  %v621_v60 = vmul.f32 %v504_v47, %v504_v47  ;;  %v650_v43 = vlaneseq }
  0xfe   :  { %v599_v59 = vadd.f32 %v598_v52, %v504_v47  ;;  %v635_v61 = vadd.f32 %v634_v51, %v620_v50  ;;  %v505_v62 = vmax.f32 %v489_v53, 0.0  ;;  %v840_v63 = vpop.f32.mrf.mxu0  ;;  %v459_v1 = vadd.f32 %v458_v58, %v265_v54 }
  0xff   :  { %v758_v0 = vpack.c.bf16 %v507_v56, %v506_v55  ;;  %v872_v2 = vpop.f32.mrf.mxu1  ;;  %v494_v8 = vadd.f32 %v1039_v36, %v467_v57  ;;  %v624_v18 = vmul.f32 %v507_v56, %v507_v56  ;;  %v651_v48 = vshrl.u32 %v650_v43, 7 }
 0x100   :  { %v636_v3 = vadd.f32 %v635_v61, %v621_v60  ;;  %v753_v4 = vpack.c.bf16 %v505_v62, %v504_v47  ;;  %v600_v5 = vadd.f32 %v599_v59, %v505_v62  ;;  %v622_v6 = vmul.f32 %v505_v62, %v505_v62  ;;  %v268_v7 = vpop.f32.mrf.mxu0 }
 0x101   :  { %774 = vst [vmem:[%s1089_s5 + $0x28] sm:$0xff] %v758_v0   ;;  %v492_v9 = vadd.f32 %v1039_v36, %v459_v1  ;;  %v470_v10 = vadd.f32 %v872_v2, %v840_v63  ;;  %v461_v11 = vpop.f32.mrf.mxu1  ;;  %v510_v22 = vmax.f32 %v494_v8, 0.0  ;;  %vm653_vm0 = vcmp.eq.s32.totalorder %v651_v48, 1 }
 0x102   :  { %773 = vst [vmem:[%s1089_s5 + $0x20] sm:$0xff] %v753_v4   ;;  %v601_v13 = vadd.f32 %v600_v5, %v506_v55  ;;  %v637_v14 = vadd.f32 %v636_v3, %v622_v6  ;;  %v462_v15 = vadd.f32 %v461_v11, %v268_v7  ;;  %vm652_vm1 = vcmp.eq.s32.totalorder %v651_v48, 0 }
 0x103   :  { %v508_v16 = vmax.f32 %v492_v9, 0.0  ;;  %v495_v17 = vadd.f32 %v1039_v36, %v470_v10  ;;  %v627_v33 = vmul.f32 %v510_v22, %v510_v22 }
 0x104   :  { %v638_v19 = vadd.f32 %v637_v14, %v623_v12  ;;  %v602_v20 = vadd.f32 %v601_v13, %v507_v56  ;;  %v493_v21 = vadd.f32 %v1039_v36, %v462_v15 }
 0x105   :  { %v511_v23 = vmax.f32 %v495_v17, 0.0  ;;  %v625_v25 = vmul.f32 %v508_v16, %v508_v16 }
 0x106   :  { %v603_v24 = vadd.f32 %v602_v20, %v508_v16  ;;  %v639_v26 = vadd.f32 %v638_v19, %v624_v18  ;;  %v509_v27 = vmax.f32 %v493_v21, 0.0 }
 0x107   :  { %v768_v28 = vpack.c.bf16 %v511_v23, %v510_v22  ;;  %v628_v35 = vmul.f32 %v511_v23, %v511_v23 }
 0x108   :  { %v640_v29 = vadd.f32 %v639_v26, %v625_v25  ;;  %v763_v30 = vpack.c.bf16 %v509_v27, %v508_v16  ;;  %v604_v31 = vadd.f32 %v603_v24, %v509_v27  ;;  %v626_v32 = vmul.f32 %v509_v27, %v509_v27 }
 0x109   :  { %776 = vst [vmem:[%s1089_s5 + $0x38] sm:$0xff] %v768_v28  }
 0x10a   :  { %775 = vst [vmem:[%s1089_s5 + $0x30] sm:$0xff] %v763_v30   ;;  %v605_v36 = vadd.f32 %v604_v31, %v510_v22  ;;  %v641_v34 = vadd.f32 %v640_v29, %v626_v32 }
 0x10c   :  { %v606_v37 = vadd.f32 %v605_v36, %v511_v23  ;;  %v642_v38 = vadd.f32 %v641_v34, %v627_v33 }
 0x10e   :  { %v607_v39 = vrot.slane %v606_v37, 4  ;;  %v643_v40 = vadd.f32 %v642_v38, %v628_v35 }
 0x110   :  { %v608_v41 = vadd.f32 %v607_v39, %v606_v37  ;;  %v644_v42 = vrot.slane %v643_v40, 4 }
 0x112   :  { %v609_v44 = vrot.slane %v608_v41, 2  ;;  %v645_v45 = vadd.f32 %v644_v42, %v643_v40 }
 0x114   :  { %v610_v46 = vadd.f32 %v609_v44, %v608_v41  ;;  %v646_v47 = vrot.slane %v645_v45, 2 }
 0x116   :  { %v647_v49 = vadd.f32 %v646_v47, %v645_v45  ;;  %v611_v50 = vrot.slane %v610_v46, 1 }
 0x118   :  { %v648_v51 = vrot.slane %v647_v49, 1  ;;  %v612_v53 = vadd.f32 %v611_v50, %v610_v46 }
 0x11a   :  { %v649_v52 = vadd.f32 %v648_v51, %v647_v49 }
 0x11c   :  { %v654_v54 = vsel %vm653_vm0, %v649_v52, 0.0 }
 0x11d   :  { %v655_v55 = vsel %vm652_vm1, %v612_v53, %v654_v54 }
 0x11e   :  { %656 = vst [vmem:[%s1090_s6] sm:$0xff] %v655_v55 }

// kernel: unet_forward.34
= control target key start
LH: loop header
LB: loop body
LE: loop exit
PB: predicated region body
PF: predicated region fallthrough
CT: control target
= control target key end

     0   :  { %s1647_s3 = inlined_call_operand.vmem [shape: bf16[256,128], index: 3, kind: input, shape index: {}]   ;;  %s1648_s2 = inlined_call_operand.vmem [shape: bf16[256,128], index: 2, kind: input, shape index: {}]   ;;  %s1649_s1 = inlined_call_operand.vmem [shape: bf16[144,256], index: 1, kind: input, shape index: {}]   ;;  %s1650_s0 = inlined_call_operand.vmem [shape: bf16[144,256], index: 0, kind: input, shape index: {}]   ;;  %s1651_s4 = inlined_call_operand.vmem [shape: f32[1,128], index: 4, kind: input, shape index: {}]   ;;  %s1652_s5 = inlined_call_operand.vmem [shape: bf16[144,128], index: 5, kind: output, shape index: {0}]   ;;  %s1653_s6 = inlined_call_operand.vmem [shape: f32[1,8,128], index: 6, kind: output, shape index: {1}]  }
   0x1   :  { %v1215_v0 = vld [vmem:[%s1647_s3 + $0x78] sm:$0xff]   ;;  %v1219_v4 = vld [vmem:[%s1647_s3 + $0x70] sm:$0xff]   ;;  %v1223_v8 = vld [vmem:[%s1647_s3 + $0x68] sm:$0xff]  }
   0x2   :  { %v1216_v1 = vld [vmem:[%s1648_s2 + $0x78] sm:$0xff]   ;;  %1075 = vmatprep.subr.bf16.mxu0 %v1215_v0  ;;  %v1220_v5 = vld [vmem:[%s1648_s2 + $0x70] sm:$0xff]   ;;  %v1224_v9 = vld [vmem:[%s1648_s2 + $0x68] sm:$0xff]  }
   0x3   :  { %v1217_v2 = vld [vmem:[%s1647_s3 + $0x38] sm:$0xff]   ;;  %1145 = vmatprep.subr.bf16.mxu1 %v1216_v1  ;;  %v1221_v6 = vld [vmem:[%s1647_s3 + $0x30] sm:$0xff]   ;;  %v1225_v10 = vld [vmem:[%s1647_s3 + $0x28] sm:$0xff]  }
   0x4   :  { %v1218_v3 = vld [vmem:[%s1648_s2 + $0x38] sm:$0xff]   ;;  %1076 = vmatpush3.bf16.msra.mxu0 %v1217_v2  ;;  %v1222_v7 = vld [vmem:[%s1648_s2 + $0x30] sm:$0xff]   ;;  %v1226_v11 = vld [vmem:[%s1648_s2 + $0x28] sm:$0xff]  }
   0x5   :  { %1146 = vmatpush3.bf16.msra.mxu1 %v1218_v3  ;;  %1077 = vmatprep.subr.bf16.mxu0 %v1219_v4  ;;  %v1227_v12 = vld [vmem:[%s1647_s3 + $0x60] sm:$0xff]   ;;  %v1231_v16 = vld [vmem:[%s1647_s3 + $0x58] sm:$0xff]   ;;  %v1235_v20 = vld [vmem:[%s1647_s3 + $0x50] sm:$0xff]  }
   0x6   :  { %1147 = vmatprep.subr.bf16.mxu1 %v1220_v5  ;;  %v1228_v13 = vld [vmem:[%s1648_s2 + $0x60] sm:$0xff]   ;;  %v1232_v17 = vld [vmem:[%s1648_s2 + $0x58] sm:$0xff]   ;;  %v1236_v21 = vld [vmem:[%s1648_s2 + $0x50] sm:$0xff]  }
   0x7   :  { %v1229_v14 = vld [vmem:[%s1647_s3 + $0x20] sm:$0xff]   ;;  %v1233_v18 = vld [vmem:[%s1647_s3 + $0x18] sm:$0xff]   ;;  %v1237_v22 = vld [vmem:[%s1647_s3 + $0x10] sm:$0xff]  }
   0x8   :  { %1078 = vmatpush3.bf16.msra.mxu0 %v1221_v6  ;;  %v1230_v15 = vld [vmem:[%s1648_s2 + $0x20] sm:$0xff]   ;;  %v1234_v19 = vld [vmem:[%s1648_s2 + $0x18] sm:$0xff]   ;;  %v1238_v23 = vld [vmem:[%s1648_s2 + $0x10] sm:$0xff]  }
   0x9   :  { %1148 = vmatpush3.bf16.msra.mxu1 %v1222_v7  ;;  %1079 = vmatprep.subr.bf16.mxu0 %v1223_v8  ;;  %v1239_v24 = vld [vmem:[%s1647_s3 + $0x48] sm:$0xff]   ;;  %v1243_v28 = vld [vmem:[%s1647_s3 + $0x40] sm:$0xff]   ;;  %v1253_v36 = vld [vmem:[%s1649_s1 + $0x14] ss:$8 sps:$4 sm:$0xff]  }
   0xa   :  { %1149 = vmatprep.subr.bf16.mxu1 %v1224_v9  ;;  %v1240_v25 = vld [vmem:[%s1648_s2 + $0x48] sm:$0xff]   ;;  %v1244_v29 = vld [vmem:[%s1648_s2 + $0x40] sm:$0xff]   ;;  %v1255_v37 = vld [vmem:[%s1650_s0 + $0x14] ss:$8 sps:$4 sm:$0xff]  }
   0xb   :  { %v1241_v26 = vld [vmem:[%s1647_s3 + $0x8] sm:$0xff]   ;;  %v1245_v30 = vld [vmem:[%s1647_s3] sm:$0xff]   ;;  %v1257_v38 = vld [vmem:[%s1649_s1 + $0x10] ss:$8 sps:$4 sm:$0xff]  }
   0xc   :  { %1080 = vmatpush3.bf16.msra.mxu0 %v1225_v10  ;;  %v1242_v27 = vld [vmem:[%s1648_s2 + $0x8] sm:$0xff]   ;;  %v1246_v31 = vld [vmem:[%s1648_s2] sm:$0xff]   ;;  %v1258_v39 = vld [vmem:[%s1650_s0 + $0x10] ss:$8 sps:$4 sm:$0xff]  }
   0xd   :  { %1150 = vmatpush3.bf16.msra.mxu1 %v1226_v11  ;;  %1081 = vmatprep.subr.bf16.mxu0 %v1227_v12  ;;  %v1247_v32 = vld [vmem:[%s1649_s1] ss:$8 sps:$4 sm:$0xff]   ;;  %v1249_v33 = vld [vmem:[%s1649_s1 + $0x4] ss:$8 sps:$4 sm:$0xff]   ;;  %v1265_v44 = vld [vmem:[%s1649_s1 + $0x34] ss:$8 sps:$4 sm:$0xff]  }
   0xe   :  { %1151 = vmatprep.subr.bf16.mxu1 %v1228_v13  ;;  %v1250_v34 = vld [vmem:[%s1650_s0] ss:$8 sps:$4 sm:$0xff]   ;;  %v1252_v35 = vld [vmem:[%s1650_s0 + $0x4] ss:$8 sps:$4 sm:$0xff]   ;;  %341 = vmatprep.mubr.bf16.mxu0 %v1249_v33  ;;  %v1267_v45 = vld [vmem:[%s1650_s0 + $0x34] ss:$8 sps:$4 sm:$0xff]  }
   0xf   :  { %632 = vmatprep.mubr.bf16.mxu1 %v1252_v35  ;;  %v1259_v40 = vld [vmem:[%s1649_s1 + $0x24] ss:$8 sps:$4 sm:$0xff]   ;;  %v1263_v42 = vld [vmem:[%s1649_s1 + $0x20] ss:$8 sps:$4 sm:$0xff]   ;;  %v1269_v46 = vld [vmem:[%s1649_s1 + $0x30] ss:$8 sps:$4 sm:$0xff]  }
  0x10   :  { %1082 = vmatpush3.bf16.msra.mxu0 %v1229_v14  ;;  %v1261_v41 = vld [vmem:[%s1650_s0 + $0x24] ss:$8 sps:$4 sm:$0xff]   ;;  %v1264_v43 = vld [vmem:[%s1650_s0 + $0x20] ss:$8 sps:$4 sm:$0xff]   ;;  %v1270_v47 = vld [vmem:[%s1650_s0 + $0x30] ss:$8 sps:$4 sm:$0xff]  }
  0x11   :  { %1152 = vmatpush3.bf16.msra.mxu1 %v1230_v15  ;;  %1083 = vmatprep.subr.bf16.mxu0 %v1231_v16  ;;  %v1271_v48 = vld [vmem:[%s1649_s1 + $0x44] ss:$8 sps:$4 sm:$0xff]   ;;  %v1275_v50 = vld [vmem:[%s1649_s1 + $0x40] ss:$8 sps:$4 sm:$0xff]   ;;  %v1277_v52 = vld [vmem:[%s1649_s1 + $0x54] ss:$8 sps:$4 sm:$0xff]  }
  0x12   :  { %1153 = vmatprep.subr.bf16.mxu1 %v1232_v17  ;;  %v1273_v49 = vld [vmem:[%s1650_s0 + $0x44] ss:$8 sps:$4 sm:$0xff]   ;;  %v1276_v51 = vld [vmem:[%s1650_s0 + $0x40] ss:$8 sps:$4 sm:$0xff]   ;;  %v1279_v53 = vld [vmem:[%s1650_s0 + $0x54] ss:$8 sps:$4 sm:$0xff]  }
  0x13   :  { %v1281_v54 = vld [vmem:[%s1649_s1 + $0x50] ss:$8 sps:$4 sm:$0xff]   ;;  %v1283_v56 = vld [vmem:[%s1649_s1 + $0x64] ss:$8 sps:$4 sm:$0xff]   ;;  %v1287_v58 = vld [vmem:[%s1649_s1 + $0x60] ss:$8 sps:$4 sm:$0xff]  }
  0x14   :  { %1084 = vmatpush3.bf16.msra.mxu0 %v1233_v18  ;;  %v1282_v55 = vld [vmem:[%s1650_s0 + $0x50] ss:$8 sps:$4 sm:$0xff]   ;;  %v1285_v57 = vld [vmem:[%s1650_s0 + $0x64] ss:$8 sps:$4 sm:$0xff]   ;;  %v1288_v59 = vld [vmem:[%s1650_s0 + $0x60] ss:$8 sps:$4 sm:$0xff]  }
  0x15   :  { %1154 = vmatpush3.bf16.msra.mxu1 %v1234_v19  ;;  %1085 = vmatprep.subr.bf16.mxu0 %v1235_v20  ;;  %v1289_v60 = vld [vmem:[%s1649_s1 + $0x74] ss:$8 sps:$4 sm:$0xff]   ;;  %v1293_v62 = vld [vmem:[%s1649_s1 + $0x70] ss:$8 sps:$4 sm:$0xff]   ;;  %v1295_v0 = vld [vmem:[%s1649_s1 + $0x84] ss:$8 sps:$4 sm:$0xff]  }
  0x16   :  { %1155 = vmatprep.subr.bf16.mxu1 %v1236_v21  ;;  %v1291_v61 = vld [vmem:[%s1650_s0 + $0x74] ss:$8 sps:$4 sm:$0xff]   ;;  %v1294_v63 = vld [vmem:[%s1650_s0 + $0x70] ss:$8 sps:$4 sm:$0xff]   ;;  %v1297_v1 = vld [vmem:[%s1650_s0 + $0x84] ss:$8 sps:$4 sm:$0xff]  }
  0x17   :  { %v1299_v2 = vld [vmem:[%s1649_s1 + $0x80] ss:$8 sps:$4 sm:$0xff]  }
  0x18   :  { %1086 = vmatpush3.bf16.msra.mxu0 %v1237_v22  ;;  %v1300_v3 = vld [vmem:[%s1650_s0 + $0x80] ss:$8 sps:$4 sm:$0xff]  }
  0x19   :  { %1156 = vmatpush3.bf16.msra.mxu1 %v1238_v23  ;;  %1087 = vmatprep.subr.bf16.mxu0 %v1239_v24  ;;  %v1543_v14 = vld [vmem:[%s1651_s4] ss:$0 sm:$0xff] }
  0x1a   :  { %1157 = vmatprep.subr.bf16.mxu1 %v1240_v25 }
  0x1c   :  { %1088 = vmatpush3.bf16.msra.mxu0 %v1241_v26 }
  0x1d   :  { %1158 = vmatpush3.bf16.msra.mxu1 %v1242_v27  ;;  %1089 = vmatprep.subr.bf16.mxu0 %v1243_v28 }
  0x1e   :  { %1159 = vmatprep.subr.bf16.mxu1 %v1244_v29 }
  0x20   :  { %1090 = vmatpush3.bf16.msra.mxu0 %v1245_v30 }
  0x21   :  { %1160 = vmatpush3.bf16.msra.mxu1 %v1246_v31 }
  0x23   :  { %342 = vmatmul.mubr.bf16.vlgmr.msra.gmra.mxu0 %v1247_v32 }
  0x24   :  { %633 = vmatmul.mubr.bf16.vlgmr.msra.gmra.mxu1 %v1250_v34  ;;  %349 = vmatprep.mubr.bf16.mxu0 %v1253_v36 }
  0x25   :  { %640 = vmatprep.mubr.bf16.mxu1 %v1255_v37 }
  0x2b   :  { %350 = vmatmul.mubr.bf16.gmra.mxu0 %v1257_v38 }
  0x2c   :  { %641 = vmatmul.mubr.bf16.gmra.mxu1 %v1258_v39  ;;  %357 = vmatprep.mubr.bf16.mxu0 %v1259_v40 }
  0x2d   :  { %648 = vmatprep.mubr.bf16.mxu1 %v1261_v41 }
  0x33   :  { %358 = vmatmul.mubr.bf16.gmra.mxu0 %v1263_v42 }
  0x34   :  { %649 = vmatmul.mubr.bf16.gmra.mxu1 %v1264_v43  ;;  %365 = vmatprep.mubr.bf16.mxu0 %v1265_v44 }
  0x35   :  { %656 = vmatprep.mubr.bf16.mxu1 %v1267_v45 }
  0x3b   :  { %366 = vmatmul.mubr.bf16.gmra.mxu0 %v1269_v46 }
  0x3c   :  { %657 = vmatmul.mubr.bf16.gmra.mxu1 %v1270_v47  ;;  %373 = vmatprep.mubr.bf16.mxu0 %v1271_v48 }
  0x3d   :  { %664 = vmatprep.mubr.bf16.mxu1 %v1273_v49 }
  0x43   :  { %374 = vmatmul.mubr.bf16.gmra.mxu0 %v1275_v50 }
  0x44   :  { %665 = vmatmul.mubr.bf16.gmra.mxu1 %v1276_v51  ;;  %381 = vmatprep.mubr.bf16.mxu0 %v1277_v52 }
  0x45   :  { %672 = vmatprep.mubr.bf16.mxu1 %v1279_v53 }
  0x4b   :  { %382 = vmatmul.mubr.bf16.gmra.mxu0 %v1281_v54 }
  0x4c   :  { %673 = vmatmul.mubr.bf16.gmra.mxu1 %v1282_v55  ;;  %389 = vmatprep.mubr.bf16.mxu0 %v1283_v56 }
  0x4d   :  { %680 = vmatprep.mubr.bf16.mxu1 %v1285_v57 }
  0x53   :  { %390 = vmatmul.mubr.bf16.gmra.mxu0 %v1287_v58 }
  0x54   :  { %681 = vmatmul.mubr.bf16.gmra.mxu1 %v1288_v59  ;;  %397 = vmatprep.mubr.bf16.mxu0 %v1289_v60 }
  0x55   :  { %688 = vmatprep.mubr.bf16.mxu1 %v1291_v61 }
  0x5b   :  { %398 = vmatmul.mubr.bf16.gmra.mxu0 %v1293_v62 }
  0x5c   :  { %689 = vmatmul.mubr.bf16.gmra.mxu1 %v1294_v63  ;;  %405 = vmatprep.mubr.bf16.mxu0 %v1295_v0 }
  0x5d   :  { %696 = vmatprep.mubr.bf16.mxu1 %v1297_v1 }
  0x63   :  { %406 = vmatmul.mubr.bf16.gmra.mxu0 %v1299_v2 }
  0x64   :  { %697 = vmatmul.mubr.bf16.gmra.mxu1 %v1300_v3 }
  0xe3   :  { %v1091_v4 = vpop.f32.mrf.mxu0 }
  0xe4   :  { %v1161_v5 = vpop.f32.mrf.mxu1 }
  0xe5   :  { %v1092_v6 = vpop.f32.mrf.mxu0 }
  0xe6   :  { %v1093_v7 = vadd.f32 %v1092_v6, %v1091_v4  ;;  %v1162_v8 = vpop.f32.mrf.mxu1 }
  0xe7   :  { %v1163_v9 = vadd.f32 %v1162_v8, %v1161_v5  ;;  %v1094_v10 = vpop.f32.mrf.mxu0 }
  0xe8   :  { %v1164_v11 = vpop.f32.mrf.mxu1 }
  0xe9   :  { %v635_v12 = vadd.f32 %v1163_v9, %v1093_v7  ;;  %v1095_v13 = vpop.f32.mrf.mxu0 }
  0xea   :  { %v1096_v15 = vadd.f32 %v1095_v13, %v1094_v10  ;;  %v1165_v16 = vpop.f32.mrf.mxu1 }
  0xeb   :  { %v1166_v17 = vadd.f32 %v1165_v16, %v1164_v11  ;;  %v1097_v18 = vpop.f32.mrf.mxu0  ;;  %v712_v20 = vadd.f32 %v1543_v14, %v635_v12 }
  0xec   :  { %v1167_v19 = vpop.f32.mrf.mxu1 }
  0xed   :  { %v638_v21 = vadd.f32 %v1166_v17, %v1096_v15  ;;  %v1098_v22 = vpop.f32.mrf.mxu0  ;;  %v1547_v29 = vmax.f32 %v712_v20, 0.0 }
  0xee   :  { %v1099_v23 = vadd.f32 %v1098_v22, %v1097_v18  ;;  %v1168_v24 = vpop.f32.mrf.mxu1 }
  0xef   :  { %v713_v25 = vadd.f32 %v1543_v14, %v638_v21  ;;  %v1169_v26 = vadd.f32 %v1168_v24, %v1167_v19  ;;  %v1100_v27 = vpop.f32.mrf.mxu0 }
  0xf0   :  { %v1170_v28 = vpop.f32.mrf.mxu1 }
  0xf1   :  { %v1549_v30 = vmax.f32 %v713_v25, 0.0  ;;  %v1101_v31 = vpop.f32.mrf.mxu0  ;;  %v643_v32 = vadd.f32 %v1169_v26, %v1099_v23 }
  0xf2   :  { %v1102_v33 = vadd.f32 %v1101_v31, %v1100_v27  ;;  %v1171_v34 = vpop.f32.mrf.mxu1 }
  0xf3   :  { %v1025_v35 = vpack.c.bf16 %v1549_v30, %v1547_v29  ;;  %v1103_v36 = vpop.f32.mrf.mxu0  ;;  %v1172_v37 = vadd.f32 %v1171_v34, %v1170_v28  ;;  %v714_v40 = vadd.f32 %v1543_v14, %v643_v32 }
  0xf4   :  { %v1173_v38 = vpop.f32.mrf.mxu1 }
  0xf5   :  { %1026 = vst [vmem:[%s1652_s5] sm:$0xff] %v1025_v35   ;;  %v1104_v39 = vpop.f32.mrf.mxu0  ;;  %v646_v41 = vadd.f32 %v1172_v37, %v1102_v33  ;;  %v1558_v50 = vmax.f32 %v714_v40, 0.0  ;;  %v862_v40 = vmul.f32 %v1549_v30, %v1549_v30 }
  0xf6   :  { %v1105_v42 = vadd.f32 %v1104_v39, %v1103_v36  ;;  %v1174_v43 = vpop.f32.mrf.mxu1 }
  0xf7   :  { %v1175_v44 = vadd.f32 %v1174_v43, %v1173_v38  ;;  %v1106_v45 = vpop.f32.mrf.mxu0  ;;  %v715_v46 = vadd.f32 %v1543_v14, %v646_v41 }
  0xf8   :  { %v1176_v47 = vpop.f32.mrf.mxu1 }
  0xf9   :  { %v651_v48 = vadd.f32 %v1175_v44, %v1105_v42  ;;  %v1107_v49 = vpop.f32.mrf.mxu0  ;;  %v1560_v51 = vmax.f32 %v715_v46, 0.0  ;;  %v863_v46 = vmul.f32 %v1558_v50, %v1558_v50 }
  0xfa   :  { %v1108_v52 = vadd.f32 %v1107_v49, %v1106_v45  ;;  %v1177_v53 = vpop.f32.mrf.mxu1  ;;  %v861_v45 = vmul.f32 %v1547_v29, %v1547_v29 }
  0xfb   :  { %v1178_v54 = vadd.f32 %v1177_v53, %v1176_v47  ;;  %v1109_v55 = vpop.f32.mrf.mxu0  ;;  %v1030_v56 = vpack.c.bf16 %v1560_v51, %v1558_v50  ;;  %v716_v58 = vadd.f32 %v1543_v14, %v651_v48 }
  0xfc   :  { %v1179_v57 = vpop.f32.mrf.mxu1 }
  0xfd   :  { %v654_v59 = vadd.f32 %v1178_v54, %v1108_v52  ;;  %v1110_v60 = vpop.f32.mrf.mxu0  ;;  %1067 = vst [vmem:[%s1652_s5 + $0x8] sm:$0xff] %v1030_v56   ;;  %v1569_v3 = vmax.f32 %v716_v58, 0.0  ;;  %v879_v56 = vadd.f32 %v862_v40, %v861_v45 }
  0xfe   :  { %v1111_v61 = vadd.f32 %v1110_v60, %v1109_v55  ;;  %v1180_v62 = vpop.f32.mrf.mxu1  ;;  %v838_v55 = vadd.f32 %v1549_v30, %v1547_v29 }
  0xff   :  { %v717_v63 = vadd.f32 %v1543_v14, %v654_v59  ;;  %v1181_v0 = vadd.f32 %v1180_v62, %v1179_v57  ;;  %v1112_v1 = vpop.f32.mrf.mxu0  ;;  %v864_v57 = vmul.f32 %v1560_v51, %v1560_v51 }
 0x100   :  { %v1182_v2 = vpop.f32.mrf.mxu1  ;;  %v839_v62 = vadd.f32 %v838_v55, %v1558_v50 }
 0x101   :  { %v1571_v4 = vmax.f32 %v717_v63, 0.0  ;;  %v1113_v5 = vpop.f32.mrf.mxu0  ;;  %v659_v6 = vadd.f32 %v1181_v0, %v1111_v61  ;;  %v880_v63 = vadd.f32 %v879_v56, %v863_v46  ;;  %v865_v0 = vmul.f32 %v1569_v3, %v1569_v3 }
 0x102   :  { %v1114_v7 = vadd.f32 %v1113_v5, %v1112_v1  ;;  %v1183_v8 = vpop.f32.mrf.mxu1 }
 0x103   :  { %v1035_v9 = vpack.c.bf16 %v1571_v4, %v1569_v3  ;;  %v1115_v10 = vpop.f32.mrf.mxu0  ;;  %v1184_v11 = vadd.f32 %v1183_v8, %v1182_v2  ;;  %v718_v15 = vadd.f32 %v1543_v14, %v659_v6  ;;  %v840_v6 = vadd.f32 %v839_v62, %v1560_v51 }
 0x104   :  { %v1185_v12 = vpop.f32.mrf.mxu1  ;;  %v866_v50 = vmul.f32 %v1571_v4, %v1571_v4 }
 0x105   :  { %1068 = vst [vmem:[%s1652_s5 + $0x10] sm:$0xff] %v1035_v9   ;;  %v1116_v13 = vpop.f32.mrf.mxu0  ;;  %v662_v16 = vadd.f32 %v1184_v11, %v1114_v7  ;;  %v1580_v25 = vmax.f32 %v718_v15, 0.0  ;;  %v881_v7 = vadd.f32 %v880_v63, %v864_v57 }
 0x106   :  { %v1117_v17 = vadd.f32 %v1116_v13, %v1115_v10  ;;  %v1186_v18 = vpop.f32.mrf.mxu1 }
 0x107   :  { %v1187_v19 = vadd.f32 %v1186_v18, %v1185_v12  ;;  %v1118_v20 = vpop.f32.mrf.mxu0  ;;  %v719_v21 = vadd.f32 %v1543_v14, %v662_v16  ;;  %v841_v12 = vadd.f32 %v840_v6, %v1569_v3  ;;  %v882_v13 = vadd.f32 %v881_v7, %v865_v0 }
 0x108   :  { %v1188_v22 = vpop.f32.mrf.mxu1 }
 0x109   :  { %v667_v23 = vadd.f32 %v1187_v19, %v1117_v17  ;;  %v1119_v24 = vpop.f32.mrf.mxu0  ;;  %v1582_v26 = vmax.f32 %v719_v21, 0.0  ;;  %v867_v17 = vmul.f32 %v1580_v25, %v1580_v25  ;;  %v842_v21 = vadd.f32 %v841_v12, %v1571_v4 }
 0x10a   :  { %v1120_v27 = vadd.f32 %v1119_v24, %v1118_v20  ;;  %v1189_v28 = vpop.f32.mrf.mxu1  ;;  %v883_v24 = vadd.f32 %v882_v13, %v866_v50 }
 0x10b   :  { %v1190_v31 = vadd.f32 %v1189_v28, %v1188_v22  ;;  %v1121_v32 = vpop.f32.mrf.mxu0  ;;  %v1040_v33 = vpack.c.bf16 %v1582_v26, %v1580_v25  ;;  %v720_v35 = vadd.f32 %v1543_v14, %v667_v23 }
 0x10c   :  { %v1191_v34 = vpop.f32.mrf.mxu1 }
 0x10d   :  { %v670_v36 = vadd.f32 %v1190_v31, %v1120_v27  ;;  %v1122_v37 = vpop.f32.mrf.mxu0  ;;  %1069 = vst [vmem:[%s1652_s5 + $0x18] sm:$0xff] %v1040_v33   ;;  %v738_v47 = vmax.f32 %v720_v35, 0.0  ;;  %v868_v27 = vmul.f32 %v1582_v26, %v1582_v26  ;;  %v843_v31 = vadd.f32 %v842_v21, %v1580_v25 }
 0x10e   :  { %v1123_v38 = vadd.f32 %v1122_v37, %v1121_v32  ;;  %v1192_v39 = vpop.f32.mrf.mxu1  ;;  %v884_v35 = vadd.f32 %v883_v24, %v867_v17 }
 0x10f   :  { %v721_v41 = vadd.f32 %v1543_v14, %v670_v36  ;;  %v1193_v42 = vadd.f32 %v1192_v39, %v1191_v34  ;;  %v1124_v43 = vpop.f32.mrf.mxu0  ;;  %v869_v36 = vmul.f32 %v738_v47, %v738_v47 }
 0x110   :  { %v1194_v44 = vpop.f32.mrf.mxu1 }
 0x111   :  { %v1597_v48 = vmax.f32 %v721_v41, 0.0  ;;  %v1125_v49 = vpop.f32.mrf.mxu0  ;;  %v675_v52 = vadd.f32 %v1193_v42, %v1123_v38  ;;  %v844_v38 = vadd.f32 %v843_v31, %v1582_v26  ;;  %v885_v42 = vadd.f32 %v884_v35, %v868_v27 }
 0x112   :  { %v1126_v53 = vadd.f32 %v1125_v49, %v1124_v43  ;;  %v1195_v54 = vpop.f32.mrf.mxu1 }
 0x113   :  { %v1045_v58 = vpack.c.bf16 %v1597_v48, %v738_v47  ;;  %v1127_v59 = vpop.f32.mrf.mxu0  ;;  %v1196_v60 = vadd.f32 %v1195_v54, %v1194_v44  ;;  %v722_v30 = vadd.f32 %v1543_v14, %v675_v52  ;;  %v870_v25 = vmul.f32 %v1597_v48, %v1597_v48 }
 0x114   :  { %v1197_v61 = vpop.f32.mrf.mxu1  ;;  %v845_v44 = vadd.f32 %v844_v38, %v738_v47 }
 0x115   :  { %1070 = vst [vmem:[%s1652_s5 + $0x20] sm:$0xff] %v1045_v58   ;;  %v1128_v29 = vpop.f32.mrf.mxu0  ;;  %v678_v1 = vadd.f32 %v1196_v60, %v1126_v53  ;;  %v740_v18 = vmax.f32 %v722_v30, 0.0  ;;  %v886_v53 = vadd.f32 %v885_v42, %v869_v36 }
 0x116   :  { %v1129_v2 = vadd.f32 %v1128_v29, %v1127_v59  ;;  %v1198_v5 = vpop.f32.mrf.mxu1  ;;  %v846_v26 = vadd.f32 %v845_v44, %v1597_v48 }
 0x117   :  { %v1199_v8 = vadd.f32 %v1198_v5, %v1197_v61  ;;  %v1130_v9 = vpop.f32.mrf.mxu0  ;;  %v723_v10 = vadd.f32 %v1543_v14, %v678_v1  ;;  %v871_v54 = vmul.f32 %v740_v18, %v740_v18  ;;  %v887_v60 = vadd.f32 %v886_v53, %v870_v25 }
 0x118   :  { %v1200_v11 = vpop.f32.mrf.mxu1  ;;  %v847_v0 = vadd.f32 %v846_v26, %v740_v18 }
 0x119   :  { %v683_v15 = vadd.f32 %v1199_v8, %v1129_v2  ;;  %v1131_v16 = vpop.f32.mrf.mxu0  ;;  %v741_v19 = vmax.f32 %v723_v10, 0.0  ;;  %v888_v29 = vadd.f32 %v887_v60, %v871_v54 }
 0x11a   :  { %v1132_v51 = vadd.f32 %v1131_v16, %v1130_v9  ;;  %v1201_v20 = vpop.f32.mrf.mxu1 }
 0x11b   :  { %v1202_v22 = vadd.f32 %v1201_v20, %v1200_v11  ;;  %v1133_v23 = vpop.f32.mrf.mxu0  ;;  %v1050_v28 = vpack.c.bf16 %v741_v19, %v740_v18  ;;  %v724_v32 = vadd.f32 %v1543_v14, %v683_v15  ;;  %v872_v61 = vmul.f32 %v741_v19, %v741_v19 }
 0x11c   :  { %v1203_v3 = vpop.f32.mrf.mxu1  ;;  %v848_v48 = vadd.f32 %v847_v0, %v741_v19 }
 0x11d   :  { %v686_v33 = vadd.f32 %v1202_v22, %v1132_v51  ;;  %v1134_v34 = vpop.f32.mrf.mxu0  ;;  %1071 = vst [vmem:[%s1652_s5 + $0x28] sm:$0xff] %v1050_v28   ;;  %v742_v45 = vmax.f32 %v724_v32, 0.0  ;;  %v889_v9 = vadd.f32 %v888_v29, %v872_v61 }
 0x11e   :  { %v1135_v4 = vadd.f32 %v1134_v34, %v1133_v23  ;;  %v1204_v37 = vpop.f32.mrf.mxu1 }
 0x11f   :  { %v725_v39 = vadd.f32 %v1543_v14, %v686_v33  ;;  %v1205_v40 = vadd.f32 %v1204_v37, %v1203_v3  ;;  %v1136_v41 = vpop.f32.mrf.mxu0  ;;  %v873_v30 = vmul.f32 %v742_v45, %v742_v45  ;;  %v849_v12 = vadd.f32 %v848_v48, %v742_v45 }
 0x120   :  { %v1206_v43 = vpop.f32.mrf.mxu1 }
 0x121   :  { %v743_v46 = vmax.f32 %v725_v39, 0.0  ;;  %v691_v49 = vadd.f32 %v1205_v40, %v1135_v4  ;;  %v1137_v52 = vpop.f32.mrf.mxu0  ;;  %v890_v16 = vadd.f32 %v889_v9, %v873_v30 }
 0x122   :  { %v1138_v55 = vadd.f32 %v1137_v52, %v1136_v41  ;;  %v1207_v56 = vpop.f32.mrf.mxu1 }
 0x123   :  { %v1055_v57 = vpack.c.bf16 %v743_v46, %v742_v45  ;;  %v726_v58 = vadd.f32 %v1543_v14, %v691_v49  ;;  %v1139_v59 = vpop.f32.mrf.mxu0  ;;  %v1208_v62 = vadd.f32 %v1207_v56, %v1206_v43  ;;  %v874_v50 = vmul.f32 %v743_v46, %v743_v46 }
 0x124   :  { %v1209_v63 = vpop.f32.mrf.mxu1  ;;  %v850_v20 = vadd.f32 %v849_v12, %v743_v46  ;;  %v902_v45 = vlaneseq }
 0x125   :  { %1072 = vst [vmem:[%s1652_s5 + $0x30] sm:$0xff] %v1055_v57   ;;  %v1140_v47 = vpop.f32.mrf.mxu0  ;;  %v694_v1 = vadd.f32 %v1208_v62, %v1138_v55  ;;  %v744_v6 = vmax.f32 %v726_v58, 0.0  ;;  %v891_v23 = vadd.f32 %v890_v16, %v874_v50 }
 0x126   :  { %v1141_v2 = vadd.f32 %v1140_v47, %v1139_v59  ;;  %v1210_v5 = vpop.f32.mrf.mxu1  ;;  %v903_v53 = vshrl.u32 %v902_v45, 7 }
 0x127   :  { %v1211_v7 = vadd.f32 %v1210_v5, %v1209_v63  ;;  %v1142_v8 = vpop.f32.mrf.mxu0  ;;  %v727_v10 = vadd.f32 %v1543_v14, %v694_v1  ;;  %v875_v21 = vmul.f32 %v744_v6, %v744_v6  ;;  %v851_v27 = vadd.f32 %v850_v20, %v744_v6 }
 0x128   :  { %v1212_v11 = vpop.f32.mrf.mxu1  ;;  %vm905_vm0 = vcmp.eq.s32.totalorder %v903_v53, 1  ;;  %vm904_vm1 = vcmp.eq.s32.totalorder %v903_v53, 0 }
 0x129   :  { %v699_v13 = vadd.f32 %v1211_v7, %v1141_v2  ;;  %v1143_v15 = vpop.f32.mrf.mxu0  ;;  %v745_v17 = vmax.f32 %v727_v10, 0.0  ;;  %v892_v32 = vadd.f32 %v891_v23, %v875_v21 }
 0x12a   :  { %v1144_v18 = vadd.f32 %v1143_v15, %v1142_v8  ;;  %v1213_v51 = vpop.f32.mrf.mxu1 }
 0x12b   :  { %v728_v22 = vadd.f32 %v1543_v14, %v699_v13  ;;  %v1214_v19 = vadd.f32 %v1213_v51, %v1212_v11  ;;  %v1060_v24 = vpack.c.bf16 %v745_v17, %v744_v6  ;;  %v876_v28 = vmul.f32 %v745_v17, %v745_v17 }
 0x12c   :  { %v852_v33 = vadd.f32 %v851_v27, %v745_v17 }
 0x12d   :  { %v746_v3 = vmax.f32 %v728_v22, 0.0  ;;  %v702_v31 = vadd.f32 %v1214_v19, %v1144_v18  ;;  %1073 = vst [vmem:[%s1652_s5 + $0x38] sm:$0xff] %v1060_v24   ;;  %v893_v36 = vadd.f32 %v892_v32, %v876_v28 }
 0x12f   :  { %v877_v34 = vmul.f32 %v746_v3, %v746_v3  ;;  %v729_v35 = vadd.f32 %v1543_v14, %v702_v31  ;;  %v853_v4 = vadd.f32 %v852_v33, %v746_v3 }
 0x131   :  { %v747_v37 = vmax.f32 %v729_v35, 0.0  ;;  %v894_v38 = vadd.f32 %v893_v36, %v877_v34 }
 0x133   :  { %v1065_v39 = vpack.c.bf16 %v747_v37, %v746_v3  ;;  %v854_v40 = vadd.f32 %v853_v4, %v747_v37  ;;  %v878_v41 = vmul.f32 %v747_v37, %v747_v37 }
 0x135   :  { %1074 = vst [vmem:[%s1652_s5 + $0x40] sm:$0xff] %v1065_v39   ;;  %v855_v42 = vrot.slane %v854_v40, 4  ;;  %v895_v25 = vadd.f32 %v894_v38, %v878_v41 }
 0x137   :  { %v856_v43 = vadd.f32 %v855_v42, %v854_v40  ;;  %v896_v44 = vrot.slane %v895_v25, 4 }
 0x139   :  { %v857_v46 = vrot.slane %v856_v43, 2  ;;  %v897_v49 = vadd.f32 %v896_v44, %v895_v25 }
 0x13b   :  { %v858_v52 = vadd.f32 %v857_v46, %v856_v43  ;;  %v898_v14 = vrot.slane %v897_v49, 2 }
 0x13d   :  { %v899_v54 = vadd.f32 %v898_v14, %v897_v49  ;;  %v859_v55 = vrot.slane %v858_v52, 1 }
 0x13f   :  { %v900_v56 = vrot.slane %v899_v54, 1  ;;  %v860_v57 = vadd.f32 %v859_v55, %v858_v52 }
 0x141   :  { %v901_v26 = vadd.f32 %v900_v56, %v899_v54 }
 0x143   :  { %v906_v58 = vsel %vm905_vm0, %v901_v26, 0.0 }
 0x144   :  { %v907_v59 = vsel %vm904_vm1, %v860_v57, %v906_v58 }
 0x145   :  { %908 = vst [vmem:[%s1653_s6] sm:$0xff] %v907_v59 }

// kernel: unet_forward.32
= control target key start
LH: loop header
LB: loop body
LE: loop exit
PB: predicated region body
PF: predicated region fallthrough
CT: control target
= control target key end

     0   :  { %s3205_s3 = inlined_call_operand.vmem [shape: bf16[512,128], index: 3, kind: input, shape index: {}]   ;;  %s3206_s1 = inlined_call_operand.vmem [shape: bf16[176,512], index: 1, kind: input, shape index: {}]   ;;  %s3207_s2 = inlined_call_operand.vmem [shape: bf16[512,128], index: 2, kind: input, shape index: {}]   ;;  %s3208_s0 = inlined_call_operand.vmem [shape: bf16[176,512], index: 0, kind: input, shape index: {}]   ;;  %s3209_s4 = inlined_call_operand.vmem [shape: f32[1,128], index: 4, kind: input, shape index: {}]   ;;  %s3210_s5 = inlined_call_operand.vmem [shape: bf16[176,128], index: 5, kind: output, shape index: {0}]   ;;  %s3211_s6 = inlined_call_operand.vmem [shape: f32[1,8,128], index: 6, kind: output, shape index: {1}]  }
   0x1   :  { %v2389_v0 = vld [vmem:[%s3205_s3 + $0x78] sm:$0xff]   ;;  %v2393_v4 = vld [vmem:[%s3205_s3 + $0x70] sm:$0xff]   ;;  %v2397_v8 = vld [vmem:[%s3205_s3 + $0x68] sm:$0xff]  }
   0x2   :  { %v2390_v1 = vld [vmem:[%s3205_s3 + $0xf8] sm:$0xff]   ;;  %2061 = vmatprep.subr.bf16.mxu0 %v2389_v0  ;;  %v2394_v5 = vld [vmem:[%s3205_s3 + $0xf0] sm:$0xff]   ;;  %v2398_v9 = vld [vmem:[%s3205_s3 + $0xe8] sm:$0xff]  }
   0x3   :  { %v2391_v2 = vld [vmem:[%s3205_s3 + $0x38] sm:$0xff]   ;;  %2143 = vmatprep.subr.bf16.mxu1 %v2390_v1  ;;  %v2395_v6 = vld [vmem:[%s3205_s3 + $0x30] sm:$0xff]   ;;  %v2399_v10 = vld [vmem:[%s3205_s3 + $0x28] sm:$0xff]  }
   0x4   :  { %v2392_v3 = vld [vmem:[%s3205_s3 + $0xb8] sm:$0xff]   ;;  %2062 = vmatpush3.bf16.msra.mxu0 %v2391_v2  ;;  %v2396_v7 = vld [vmem:[%s3205_s3 + $0xb0] sm:$0xff]   ;;  %v2400_v11 = vld [vmem:[%s3205_s3 + $0xa8] sm:$0xff]  }
   0x5   :  { %2144 = vmatpush3.bf16.msra.mxu1 %v2392_v3  ;;  %2063 = vmatprep.subr.bf16.mxu0 %v2393_v4  ;;  %v2401_v12 = vld [vmem:[%s3205_s3 + $0x60] sm:$0xff]   ;;  %v2405_v16 = vld [vmem:[%s3205_s3 + $0x58] sm:$0xff]   ;;  %v2409_v20 = vld [vmem:[%s3205_s3 + $0x50] sm:$0xff]  }
   0x6   :  { %2145 = vmatprep.subr.bf16.mxu1 %v2394_v5  ;;  %v2402_v13 = vld [vmem:[%s3205_s3 + $0xe0] sm:$0xff]   ;;  %v2406_v17 = vld [vmem:[%s3205_s3 + $0xd8] sm:$0xff]   ;;  %v2410_v21 = vld [vmem:[%s3205_s3 + $0xd0] sm:$0xff]  }
   0x7   :  { %v2403_v14 = vld [vmem:[%s3205_s3 + $0x20] sm:$0xff]   ;;  %v2407_v18 = vld [vmem:[%s3205_s3 + $0x18] sm:$0xff]   ;;  %v2411_v22 = vld [vmem:[%s3205_s3 + $0x10] sm:$0xff]  }
   0x8   :  { %2064 = vmatpush3.bf16.msra.mxu0 %v2395_v6  ;;  %v2404_v15 = vld [vmem:[%s3205_s3 + $0xa0] sm:$0xff]   ;;  %v2408_v19 = vld [vmem:[%s3205_s3 + $0x98] sm:$0xff]   ;;  %v2412_v23 = vld [vmem:[%s3205_s3 + $0x90] sm:$0xff]  }
   0x9   :  { %2146 = vmatpush3.bf16.msra.mxu1 %v2396_v7  ;;  %2065 = vmatprep.subr.bf16.mxu0 %v2397_v8  ;;  %v2413_v24 = vld [vmem:[%s3205_s3 + $0x48] sm:$0xff]   ;;  %v2417_v28 = vld [vmem:[%s3205_s3 + $0x40] sm:$0xff]   ;;  %v2427_v36 = vld [vmem:[%s3207_s2 + $0x78] sm:$0xff]  }
   0xa   :  { %2147 = vmatprep.subr.bf16.mxu1 %v2398_v9  ;;  %v2414_v25 = vld [vmem:[%s3205_s3 + $0xc8] sm:$0xff]   ;;  %v2418_v29 = vld [vmem:[%s3205_s3 + $0xc0] sm:$0xff]   ;;  %v2428_v37 = vld [vmem:[%s3207_s2 + $0x38] sm:$0xff]  }
   0xb   :  { %v2415_v26 = vld [vmem:[%s3205_s3 + $0x8] sm:$0xff]   ;;  %v2419_v30 = vld [vmem:[%s3205_s3] sm:$0xff]   ;;  %v2429_v38 = vld [vmem:[%s3207_s2 + $0xf8] sm:$0xff]  }
   0xc   :  { %2066 = vmatpush3.bf16.msra.mxu0 %v2399_v10  ;;  %v2416_v27 = vld [vmem:[%s3205_s3 + $0x88] sm:$0xff]   ;;  %v2420_v31 = vld [vmem:[%s3205_s3 + $0x80] sm:$0xff]   ;;  %v2430_v39 = vld [vmem:[%s3207_s2 + $0xb8] sm:$0xff]  }
   0xd   :  { %2148 = vmatpush3.bf16.msra.mxu1 %v2400_v11  ;;  %2067 = vmatprep.subr.bf16.mxu0 %v2401_v12  ;;  %v2421_v32 = vld [vmem:[%s3206_s1] ss:$16 sps:$4 sm:$0xff]   ;;  %v2423_v33 = vld [vmem:[%s3206_s1 + $0x4] ss:$16 sps:$4 sm:$0xff]   ;;  %v2424_v34 = vld [vmem:[%s3206_s1 + $0x8] ss:$16 sps:$4 sm:$0xff]  }
   0xe   :  { %2149 = vmatprep.subr.bf16.mxu1 %v2402_v13  ;;  %v2426_v35 = vld [vmem:[%s3206_s1 + $0xc] ss:$16 sps:$4 sm:$0xff]   ;;  %683 = vmatprep.mubr.bf16.mxu0 %v2423_v33  ;;  %v2431_v40 = vld [vmem:[%s3206_s1 + $0x24] ss:$16 sps:$4 sm:$0xff]   ;;  %v2435_v42 = vld [vmem:[%s3206_s1 + $0x20] ss:$16 sps:$4 sm:$0xff]  }
   0xf   :  { %804 = vmatprep.mubr.bf16.mxu1 %v2426_v35  ;;  %v2433_v41 = vld [vmem:[%s3206_s1 + $0x2c] ss:$16 sps:$4 sm:$0xff]   ;;  %v2436_v43 = vld [vmem:[%s3206_s1 + $0x28] ss:$16 sps:$4 sm:$0xff]   ;;  %v2437_v44 = vld [vmem:[%s3207_s2 + $0x70] sm:$0xff]  }
  0x10   :  { %2068 = vmatpush3.bf16.msra.mxu0 %v2403_v14  ;;  %v2438_v45 = vld [vmem:[%s3207_s2 + $0x30] sm:$0xff]   ;;  %v2443_v49 = vld [vmem:[%s3206_s1 + $0x4c] ss:$16 sps:$4 sm:$0xff]   ;;  %v2446_v51 = vld [vmem:[%s3206_s1 + $0x48] ss:$16 sps:$4 sm:$0xff]  }
  0x11   :  { %2150 = vmatpush3.bf16.msra.mxu1 %v2404_v15  ;;  %2069 = vmatprep.subr.bf16.mxu0 %v2405_v16  ;;  %v2439_v46 = vld [vmem:[%s3207_s2 + $0xf0] sm:$0xff]   ;;  %v2447_v52 = vld [vmem:[%s3207_s2 + $0x68] sm:$0xff]   ;;  %v2463_v62 = vld [vmem:[%s3207_s2 + $0x60] sm:$0xff]  }
  0x12   :  { %2151 = vmatprep.subr.bf16.mxu1 %v2406_v17  ;;  %v2440_v47 = vld [vmem:[%s3207_s2 + $0xb0] sm:$0xff]   ;;  %v2450_v54 = vld [vmem:[%s3206_s1 + $0x6c] ss:$16 sps:$4 sm:$0xff]   ;;  %v2454_v59 = vld [vmem:[%s3206_s1 + $0x68] ss:$16 sps:$4 sm:$0xff]  }
  0x13   :  { %v2441_v48 = vld [vmem:[%s3206_s1 + $0x44] ss:$16 sps:$4 sm:$0xff]   ;;  %v2445_v50 = vld [vmem:[%s3206_s1 + $0x40] ss:$16 sps:$4 sm:$0xff]   ;;  %v2452_v55 = vld [vmem:[%s3207_s2 + $0x28] sm:$0xff]  }
  0x14   :  { %2070 = vmatpush3.bf16.msra.mxu0 %v2407_v18  ;;  %v2448_v53 = vld [vmem:[%s3206_s1 + $0x64] ss:$16 sps:$4 sm:$0xff]   ;;  %v2455_v56 = vld [vmem:[%s3207_s2 + $0xe8] sm:$0xff]   ;;  %v2453_v58 = vld [vmem:[%s3206_s1 + $0x60] ss:$16 sps:$4 sm:$0xff]  }
  0x15   :  { %2152 = vmatpush3.bf16.msra.mxu1 %v2408_v19  ;;  %2071 = vmatprep.subr.bf16.mxu0 %v2409_v20  ;;  %v2456_v57 = vld [vmem:[%s3207_s2 + $0xa8] sm:$0xff]   ;;  %v2457_v60 = vld [vmem:[%s3206_s1 + $0x84] ss:$16 sps:$4 sm:$0xff]   ;;  %v2461_v2 = vld [vmem:[%s3206_s1 + $0x80] ss:$16 sps:$4 sm:$0xff]  }
  0x16   :  { %2153 = vmatprep.subr.bf16.mxu1 %v2410_v21  ;;  %v2459_v61 = vld [vmem:[%s3206_s1 + $0x8c] ss:$16 sps:$4 sm:$0xff]   ;;  %v2464_v63 = vld [vmem:[%s3207_s2 + $0x20] sm:$0xff]   ;;  %v2462_v3 = vld [vmem:[%s3206_s1 + $0x88] ss:$16 sps:$4 sm:$0xff]  }
  0x17   :  { %v2465_v0 = vld [vmem:[%s3207_s2 + $0xe0] sm:$0xff]   ;;  %v2469_v5 = vld [vmem:[%s3206_s1 + $0xac] ss:$16 sps:$4 sm:$0xff]   ;;  %v2472_v11 = vld [vmem:[%s3206_s1 + $0xa8] ss:$16 sps:$4 sm:$0xff]  }
  0x18   :  { %2072 = vmatpush3.bf16.msra.mxu0 %v2411_v22  ;;  %v2466_v1 = vld [vmem:[%s3207_s2 + $0xa0] sm:$0xff]   ;;  %v2473_v6 = vld [vmem:[%s3207_s2 + $0x58] sm:$0xff]   ;;  %v2487_v13 = vld [vmem:[%s3207_s2 + $0x50] sm:$0xff]  }
  0x19   :  { %2154 = vmatpush3.bf16.msra.mxu1 %v2412_v23  ;;  %2073 = vmatprep.subr.bf16.mxu0 %v2413_v24  ;;  %v2467_v4 = vld [vmem:[%s3206_s1 + $0xa4] ss:$16 sps:$4 sm:$0xff]   ;;  %v2474_v7 = vld [vmem:[%s3207_s2 + $0x18] sm:$0xff]   ;;  %v2471_v10 = vld [vmem:[%s3206_s1 + $0xa0] ss:$16 sps:$4 sm:$0xff]  }
  0x1a   :  { %2155 = vmatprep.subr.bf16.mxu1 %v2414_v25  ;;  %v2475_v8 = vld [vmem:[%s3207_s2 + $0xd8] sm:$0xff]   ;;  %v2476_v12 = vld [vmem:[%s3206_s1 + $0xc4] ss:$16 sps:$4 sm:$0xff]   ;;  %v2481_v18 = vld [vmem:[%s3206_s1 + $0xc0] ss:$16 sps:$4 sm:$0xff]  }
  0x1b   :  { %v2480_v9 = vld [vmem:[%s3207_s2 + $0x98] sm:$0xff]   ;;  %v2490_v15 = vld [vmem:[%s3207_s2 + $0x10] sm:$0xff]   ;;  %v2499_v22 = vld [vmem:[%s3207_s2 + $0x48] sm:$0xff]  }
  0x1c   :  { %2074 = vmatpush3.bf16.msra.mxu0 %v2415_v26  ;;  %v2478_v14 = vld [vmem:[%s3206_s1 + $0xcc] ss:$16 sps:$4 sm:$0xff]   ;;  %v2491_v16 = vld [vmem:[%s3207_s2 + $0xd0] sm:$0xff]   ;;  %v2482_v19 = vld [vmem:[%s3206_s1 + $0xc8] ss:$16 sps:$4 sm:$0xff]  }
  0x1d   :  { %2156 = vmatpush3.bf16.msra.mxu1 %v2416_v27  ;;  %2075 = vmatprep.subr.bf16.mxu0 %v2417_v28  ;;  %v2492_v17 = vld [vmem:[%s3207_s2 + $0x90] sm:$0xff]   ;;  %v2485_v21 = vld [vmem:[%s3206_s1 + $0xec] ss:$16 sps:$4 sm:$0xff]   ;;  %v2489_v27 = vld [vmem:[%s3206_s1 + $0xe8] ss:$16 sps:$4 sm:$0xff]  }
  0x1e   :  { %2157 = vmatprep.subr.bf16.mxu1 %v2418_v29  ;;  %v2483_v20 = vld [vmem:[%s3206_s1 + $0xe4] ss:$16 sps:$4 sm:$0xff]   ;;  %v2500_v23 = vld [vmem:[%s3207_s2 + $0x8] sm:$0xff]   ;;  %v2488_v26 = vld [vmem:[%s3206_s1 + $0xe0] ss:$16 sps:$4 sm:$0xff]  }
  0x1f   :  { %v2501_v24 = vld [vmem:[%s3207_s2 + $0xc8] sm:$0xff]   ;;  %v2509_v28 = vld [vmem:[%s3207_s2 + $0x40] sm:$0xff]  }
  0x20   :  { %2076 = vmatpush3.bf16.msra.mxu0 %v2419_v30  ;;  %v2502_v25 = vld [vmem:[%s3207_s2 + $0x88] sm:$0xff]   ;;  %v2510_v29 = vld [vmem:[%s3207_s2] sm:$0xff]  }
  0x21   :  { %2158 = vmatpush3.bf16.msra.mxu1 %v2420_v31  ;;  %2225 = vmatprep.subr.bf16.mxu0 %v2427_v36  ;;  %v2493_v30 = vld [vmem:[%s3206_s1 + $0x104] ss:$16 sps:$4 sm:$0xff]   ;;  %v2495_v31 = vld [vmem:[%s3206_s1 + $0x10c] ss:$16 sps:$4 sm:$0xff]   ;;  %v2498_v35 = vld [vmem:[%s3206_s1 + $0x108] ss:$16 sps:$4 sm:$0xff]  }
  0x22   :  { %2307 = vmatprep.subr.bf16.mxu1 %v2429_v38  ;;  %v2518_v33 = vld [vmem:[%s3207_s2 + $0x80] sm:$0xff]  }
  0x23   :  { %684 = vmatmul.mubr.bf16.vlgmr.msra.gmra.mxu0 %v2421_v32  ;;  %v2515_v32 = vld [vmem:[%s3207_s2 + $0xc0] sm:$0xff]  }
  0x24   :  { %805 = vmatmul.mubr.bf16.vlgmr.msra.gmra.mxu1 %v2424_v34  ;;  %2226 = vmatpush3.bf16.msra.mxu0 %v2428_v37  ;;  %v2497_v34 = vld [vmem:[%s3206_s1 + $0x100] ss:$16 sps:$4 sm:$0xff]   ;;  %v2503_v36 = vld [vmem:[%s3206_s1 + $0x124] ss:$16 sps:$4 sm:$0xff]   ;;  %v2505_v37 = vld [vmem:[%s3206_s1 + $0x12c] ss:$16 sps:$4 sm:$0xff]  }
  0x25   :  { %2308 = vmatpush3.bf16.msra.mxu1 %v2430_v39  ;;  %691 = vmatprep.mubr.bf16.mxu0 %v2431_v40  ;;  %v2507_v38 = vld [vmem:[%s3206_s1 + $0x120] ss:$16 sps:$4 sm:$0xff]   ;;  %v2508_v39 = vld [vmem:[%s3206_s1 + $0x128] ss:$16 sps:$4 sm:$0xff]   ;;  %v2511_v40 = vld [vmem:[%s3206_s1 + $0x144] ss:$16 sps:$4 sm:$0xff]  }
  0x26   :  { %812 = vmatprep.mubr.bf16.mxu1 %v2433_v41  ;;  %2227 = vmatprep.subr.bf16.mxu0 %v2437_v44  ;;  %v2513_v41 = vld [vmem:[%s3206_s1 + $0x14c] ss:$16 sps:$4 sm:$0xff]   ;;  %v2521_v44 = vld [vmem:[%s3208_s0 + $0x4] ss:$16 sps:$4 sm:$0xff]  }
  0x27   :  { %2309 = vmatprep.subr.bf16.mxu1 %v2439_v46  ;;  %v2519_v46 = vld [vmem:[%s3208_s0] ss:$16 sps:$4 sm:$0xff]  }
  0x28   :  { %2228 = vmatpush3.bf16.msra.mxu0 %v2438_v45  ;;  %v2524_v45 = vld [vmem:[%s3208_s0 + $0xc] ss:$16 sps:$4 sm:$0xff]  }
  0x29   :  { %2310 = vmatpush3.bf16.msra.mxu1 %v2440_v47  ;;  %2229 = vmatprep.subr.bf16.mxu0 %v2447_v52  ;;  %v2522_v47 = vld [vmem:[%s3208_s0 + $0x8] ss:$16 sps:$4 sm:$0xff]   ;;  %v2531_v52 = vld [vmem:[%s3208_s0 + $0x44] ss:$16 sps:$4 sm:$0xff]  }
  0x2a   :  { %2311 = vmatprep.subr.bf16.mxu1 %v2455_v56  ;;  %v2537_v56 = vld [vmem:[%s3208_s0 + $0x64] ss:$16 sps:$4 sm:$0xff]  }
  0x2b   :  { %692 = vmatmul.mubr.bf16.gmra.mxu0 %v2435_v42  ;;  %v2516_v42 = vld [vmem:[%s3206_s1 + $0x140] ss:$16 sps:$4 sm:$0xff]  }
  0x2c   :  { %813 = vmatmul.mubr.bf16.gmra.mxu1 %v2436_v43  ;;  %699 = vmatprep.mubr.bf16.mxu0 %v2441_v48  ;;  %v2517_v43 = vld [vmem:[%s3206_s1 + $0x148] ss:$16 sps:$4 sm:$0xff]   ;;  %v2525_v48 = vld [vmem:[%s3208_s0 + $0x24] ss:$16 sps:$4 sm:$0xff]  }
  0x2d   :  { %820 = vmatprep.mubr.bf16.mxu1 %v2443_v49  ;;  %2230 = vmatpush3.bf16.msra.mxu0 %v2452_v55  ;;  %v2527_v49 = vld [vmem:[%s3208_s0 + $0x2c] ss:$16 sps:$4 sm:$0xff]   ;;  %v2536_v55 = vld [vmem:[%s3208_s0 + $0x48] ss:$16 sps:$4 sm:$0xff]  }
  0x2e   :  { %2312 = vmatpush3.bf16.msra.mxu1 %v2456_v57  ;;  %2231 = vmatprep.subr.bf16.mxu0 %v2463_v62  ;;  %v2539_v57 = vld [vmem:[%s3208_s0 + $0x6c] ss:$16 sps:$4 sm:$0xff]   ;;  %v2547_v62 = vld [vmem:[%s3208_s0 + $0x80] ss:$16 sps:$4 sm:$0xff]  }
  0x2f   :  { %2313 = vmatprep.subr.bf16.mxu1 %v2465_v0  ;;  %v2549_v0 = vld [vmem:[%s3208_s0 + $0xa4] ss:$16 sps:$4 sm:$0xff]  }
  0x31   :  { %2232 = vmatpush3.bf16.msra.mxu0 %v2464_v63  ;;  %v2548_v63 = vld [vmem:[%s3208_s0 + $0x88] ss:$16 sps:$4 sm:$0xff]  }
  0x32   :  { %2314 = vmatpush3.bf16.msra.mxu1 %v2466_v1  ;;  %2233 = vmatprep.subr.bf16.mxu0 %v2473_v6  ;;  %v2551_v1 = vld [vmem:[%s3208_s0 + $0xac] ss:$16 sps:$4 sm:$0xff]   ;;  %v2559_v6 = vld [vmem:[%s3208_s0 + $0xc0] ss:$16 sps:$4 sm:$0xff]  }
  0x33   :  { %700 = vmatmul.mubr.bf16.gmra.mxu0 %v2445_v50  ;;  %2315 = vmatprep.subr.bf16.mxu1 %v2475_v8  ;;  %v2529_v50 = vld [vmem:[%s3208_s0 + $0x20] ss:$16 sps:$4 sm:$0xff]   ;;  %v2561_v8 = vld [vmem:[%s3208_s0 + $0xe4] ss:$16 sps:$4 sm:$0xff]  }
  0x34   :  { %821 = vmatmul.mubr.bf16.gmra.mxu1 %v2446_v51  ;;  %707 = vmatprep.mubr.bf16.mxu0 %v2448_v53  ;;  %v2530_v51 = vld [vmem:[%s3208_s0 + $0x28] ss:$16 sps:$4 sm:$0xff]   ;;  %v2533_v53 = vld [vmem:[%s3208_s0 + $0x4c] ss:$16 sps:$4 sm:$0xff]  }
  0x35   :  { %828 = vmatprep.mubr.bf16.mxu1 %v2450_v54  ;;  %2234 = vmatpush3.bf16.msra.mxu0 %v2474_v7  ;;  %v2535_v54 = vld [vmem:[%s3208_s0 + $0x40] ss:$16 sps:$4 sm:$0xff]   ;;  %v2560_v7 = vld [vmem:[%s3208_s0 + $0xc8] ss:$16 sps:$4 sm:$0xff]  }
  0x36   :  { %2316 = vmatpush3.bf16.msra.mxu1 %v2480_v9  ;;  %2235 = vmatprep.subr.bf16.mxu0 %v2487_v13  ;;  %v2563_v9 = vld [vmem:[%s3208_s0 + $0xec] ss:$16 sps:$4 sm:$0xff]  }
  0x37   :  { %2317 = vmatprep.subr.bf16.mxu1 %v2491_v16  ;;  %v2569_v13 = vld [vmem:[%s3208_s0 + $0x10c] ss:$16 sps:$4 sm:$0xff]   ;;  %v2573_v16 = vld [vmem:[%s3208_s0 + $0x124] ss:$16 sps:$4 sm:$0xff]  }
  0x39   :  { %2236 = vmatpush3.bf16.msra.mxu0 %v2490_v15  ;;  %v2572_v15 = vld [vmem:[%s3208_s0 + $0x108] ss:$16 sps:$4 sm:$0xff]  }
  0x3a   :  { %2318 = vmatpush3.bf16.msra.mxu1 %v2492_v17  ;;  %2237 = vmatprep.subr.bf16.mxu0 %v2499_v22  ;;  %v2575_v17 = vld [vmem:[%s3208_s0 + $0x12c] ss:$16 sps:$4 sm:$0xff]   ;;  %v2583_v22 = vld [vmem:[%s3208_s0 + $0x140] ss:$16 sps:$4 sm:$0xff]  }
  0x3b   :  { %708 = vmatmul.mubr.bf16.gmra.mxu0 %v2453_v58  ;;  %2319 = vmatprep.subr.bf16.mxu1 %v2501_v24  ;;  %v2541_v58 = vld [vmem:[%s3208_s0 + $0x60] ss:$16 sps:$4 sm:$0xff]  }
  0x3c   :  { %829 = vmatmul.mubr.bf16.gmra.mxu1 %v2454_v59  ;;  %715 = vmatprep.mubr.bf16.mxu0 %v2457_v60  ;;  %v2542_v59 = vld [vmem:[%s3208_s0 + $0x68] ss:$16 sps:$4 sm:$0xff]   ;;  %v2543_v60 = vld [vmem:[%s3208_s0 + $0x84] ss:$16 sps:$4 sm:$0xff]  }
  0x3d   :  { %836 = vmatprep.mubr.bf16.mxu1 %v2459_v61  ;;  %2238 = vmatpush3.bf16.msra.mxu0 %v2500_v23  ;;  %v2545_v61 = vld [vmem:[%s3208_s0 + $0x8c] ss:$16 sps:$4 sm:$0xff]   ;;  %v2584_v23 = vld [vmem:[%s3208_s0 + $0x148] ss:$16 sps:$4 sm:$0xff]  }
  0x3e   :  { %2320 = vmatpush3.bf16.msra.mxu1 %v2502_v25  ;;  %2239 = vmatprep.subr.bf16.mxu0 %v2509_v28 }
  0x3f   :  { %2321 = vmatprep.subr.bf16.mxu1 %v2515_v32 }
  0x41   :  { %2240 = vmatpush3.bf16.msra.mxu0 %v2510_v29 }
  0x42   :  { %2322 = vmatpush3.bf16.msra.mxu1 %v2518_v33 }
  0x43   :  { %716 = vmatmul.mubr.bf16.gmra.mxu0 %v2461_v2  ;;  %v2553_v2 = vld [vmem:[%s3208_s0 + $0xa0] ss:$16 sps:$4 sm:$0xff]  }
  0x44   :  { %837 = vmatmul.mubr.bf16.gmra.mxu1 %v2462_v3  ;;  %723 = vmatprep.mubr.bf16.mxu0 %v2467_v4  ;;  %v2554_v3 = vld [vmem:[%s3208_s0 + $0xa8] ss:$16 sps:$4 sm:$0xff]   ;;  %v2555_v4 = vld [vmem:[%s3208_s0 + $0xc4] ss:$16 sps:$4 sm:$0xff]  }
  0x45   :  { %844 = vmatprep.mubr.bf16.mxu1 %v2469_v5  ;;  %v2557_v5 = vld [vmem:[%s3208_s0 + $0xcc] ss:$16 sps:$4 sm:$0xff]  }
  0x4b   :  { %724 = vmatmul.mubr.bf16.gmra.mxu0 %v2471_v10  ;;  %v2565_v10 = vld [vmem:[%s3208_s0 + $0xe0] ss:$16 sps:$4 sm:$0xff]  }
  0x4c   :  { %845 = vmatmul.mubr.bf16.gmra.mxu1 %v2472_v11  ;;  %731 = vmatprep.mubr.bf16.mxu0 %v2476_v12  ;;  %v2566_v11 = vld [vmem:[%s3208_s0 + $0xe8] ss:$16 sps:$4 sm:$0xff]   ;;  %v2567_v12 = vld [vmem:[%s3208_s0 + $0x104] ss:$16 sps:$4 sm:$0xff]  }
  0x4d   :  { %852 = vmatprep.mubr.bf16.mxu1 %v2478_v14  ;;  %v2571_v14 = vld [vmem:[%s3208_s0 + $0x100] ss:$16 sps:$4 sm:$0xff]  }
  0x53   :  { %732 = vmatmul.mubr.bf16.gmra.mxu0 %v2481_v18  ;;  %v2577_v18 = vld [vmem:[%s3208_s0 + $0x120] ss:$16 sps:$4 sm:$0xff]  }
  0x54   :  { %853 = vmatmul.mubr.bf16.gmra.mxu1 %v2482_v19  ;;  %739 = vmatprep.mubr.bf16.mxu0 %v2483_v20  ;;  %v2578_v19 = vld [vmem:[%s3208_s0 + $0x128] ss:$16 sps:$4 sm:$0xff]   ;;  %v2579_v20 = vld [vmem:[%s3208_s0 + $0x144] ss:$16 sps:$4 sm:$0xff]  }
  0x55   :  { %860 = vmatprep.mubr.bf16.mxu1 %v2485_v21  ;;  %v2581_v21 = vld [vmem:[%s3208_s0 + $0x14c] ss:$16 sps:$4 sm:$0xff]  }
  0x5b   :  { %740 = vmatmul.mubr.bf16.gmra.mxu0 %v2488_v26 }
  0x5c   :  { %861 = vmatmul.mubr.bf16.gmra.mxu1 %v2489_v27  ;;  %747 = vmatprep.mubr.bf16.mxu0 %v2493_v30 }
  0x5d   :  { %868 = vmatprep.mubr.bf16.mxu1 %v2495_v31 }
  0x63   :  { %748 = vmatmul.mubr.bf16.gmra.mxu0 %v2497_v34 }
  0x64   :  { %869 = vmatmul.mubr.bf16.gmra.mxu1 %v2498_v35  ;;  %755 = vmatprep.mubr.bf16.mxu0 %v2503_v36 }
  0x65   :  { %876 = vmatprep.mubr.bf16.mxu1 %v2505_v37 }
  0x6b   :  { %756 = vmatmul.mubr.bf16.gmra.mxu0 %v2507_v38 }
  0x6c   :  { %877 = vmatmul.mubr.bf16.gmra.mxu1 %v2508_v39  ;;  %763 = vmatprep.mubr.bf16.mxu0 %v2511_v40 }
  0x6d   :  { %884 = vmatprep.mubr.bf16.mxu1 %v2513_v41 }
  0x73   :  { %764 = vmatmul.mubr.bf16.gmra.mxu0 %v2516_v42 }
  0x74   :  { %885 = vmatmul.mubr.bf16.gmra.mxu1 %v2517_v43  ;;  %1337 = vmatprep.mubr.bf16.mxu0 %v2521_v44 }
  0x75   :  { %1458 = vmatprep.mubr.bf16.mxu1 %v2524_v45 }
  0x7b   :  { %1338 = vmatmul.mubr.bf16.vlgmr.msra.gmra.mxu0 %v2519_v46 }
  0x7c   :  { %1459 = vmatmul.mubr.bf16.vlgmr.msra.gmra.mxu1 %v2522_v47  ;;  %1345 = vmatprep.mubr.bf16.mxu0 %v2525_v48 }
  0x7d   :  { %1466 = vmatprep.mubr.bf16.mxu1 %v2527_v49 }
  0x83   :  { %1346 = vmatmul.mubr.bf16.gmra.mxu0 %v2529_v50 }
  0x84   :  { %1467 = vmatmul.mubr.bf16.gmra.mxu1 %v2530_v51  ;;  %1353 = vmatprep.mubr.bf16.mxu0 %v2531_v52 }
  0x85   :  { %1474 = vmatprep.mubr.bf16.mxu1 %v2533_v53 }
  0x8b   :  { %1354 = vmatmul.mubr.bf16.gmra.mxu0 %v2535_v54 }
  0x8c   :  { %1475 = vmatmul.mubr.bf16.gmra.mxu1 %v2536_v55  ;;  %1361 = vmatprep.mubr.bf16.mxu0 %v2537_v56 }
  0x8d   :  { %1482 = vmatprep.mubr.bf16.mxu1 %v2539_v57 }
  0x93   :  { %1362 = vmatmul.mubr.bf16.gmra.mxu0 %v2541_v58 }
  0x94   :  { %1483 = vmatmul.mubr.bf16.gmra.mxu1 %v2542_v59  ;;  %1369 = vmatprep.mubr.bf16.mxu0 %v2543_v60 }
  0x95   :  { %1490 = vmatprep.mubr.bf16.mxu1 %v2545_v61 }
  0x9b   :  { %1370 = vmatmul.mubr.bf16.gmra.mxu0 %v2547_v62 }
  0x9c   :  { %1491 = vmatmul.mubr.bf16.gmra.mxu1 %v2548_v63  ;;  %1377 = vmatprep.mubr.bf16.mxu0 %v2549_v0 }
  0x9d   :  { %1498 = vmatprep.mubr.bf16.mxu1 %v2551_v1 }
  0xa3   :  { %1378 = vmatmul.mubr.bf16.gmra.mxu0 %v2553_v2 }
  0xa4   :  { %1499 = vmatmul.mubr.bf16.gmra.mxu1 %v2554_v3  ;;  %1385 = vmatprep.mubr.bf16.mxu0 %v2555_v4 }
  0xa5   :  { %1506 = vmatprep.mubr.bf16.mxu1 %v2557_v5 }
  0xab   :  { %1386 = vmatmul.mubr.bf16.gmra.mxu0 %v2559_v6 }
  0xac   :  { %1507 = vmatmul.mubr.bf16.gmra.mxu1 %v2560_v7  ;;  %1393 = vmatprep.mubr.bf16.mxu0 %v2561_v8 }
  0xad   :  { %1514 = vmatprep.mubr.bf16.mxu1 %v2563_v9 }
  0xb3   :  { %1394 = vmatmul.mubr.bf16.gmra.mxu0 %v2565_v10 }
  0xb4   :  { %1515 = vmatmul.mubr.bf16.gmra.mxu1 %v2566_v11  ;;  %1401 = vmatprep.mubr.bf16.mxu0 %v2567_v12 }
  0xb5   :  { %1522 = vmatprep.mubr.bf16.mxu1 %v2569_v13 }
  0xbb   :  { %1402 = vmatmul.mubr.bf16.gmra.mxu0 %v2571_v14 }
  0xbc   :  { %1523 = vmatmul.mubr.bf16.gmra.mxu1 %v2572_v15  ;;  %1409 = vmatprep.mubr.bf16.mxu0 %v2573_v16 }
  0xbd   :  { %1530 = vmatprep.mubr.bf16.mxu1 %v2575_v17 }
  0xc3   :  { %1410 = vmatmul.mubr.bf16.gmra.mxu0 %v2577_v18 }
  0xc4   :  { %1531 = vmatmul.mubr.bf16.gmra.mxu1 %v2578_v19  ;;  %1417 = vmatprep.mubr.bf16.mxu0 %v2579_v20 }
  0xc5   :  { %1538 = vmatprep.mubr.bf16.mxu1 %v2581_v21 }
  0xcb   :  { %1418 = vmatmul.mubr.bf16.gmra.mxu0 %v2583_v22 }
  0xcc   :  { %1539 = vmatmul.mubr.bf16.gmra.mxu1 %v2584_v23 }
  0xe3   :  { %v2077_v24 = vpop.f32.mrf.mxu0 }
  0xe4   :  { %v2159_v25 = vpop.f32.mrf.mxu1 }
  0xe5   :  { %v2078_v26 = vpop.f32.mrf.mxu0 }
  0xe6   :  { %v2079_v27 = vadd.f32 %v2078_v26, %v2077_v24  ;;  %v2160_v28 = vpop.f32.mrf.mxu1 }
  0xe7   :  { %v2161_v29 = vadd.f32 %v2160_v28, %v2159_v25  ;;  %v2080_v30 = vpop.f32.mrf.mxu0 }
  0xe8   :  { %v2162_v31 = vpop.f32.mrf.mxu1 }
  0xe9   :  { %v3076_v32 = vadd.f32 %v2161_v29, %v2079_v27  ;;  %v2081_v33 = vpop.f32.mrf.mxu0 }
  0xea   :  { %v2082_v34 = vadd.f32 %v2081_v33, %v2080_v30  ;;  %v2163_v35 = vpop.f32.mrf.mxu1 }
  0xeb   :  { %v2164_v36 = vadd.f32 %v2163_v35, %v2162_v31  ;;  %v2083_v37 = vpop.f32.mrf.mxu0 }
  0xec   :  { %v2165_v38 = vpop.f32.mrf.mxu1 }
  0xed   :  { %v3078_v39 = vadd.f32 %v2164_v36, %v2082_v34  ;;  %v2084_v40 = vpop.f32.mrf.mxu0 }
  0xee   :  { %v2085_v41 = vadd.f32 %v2084_v40, %v2083_v37  ;;  %v2166_v42 = vpop.f32.mrf.mxu1 }
  0xef   :  { %v2167_v43 = vadd.f32 %v2166_v42, %v2165_v38  ;;  %v2086_v44 = vpop.f32.mrf.mxu0 }
  0xf0   :  { %v2168_v45 = vpop.f32.mrf.mxu1 }
  0xf1   :  { %v3080_v46 = vadd.f32 %v2167_v43, %v2085_v41  ;;  %v2087_v47 = vpop.f32.mrf.mxu0 }
  0xf2   :  { %v2088_v48 = vadd.f32 %v2087_v47, %v2086_v44  ;;  %v2169_v49 = vpop.f32.mrf.mxu1 }
  0xf3   :  { %v2170_v50 = vadd.f32 %v2169_v49, %v2168_v45  ;;  %v2089_v51 = vpop.f32.mrf.mxu0 }
  0xf4   :  { %v2171_v52 = vpop.f32.mrf.mxu1 }
  0xf5   :  { %v3082_v53 = vadd.f32 %v2170_v50, %v2088_v48  ;;  %v2090_v54 = vpop.f32.mrf.mxu0 }
  0xf6   :  { %v2091_v55 = vadd.f32 %v2090_v54, %v2089_v51  ;;  %v2172_v56 = vpop.f32.mrf.mxu1 }
  0xf7   :  { %v2173_v57 = vadd.f32 %v2172_v56, %v2171_v52  ;;  %v2092_v58 = vpop.f32.mrf.mxu0 }
  0xf8   :  { %v2174_v59 = vpop.f32.mrf.mxu1 }
  0xf9   :  { %v3084_v60 = vadd.f32 %v2173_v57, %v2091_v55  ;;  %v2093_v61 = vpop.f32.mrf.mxu0 }
  0xfa   :  { %v2094_v62 = vadd.f32 %v2093_v61, %v2092_v58  ;;  %v2175_v63 = vpop.f32.mrf.mxu1 }
  0xfb   :  { %v2176_v0 = vadd.f32 %v2175_v63, %v2174_v59  ;;  %v2095_v1 = vpop.f32.mrf.mxu0 }
  0xfc   :  { %v2177_v2 = vpop.f32.mrf.mxu1 }
  0xfd   :  { %v3086_v3 = vadd.f32 %v2176_v0, %v2094_v62  ;;  %v2096_v4 = vpop.f32.mrf.mxu0 }
  0xfe   :  { %v2097_v5 = vadd.f32 %v2096_v4, %v2095_v1  ;;  %v2178_v6 = vpop.f32.mrf.mxu1 }
  0xff   :  { %v2179_v7 = vadd.f32 %v2178_v6, %v2177_v2  ;;  %v2098_v8 = vpop.f32.mrf.mxu0 }
 0x100   :  { %v2180_v9 = vpop.f32.mrf.mxu1 }
 0x101   :  { %v3088_v10 = vadd.f32 %v2179_v7, %v2097_v5  ;;  %v2099_v11 = vpop.f32.mrf.mxu0 }
 0x102   :  { %v2100_v12 = vadd.f32 %v2099_v11, %v2098_v8  ;;  %v2181_v13 = vpop.f32.mrf.mxu1 }
 0x103   :  { %v2182_v14 = vadd.f32 %v2181_v13, %v2180_v9  ;;  %v2101_v15 = vpop.f32.mrf.mxu0 }
 0x104   :  { %v2183_v16 = vpop.f32.mrf.mxu1 }
 0x105   :  { %v3090_v17 = vadd.f32 %v2182_v14, %v2100_v12  ;;  %v2102_v18 = vpop.f32.mrf.mxu0 }
 0x106   :  { %v2103_v19 = vadd.f32 %v2102_v18, %v2101_v15  ;;  %v2184_v20 = vpop.f32.mrf.mxu1 }
 0x107   :  { %v2185_v21 = vadd.f32 %v2184_v20, %v2183_v16  ;;  %v2104_v22 = vpop.f32.mrf.mxu0 }
 0x108   :  { %v2186_v23 = vpop.f32.mrf.mxu1 }
 0x109   :  { %v3092_v24 = vadd.f32 %v2185_v21, %v2103_v19  ;;  %v2105_v25 = vpop.f32.mrf.mxu0 }
 0x10a   :  { %v2106_v26 = vadd.f32 %v2105_v25, %v2104_v22  ;;  %v2187_v27 = vpop.f32.mrf.mxu1 }
 0x10b   :  { %v2188_v28 = vadd.f32 %v2187_v27, %v2186_v23  ;;  %v2107_v29 = vpop.f32.mrf.mxu0 }
 0x10c   :  { %v2189_v30 = vpop.f32.mrf.mxu1 }
 0x10d   :  { %v3094_v31 = vadd.f32 %v2188_v28, %v2106_v26  ;;  %v2108_v33 = vpop.f32.mrf.mxu0 }
 0x10e   :  { %v2109_v34 = vadd.f32 %v2108_v33, %v2107_v29  ;;  %v2190_v35 = vpop.f32.mrf.mxu1 }
 0x10f   :  { %v2191_v36 = vadd.f32 %v2190_v35, %v2189_v30  ;;  %v2110_v37 = vpop.f32.mrf.mxu0 }
 0x110   :  { %v2192_v38 = vpop.f32.mrf.mxu1 }
 0x111   :  { %v3096_v40 = vadd.f32 %v2191_v36, %v2109_v34  ;;  %v2111_v41 = vpop.f32.mrf.mxu0 }
 0x112   :  { %v2112_v42 = vadd.f32 %v2111_v41, %v2110_v37  ;;  %v2193_v43 = vpop.f32.mrf.mxu1 }
 0x113   :  { %v2194_v44 = vadd.f32 %v2193_v43, %v2192_v38  ;;  %v2113_v45 = vpop.f32.mrf.mxu0 }
 0x114   :  { %v2195_v47 = vpop.f32.mrf.mxu1 }
 0x115   :  { %v3098_v48 = vadd.f32 %v2194_v44, %v2112_v42  ;;  %v2114_v49 = vpop.f32.mrf.mxu0 }
 0x116   :  { %v2115_v50 = vadd.f32 %v2114_v49, %v2113_v45  ;;  %v2196_v51 = vpop.f32.mrf.mxu1 }
 0x117   :  { %v2197_v52 = vadd.f32 %v2196_v51, %v2195_v47  ;;  %v2116_v54 = vpop.f32.mrf.mxu0 }
 0x118   :  { %v2198_v55 = vpop.f32.mrf.mxu1 }
 0x119   :  { %v3100_v56 = vadd.f32 %v2197_v52, %v2115_v50  ;;  %v2117_v57 = vpop.f32.mrf.mxu0 }
 0x11a   :  { %v2118_v58 = vadd.f32 %v2117_v57, %v2116_v54  ;;  %v2199_v59 = vpop.f32.mrf.mxu1 }
 0x11b   :  { %v2200_v61 = vadd.f32 %v2199_v59, %v2198_v55  ;;  %v2119_v62 = vpop.f32.mrf.mxu0 }
 0x11c   :  { %v2201_v63 = vpop.f32.mrf.mxu1 }
 0x11d   :  { %v3102_v0 = vadd.f32 %v2200_v61, %v2118_v58  ;;  %v2120_v1 = vpop.f32.mrf.mxu0 }
 0x11e   :  { %v2121_v2 = vadd.f32 %v2120_v1, %v2119_v62  ;;  %v2202_v4 = vpop.f32.mrf.mxu1 }
 0x11f   :  { %v2203_v5 = vadd.f32 %v2202_v4, %v2201_v63  ;;  %v2122_v6 = vpop.f32.mrf.mxu0 }
 0x120   :  { %v2204_v7 = vpop.f32.mrf.mxu1 }
 0x121   :  { %v3104_v8 = vadd.f32 %v2203_v5, %v2121_v2  ;;  %v2123_v9 = vpop.f32.mrf.mxu0 }
 0x122   :  { %v2124_v11 = vadd.f32 %v2123_v9, %v2122_v6  ;;  %v2205_v12 = vpop.f32.mrf.mxu1 }
 0x123   :  { %v2206_v13 = vadd.f32 %v2205_v12, %v2204_v7  ;;  %v2125_v14 = vpop.f32.mrf.mxu0 }
 0x124   :  { %v2207_v15 = vpop.f32.mrf.mxu1 }
 0x125   :  { %v3106_v16 = vadd.f32 %v2206_v13, %v2124_v11  ;;  %v2126_v18 = vpop.f32.mrf.mxu0 }
 0x126   :  { %v2127_v19 = vadd.f32 %v2126_v18, %v2125_v14  ;;  %v2208_v20 = vpop.f32.mrf.mxu1 }
 0x127   :  { %v2209_v21 = vadd.f32 %v2208_v20, %v2207_v15  ;;  %v2128_v22 = vpop.f32.mrf.mxu0 }
 0x128   :  { %v2210_v23 = vpop.f32.mrf.mxu1 }
 0x129   :  { %v3108_v25 = vadd.f32 %v2209_v21, %v2127_v19  ;;  %v2129_v26 = vpop.f32.mrf.mxu0  ;;  %v3124_v19 = vld [vmem:[%s3209_s4] ss:$0 sm:$0xff] }
 0x12a   :  { %v2130_v27 = vadd.f32 %v2129_v26, %v2128_v22  ;;  %v2211_v28 = vpop.f32.mrf.mxu1 }
 0x12b   :  { %v2212_v29 = vadd.f32 %v2211_v28, %v2210_v23  ;;  %v2131_v30 = vpop.f32.mrf.mxu0 }
 0x12c   :  { %v2213_v33 = vpop.f32.mrf.mxu1 }
 0x12d   :  { %v3110_v34 = vadd.f32 %v2212_v29, %v2130_v27  ;;  %v2132_v35 = vpop.f32.mrf.mxu0 }
 0x12e   :  { %v2133_v36 = vadd.f32 %v2132_v35, %v2131_v30  ;;  %v2214_v37 = vpop.f32.mrf.mxu1 }
 0x12f   :  { %v2215_v38 = vadd.f32 %v2214_v37, %v2213_v33  ;;  %v2134_v41 = vpop.f32.mrf.mxu0 }
 0x130   :  { %v2216_v42 = vpop.f32.mrf.mxu1 }
 0x131   :  { %v3112_v43 = vadd.f32 %v2215_v38, %v2133_v36  ;;  %v2135_v44 = vpop.f32.mrf.mxu0 }
 0x132   :  { %v2136_v45 = vadd.f32 %v2135_v44, %v2134_v41  ;;  %v2217_v47 = vpop.f32.mrf.mxu1 }
 0x133   :  { %v2218_v49 = vadd.f32 %v2217_v47, %v2216_v42  ;;  %v2137_v50 = vpop.f32.mrf.mxu0 }
 0x134   :  { %v2219_v51 = vpop.f32.mrf.mxu1 }
 0x135   :  { %v3114_v52 = vadd.f32 %v2218_v49, %v2136_v45  ;;  %v2138_v54 = vpop.f32.mrf.mxu0 }
 0x136   :  { %v2139_v55 = vadd.f32 %v2138_v54, %v2137_v50  ;;  %v2220_v57 = vpop.f32.mrf.mxu1 }
 0x137   :  { %v2221_v58 = vadd.f32 %v2220_v57, %v2219_v51  ;;  %v2140_v59 = vpop.f32.mrf.mxu0 }
 0x138   :  { %v2222_v61 = vpop.f32.mrf.mxu1 }
 0x139   :  { %v3116_v62 = vadd.f32 %v2221_v58, %v2139_v55  ;;  %v2141_v63 = vpop.f32.mrf.mxu0 }
 0x13a   :  { %v2142_v1 = vadd.f32 %v2141_v63, %v2140_v59  ;;  %v2223_v2 = vpop.f32.mrf.mxu1 }
 0x13b   :  { %v2224_v4 = vadd.f32 %v2223_v2, %v2222_v61  ;;  %v2241_v5 = vpop.f32.mrf.mxu0 }
 0x13c   :  { %v2323_v6 = vpop.f32.mrf.mxu1 }
 0x13d   :  { %v3118_v7 = vadd.f32 %v2224_v4, %v2142_v1  ;;  %v2242_v9 = vpop.f32.mrf.mxu0 }
 0x13e   :  { %v2243_v11 = vadd.f32 %v2242_v9, %v2241_v5  ;;  %v2324_v12 = vpop.f32.mrf.mxu1 }
 0x13f   :  { %v2244_v13 = vpop.f32.mrf.mxu0  ;;  %v2325_v15 = vadd.f32 %v2324_v12, %v2323_v6 }
 0x140   :  { %v1340_v14 = vadd.f32 %v2243_v11, %v3076_v32  ;;  %v2326_v18 = vpop.f32.mrf.mxu1 }
 0x141   :  { %v2245_v20 = vpop.f32.mrf.mxu0 }
 0x142   :  { %v1461_v21 = vadd.f32 %v2325_v15, %v1340_v14  ;;  %v2246_v22 = vadd.f32 %v2245_v20, %v2244_v13  ;;  %v2327_v23 = vpop.f32.mrf.mxu1 }
 0x143   :  { %v2247_v26 = vpop.f32.mrf.mxu0  ;;  %v2328_v29 = vadd.f32 %v2327_v23, %v2326_v18 }
 0x144   :  { %v1554_v27 = vadd.f32 %v3124_v19, %v1461_v21  ;;  %v1343_v28 = vadd.f32 %v2246_v22, %v3078_v39  ;;  %v2329_v30 = vpop.f32.mrf.mxu1 }
 0x145   :  { %v2248_v33 = vpop.f32.mrf.mxu0 }
 0x146   :  { %v1464_v32 = vadd.f32 %v2328_v29, %v1343_v28  ;;  %v2249_v35 = vadd.f32 %v2248_v33, %v2247_v26  ;;  %v2330_v36 = vpop.f32.mrf.mxu1  ;;  %v1576_v37 = vmax.f32 %v1554_v27, 0.0 }
 0x147   :  { %v2250_v38 = vpop.f32.mrf.mxu0  ;;  %v2331_v44 = vadd.f32 %v2330_v36, %v2329_v30 }
 0x148   :  { %v1555_v41 = vadd.f32 %v3124_v19, %v1464_v32  ;;  %v1348_v42 = vadd.f32 %v2249_v35, %v3080_v46  ;;  %v2332_v45 = vpop.f32.mrf.mxu1  ;;  %v1735_v39 = vmul.f32 %v1576_v37, %v1576_v37 }
 0x149   :  { %v2251_v47 = vpop.f32.mrf.mxu0 }
 0x14a   :  { %v1577_v49 = vmax.f32 %v1555_v41, 0.0  ;;  %v1469_v50 = vadd.f32 %v2331_v44, %v1348_v42  ;;  %v2252_v51 = vadd.f32 %v2251_v47, %v2250_v38  ;;  %v2333_v54 = vpop.f32.mrf.mxu1 }
 0x14b   :  { %v2253_v55 = vpop.f32.mrf.mxu0  ;;  %v2334_v2 = vadd.f32 %v2333_v54, %v2332_v45 }
 0x14c   :  { %v1999_v57 = vpack.c.bf16 %v1577_v49, %v1576_v37  ;;  %v1708_v58 = vadd.f32 %v1577_v49, %v1576_v37  ;;  %v1736_v59 = vmul.f32 %v1577_v49, %v1577_v49  ;;  %v1556_v61 = vadd.f32 %v3124_v19, %v1469_v50  ;;  %v2335_v63 = vpop.f32.mrf.mxu1 }
 0x14d   :  { %v1351_v1 = vadd.f32 %v2252_v51, %v3082_v53  ;;  %v2254_v4 = vpop.f32.mrf.mxu0 }
 0x14e   :  { %2000 = vst [vmem:[%s3210_s5] sm:$0xff] %v1999_v57   ;;  %v1757_v46 = vadd.f32 %v1736_v59, %v1735_v39  ;;  %v1578_v5 = vmax.f32 %v1556_v61, 0.0  ;;  %v2255_v6 = vadd.f32 %v2254_v4, %v2253_v55  ;;  %v2336_v9 = vpop.f32.mrf.mxu1 }
 0x14f   :  { %v1472_v11 = vadd.f32 %v2334_v2, %v1351_v1  ;;  %v2256_v12 = vpop.f32.mrf.mxu0  ;;  %v2337_v18 = vadd.f32 %v2336_v9, %v2335_v63 }
 0x150   :  { %v1709_v13 = vadd.f32 %v1708_v58, %v1578_v5  ;;  %v1737_v14 = vmul.f32 %v1578_v5, %v1578_v5  ;;  %v1356_v15 = vadd.f32 %v2255_v6, %v3084_v60  ;;  %v2338_v20 = vpop.f32.mrf.mxu1 }
 0x151   :  { %v1557_v53 = vadd.f32 %v3124_v19, %v1472_v11  ;;  %v2257_v21 = vpop.f32.mrf.mxu0 }
 0x152   :  { %v1758_v22 = vadd.f32 %v1757_v46, %v1737_v14  ;;  %v1477_v23 = vadd.f32 %v2337_v18, %v1356_v15  ;;  %v2258_v26 = vadd.f32 %v2257_v21, %v2256_v12  ;;  %v2339_v27 = vpop.f32.mrf.mxu1 }
 0x153   :  { %v1579_v28 = vmax.f32 %v1557_v53, 0.0  ;;  %v2259_v29 = vpop.f32.mrf.mxu0  ;;  %v2340_v32 = vadd.f32 %v2339_v27, %v2338_v20 }
 0x154   :  { %v1558_v30 = vadd.f32 %v3124_v19, %v1477_v23  ;;  %v1359_v33 = vadd.f32 %v2258_v26, %v3086_v3  ;;  %v2341_v35 = vpop.f32.mrf.mxu1 }
 0x155   :  { %v2004_v36 = vpack.c.bf16 %v1579_v28, %v1578_v5  ;;  %v1710_v37 = vadd.f32 %v1709_v13, %v1579_v28  ;;  %v1738_v60 = vmul.f32 %v1579_v28, %v1579_v28  ;;  %v2260_v38 = vpop.f32.mrf.mxu0 }
 0x156   :  { %v1580_v41 = vmax.f32 %v1558_v30, 0.0  ;;  %v1480_v42 = vadd.f32 %v2340_v32, %v1359_v33  ;;  %v2261_v44 = vadd.f32 %v2260_v38, %v2259_v29  ;;  %v2342_v45 = vpop.f32.mrf.mxu1 }
 0x157   :  { %2051 = vst [vmem:[%s3210_s5 + $0x8] sm:$0xff] %v2004_v36   ;;  %v1759_v47 = vadd.f32 %v1758_v22, %v1738_v60  ;;  %v2343_v49 = vadd.f32 %v2342_v45, %v2341_v35  ;;  %v2262_v50 = vpop.f32.mrf.mxu0 }
 0x158   :  { %v1711_v51 = vadd.f32 %v1710_v37, %v1580_v41  ;;  %v1739_v54 = vmul.f32 %v1580_v41, %v1580_v41  ;;  %v1559_v3 = vadd.f32 %v3124_v19, %v1480_v42  ;;  %v1364_v39 = vadd.f32 %v2261_v44, %v3088_v10  ;;  %v2344_v55 = vpop.f32.mrf.mxu1 }
 0x159   :  { %v2263_v57 = vpop.f32.mrf.mxu0 }
 0x15a   :  { %v1760_v58 = vadd.f32 %v1759_v47, %v1739_v54  ;;  %v1581_v59 = vmax.f32 %v1559_v3, 0.0  ;;  %v1485_v61 = vadd.f32 %v2343_v49, %v1364_v39  ;;  %v2264_v63 = vadd.f32 %v2263_v57, %v2262_v50  ;;  %v2345_v1 = vpop.f32.mrf.mxu1 }
 0x15b   :  { %v2265_v2 = vpop.f32.mrf.mxu0  ;;  %v2346_v12 = vadd.f32 %v2345_v1, %v2344_v55 }
 0x15c   :  { %v2009_v4 = vpack.c.bf16 %v1581_v59, %v1580_v41  ;;  %v1712_v46 = vadd.f32 %v1711_v51, %v1581_v59  ;;  %v1740_v5 = vmul.f32 %v1581_v59, %v1581_v59  ;;  %v1560_v6 = vadd.f32 %v3124_v19, %v1485_v61  ;;  %v2347_v9 = vpop.f32.mrf.mxu1 }
 0x15d   :  { %v1367_v11 = vadd.f32 %v2264_v63, %v3090_v17  ;;  %v2266_v13 = vpop.f32.mrf.mxu0 }
 0x15e   :  { %2052 = vst [vmem:[%s3210_s5 + $0x10] sm:$0xff] %v2009_v4   ;;  %v1761_v10 = vadd.f32 %v1760_v58, %v1740_v5  ;;  %v1582_v14 = vmax.f32 %v1560_v6, 0.0  ;;  %v2267_v15 = vadd.f32 %v2266_v13, %v2265_v2  ;;  %v2348_v18 = vpop.f32.mrf.mxu1 }
 0x15f   :  { %v1488_v20 = vadd.f32 %v2346_v12, %v1367_v11  ;;  %v2268_v53 = vpop.f32.mrf.mxu0  ;;  %v2349_v26 = vadd.f32 %v2348_v18, %v2347_v9 }
 0x160   :  { %v1713_v21 = vadd.f32 %v1712_v46, %v1582_v14  ;;  %v1741_v22 = vmul.f32 %v1582_v14, %v1582_v14  ;;  %v1372_v23 = vadd.f32 %v2267_v15, %v3092_v24  ;;  %v2350_v27 = vpop.f32.mrf.mxu1 }
 0x161   :  { %v1561_v17 = vadd.f32 %v3124_v19, %v1488_v20  ;;  %v2269_v28 = vpop.f32.mrf.mxu0 }
 0x162   :  { %v1762_v29 = vadd.f32 %v1761_v10, %v1741_v22  ;;  %v1493_v30 = vadd.f32 %v2349_v26, %v1372_v23  ;;  %v2270_v33 = vadd.f32 %v2269_v28, %v2268_v53  ;;  %v2351_v32 = vpop.f32.mrf.mxu1 }
 0x163   :  { %v1583_v35 = vmax.f32 %v1561_v17, 0.0  ;;  %v2271_v36 = vpop.f32.mrf.mxu0  ;;  %v2352_v38 = vadd.f32 %v2351_v32, %v2350_v27 }
 0x164   :  { %v1562_v37 = vadd.f32 %v3124_v19, %v1493_v30  ;;  %v1375_v60 = vadd.f32 %v2270_v33, %v3094_v31  ;;  %v2353_v41 = vpop.f32.mrf.mxu1 }
 0x165   :  { %v2014_v42 = vpack.c.bf16 %v1583_v35, %v1582_v14  ;;  %v1714_v44 = vadd.f32 %v1713_v21, %v1583_v35  ;;  %v1742_v24 = vmul.f32 %v1583_v35, %v1583_v35  ;;  %v2272_v45 = vpop.f32.mrf.mxu0 }
 0x166   :  { %v1584_v47 = vmax.f32 %v1562_v37, 0.0  ;;  %v1496_v49 = vadd.f32 %v2352_v38, %v1375_v60  ;;  %v2273_v50 = vadd.f32 %v2272_v45, %v2271_v36  ;;  %v2354_v51 = vpop.f32.mrf.mxu1 }
 0x167   :  { %2053 = vst [vmem:[%s3210_s5 + $0x18] sm:$0xff] %v2014_v42   ;;  %v1763_v54 = vadd.f32 %v1762_v29, %v1742_v24  ;;  %v2355_v3 = vadd.f32 %v2354_v51, %v2353_v41  ;;  %v2274_v39 = vpop.f32.mrf.mxu0 }
 0x168   :  { %v1715_v55 = vadd.f32 %v1714_v44, %v1584_v47  ;;  %v1743_v57 = vmul.f32 %v1584_v47, %v1584_v47  ;;  %v1563_v31 = vadd.f32 %v3124_v19, %v1496_v49  ;;  %v1380_v58 = vadd.f32 %v2273_v50, %v3096_v40  ;;  %v2356_v59 = vpop.f32.mrf.mxu1 }
 0x169   :  { %v2275_v61 = vpop.f32.mrf.mxu0 }
 0x16a   :  { %v1764_v63 = vadd.f32 %v1763_v54, %v1743_v57  ;;  %v1585_v1 = vmax.f32 %v1563_v31, 0.0  ;;  %v1501_v2 = vadd.f32 %v2355_v3, %v1380_v58  ;;  %v2276_v4 = vadd.f32 %v2275_v61, %v2274_v39  ;;  %v2357_v46 = vpop.f32.mrf.mxu1 }
 0x16b   :  { %v2277_v5 = vpop.f32.mrf.mxu0  ;;  %v2358_v14 = vadd.f32 %v2357_v46, %v2356_v59 }
 0x16c   :  { %v2019_v6 = vpack.c.bf16 %v1585_v1, %v1584_v47  ;;  %v1716_v9 = vadd.f32 %v1715_v55, %v1585_v1  ;;  %v1744_v11 = vmul.f32 %v1585_v1, %v1585_v1  ;;  %v1564_v12 = vadd.f32 %v3124_v19, %v1501_v2  ;;  %v2359_v13 = vpop.f32.mrf.mxu1 }
 0x16d   :  { %v1383_v10 = vadd.f32 %v2276_v4, %v3098_v48  ;;  %v2278_v15 = vpop.f32.mrf.mxu0 }
 0x16e   :  { %2054 = vst [vmem:[%s3210_s5 + $0x20] sm:$0xff] %v2019_v6   ;;  %v1765_v40 = vadd.f32 %v1764_v63, %v1744_v11  ;;  %v1586_v18 = vmax.f32 %v1564_v12, 0.0  ;;  %v2279_v20 = vadd.f32 %v2278_v15, %v2277_v5  ;;  %v2360_v53 = vpop.f32.mrf.mxu1 }
 0x16f   :  { %v1504_v21 = vadd.f32 %v2358_v14, %v1383_v10  ;;  %v2280_v22 = vpop.f32.mrf.mxu0  ;;  %v2361_v17 = vadd.f32 %v2360_v53, %v2359_v13 }
 0x170   :  { %v1717_v23 = vadd.f32 %v1716_v9, %v1586_v18  ;;  %v1745_v26 = vmul.f32 %v1586_v18, %v1586_v18  ;;  %v1388_v27 = vadd.f32 %v2279_v20, %v3100_v56  ;;  %v2362_v28 = vpop.f32.mrf.mxu1 }
 0x171   :  { %v1565_v48 = vadd.f32 %v3124_v19, %v1504_v21  ;;  %v2281_v29 = vpop.f32.mrf.mxu0 }
 0x172   :  { %v1766_v30 = vadd.f32 %v1765_v40, %v1745_v26  ;;  %v1509_v33 = vadd.f32 %v2361_v17, %v1388_v27  ;;  %v2282_v32 = vadd.f32 %v2281_v29, %v2280_v22  ;;  %v2363_v35 = vpop.f32.mrf.mxu1 }
 0x173   :  { %v1587_v36 = vmax.f32 %v1565_v48, 0.0  ;;  %v2283_v37 = vpop.f32.mrf.mxu0  ;;  %v2364_v41 = vadd.f32 %v2363_v35, %v2362_v28 }
 0x174   :  { %v1566_v60 = vadd.f32 %v3124_v19, %v1509_v33  ;;  %v1391_v38 = vadd.f32 %v2282_v32, %v3102_v0  ;;  %v2365_v42 = vpop.f32.mrf.mxu1 }
 0x175   :  { %v2024_v44 = vpack.c.bf16 %v1587_v36, %v1586_v18  ;;  %v1718_v24 = vadd.f32 %v1717_v23, %v1587_v36  ;;  %v1746_v56 = vmul.f32 %v1587_v36, %v1587_v36  ;;  %v2284_v45 = vpop.f32.mrf.mxu0 }
 0x176   :  { %v1588_v47 = vmax.f32 %v1566_v60, 0.0  ;;  %v1512_v49 = vadd.f32 %v2364_v41, %v1391_v38  ;;  %v2285_v50 = vadd.f32 %v2284_v45, %v2283_v37  ;;  %v2366_v51 = vpop.f32.mrf.mxu1 }
 0x177   :  { %2055 = vst [vmem:[%s3210_s5 + $0x28] sm:$0xff] %v2024_v44   ;;  %v1767_v54 = vadd.f32 %v1766_v30, %v1746_v56  ;;  %v2367_v3 = vadd.f32 %v2366_v51, %v2365_v42  ;;  %v2286_v39 = vpop.f32.mrf.mxu0 }
 0x178   :  { %v1719_v55 = vadd.f32 %v1718_v24, %v1588_v47  ;;  %v1747_v57 = vmul.f32 %v1588_v47, %v1588_v47  ;;  %v1567_v0 = vadd.f32 %v3124_v19, %v1512_v49  ;;  %v1396_v31 = vadd.f32 %v2285_v50, %v3104_v8  ;;  %v2368_v58 = vpop.f32.mrf.mxu1 }
 0x179   :  { %v2287_v59 = vpop.f32.mrf.mxu0 }
 0x17a   :  { %v1768_v61 = vadd.f32 %v1767_v54, %v1747_v57  ;;  %v1589_v63 = vmax.f32 %v1567_v0, 0.0  ;;  %v1517_v1 = vadd.f32 %v2367_v3, %v1396_v31  ;;  %v2288_v2 = vadd.f32 %v2287_v59, %v2286_v39  ;;  %v2369_v4 = vpop.f32.mrf.mxu1 }
 0x17b   :  { %v2289_v46 = vpop.f32.mrf.mxu0  ;;  %v2370_v10 = vadd.f32 %v2369_v4, %v2368_v58 }
 0x17c   :  { %v2029_v5 = vpack.c.bf16 %v1589_v63, %v1588_v47  ;;  %v1720_v6 = vadd.f32 %v1719_v55, %v1589_v63  ;;  %v1748_v9 = vmul.f32 %v1589_v63, %v1589_v63  ;;  %v1568_v11 = vadd.f32 %v3124_v19, %v1517_v1  ;;  %v2371_v12 = vpop.f32.mrf.mxu1 }
 0x17d   :  { %v1399_v13 = vadd.f32 %v2288_v2, %v3106_v16  ;;  %v2290_v14 = vpop.f32.mrf.mxu0 }
 0x17e   :  { %2056 = vst [vmem:[%s3210_s5 + $0x30] sm:$0xff] %v2029_v5   ;;  %v1769_v8 = vadd.f32 %v1768_v61, %v1748_v9  ;;  %v1590_v15 = vmax.f32 %v1568_v11, 0.0  ;;  %v2291_v40 = vadd.f32 %v2290_v14, %v2289_v46  ;;  %v2372_v18 = vpop.f32.mrf.mxu1 }
 0x17f   :  { %v1520_v20 = vadd.f32 %v2370_v10, %v1399_v13  ;;  %v2292_v53 = vpop.f32.mrf.mxu0  ;;  %v2373_v26 = vadd.f32 %v2372_v18, %v2371_v12 }
 0x180   :  { %v1721_v21 = vadd.f32 %v1720_v6, %v1590_v15  ;;  %v1749_v22 = vmul.f32 %v1590_v15, %v1590_v15  ;;  %v1404_v23 = vadd.f32 %v2291_v40, %v3108_v25  ;;  %v2374_v27 = vpop.f32.mrf.mxu1 }
 0x181   :  { %v1569_v16 = vadd.f32 %v3124_v19, %v1520_v20  ;;  %v2293_v17 = vpop.f32.mrf.mxu0 }
 0x182   :  { %v1770_v28 = vadd.f32 %v1769_v8, %v1749_v22  ;;  %v1525_v48 = vadd.f32 %v2373_v26, %v1404_v23  ;;  %v2294_v29 = vadd.f32 %v2293_v17, %v2292_v53  ;;  %v2375_v30 = vpop.f32.mrf.mxu1 }
 0x183   :  { %v1591_v33 = vmax.f32 %v1569_v16, 0.0  ;;  %v2295_v32 = vpop.f32.mrf.mxu0  ;;  %v2376_v37 = vadd.f32 %v2375_v30, %v2374_v27 }
 0x184   :  { %v1570_v35 = vadd.f32 %v3124_v19, %v1525_v48  ;;  %v1407_v36 = vadd.f32 %v2294_v29, %v3110_v34  ;;  %v2377_v60 = vpop.f32.mrf.mxu1 }
 0x185   :  { %v2034_v38 = vpack.c.bf16 %v1591_v33, %v1590_v15  ;;  %v1722_v41 = vadd.f32 %v1721_v21, %v1591_v33  ;;  %v1750_v25 = vmul.f32 %v1591_v33, %v1591_v33  ;;  %v2296_v42 = vpop.f32.mrf.mxu0 }
 0x186   :  { %v1592_v44 = vmax.f32 %v1570_v35, 0.0  ;;  %v1528_v24 = vadd.f32 %v2376_v37, %v1407_v36  ;;  %v2297_v56 = vadd.f32 %v2296_v42, %v2295_v32  ;;  %v2378_v45 = vpop.f32.mrf.mxu1 }
 0x187   :  { %2057 = vst [vmem:[%s3210_s5 + $0x38] sm:$0xff] %v2034_v38   ;;  %v1771_v47 = vadd.f32 %v1770_v28, %v1750_v25  ;;  %v2379_v49 = vadd.f32 %v2378_v45, %v2377_v60  ;;  %v2298_v50 = vpop.f32.mrf.mxu0  ;;  %v1784_v45 = vlaneseq }
 0x188   :  { %v1723_v51 = vadd.f32 %v1722_v41, %v1592_v44  ;;  %v1751_v54 = vmul.f32 %v1592_v44, %v1592_v44  ;;  %v1571_v34 = vadd.f32 %v3124_v19, %v1528_v24  ;;  %v1412_v3 = vadd.f32 %v2297_v56, %v3112_v43  ;;  %v2380_v39 = vpop.f32.mrf.mxu1 }
 0x189   :  { %v2299_v55 = vpop.f32.mrf.mxu0 }
 0x18a   :  { %v1772_v57 = vadd.f32 %v1771_v47, %v1751_v54  ;;  %v1593_v0 = vmax.f32 %v1571_v34, 0.0  ;;  %v1533_v31 = vadd.f32 %v2379_v49, %v1412_v3  ;;  %v2300_v58 = vadd.f32 %v2299_v55, %v2298_v50  ;;  %v2381_v59 = vpop.f32.mrf.mxu1 }
 0x18b   :  { %v2301_v61 = vpop.f32.mrf.mxu0  ;;  %v2382_v6 = vadd.f32 %v2381_v59, %v2380_v39  ;;  %v1785_v54 = vshrl.u32 %v1784_v45, 7 }
 0x18c   :  { %v2039_v63 = vpack.c.bf16 %v1593_v0, %v1592_v44  ;;  %v1724_v1 = vadd.f32 %v1723_v51, %v1593_v0  ;;  %v1752_v2 = vmul.f32 %v1593_v0, %v1593_v0  ;;  %v1572_v4 = vadd.f32 %v3124_v19, %v1533_v31  ;;  %v2383_v46 = vpop.f32.mrf.mxu1 }
 0x18d   :  { %v1415_v5 = vadd.f32 %v2300_v58, %v3114_v52  ;;  %v2302_v9 = vpop.f32.mrf.mxu0  ;;  %vm1787_vm0 = vcmp.eq.s32.totalorder %v1785_v54, 1  ;;  %vm1786_vm1 = vcmp.eq.s32.totalorder %v1785_v54, 0 }
 0x18e   :  { %2058 = vst [vmem:[%s3210_s5 + $0x40] sm:$0xff] %v2039_v63   ;;  %v1773_v43 = vadd.f32 %v1772_v57, %v1752_v2  ;;  %v1594_v11 = vmax.f32 %v1572_v4, 0.0  ;;  %v2303_v12 = vadd.f32 %v2302_v9, %v2301_v61  ;;  %v2384_v13 = vpop.f32.mrf.mxu1 }
 0x18f   :  { %v1536_v10 = vadd.f32 %v2382_v6, %v1415_v5  ;;  %v2304_v14 = vpop.f32.mrf.mxu0  ;;  %v2385_v18 = vadd.f32 %v2384_v13, %v2383_v46 }
 0x190   :  { %v1725_v8 = vadd.f32 %v1724_v1, %v1594_v11  ;;  %v1753_v15 = vmul.f32 %v1594_v11, %v1594_v11  ;;  %v1420_v40 = vadd.f32 %v2303_v12, %v3116_v62  ;;  %v2386_v20 = vpop.f32.mrf.mxu1 }
 0x191   :  { %v1573_v52 = vadd.f32 %v3124_v19, %v1536_v10  ;;  %v2305_v53 = vpop.f32.mrf.mxu0 }
 0x192   :  { %v1774_v21 = vadd.f32 %v1773_v43, %v1753_v15  ;;  %v1541_v22 = vadd.f32 %v2385_v18, %v1420_v40  ;;  %v2306_v23 = vadd.f32 %v2305_v53, %v2304_v14  ;;  %v2387_v26 = vpop.f32.mrf.mxu1 }
 0x193   :  { %v1595_v27 = vmax.f32 %v1573_v52, 0.0  ;;  %v2388_v28 = vadd.f32 %v2387_v26, %v2386_v20 }
 0x194   :  { %v1574_v16 = vadd.f32 %v3124_v19, %v1541_v22  ;;  %v1423_v17 = vadd.f32 %v2306_v23, %v3118_v7 }
 0x195   :  { %v2044_v48 = vpack.c.bf16 %v1595_v27, %v1594_v11  ;;  %v1726_v29 = vadd.f32 %v1725_v8, %v1595_v27  ;;  %v1754_v30 = vmul.f32 %v1595_v27, %v1595_v27 }
 0x196   :  { %v1596_v33 = vmax.f32 %v1574_v16, 0.0  ;;  %v1544_v62 = vadd.f32 %v2388_v28, %v1423_v17 }
 0x197   :  { %2059 = vst [vmem:[%s3210_s5 + $0x48] sm:$0xff] %v2044_v48   ;;  %v1775_v32 = vadd.f32 %v1774_v21, %v1754_v30 }
 0x198   :  { %v1727_v35 = vadd.f32 %v1726_v29, %v1596_v33  ;;  %v1755_v36 = vmul.f32 %v1596_v33, %v1596_v33  ;;  %v1575_v37 = vadd.f32 %v3124_v19, %v1544_v62 }
 0x19a   :  { %v1776_v60 = vadd.f32 %v1775_v32, %v1755_v36  ;;  %v1597_v38 = vmax.f32 %v1575_v37, 0.0 }
 0x19c   :  { %v2049_v41 = vpack.c.bf16 %v1597_v38, %v1596_v33  ;;  %v1728_v25 = vadd.f32 %v1727_v35, %v1597_v38  ;;  %v1756_v7 = vmul.f32 %v1597_v38, %v1597_v38 }
 0x19e   :  { %2060 = vst [vmem:[%s3210_s5 + $0x50] sm:$0xff] %v2049_v41   ;;  %v1729_v42 = vrot.slane %v1728_v25, 4  ;;  %v1777_v44 = vadd.f32 %v1776_v60, %v1756_v7 }
 0x1a0   :  { %v1730_v24 = vadd.f32 %v1729_v42, %v1728_v25  ;;  %v1778_v56 = vrot.slane %v1777_v44, 4 }
 0x1a2   :  { %v1731_v47 = vrot.slane %v1730_v24, 2  ;;  %v1779_v49 = vadd.f32 %v1778_v56, %v1777_v44 }
 0x1a4   :  { %v1732_v50 = vadd.f32 %v1731_v47, %v1730_v24  ;;  %v1780_v51 = vrot.slane %v1779_v49, 2 }
 0x1a6   :  { %v1781_v19 = vadd.f32 %v1780_v51, %v1779_v49  ;;  %v1733_v34 = vrot.slane %v1732_v50, 1 }
 0x1a8   :  { %v1782_v3 = vrot.slane %v1781_v19, 1  ;;  %v1734_v55 = vadd.f32 %v1733_v34, %v1732_v50 }
 0x1aa   :  { %v1783_v39 = vadd.f32 %v1782_v3, %v1781_v19 }
 0x1ac   :  { %v1788_v57 = vsel %vm1787_vm0, %v1783_v39, 0.0 }
 0x1ad   :  { %v1789_v0 = vsel %vm1786_vm1, %v1734_v55, %v1788_v57 }
 0x1ae   :  { %1790 = vst [vmem:[%s3211_s6] sm:$0xff] %v1789_v0 }

// kernel: unet_forward.37
= control target key start
LH: loop header
LB: loop body
LE: loop exit
PB: predicated region body
PF: predicated region fallthrough
CT: control target
= control target key end

     0   :  { %s2423_s1 = inlined_call_operand.vmem [shape: bf16[128,128], index: 1, kind: input, shape index: {}]   ;;  %s2424_s0 = inlined_call_operand.vmem [shape: bf16[512,128], index: 0, kind: input, shape index: {}]   ;;  %s2425_s2 = inlined_call_operand.vmem [shape: f32[1,128], index: 2, kind: input, shape index: {}]   ;;  %s2426_s3 = inlined_call_operand.vmem [shape: f32[512,128], index: 3, kind: output, shape index: {}]  }
   0x1   :  { %v1327_v0 = vld [vmem:[%s2423_s1 + $0x38] sm:$0xff]   ;;  %v1328_v1 = vld [vmem:[%s2423_s1 + $0x30] sm:$0xff]   ;;  %v1329_v2 = vld [vmem:[%s2423_s1 + $0x28] sm:$0xff]  }
   0x2   :  { %1231 = vmatprep.subr.bf16.mxu0 %v1327_v0  ;;  %1311 = vmatprep.subr.bf16.mxu1 %v1327_v0  ;;  %v1330_v3 = vld [vmem:[%s2423_s1 + $0x20] sm:$0xff]   ;;  %v1331_v6 = vld [vmem:[%s2423_s1 + $0x18] sm:$0xff]   ;;  %v1332_v7 = vld [vmem:[%s2423_s1 + $0x10] sm:$0xff]  }
   0x3   :  { %1232 = vmatpush3.bf16.msra.mxu0 %v1327_v0  ;;  %1319 = vmatpush3.bf16.msra.mxu1 %v1327_v0  ;;  %v1335_v4 = vld [vmem:[%s2424_s0] sm:$0xff]   ;;  %v1333_v8 = vld [vmem:[%s2423_s1 + $0x8] sm:$0xff]   ;;  %v1339_v12 = vld [vmem:[%s2424_s0 + $0x10] sm:$0xff]  }
   0x4   :  { %1233 = vmatprep.subr.bf16.mxu0 %v1328_v1  ;;  %1312 = vmatprep.subr.bf16.mxu1 %v1328_v1  ;;  %v1336_v5 = vld [vmem:[%s2424_s0 + $0x80] sm:$0xff]   ;;  %v1337_v10 = vld [vmem:[%s2424_s0 + $0x8] sm:$0xff]   ;;  %v1340_v13 = vld [vmem:[%s2424_s0 + $0x90] sm:$0xff]  }
   0x5   :  { %1247 = vmatprep.mubr.bf16.mxu0 %v1335_v4  ;;  %1279 = vmatprep.mubr.bf16.mxu1 %v1336_v5  ;;  %v1334_v9 = vld [vmem:[%s2423_s1] sm:$0xff]   ;;  %v1338_v11 = vld [vmem:[%s2424_s0 + $0x88] sm:$0xff]   ;;  %v1341_v14 = vld [vmem:[%s2424_s0 + $0x18] sm:$0xff]  }
   0x6   :  { %v1342_v15 = vld [vmem:[%s2424_s0 + $0x98] sm:$0xff]   ;;  %v1343_v16 = vld [vmem:[%s2424_s0 + $0x20] sm:$0xff]   ;;  %v1345_v18 = vld [vmem:[%s2424_s0 + $0x28] sm:$0xff]  }
   0x7   :  { %1234 = vmatpush3.bf16.msra.mxu0 %v1328_v1  ;;  %1320 = vmatpush3.bf16.msra.mxu1 %v1328_v1  ;;  %v1344_v17 = vld [vmem:[%s2424_s0 + $0xa0] sm:$0xff]   ;;  %v1346_v19 = vld [vmem:[%s2424_s0 + $0xa8] sm:$0xff]   ;;  %v1347_v20 = vld [vmem:[%s2424_s0 + $0x30] sm:$0xff]  }
   0x8   :  { %1235 = vmatprep.subr.bf16.mxu0 %v1329_v2  ;;  %1313 = vmatprep.subr.bf16.mxu1 %v1329_v2  ;;  %v1348_v21 = vld [vmem:[%s2424_s0 + $0xb0] sm:$0xff]   ;;  %v1349_v22 = vld [vmem:[%s2424_s0 + $0x38] sm:$0xff]   ;;  %v1351_v24 = vld [vmem:[%s2424_s0 + $0x40] sm:$0xff]  }
   0x9   :  { %v1350_v23 = vld [vmem:[%s2424_s0 + $0xb8] sm:$0xff]   ;;  %v1352_v25 = vld [vmem:[%s2424_s0 + $0xc0] sm:$0xff]   ;;  %v1353_v26 = vld [vmem:[%s2424_s0 + $0x48] sm:$0xff]  }
   0xa   :  { %v1354_v27 = vld [vmem:[%s2424_s0 + $0xc8] sm:$0xff]   ;;  %v1355_v28 = vld [vmem:[%s2424_s0 + $0x50] sm:$0xff]   ;;  %v1357_v30 = vld [vmem:[%s2424_s0 + $0x58] sm:$0xff]  }
   0xb   :  { %1236 = vmatpush3.bf16.msra.mxu0 %v1329_v2  ;;  %1321 = vmatpush3.bf16.msra.mxu1 %v1329_v2  ;;  %v1356_v29 = vld [vmem:[%s2424_s0 + $0xd0] sm:$0xff]   ;;  %v1358_v31 = vld [vmem:[%s2424_s0 + $0xd8] sm:$0xff]   ;;  %v1359_v32 = vld [vmem:[%s2424_s0 + $0x60] sm:$0xff]  }
   0xc   :  { %1237 = vmatprep.subr.bf16.mxu0 %v1330_v3  ;;  %1314 = vmatprep.subr.bf16.mxu1 %v1330_v3  ;;  %v1360_v33 = vld [vmem:[%s2424_s0 + $0xe0] sm:$0xff]   ;;  %v1361_v34 = vld [vmem:[%s2424_s0 + $0x68] sm:$0xff]   ;;  %v1363_v36 = vld [vmem:[%s2424_s0 + $0x70] sm:$0xff]  }
   0xd   :  { %v1362_v35 = vld [vmem:[%s2424_s0 + $0xe8] sm:$0xff]   ;;  %v1364_v37 = vld [vmem:[%s2424_s0 + $0xf0] sm:$0xff]   ;;  %v1365_v38 = vld [vmem:[%s2424_s0 + $0x78] sm:$0xff]  }
   0xe   :  { %v1366_v39 = vld [vmem:[%s2424_s0 + $0xf8] sm:$0xff]   ;;  %v1767_v40 = vld [vmem:[%s2425_s2] ss:$0 sm:$0xff] }
   0xf   :  { %1238 = vmatpush3.bf16.msra.mxu0 %v1330_v3  ;;  %1322 = vmatpush3.bf16.msra.mxu1 %v1330_v3 }
  0x10   :  { %1239 = vmatprep.subr.bf16.mxu0 %v1331_v6  ;;  %1315 = vmatprep.subr.bf16.mxu1 %v1331_v6 }
  0x13   :  { %1240 = vmatpush3.bf16.msra.mxu0 %v1331_v6  ;;  %1323 = vmatpush3.bf16.msra.mxu1 %v1331_v6 }
  0x14   :  { %1241 = vmatprep.subr.bf16.mxu0 %v1332_v7  ;;  %1316 = vmatprep.subr.bf16.mxu1 %v1332_v7 }
  0x17   :  { %1242 = vmatpush3.bf16.msra.mxu0 %v1332_v7  ;;  %1324 = vmatpush3.bf16.msra.mxu1 %v1332_v7 }
  0x18   :  { %1243 = vmatprep.subr.bf16.mxu0 %v1333_v8  ;;  %1317 = vmatprep.subr.bf16.mxu1 %v1333_v8 }
  0x1b   :  { %1244 = vmatpush3.bf16.msra.mxu0 %v1333_v8  ;;  %1325 = vmatpush3.bf16.msra.mxu1 %v1333_v8 }
  0x1c   :  { %1245 = vmatprep.subr.bf16.mxu0 %v1334_v9  ;;  %1318 = vmatprep.subr.bf16.mxu1 %v1334_v9 }
  0x1f   :  { %1246 = vmatpush3.bf16.msra.mxu0 %v1334_v9  ;;  %1326 = vmatpush3.bf16.msra.mxu1 %v1334_v9 }
  0x22   :  { %1248 = vmatmul.mubr.bf16.vlgmr.msra.gmra.mxu0 %v1337_v10  ;;  %1280 = vmatmul.mubr.bf16.vlgmr.msra.gmra.mxu1 %v1338_v11 }
  0x23   :  { %1251 = vmatprep.mubr.bf16.mxu0 %v1339_v12  ;;  %1283 = vmatprep.mubr.bf16.mxu1 %v1340_v13 }
  0x2a   :  { %1252 = vmatmul.mubr.bf16.gmra.mxu0 %v1341_v14  ;;  %1284 = vmatmul.mubr.bf16.gmra.mxu1 %v1342_v15 }
  0x2b   :  { %1255 = vmatprep.mubr.bf16.mxu0 %v1343_v16  ;;  %1287 = vmatprep.mubr.bf16.mxu1 %v1344_v17 }
  0x32   :  { %1256 = vmatmul.mubr.bf16.gmra.mxu0 %v1345_v18  ;;  %1288 = vmatmul.mubr.bf16.gmra.mxu1 %v1346_v19 }
  0x33   :  { %1259 = vmatprep.mubr.bf16.mxu0 %v1347_v20  ;;  %1291 = vmatprep.mubr.bf16.mxu1 %v1348_v21 }
  0x3a   :  { %1260 = vmatmul.mubr.bf16.gmra.mxu0 %v1349_v22  ;;  %1292 = vmatmul.mubr.bf16.gmra.mxu1 %v1350_v23 }
  0x3b   :  { %1263 = vmatprep.mubr.bf16.mxu0 %v1351_v24  ;;  %1295 = vmatprep.mubr.bf16.mxu1 %v1352_v25 }
  0x42   :  { %1264 = vmatmul.mubr.bf16.gmra.mxu0 %v1353_v26  ;;  %1296 = vmatmul.mubr.bf16.gmra.mxu1 %v1354_v27 }
  0x43   :  { %1267 = vmatprep.mubr.bf16.mxu0 %v1355_v28  ;;  %1299 = vmatprep.mubr.bf16.mxu1 %v1356_v29 }
  0x4a   :  { %1268 = vmatmul.mubr.bf16.gmra.mxu0 %v1357_v30  ;;  %1300 = vmatmul.mubr.bf16.gmra.mxu1 %v1358_v31 }
  0x4b   :  { %1271 = vmatprep.mubr.bf16.mxu0 %v1359_v32  ;;  %1303 = vmatprep.mubr.bf16.mxu1 %v1360_v33 }
  0x52   :  { %1272 = vmatmul.mubr.bf16.gmra.mxu0 %v1361_v34  ;;  %1304 = vmatmul.mubr.bf16.gmra.mxu1 %v1362_v35 }
  0x53   :  { %1275 = vmatprep.mubr.bf16.mxu0 %v1363_v36  ;;  %1307 = vmatprep.mubr.bf16.mxu1 %v1364_v37 }
  0x5a   :  { %1276 = vmatmul.mubr.bf16.gmra.mxu0 %v1365_v38  ;;  %1308 = vmatmul.mubr.bf16.gmra.mxu1 %v1366_v39 }
  0xe2   :  { %v1249_v41 = vpop.f32.mrf.mxu0  ;;  %v1281_v42 = vpop.f32.mrf.mxu1 }
  0xe3   :  { %v1770_v43 = vadd.f32 %v1249_v41, %v1767_v40  ;;  %v1773_v44 = vadd.f32 %v1281_v42, %v1767_v40 }
  0xe4   :  { %v376_v45 = vpop.f32.mrf.mxu0  ;;  %v504_v46 = vpop.f32.mrf.mxu1 }
  0xe5   :  { %v636_v47 = vsub.f32 0.0, %v1770_v43  ;;  %v668_v48 = vsub.f32 0.0, %v1773_v44  ;;  %v1778_v49 = vadd.f32 %v1767_v40, %v376_v45  ;;  %v1781_v50 = vadd.f32 %v1767_v40, %v504_v46 }
  0xe6   :  { %v1250_v51 = vpop.f32.mrf.mxu0  ;;  %v1282_v52 = vpop.f32.mrf.mxu1 }
  0xe7   :  { %v702_v53 = vmul.f32 1.442695, %v636_v47  ;;  %v766_v54 = vmul.f32 1.442695, %v668_v48  ;;  %v634_v55 = vsub.f32 0.0, %v1778_v49  ;;  %v666_v56 = vsub.f32 0.0, %v1781_v50 }
  0xe8   :  { %v1786_v57 = vadd.f32 %v1250_v51, %v1767_v40  ;;  %v1789_v58 = vadd.f32 %v1282_v52, %v1767_v40  ;;  %v379_v59 = vpop.f32.mrf.mxu0  ;;  %v507_v60 = vpop.f32.mrf.mxu1 }
  0xe9   :  { %1367 = vpow2.f32 %v702_v53  ;;  %v698_v61 = vmul.f32 1.442695, %v634_v55  ;;  %v762_v62 = vmul.f32 1.442695, %v666_v56  ;;  %v1792_v63 = vadd.f32 %v1767_v40, %v379_v59 }
  0xea   :  { %1369 = vpow2.f32 %v766_v54  ;;  %v637_v0 = vsub.f32 0.0, %v1786_v57  ;;  %v669_v1 = vsub.f32 0.0, %v1789_v58  ;;  %v1797_v2 = vadd.f32 %v1767_v40, %v507_v60  ;;  %v1253_v3 = vpop.f32.mrf.mxu0  ;;  %v1285_v4 = vpop.f32.mrf.mxu1 }
  0xeb   :  { %1371 = vpow2.f32 %v698_v61  ;;  %v635_v5 = vsub.f32 0.0, %v1792_v63  ;;  %v1801_v6 = vadd.f32 %v1253_v3, %v1767_v40  ;;  %v1804_v7 = vadd.f32 %v1285_v4, %v1767_v40 }
  0xec   :  { %1373 = vpow2.f32 %v762_v62  ;;  %v704_v8 = vmul.f32 1.442695, %v637_v0  ;;  %v768_v9 = vmul.f32 1.442695, %v669_v1  ;;  %v667_v10 = vsub.f32 0.0, %v1797_v2  ;;  %v392_v11 = vpop.f32.mrf.mxu0  ;;  %v520_v12 = vpop.f32.mrf.mxu1 }
  0xed   :  { %v700_v13 = vmul.f32 1.442695, %v635_v5  ;;  %v640_v14 = vsub.f32 0.0, %v1801_v6  ;;  %v672_v15 = vsub.f32 0.0, %v1804_v7  ;;  %v1810_v16 = vadd.f32 %v1767_v40, %v392_v11 }
  0xee   :  { %1375 = vpow2.f32 %v704_v8  ;;  %v764_v17 = vmul.f32 1.442695, %v667_v10  ;;  %v1813_v18 = vadd.f32 %v1767_v40, %v520_v12  ;;  %v1254_v19 = vpop.f32.mrf.mxu0  ;;  %v1286_v20 = vpop.f32.mrf.mxu1  ;;  %v631_v54 = vlaneseq }
  0xef   :  { %1377 = vpow2.f32 %v768_v9  ;;  %v710_v21 = vmul.f32 1.442695, %v640_v14  ;;  %v774_v22 = vmul.f32 1.442695, %v672_v15  ;;  %v638_v23 = vsub.f32 0.0, %v1810_v16 }
  0xf0   :  { %1379 = vpow2.f32 %v700_v13  ;;  %v670_v24 = vsub.f32 0.0, %v1813_v18  ;;  %v1818_v25 = vadd.f32 %v1254_v19, %v1767_v40  ;;  %v1821_v26 = vadd.f32 %v1286_v20, %v1767_v40  ;;  %v395_v27 = vpop.f32.mrf.mxu0  ;;  %v523_v28 = vpop.f32.mrf.mxu1 }
  0xf1   :  { %1381 = vpow2.f32 %v764_v17  ;;  %v706_v29 = vmul.f32 1.442695, %v638_v23  ;;  %v1824_v30 = vadd.f32 %v1767_v40, %v395_v27  ;;  %v1827_v31 = vadd.f32 %v1767_v40, %v523_v28 }
  0xf2   :  { %1383 = vpow2.f32 %v710_v21  ;;  %v770_v32 = vmul.f32 1.442695, %v670_v24  ;;  %v641_v33 = vsub.f32 0.0, %v1818_v25  ;;  %v673_v34 = vsub.f32 0.0, %v1821_v26  ;;  %v1257_v35 = vpop.f32.mrf.mxu0  ;;  %v1289_v36 = vpop.f32.mrf.mxu1 }
  0xf3   :  { %1385 = vpow2.f32 %v774_v22  ;;  %v639_v37 = vsub.f32 0.0, %v1824_v30  ;;  %v671_v46 = vsub.f32 0.0, %v1827_v31  ;;  %v1834_v1 = vadd.f32 %v1257_v35, %v1767_v40 }
  0xf4   :  { %1387 = vpow2.f32 %v706_v29  ;;  %v712_v38 = vmul.f32 1.442695, %v641_v33  ;;  %v776_v39 = vmul.f32 1.442695, %v673_v34  ;;  %v408_v41 = vpop.f32.mrf.mxu0  ;;  %v536_v42 = vpop.f32.mrf.mxu1  ;;  %v1837_v4 = vadd.f32 %v1289_v36, %v1767_v40 }
  0xf5   :  { %1389 = vpow2.f32 %v770_v32  ;;  %v708_v45 = vmul.f32 1.442695, %v639_v37  ;;  %v772_v61 = vmul.f32 1.442695, %v671_v46  ;;  %v1839_v8 = vand.u32 127, %v631_v54 }
  0xf6   :  { %v1368_v47 = vpop.eup %1367  ;;  %1391 = vpow2.f32 %v712_v38  ;;  %v1258_v48 = vpop.f32.mrf.mxu0  ;;  %v1842_v10 = vadd.f32 %v1767_v40, %v408_v41  ;;  %v1845_v14 = vadd.f32 %v1767_v40, %v536_v42  ;;  %v644_v20 = vsub.f32 0.0, %v1834_v1 }
  0xf7   :  { %v1370_v51 = vpop.eup %1369  ;;  %v828_v52 = vadd.f32 1.0, %v1368_v47  ;;  %1393 = vpow2.f32 %v776_v39  ;;  %v1290_v56 = vpop.f32.mrf.mxu1  ;;  %v1849_v21 = vadd.f32 %v1258_v48, %v1767_v40  ;;  %v676_v24 = vsub.f32 0.0, %v1837_v4 }
  0xf8   :  { %v1372_v53 = vpop.eup %1371  ;;  %v860_v55 = vadd.f32 1.0, %v1370_v51  ;;  %1395 = vpow2.f32 %v708_v45  ;;  %v411_v62 = vpop.f32.mrf.mxu0  ;;  %v1853_v27 = vadd.f32 %v1290_v56, %v1767_v40  ;;  %vm633_vm0 = vcmp.eq.s32.totalorder %v1839_v8, 3 }
  0xf9   :  { %v1374_v59 = vpop.eup %1373  ;;  %1397 = vrcp.f32 %v828_v52  ;;  %v826_v60 = vadd.f32 1.0, %v1372_v53  ;;  %v539_v11 = vpop.f32.mrf.mxu1  ;;  %v642_v32 = vsub.f32 0.0, %v1842_v10  ;;  %v674_v36 = vsub.f32 0.0, %v1845_v14 }
  0xfa   :  { %1399 = vrcp.f32 %v860_v55  ;;  %v858_v0 = vadd.f32 1.0, %v1374_v59  ;;  %v1261_v15 = vpop.f32.mrf.mxu0  ;;  %v1859_v37 = vadd.f32 %v1767_v40, %v411_v62  ;;  %v718_v42 = vmul.f32 1.442695, %v644_v20 }
  0xfb   :  { %v1376_v3 = vpop.eup %1375  ;;  %1401 = vrcp.f32 %v826_v60  ;;  %v1293_v33 = vpop.f32.mrf.mxu1  ;;  %v645_v45 = vsub.f32 0.0, %v1849_v21  ;;  %v782_v48 = vmul.f32 1.442695, %v676_v24  ;;  %v677_v51 = vsub.f32 0.0, %v1853_v27 }
  0xfc   :  { %v1378_v5 = vpop.eup %1377  ;;  %1403 = vrcp.f32 %v858_v0  ;;  %v829_v9 = vadd.f32 1.0, %v1376_v3  ;;  %v424_v38 = vpop.f32.mrf.mxu0  ;;  %v714_v54 = vmul.f32 1.442695, %v642_v32  ;;  %v1864_v55 = vadd.f32 %v1767_v40, %v539_v11 }
  0xfd   :  { %v1380_v12 = vpop.eup %1379  ;;  %v861_v13 = vadd.f32 1.0, %v1378_v5  ;;  %1405 = vpow2.f32 %v772_v61  ;;  %v552_v56 = vpop.f32.mrf.mxu1  ;;  %v778_v61 = vmul.f32 1.442695, %v674_v36  ;;  %v643_v62 = vsub.f32 0.0, %v1859_v37 }
  0xfe   :  { %v1382_v17 = vpop.eup %1381  ;;  %1407 = vrcp.f32 %v829_v9  ;;  %v827_v19 = vadd.f32 1.0, %v1380_v12  ;;  %v1262_v0 = vpop.f32.mrf.mxu0  ;;  %v720_v9 = vmul.f32 1.442695, %v645_v45  ;;  %v1868_v12 = vadd.f32 %v1261_v15, %v1767_v40 }
  0xff   :  { %v1384_v22 = vpop.eup %1383  ;;  %1409 = vrcp.f32 %v861_v13  ;;  %v859_v23 = vadd.f32 1.0, %v1382_v17  ;;  %v784_v17 = vmul.f32 1.442695, %v677_v51 }
 0x100   :  { %v1386_v28 = vpop.eup %1385  ;;  %1411 = vrcp.f32 %v827_v19  ;;  %v832_v29 = vadd.f32 1.0, %v1384_v22  ;;  %v1874_v19 = vadd.f32 %v1293_v33, %v1767_v40  ;;  %v675_v22 = vsub.f32 0.0, %v1864_v55  ;;  %v427_v32 = vpop.f32.mrf.mxu0 }
 0x101   :  { %v1388_v34 = vpop.eup %1387  ;;  %1413 = vrcp.f32 %v859_v23  ;;  %v864_v35 = vadd.f32 1.0, %v1386_v28  ;;  %v1884_v23 = vadd.f32 %v1767_v40, %v424_v38 }
 0x102   :  { %v1390_v39 = vpop.eup %1389  ;;  %1415 = vrcp.f32 %v832_v29  ;;  %v830_v41 = vadd.f32 1.0, %v1388_v34  ;;  %v716_v29 = vmul.f32 1.442695, %v643_v62 }
 0x103   :  { %v1392_v46 = vpop.eup %1391  ;;  %1417 = vrcp.f32 %v864_v35  ;;  %v862_v47 = vadd.f32 1.0, %v1390_v39  ;;  %v648_v35 = vsub.f32 0.0, %v1868_v12  ;;  %v680_v39 = vsub.f32 0.0, %v1874_v19 }
 0x104   :  { %v1394_v52 = vpop.eup %1393  ;;  %1419 = vrcp.f32 %v830_v41  ;;  %v833_v53 = vadd.f32 1.0, %v1392_v46  ;;  %v646_v45 = vsub.f32 0.0, %v1884_v23  ;;  %v1917_v46 = vadd.f32 %v1767_v40, %v427_v32 }
 0x105   :  { %v1396_v59 = vpop.eup %1395  ;;  %1421 = vrcp.f32 %v862_v47  ;;  %v865_v60 = vadd.f32 1.0, %v1394_v52  ;;  %v780_v52 = vmul.f32 1.442695, %v675_v22  ;;  %v790_v62 = vmul.f32 1.442695, %v680_v39 }
 0x106   :  { %v1398_v3 = vpop.eup %1397  ;;  %1423 = vrcp.f32 %v833_v53  ;;  %v831_v5 = vadd.f32 1.0, %v1396_v59  ;;  %v1926_v53 = vpop.f32.mrf.mxu0  ;;  %v726_v59 = vmul.f32 1.442695, %v648_v35 }
 0x107   :  { %v1400_v13 = vpop.eup %1399  ;;  %v1020_v11 = vsel %vm633_vm0, %v1398_v3, %v1770_v43  ;;  %1425 = vrcp.f32 %v865_v60  ;;  %v1294_v43 = vpop.f32.mrf.mxu1 }
 0x108   :  { %v1402_v20 = vpop.eup %1401  ;;  %1084 = vst [vmem:[%s2426_s3 + $0x10] sm:$0xff] %v1020_v11  ;;  %v1052_v15 = vsel %vm633_vm0, %v1400_v13, %v1773_v44  ;;  %1427 = vrcp.f32 %v831_v5  ;;  %v1893_v44 = vadd.f32 %v1767_v40, %v552_v56  ;;  %v1910_v41 = vadd.f32 %v1294_v43, %v1767_v40 }
 0x109   :  { %v1404_v24 = vpop.eup %1403  ;;  %1116 = vst [vmem:[%s2426_s3 + $0x110] sm:$0xff] %v1052_v15  ;;  %v1018_v28 = vsel %vm633_vm0, %v1402_v20, %v1778_v49  ;;  %1429 = vpow2.f32 %v718_v42  ;;  %v1903_v49 = vadd.f32 %v1262_v0, %v1767_v40  ;;  %v555_v47 = vpop.f32.mrf.mxu1  ;;  %v722_v5 = vmul.f32 1.442695, %v646_v45 }
 0x10a   :  { %v1406_v33 = vpop.eup %1405  ;;  %1082 = vst [vmem:[%s2426_s3] sm:$0xff] %v1018_v28  ;;  %v1050_v34 = vsel %vm633_vm0, %v1404_v24, %v1781_v50  ;;  %1431 = vpow2.f32 %v782_v48  ;;  %v681_v0 = vsub.f32 0.0, %v1910_v41  ;;  %v1956_v20 = vadd.f32 %v1767_v40, %v555_v47 }
 0x10b   :  { %v1408_v36 = vpop.eup %1407  ;;  %1114 = vst [vmem:[%s2426_s3 + $0x100] sm:$0xff] %v1050_v34  ;;  %v863_v38 = vadd.f32 1.0, %v1406_v33  ;;  %1433 = vpow2.f32 %v714_v54  ;;  %v649_v60 = vsub.f32 0.0, %v1903_v49  ;;  %v1297_v13 = vpop.f32.mrf.mxu1 }
 0x10c   :  { %v1410_v42 = vpop.eup %1409  ;;  %v1021_v50 = vsel %vm633_vm0, %v1408_v36, %v1786_v57  ;;  %1435 = vpow2.f32 %v778_v61  ;;  %v678_v57 = vsub.f32 0.0, %v1893_v44  ;;  %v792_v28 = vmul.f32 1.442695, %v681_v0 }
 0x10d   :  { %v1412_v48 = vpop.eup %1411  ;;  %1085 = vst [vmem:[%s2426_s3 + $0x18] sm:$0xff] %v1021_v50  ;;  %v1053_v51 = vsel %vm633_vm0, %v1410_v42, %v1789_v58  ;;  %1437 = vrcp.f32 %v863_v38  ;;  %v728_v43 = vmul.f32 1.442695, %v649_v60  ;;  %v568_v33 = vpop.f32.mrf.mxu1  ;;  %v679_v35 = vsub.f32 0.0, %v1956_v20 }
 0x10e   :  { %v1414_v54 = vpop.eup %1413  ;;  %1117 = vst [vmem:[%s2426_s3 + $0x118] sm:$0xff] %v1053_v51  ;;  %v1019_v56 = vsel %vm633_vm0, %v1412_v48, %v1792_v63  ;;  %1439 = vpow2.f32 %v720_v9  ;;  %v647_v9 = vsub.f32 0.0, %v1917_v46  ;;  %v2000_v60 = vadd.f32 %v1297_v13, %v1767_v40 }
 0x10f   :  { %v1416_v58 = vpop.eup %1415  ;;  %1083 = vst [vmem:[%s2426_s3 + $0x8] sm:$0xff] %v1019_v56  ;;  %v1051_v61 = vsel %vm633_vm0, %v1414_v54, %v1797_v2  ;;  %1441 = vpow2.f32 %v784_v17  ;;  %v786_v17 = vmul.f32 1.442695, %v678_v57  ;;  %v1298_v45 = vpop.f32.mrf.mxu1  ;;  %v788_v51 = vmul.f32 1.442695, %v679_v35 }
 0x110   :  { %v1418_v3 = vpop.eup %1417  ;;  %1115 = vst [vmem:[%s2426_s3 + $0x108] sm:$0xff] %v1051_v61  ;;  %v1024_v63 = vsel %vm633_vm0, %v1416_v58, %v1801_v6  ;;  %1443 = vpow2.f32 %v716_v29  ;;  %v440_v6 = vpop.f32.mrf.mxu0  ;;  %v724_v32 = vmul.f32 1.442695, %v647_v9  ;;  %v1994_v54 = vadd.f32 %v1926_v53, %v1767_v40 }
 0x111   :  { %v1420_v11 = vpop.eup %1419  ;;  %1088 = vst [vmem:[%s2426_s3 + $0x30] sm:$0xff] %v1024_v63  ;;  %v1056_v2 = vsel %vm633_vm0, %v1418_v3, %v1804_v7  ;;  %1445 = vpow2.f32 %v780_v52  ;;  %v571_v53 = vpop.f32.mrf.mxu1 }
 0x112   :  { %v1422_v15 = vpop.eup %1421  ;;  %1120 = vst [vmem:[%s2426_s3 + $0x130] sm:$0xff] %v1056_v2  ;;  %v1022_v22 = vsel %vm633_vm0, %v1420_v11, %v1810_v16  ;;  %1447 = vpow2.f32 %v726_v59  ;;  %v1266_v36 = vpop.f32.mrf.mxu0  ;;  %v652_v13 = vsub.f32 0.0, %v1994_v54 }
 0x113   :  { %v1424_v24 = vpop.eup %1423  ;;  %1086 = vst [vmem:[%s2426_s3 + $0x20] sm:$0xff] %v1022_v22  ;;  %v1054_v7 = vsel %vm633_vm0, %v1422_v15, %v1813_v18  ;;  %1449 = vpow2.f32 %v790_v62  ;;  %v2006_v62 = vadd.f32 %v1767_v40, %v440_v6  ;;  %v2013_v11 = vadd.f32 %v1266_v36, %v1767_v40 }
 0x114   :  { %v1426_v29 = vpop.eup %1425  ;;  %1118 = vst [vmem:[%s2426_s3 + $0x120] sm:$0xff] %v1054_v7  ;;  %v1025_v16 = vsel %vm633_vm0, %v1424_v24, %v1818_v25  ;;  %1451 = vpow2.f32 %v722_v5  ;;  %v443_v52 = vpop.f32.mrf.mxu0  ;;  %v684_v6 = vsub.f32 0.0, %v2000_v60  ;;  %v2017_v15 = vadd.f32 %v1298_v45, %v1767_v40 }
 0x115   :  { %v1428_v34 = vpop.eup %1427  ;;  %1089 = vst [vmem:[%s2426_s3 + $0x38] sm:$0xff] %v1025_v16  ;;  %v1057_v18 = vsel %vm633_vm0, %v1426_v29, %v1821_v26  ;;  %1453 = vpow2.f32 %v786_v17  ;;  %v650_v24 = vsub.f32 0.0, %v2006_v62  ;;  %v1301_v7 = vpop.f32.mrf.mxu1  ;;  %v734_v35 = vmul.f32 1.442695, %v652_v13 }
 0x116   :  { %v1430_v38 = vpop.eup %1429  ;;  %1121 = vst [vmem:[%s2426_s3 + $0x138] sm:$0xff] %v1057_v18  ;;  %v1023_v25 = vsel %vm633_vm0, %v1428_v34, %v1824_v30  ;;  %1455 = vpow2.f32 %v728_v43  ;;  %v1269_v63 = vpop.f32.mrf.mxu0  ;;  %v653_v36 = vsub.f32 0.0, %v2013_v11 }
 0x117   :  { %v1432_v39 = vpop.eup %1431  ;;  %1087 = vst [vmem:[%s2426_s3 + $0x28] sm:$0xff] %v1023_v25  ;;  %v836_v26 = vadd.f32 1.0, %v1430_v38  ;;  %1457 = vpow2.f32 %v792_v28  ;;  %v730_v45 = vmul.f32 1.442695, %v650_v24 }
 0x118   :  { %v1434_v42 = vpop.eup %1433  ;;  %v868_v50 = vadd.f32 1.0, %v1432_v39  ;;  %1459 = vpow2.f32 %v724_v32  ;;  %v2022_v32 = vadd.f32 %v1767_v40, %v443_v52  ;;  %v798_v39 = vmul.f32 1.442695, %v684_v6 }
 0x119   :  { %v1436_v47 = vpop.eup %1435  ;;  %1461 = vrcp.f32 %v836_v26  ;;  %v834_v48 = vadd.f32 1.0, %v1434_v42  ;;  %v685_v26 = vsub.f32 0.0, %v2017_v15 }
 0x11a   :  { %v1438_v57 = vpop.eup %1437  ;;  %1463 = vrcp.f32 %v868_v50  ;;  %v866_v30 = vadd.f32 1.0, %v1436_v47  ;;  %v2027_v47 = vadd.f32 %v1767_v40, %v571_v53 }
 0x11b   :  { %v1440_v56 = vpop.eup %1439  ;;  %v1055_v59 = vsel %vm633_vm0, %v1438_v57, %v1827_v31  ;;  %1465 = vrcp.f32 %v834_v48  ;;  %v2009_v31 = vadd.f32 %v1767_v40, %v568_v33  ;;  %v456_v33 = vpop.f32.mrf.mxu0 }
 0x11c   :  { %v1442_v58 = vpop.eup %1441  ;;  %1119 = vst [vmem:[%s2426_s3 + $0x128] sm:$0xff] %v1055_v59  ;;  %1467 = vrcp.f32 %v866_v30  ;;  %v837_v61 = vadd.f32 1.0, %v1440_v56  ;;  %v584_v48 = vpop.f32.mrf.mxu1  ;;  %v651_v30 = vsub.f32 0.0, %v2022_v32 }
 0x11d   :  { %v1444_v0 = vpop.eup %1443  ;;  %v869_v3 = vadd.f32 1.0, %v1442_v58  ;;  %1469 = vpow2.f32 %v788_v51  ;;  %v682_v16 = vsub.f32 0.0, %v2009_v31  ;;  %v1270_v56 = vpop.f32.mrf.mxu0 }
 0x11e   :  { %v1446_v5 = vpop.eup %1445  ;;  %1471 = vrcp.f32 %v837_v61  ;;  %v835_v9 = vadd.f32 1.0, %v1444_v0  ;;  %v736_v61 = vmul.f32 1.442695, %v653_v36  ;;  %v2031_v0 = vadd.f32 %v1269_v63, %v1767_v40 }
 0x11f   :  { %v1448_v2 = vpop.eup %1447  ;;  %1473 = vrcp.f32 %v869_v3  ;;  %v867_v17 = vadd.f32 1.0, %v1446_v5  ;;  %v794_v57 = vmul.f32 1.442695, %v682_v16  ;;  %v800_v5 = vmul.f32 1.442695, %v685_v26  ;;  %v459_v24 = vpop.f32.mrf.mxu0 }
 0x120   :  { %v1450_v22 = vpop.eup %1449  ;;  %1475 = vrcp.f32 %v835_v9  ;;  %v840_v43 = vadd.f32 1.0, %v1448_v2  ;;  %v2037_v9 = vadd.f32 %v1301_v7, %v1767_v40  ;;  %v683_v2 = vsub.f32 0.0, %v2027_v47 }
 0x121   :  { %v1452_v28 = vpop.eup %1451  ;;  %1477 = vrcp.f32 %v867_v17  ;;  %v872_v29 = vadd.f32 1.0, %v1450_v22  ;;  %v2047_v17 = vadd.f32 %v1767_v40, %v456_v33 }
 0x122   :  { %v1454_v34 = vpop.eup %1453  ;;  %1479 = vrcp.f32 %v840_v43  ;;  %v838_v18 = vadd.f32 1.0, %v1452_v28  ;;  %v732_v43 = vmul.f32 1.442695, %v651_v30 }
 0x123   :  { %v1456_v38 = vpop.eup %1455  ;;  %1481 = vrcp.f32 %v872_v29  ;;  %v870_v25 = vadd.f32 1.0, %v1454_v34  ;;  %v656_v29 = vsub.f32 0.0, %v2031_v0  ;;  %v688_v34 = vsub.f32 0.0, %v2037_v9 }
 0x124   :  { %v1458_v42 = vpop.eup %1457  ;;  %1483 = vrcp.f32 %v838_v18  ;;  %v841_v50 = vadd.f32 1.0, %v1456_v38  ;;  %v654_v36 = vsub.f32 0.0, %v2047_v17  ;;  %v2080_v38 = vadd.f32 %v1767_v40, %v459_v24 }
 0x125   :  { %v1460_v51 = vpop.eup %1459  ;;  %1485 = vrcp.f32 %v870_v25  ;;  %v873_v52 = vadd.f32 1.0, %v1458_v42  ;;  %v796_v42 = vmul.f32 1.442695, %v683_v2  ;;  %v806_v30 = vmul.f32 1.442695, %v688_v34 }
 0x126   :  { %v1462_v59 = vpop.eup %1461  ;;  %1487 = vrcp.f32 %v841_v50  ;;  %v839_v58 = vadd.f32 1.0, %v1460_v51  ;;  %v2089_v50 = vpop.f32.mrf.mxu0  ;;  %v742_v51 = vmul.f32 1.442695, %v656_v29 }
 0x127   :  { %v1464_v3 = vpop.eup %1463  ;;  %v1028_v53 = vsel %vm633_vm0, %v1462_v59, %v1834_v1  ;;  %1489 = vrcp.f32 %v873_v52  ;;  %v1302_v1 = vpop.f32.mrf.mxu1 }
 0x128   :  { %v1466_v13 = vpop.eup %1465  ;;  %1092 = vst [vmem:[%s2426_s3 + $0x50] sm:$0xff] %v1028_v53  ;;  %v1060_v63 = vsel %vm633_vm0, %v1464_v3, %v1837_v4  ;;  %1491 = vrcp.f32 %v839_v58  ;;  %v2056_v4 = vadd.f32 %v1767_v40, %v584_v48  ;;  %v2073_v18 = vadd.f32 %v1302_v1, %v1767_v40 }
 0x129   :  { %v1468_v6 = vpop.eup %1467  ;;  %1124 = vst [vmem:[%s2426_s3 + $0x150] sm:$0xff] %v1060_v63  ;;  %v1026_v22 = vsel %vm633_vm0, %v1466_v13, %v1842_v10  ;;  %1493 = vpow2.f32 %v734_v35  ;;  %v2066_v10 = vadd.f32 %v1270_v56, %v1767_v40  ;;  %v587_v25 = vpop.f32.mrf.mxu1  ;;  %v738_v58 = vmul.f32 1.442695, %v654_v36 }
 0x12a   :  { %v1470_v7 = vpop.eup %1469  ;;  %1090 = vst [vmem:[%s2426_s3 + $0x40] sm:$0xff] %v1026_v22  ;;  %v1058_v28 = vsel %vm633_vm0, %v1468_v6, %v1845_v14  ;;  %1495 = vpow2.f32 %v798_v39  ;;  %v689_v56 = vsub.f32 0.0, %v2073_v18  ;;  %v2119_v13 = vadd.f32 %v1767_v40, %v587_v25 }
 0x12b   :  { %v1472_v16 = vpop.eup %1471  ;;  %1122 = vst [vmem:[%s2426_s3 + $0x140] sm:$0xff] %v1058_v28  ;;  %v871_v33 = vadd.f32 1.0, %v1470_v7  ;;  %1497 = vpow2.f32 %v730_v45  ;;  %v657_v52 = vsub.f32 0.0, %v2066_v10  ;;  %v1305_v3 = vpop.f32.mrf.mxu1 }
 0x12c   :  { %v1474_v35 = vpop.eup %1473  ;;  %v1029_v14 = vsel %vm633_vm0, %v1472_v16, %v1849_v21  ;;  %1499 = vpow2.f32 %v794_v57  ;;  %v686_v21 = vsub.f32 0.0, %v2056_v4  ;;  %v808_v22 = vmul.f32 1.442695, %v689_v56 }
 0x12d   :  { %v1476_v39 = vpop.eup %1475  ;;  %1093 = vst [vmem:[%s2426_s3 + $0x58] sm:$0xff] %v1029_v14  ;;  %v1061_v26 = vsel %vm633_vm0, %v1474_v35, %v1853_v27  ;;  %1501 = vrcp.f32 %v871_v33  ;;  %v744_v1 = vmul.f32 1.442695, %v657_v52  ;;  %v600_v7 = vpop.f32.mrf.mxu1  ;;  %v687_v29 = vsub.f32 0.0, %v2119_v13 }
 0x12e   :  { %v1478_v45 = vpop.eup %1477  ;;  %1125 = vst [vmem:[%s2426_s3 + $0x158] sm:$0xff] %v1061_v26  ;;  %v1027_v48 = vsel %vm633_vm0, %v1476_v39, %v1859_v37  ;;  %1503 = vpow2.f32 %v736_v61  ;;  %v655_v61 = vsub.f32 0.0, %v2080_v38  ;;  %v2163_v52 = vadd.f32 %v1305_v3, %v1767_v40 }
 0x12f   :  { %v1480_v27 = vpop.eup %1479  ;;  %1091 = vst [vmem:[%s2426_s3 + $0x48] sm:$0xff] %v1027_v48  ;;  %v1059_v57 = vsel %vm633_vm0, %v1478_v45, %v1864_v55  ;;  %1505 = vpow2.f32 %v800_v5  ;;  %v802_v5 = vmul.f32 1.442695, %v686_v21  ;;  %v1306_v36 = vpop.f32.mrf.mxu1  ;;  %v804_v26 = vmul.f32 1.442695, %v687_v29 }
 0x130   :  { %v1482_v59 = vpop.eup %1481  ;;  %1123 = vst [vmem:[%s2426_s3 + $0x148] sm:$0xff] %v1059_v57  ;;  %v1032_v37 = vsel %vm633_vm0, %v1480_v27, %v1868_v12  ;;  %1507 = vpow2.f32 %v732_v43  ;;  %v472_v12 = vpop.f32.mrf.mxu0  ;;  %v740_v24 = vmul.f32 1.442695, %v655_v61  ;;  %v2157_v45 = vadd.f32 %v2089_v50, %v1767_v40 }
 0x131   :  { %v1484_v53 = vpop.eup %1483  ;;  %1096 = vst [vmem:[%s2426_s3 + $0x70] sm:$0xff] %v1032_v37  ;;  %v1064_v55 = vsel %vm633_vm0, %v1482_v59, %v1874_v19  ;;  %1509 = vpow2.f32 %v796_v42  ;;  %v603_v50 = vpop.f32.mrf.mxu1 }
 0x132   :  { %v1486_v63 = vpop.eup %1485  ;;  %1128 = vst [vmem:[%s2426_s3 + $0x170] sm:$0xff] %v1064_v55  ;;  %v1030_v2 = vsel %vm633_vm0, %v1484_v53, %v1884_v23  ;;  %1511 = vpow2.f32 %v742_v51  ;;  %v1274_v16 = vpop.f32.mrf.mxu0  ;;  %v660_v3 = vsub.f32 0.0, %v2157_v45 }
 0x133   :  { %v1488_v6 = vpop.eup %1487  ;;  %1094 = vst [vmem:[%s2426_s3 + $0x60] sm:$0xff] %v1030_v2  ;;  %v1062_v19 = vsel %vm633_vm0, %v1486_v63, %v1893_v44  ;;  %1513 = vpow2.f32 %v806_v30  ;;  %v2169_v30 = vadd.f32 %v1767_v40, %v472_v12  ;;  %v2176_v53 = vadd.f32 %v1274_v16, %v1767_v40 }
 0x134   :  { %v1490_v43 = vpop.eup %1489  ;;  %1126 = vst [vmem:[%s2426_s3 + $0x160] sm:$0xff] %v1062_v19  ;;  %v1033_v23 = vsel %vm633_vm0, %v1488_v6, %v1903_v49  ;;  %1515 = vpow2.f32 %v738_v58  ;;  %v475_v42 = vpop.f32.mrf.mxu0  ;;  %v692_v12 = vsub.f32 0.0, %v2163_v52  ;;  %v2180_v63 = vadd.f32 %v1306_v36, %v1767_v40 }
 0x135   :  { %v1492_v28 = vpop.eup %1491  ;;  %1097 = vst [vmem:[%s2426_s3 + $0x78] sm:$0xff] %v1033_v23  ;;  %v1065_v44 = vsel %vm633_vm0, %v1490_v43, %v1910_v41  ;;  %1517 = vpow2.f32 %v802_v5  ;;  %v658_v6 = vsub.f32 0.0, %v2169_v30  ;;  %v1309_v19 = vpop.f32.mrf.mxu1  ;;  %v750_v29 = vmul.f32 1.442695, %v660_v3 }
 0x136   :  { %v1494_v33 = vpop.eup %1493  ;;  %1129 = vst [vmem:[%s2426_s3 + $0x178] sm:$0xff] %v1065_v44  ;;  %v1031_v49 = vsel %vm633_vm0, %v1492_v28, %v1917_v46  ;;  %1519 = vpow2.f32 %v744_v1  ;;  %v1277_v37 = vpop.f32.mrf.mxu0  ;;  %v661_v16 = vsub.f32 0.0, %v2176_v53 }
 0x137   :  { %v1496_v34 = vpop.eup %1495  ;;  %1095 = vst [vmem:[%s2426_s3 + $0x68] sm:$0xff] %v1031_v49  ;;  %v844_v41 = vadd.f32 1.0, %v1494_v33  ;;  %1521 = vpow2.f32 %v808_v22  ;;  %v746_v36 = vmul.f32 1.442695, %v658_v6 }
 0x138   :  { %v1498_v35 = vpop.eup %1497  ;;  %v876_v14 = vadd.f32 1.0, %v1496_v34  ;;  %1523 = vpow2.f32 %v740_v24  ;;  %v2185_v24 = vadd.f32 %v1767_v40, %v475_v42  ;;  %v814_v34 = vmul.f32 1.442695, %v692_v12 }
 0x139   :  { %v1500_v25 = vpop.eup %1499  ;;  %1525 = vrcp.f32 %v844_v41  ;;  %v842_v39 = vadd.f32 1.0, %v1498_v35  ;;  %v693_v41 = vsub.f32 0.0, %v2180_v63 }
 0x13a   :  { %v1502_v21 = vpop.eup %1501  ;;  %1527 = vrcp.f32 %v876_v14  ;;  %v874_v46 = vadd.f32 1.0, %v1500_v25  ;;  %v2190_v25 = vadd.f32 %v1767_v40, %v603_v50 }
 0x13b   :  { %v1504_v48 = vpop.eup %1503  ;;  %v1063_v51 = vsel %vm633_vm0, %v1502_v21, %v1956_v20  ;;  %1529 = vrcp.f32 %v842_v39  ;;  %v2172_v20 = vadd.f32 %v1767_v40, %v600_v7  ;;  %v488_v7 = vpop.f32.mrf.mxu0 }
 0x13c   :  { %v1506_v27 = vpop.eup %1505  ;;  %1127 = vst [vmem:[%s2426_s3 + $0x168] sm:$0xff] %v1063_v51  ;;  %1531 = vrcp.f32 %v874_v46  ;;  %v845_v57 = vadd.f32 1.0, %v1504_v48  ;;  %v616_v39 = vpop.f32.mrf.mxu1  ;;  %v659_v46 = vsub.f32 0.0, %v2185_v24 }
 0x13d   :  { %v1508_v56 = vpop.eup %1507  ;;  %v877_v59 = vadd.f32 1.0, %v1506_v27  ;;  %1533 = vpow2.f32 %v804_v26  ;;  %v690_v23 = vsub.f32 0.0, %v2172_v20  ;;  %v1278_v48 = vpop.f32.mrf.mxu0 }
 0x13e   :  { %v1510_v58 = vpop.eup %1509  ;;  %1535 = vrcp.f32 %v845_v57  ;;  %v843_v61 = vadd.f32 1.0, %v1508_v56  ;;  %v752_v57 = vmul.f32 1.442695, %v661_v16  ;;  %v2196_v56 = vld [vmem:[%s2425_s2] ss:$0 sm:$0xff] }
 0x13f   :  { %v1512_v55 = vpop.eup %1511  ;;  %1537 = vrcp.f32 %v877_v59  ;;  %v875_v5 = vadd.f32 1.0, %v1510_v58  ;;  %v810_v21 = vmul.f32 1.442695, %v690_v23  ;;  %v2199_v40 = vadd.f32 %v2196_v56, %v1277_v37  ;;  %v491_v6 = vpop.f32.mrf.mxu0 }
 0x140   :  { %v1514_v2 = vpop.eup %1513  ;;  %1539 = vrcp.f32 %v843_v61  ;;  %v848_v1 = vadd.f32 1.0, %v1512_v55  ;;  %v816_v58 = vmul.f32 1.442695, %v693_v41  ;;  %v2205_v61 = vadd.f32 %v2196_v56, %v1309_v19 }
 0x141   :  { %v1516_v22 = vpop.eup %1515  ;;  %1541 = vrcp.f32 %v875_v5  ;;  %v880_v43 = vadd.f32 1.0, %v1514_v2  ;;  %v691_v55 = vsub.f32 0.0, %v2190_v25  ;;  %v2215_v5 = vadd.f32 %v2196_v56, %v488_v7 }
 0x142   :  { %v1518_v28 = vpop.eup %1517  ;;  %1543 = vrcp.f32 %v848_v1  ;;  %v846_v44 = vadd.f32 1.0, %v1516_v22  ;;  %v748_v1 = vmul.f32 1.442695, %v659_v46 }
 0x143   :  { %v1520_v33 = vpop.eup %1519  ;;  %1545 = vrcp.f32 %v880_v43  ;;  %v878_v49 = vadd.f32 1.0, %v1518_v28  ;;  %v664_v43 = vsub.f32 0.0, %v2199_v40  ;;  %v696_v28 = vsub.f32 0.0, %v2205_v61 }
 0x144   :  { %v1522_v35 = vpop.eup %1521  ;;  %1547 = vrcp.f32 %v846_v44  ;;  %v849_v14 = vadd.f32 1.0, %v1520_v33  ;;  %v662_v16 = vsub.f32 0.0, %v2215_v5  ;;  %v2248_v33 = vadd.f32 %v2196_v56, %v491_v6 }
 0x145   :  { %v1524_v26 = vpop.eup %1523  ;;  %1549 = vrcp.f32 %v878_v49  ;;  %v881_v42 = vadd.f32 1.0, %v1522_v35  ;;  %v812_v41 = vmul.f32 1.442695, %v691_v55 }
 0x146   :  { %v1526_v51 = vpop.eup %1525  ;;  %1551 = vrcp.f32 %v849_v14  ;;  %v847_v27 = vadd.f32 1.0, %v1524_v26 }
 0x147   :  { %v1528_v50 = vpop.eup %1527  ;;  %v1036_v59 = vsel %vm633_vm0, %v1526_v51, %v1994_v54  ;;  %1553 = vrcp.f32 %v881_v42  ;;  %v1310_v54 = vpop.f32.mrf.mxu1  ;;  %v754_v51 = vmul.f32 1.442695, %v662_v16 }
 0x148   :  { %v1530_v3 = vpop.eup %1529  ;;  %1100 = vst [vmem:[%s2426_s3 + $0x90] sm:$0xff] %v1036_v59  ;;  %v1068_v37 = vsel %vm633_vm0, %v1528_v50, %v2000_v60  ;;  %1555 = vrcp.f32 %v847_v27  ;;  %v2224_v60 = vadd.f32 %v2196_v56, %v616_v39  ;;  %v2241_v44 = vadd.f32 %v2196_v56, %v1310_v54 }
 0x149   :  { %v1532_v12 = vpop.eup %1531  ;;  %1132 = vst [vmem:[%s2426_s3 + $0x190] sm:$0xff] %v1068_v37  ;;  %v1034_v2 = vsel %vm633_vm0, %v1530_v3, %v2006_v62  ;;  %1557 = vpow2.f32 %v750_v29  ;;  %v2234_v62 = vadd.f32 %v2196_v56, %v1278_v48  ;;  %v619_v26 = vpop.f32.mrf.mxu1  ;;  %v663_v27 = vsub.f32 0.0, %v2248_v33 }
 0x14a   :  { %v1534_v19 = vpop.eup %1533  ;;  %1098 = vst [vmem:[%s2426_s3 + $0x80] sm:$0xff] %v1034_v2  ;;  %v1066_v22 = vsel %vm633_vm0, %v1532_v12, %v2009_v31  ;;  %1559 = vpow2.f32 %v814_v34  ;;  %v694_v35 = vsub.f32 0.0, %v2224_v60  ;;  %v697_v46 = vsub.f32 0.0, %v2241_v44 }
 0x14b   :  { %v1536_v23 = vpop.eup %1535  ;;  %1130 = vst [vmem:[%s2426_s3 + $0x180] sm:$0xff] %v1066_v22  ;;  %v879_v7 = vadd.f32 1.0, %v1534_v19  ;;  %1561 = vpow2.f32 %v746_v36  ;;  %v758_v36 = vmul.f32 1.442695, %v664_v43  ;;  %v665_v39 = vsub.f32 0.0, %v2234_v62 }
 0x14c   :  { %v1538_v29 = vpop.eup %1537  ;;  %v1037_v31 = vsel %vm633_vm0, %v1536_v23, %v2013_v11  ;;  %1563 = vpow2.f32 %v810_v21  ;;  %v822_v21 = vmul.f32 1.442695, %v696_v28  ;;  %v818_v50 = vmul.f32 1.442695, %v694_v35 }
 0x14d   :  { %v1540_v49 = vpop.eup %1539  ;;  %1101 = vst [vmem:[%s2426_s3 + $0x98] sm:$0xff] %v1037_v31  ;;  %v1069_v34 = vsel %vm633_vm0, %v1538_v29, %v2017_v15  ;;  %1565 = vrcp.f32 %v879_v7  ;;  %v2285_v59 = vadd.f32 %v2196_v56, %v619_v26  ;;  %v760_v3 = vmul.f32 1.442695, %v665_v39 }
 0x14e   :  { %v1542_v11 = vpop.eup %1541  ;;  %1133 = vst [vmem:[%s2426_s3 + $0x198] sm:$0xff] %v1069_v34  ;;  %v1035_v14 = vsel %vm633_vm0, %v1540_v49, %v2022_v32  ;;  %1567 = vpow2.f32 %v752_v57  ;;  %v824_v56 = vmul.f32 1.442695, %v697_v46  ;;  %v756_v54 = vmul.f32 1.442695, %v663_v27 }
 0x14f   :  { %v1544_v42 = vpop.eup %1543  ;;  %1099 = vst [vmem:[%s2426_s3 + $0x88] sm:$0xff] %v1035_v14  ;;  %v1067_v15 = vsel %vm633_vm0, %v1542_v11, %v2027_v47  ;;  %1569 = vpow2.f32 %v816_v58  ;;  %v695_v2 = vsub.f32 0.0, %v2285_v59 }
 0x150   :  { %v1546_v48 = vpop.eup %1545  ;;  %1131 = vst [vmem:[%s2426_s3 + $0x188] sm:$0xff] %v1067_v15  ;;  %v1040_v32 = vsel %vm633_vm0, %v1544_v42, %v2031_v0  ;;  %1571 = vpow2.f32 %v748_v1 }
 0x151   :  { %v1548_v57 = vpop.eup %1547  ;;  %1104 = vst [vmem:[%s2426_s3 + $0xb0] sm:$0xff] %v1040_v32  ;;  %v1072_v47 = vsel %vm633_vm0, %v1546_v48, %v2037_v9  ;;  %1573 = vpow2.f32 %v812_v41  ;;  %v820_v7 = vmul.f32 1.442695, %v695_v2 }
 0x152   :  { %v1550_v58 = vpop.eup %1549  ;;  %1136 = vst [vmem:[%s2426_s3 + $0x1b0] sm:$0xff] %v1072_v47  ;;  %v1038_v0 = vsel %vm633_vm0, %v1548_v57, %v2047_v17  ;;  %1575 = vpow2.f32 %v758_v36 }
 0x153   :  { %v1552_v37 = vpop.eup %1551  ;;  %1102 = vst [vmem:[%s2426_s3 + $0xa0] sm:$0xff] %v1038_v0  ;;  %v1070_v9 = vsel %vm633_vm0, %v1550_v58, %v2056_v4  ;;  %1577 = vpow2.f32 %v822_v21 }
 0x154   :  { %v1554_v55 = vpop.eup %1553  ;;  %1134 = vst [vmem:[%s2426_s3 + $0x1a0] sm:$0xff] %v1070_v9  ;;  %v1041_v17 = vsel %vm633_vm0, %v1552_v37, %v2066_v10  ;;  %1579 = vpow2.f32 %v754_v51 }
 0x155   :  { %v1556_v12 = vpop.eup %1555  ;;  %1105 = vst [vmem:[%s2426_s3 + $0xb8] sm:$0xff] %v1041_v17  ;;  %v1073_v4 = vsel %vm633_vm0, %v1554_v55, %v2073_v18  ;;  %1581 = vpow2.f32 %v818_v50 }
 0x156   :  { %v1558_v1 = vpop.eup %1557  ;;  %1137 = vst [vmem:[%s2426_s3 + $0x1b8] sm:$0xff] %v1073_v4  ;;  %v1039_v10 = vsel %vm633_vm0, %v1556_v12, %v2080_v38  ;;  %1583 = vpow2.f32 %v760_v3 }
 0x157   :  { %v1560_v6 = vpop.eup %1559  ;;  %1103 = vst [vmem:[%s2426_s3 + $0xa8] sm:$0xff] %v1039_v10  ;;  %v852_v19 = vadd.f32 1.0, %v1558_v1  ;;  %1585 = vpow2.f32 %v824_v56 }
 0x158   :  { %v1562_v18 = vpop.eup %1561  ;;  %v884_v22 = vadd.f32 1.0, %v1560_v6  ;;  %1587 = vpow2.f32 %v756_v54 }
 0x159   :  { %v1564_v43 = vpop.eup %1563  ;;  %1589 = vrcp.f32 %v852_v19  ;;  %v850_v23 = vadd.f32 1.0, %v1562_v18 }
 0x15a   :  { %v1566_v28 = vpop.eup %1565  ;;  %1591 = vrcp.f32 %v884_v22  ;;  %v882_v29 = vadd.f32 1.0, %v1564_v43 }
 0x15b   :  { %v1568_v31 = vpop.eup %1567  ;;  %v1071_v38 = vsel %vm633_vm0, %v1566_v28, %v2119_v13  ;;  %1593 = vrcp.f32 %v850_v23 }
 0x15c   :  { %v1570_v16 = vpop.eup %1569  ;;  %1135 = vst [vmem:[%s2426_s3 + $0x1a8] sm:$0xff] %v1071_v38  ;;  %1595 = vrcp.f32 %v882_v29  ;;  %v853_v49 = vadd.f32 1.0, %v1568_v31 }
 0x15d   :  { %v1572_v34 = vpop.eup %1571  ;;  %v885_v41 = vadd.f32 1.0, %v1570_v16  ;;  %1597 = vpow2.f32 %v820_v7 }
 0x15e   :  { %v1574_v35 = vpop.eup %1573  ;;  %1599 = vrcp.f32 %v853_v49  ;;  %v851_v11 = vadd.f32 1.0, %v1572_v34 }
 0x15f   :  { %v1576_v14 = vpop.eup %1575  ;;  %1601 = vrcp.f32 %v885_v41  ;;  %v883_v36 = vadd.f32 1.0, %v1574_v35 }
 0x160   :  { %v1578_v39 = vpop.eup %1577  ;;  %1603 = vrcp.f32 %v851_v11  ;;  %v856_v13 = vadd.f32 1.0, %v1576_v14 }
 0x161   :  { %v1580_v26 = vpop.eup %1579  ;;  %1605 = vrcp.f32 %v883_v36  ;;  %v888_v42 = vadd.f32 1.0, %v1578_v39 }
 0x162   :  { %v1582_v15 = vpop.eup %1581  ;;  %1607 = vrcp.f32 %v856_v13  ;;  %v854_v21 = vadd.f32 1.0, %v1580_v26 }
 0x163   :  { %v1584_v46 = vpop.eup %1583  ;;  %1609 = vrcp.f32 %v888_v42  ;;  %v886_v48 = vadd.f32 1.0, %v1582_v15 }
 0x164   :  { %v1586_v32 = vpop.eup %1585  ;;  %1611 = vrcp.f32 %v854_v21  ;;  %v857_v51 = vadd.f32 1.0, %v1584_v46 }
 0x165   :  { %v1588_v27 = vpop.eup %1587  ;;  %1613 = vrcp.f32 %v886_v48  ;;  %v889_v57 = vadd.f32 1.0, %v1586_v32 }
 0x166   :  { %v1590_v47 = vpop.eup %1589  ;;  %1615 = vrcp.f32 %v857_v51  ;;  %v855_v50 = vadd.f32 1.0, %v1588_v27 }
 0x167   :  { %v1592_v58 = vpop.eup %1591  ;;  %v1044_v0 = vsel %vm633_vm0, %v1590_v47, %v2157_v45  ;;  %1617 = vrcp.f32 %v889_v57 }
 0x168   :  { %v1594_v3 = vpop.eup %1593  ;;  %1108 = vst [vmem:[%s2426_s3 + $0xd0] sm:$0xff] %v1044_v0  ;;  %v1076_v37 = vsel %vm633_vm0, %v1592_v58, %v2163_v52  ;;  %1619 = vrcp.f32 %v855_v50 }
 0x169   :  { %v1596_v9 = vpop.eup %1595  ;;  %1140 = vst [vmem:[%s2426_s3 + $0x1d0] sm:$0xff] %v1076_v37  ;;  %v1042_v45 = vsel %vm633_vm0, %v1594_v3, %v2169_v30 }
 0x16a   :  { %v1598_v56 = vpop.eup %1597  ;;  %1106 = vst [vmem:[%s2426_s3 + $0xc0] sm:$0xff] %v1042_v45  ;;  %v1074_v55 = vsel %vm633_vm0, %v1596_v9, %v2172_v20 }
 0x16b   :  { %v1600_v52 = vpop.eup %1599  ;;  %1138 = vst [vmem:[%s2426_s3 + $0x1c0] sm:$0xff] %v1074_v55  ;;  %v887_v17 = vadd.f32 1.0, %v1598_v56 }
 0x16c   :  { %v1602_v54 = vpop.eup %1601  ;;  %v1045_v30 = vsel %vm633_vm0, %v1600_v52, %v2176_v53 }
 0x16d   :  { %v1604_v12 = vpop.eup %1603  ;;  %1109 = vst [vmem:[%s2426_s3 + $0xd8] sm:$0xff] %v1045_v30  ;;  %v1077_v20 = vsel %vm633_vm0, %v1602_v54, %v2180_v63  ;;  %1621 = vrcp.f32 %v887_v17 }
 0x16e   :  { %v1606_v4 = vpop.eup %1605  ;;  %1141 = vst [vmem:[%s2426_s3 + $0x1d8] sm:$0xff] %v1077_v20  ;;  %v1043_v2 = vsel %vm633_vm0, %v1604_v12, %v2185_v24 }
 0x16f   :  { %v1608_v53 = vpop.eup %1607  ;;  %1107 = vst [vmem:[%s2426_s3 + $0xc8] sm:$0xff] %v1043_v2  ;;  %v1075_v1 = vsel %vm633_vm0, %v1606_v4, %v2190_v25 }
 0x170   :  { %v1610_v63 = vpop.eup %1609  ;;  %1139 = vst [vmem:[%s2426_s3 + $0x1c8] sm:$0xff] %v1075_v1  ;;  %v1048_v10 = vsel %vm633_vm0, %v1608_v53, %v2199_v40 }
 0x171   :  { %v1612_v6 = vpop.eup %1611  ;;  %1112 = vst [vmem:[%s2426_s3 + $0xf0] sm:$0xff] %v1048_v10  ;;  %v1080_v24 = vsel %vm633_vm0, %v1610_v63, %v2205_v61 }
 0x172   :  { %v1614_v19 = vpop.eup %1613  ;;  %1144 = vst [vmem:[%s2426_s3 + $0x1f0] sm:$0xff] %v1080_v24  ;;  %v1046_v25 = vsel %vm633_vm0, %v1612_v6, %v2215_v5 }
 0x173   :  { %v1616_v18 = vpop.eup %1615  ;;  %1110 = vst [vmem:[%s2426_s3 + $0xe0] sm:$0xff] %v1046_v25  ;;  %v1078_v40 = vsel %vm633_vm0, %v1614_v19, %v2224_v60 }
 0x174   :  { %v1618_v22 = vpop.eup %1617  ;;  %1142 = vst [vmem:[%s2426_s3 + $0x1e0] sm:$0xff] %v1078_v40  ;;  %v1049_v61 = vsel %vm633_vm0, %v1616_v18, %v2234_v62 }
 0x175   :  { %v1620_v43 = vpop.eup %1619  ;;  %1113 = vst [vmem:[%s2426_s3 + $0xf8] sm:$0xff] %v1049_v61  ;;  %v1081_v5 = vsel %vm633_vm0, %v1618_v22, %v2241_v44 }
 0x176   :  { %1145 = vst [vmem:[%s2426_s3 + $0x1f8] sm:$0xff] %v1081_v5  ;;  %v1047_v60 = vsel %vm633_vm0, %v1620_v43, %v2248_v33 }
 0x177   :  { %1111 = vst [vmem:[%s2426_s3 + $0xe8] sm:$0xff] %v1047_v60 }
 0x17a   :  { %v1622_v62 = vpop.eup %1621 }
 0x17b   :  { %v1079_v23 = vsel %vm633_vm0, %v1622_v62, %v2285_v59 }
 0x17c   :  { %1143 = vst [vmem:[%s2426_s3 + $0x1e8] sm:$0xff] %v1079_v23 }

// kernel: unet_forward.36
= control target key start
LH: loop header
LB: loop body
LE: loop exit
PB: predicated region body
PF: predicated region fallthrough
CT: control target
= control target key end

     0   :  { %v2718_v0 = vmov 0   ;;  %s3412_s1 = inlined_call_operand.vmem [shape: bf16[512,128], index: 1, kind: input, shape index: {}]   ;;  %s3413_s0 = inlined_call_operand.vmem [shape: bf16[512,512], index: 0, kind: input, shape index: {}]   ;;  %s3414_s2 = inlined_call_operand.vmem [shape: f32[1,128], index: 2, kind: input, shape index: {}]   ;;  %s3415_s3 = inlined_call_operand.vmem [shape: bf16[512,128], index: 3, kind: output, shape index: {}]  }
   0x1   :  { %1046 = vmatprep.subr.bf16.mxu0 %v2718_v0  ;;  %1335 = vmatprep.subr.bf16.mxu1 %v2718_v0  ;;  %v2493_v1 = vld [vmem:[%s3412_s1 + $0x38] sm:$0xff]   ;;  %v2495_v3 = vld [vmem:[%s3412_s1 + $0x30] sm:$0xff]   ;;  %v2497_v5 = vld [vmem:[%s3412_s1 + $0x28] sm:$0xff]  }
   0x2   :  { %v2494_v2 = vld [vmem:[%s3412_s1 + $0xb8] sm:$0xff]   ;;  %1047 = vmatpush1.bf16.msra.mxu0 %v2493_v1  ;;  %v2496_v4 = vld [vmem:[%s3412_s1 + $0xb0] sm:$0xff]   ;;  %v2498_v6 = vld [vmem:[%s3412_s1 + $0xa8] sm:$0xff]  }
   0x3   :  { %1336 = vmatpush1.bf16.msra.mxu1 %v2494_v2  ;;  %1048 = vmatprep.subr.bf16.mxu0 %v2718_v0  ;;  %v2499_v7 = vld [vmem:[%s3412_s1 + $0x20] sm:$0xff]   ;;  %v2501_v9 = vld [vmem:[%s3412_s1 + $0x18] sm:$0xff]   ;;  %v2503_v11 = vld [vmem:[%s3412_s1 + $0x10] sm:$0xff]  }
   0x4   :  { %1337 = vmatprep.subr.bf16.mxu1 %v2718_v0  ;;  %v2500_v8 = vld [vmem:[%s3412_s1 + $0xa0] sm:$0xff]   ;;  %v2502_v10 = vld [vmem:[%s3412_s1 + $0x98] sm:$0xff]   ;;  %v2504_v12 = vld [vmem:[%s3412_s1 + $0x90] sm:$0xff]  }
   0x5   :  { %v2505_v13 = vld [vmem:[%s3412_s1 + $0x8] sm:$0xff]   ;;  %v2507_v15 = vld [vmem:[%s3412_s1] sm:$0xff]   ;;  %v2509_v17 = vld [vmem:[%s3412_s1 + $0x78] sm:$0xff]  }
   0x6   :  { %1049 = vmatpush1.bf16.msra.mxu0 %v2495_v3  ;;  %v2506_v14 = vld [vmem:[%s3412_s1 + $0x88] sm:$0xff]   ;;  %v2508_v16 = vld [vmem:[%s3412_s1 + $0x80] sm:$0xff]   ;;  %v2510_v18 = vld [vmem:[%s3412_s1 + $0xf8] sm:$0xff]  }
   0x7   :  { %1338 = vmatpush1.bf16.msra.mxu1 %v2496_v4  ;;  %1050 = vmatprep.subr.bf16.mxu0 %v2718_v0  ;;  %v2527_v19 = vld [vmem:[%s3413_s0 + $0x4] ss:$16 sps:$4 sm:$0xff]   ;;  %v2530_v21 = vld [vmem:[%s3413_s0 + $0xc] ss:$16 sps:$4 sm:$0xff]   ;;  %v2525_v35 = vld [vmem:[%s3413_s0] ss:$16 sps:$4 sm:$0xff]  }
   0x8   :  { %1339 = vmatprep.subr.bf16.mxu1 %v2718_v0  ;;  %v2511_v20 = vld [vmem:[%s3412_s1 + $0x70] sm:$0xff]   ;;  %1078 = vmatprep.mubr.bf16.mxu0 %v2527_v19  ;;  %v2513_v23 = vld [vmem:[%s3412_s1 + $0x68] sm:$0xff]   ;;  %v2515_v25 = vld [vmem:[%s3412_s1 + $0x60] sm:$0xff]  }
   0x9   :  { %v2512_v22 = vld [vmem:[%s3412_s1 + $0xf0] sm:$0xff]   ;;  %1367 = vmatprep.mubr.bf16.mxu1 %v2530_v21  ;;  %v2514_v24 = vld [vmem:[%s3412_s1 + $0xe8] sm:$0xff]   ;;  %v2516_v26 = vld [vmem:[%s3412_s1 + $0xe0] sm:$0xff]  }
   0xa   :  { %1051 = vmatpush1.bf16.msra.mxu0 %v2497_v5  ;;  %v2517_v27 = vld [vmem:[%s3412_s1 + $0x58] sm:$0xff]   ;;  %v2519_v29 = vld [vmem:[%s3412_s1 + $0x50] sm:$0xff]   ;;  %v2521_v31 = vld [vmem:[%s3412_s1 + $0x48] sm:$0xff]  }
   0xb   :  { %1340 = vmatpush1.bf16.msra.mxu1 %v2498_v6  ;;  %1052 = vmatprep.subr.bf16.mxu0 %v2718_v0  ;;  %v2518_v28 = vld [vmem:[%s3412_s1 + $0xd8] sm:$0xff]   ;;  %v2520_v30 = vld [vmem:[%s3412_s1 + $0xd0] sm:$0xff]   ;;  %v2522_v32 = vld [vmem:[%s3412_s1 + $0xc8] sm:$0xff]  }
   0xc   :  { %1341 = vmatprep.subr.bf16.mxu1 %v2718_v0  ;;  %v2523_v33 = vld [vmem:[%s3412_s1 + $0x40] sm:$0xff]   ;;  %v2528_v36 = vld [vmem:[%s3413_s0 + $0x8] ss:$16 sps:$4 sm:$0xff]   ;;  %v2533_v38 = vld [vmem:[%s3413_s0 + $0x2c] ss:$16 sps:$4 sm:$0xff]  }
   0xd   :  { %v2524_v34 = vld [vmem:[%s3412_s1 + $0xc0] sm:$0xff]   ;;  %v2536_v40 = vld [vmem:[%s3413_s0 + $0x28] ss:$16 sps:$4 sm:$0xff]   ;;  %v2539_v42 = vld [vmem:[%s3413_s0 + $0x4c] ss:$16 sps:$4 sm:$0xff]  }
   0xe   :  { %1053 = vmatpush1.bf16.msra.mxu0 %v2499_v7  ;;  %v2531_v37 = vld [vmem:[%s3413_s0 + $0x24] ss:$16 sps:$4 sm:$0xff]   ;;  %v2535_v39 = vld [vmem:[%s3413_s0 + $0x20] ss:$16 sps:$4 sm:$0xff]   ;;  %v2542_v44 = vld [vmem:[%s3413_s0 + $0x48] ss:$16 sps:$4 sm:$0xff]  }
   0xf   :  { %1342 = vmatpush1.bf16.msra.mxu1 %v2500_v8  ;;  %1054 = vmatprep.subr.bf16.mxu0 %v2718_v0  ;;  %v2537_v41 = vld [vmem:[%s3413_s0 + $0x44] ss:$16 sps:$4 sm:$0xff]   ;;  %v2541_v43 = vld [vmem:[%s3413_s0 + $0x40] ss:$16 sps:$4 sm:$0xff]   ;;  %v2545_v46 = vld [vmem:[%s3413_s0 + $0x6c] ss:$16 sps:$4 sm:$0xff]  }
  0x10   :  { %1343 = vmatprep.subr.bf16.mxu1 %v2718_v0  ;;  %v2543_v45 = vld [vmem:[%s3413_s0 + $0x64] ss:$16 sps:$4 sm:$0xff]   ;;  %v2547_v47 = vld [vmem:[%s3413_s0 + $0x60] ss:$16 sps:$4 sm:$0xff]   ;;  %v2548_v48 = vld [vmem:[%s3413_s0 + $0x68] ss:$16 sps:$4 sm:$0xff]  }
  0x11   :  { %v2549_v49 = vld [vmem:[%s3413_s0 + $0x84] ss:$16 sps:$4 sm:$0xff]   ;;  %v2551_v50 = vld [vmem:[%s3413_s0 + $0x8c] ss:$16 sps:$4 sm:$0xff]   ;;  %v2553_v51 = vld [vmem:[%s3413_s0 + $0x80] ss:$16 sps:$4 sm:$0xff]  }
  0x12   :  { %1055 = vmatpush1.bf16.msra.mxu0 %v2501_v9  ;;  %v2554_v52 = vld [vmem:[%s3413_s0 + $0x88] ss:$16 sps:$4 sm:$0xff]   ;;  %v2555_v53 = vld [vmem:[%s3413_s0 + $0xa4] ss:$16 sps:$4 sm:$0xff]   ;;  %v2557_v54 = vld [vmem:[%s3413_s0 + $0xac] ss:$16 sps:$4 sm:$0xff]  }
  0x13   :  { %1344 = vmatpush1.bf16.msra.mxu1 %v2502_v10  ;;  %1056 = vmatprep.subr.bf16.mxu0 %v2718_v0  ;;  %v2559_v55 = vld [vmem:[%s3413_s0 + $0xa0] ss:$16 sps:$4 sm:$0xff]   ;;  %v2560_v56 = vld [vmem:[%s3413_s0 + $0xa8] ss:$16 sps:$4 sm:$0xff]   ;;  %v2561_v57 = vld [vmem:[%s3413_s0 + $0xc4] ss:$16 sps:$4 sm:$0xff]  }
  0x14   :  { %1345 = vmatprep.subr.bf16.mxu1 %v2718_v0  ;;  %v2563_v58 = vld [vmem:[%s3413_s0 + $0xcc] ss:$16 sps:$4 sm:$0xff]   ;;  %v2565_v59 = vld [vmem:[%s3413_s0 + $0xc0] ss:$16 sps:$4 sm:$0xff]   ;;  %v2566_v60 = vld [vmem:[%s3413_s0 + $0xc8] ss:$16 sps:$4 sm:$0xff]  }
  0x15   :  { %v2567_v61 = vld [vmem:[%s3413_s0 + $0xe4] ss:$16 sps:$4 sm:$0xff]   ;;  %v2569_v62 = vld [vmem:[%s3413_s0 + $0xec] ss:$16 sps:$4 sm:$0xff]   ;;  %v2571_v63 = vld [vmem:[%s3413_s0 + $0xe0] ss:$16 sps:$4 sm:$0xff]  }
  0x16   :  { %1057 = vmatpush1.bf16.msra.mxu0 %v2503_v11  ;;  %v2573_v1 = vld [vmem:[%s3413_s0 + $0x104] ss:$16 sps:$4 sm:$0xff]   ;;  %v2575_v2 = vld [vmem:[%s3413_s0 + $0x10c] ss:$16 sps:$4 sm:$0xff]   ;;  %v2577_v3 = vld [vmem:[%s3413_s0 + $0x100] ss:$16 sps:$4 sm:$0xff]  }
  0x17   :  { %1346 = vmatpush1.bf16.msra.mxu1 %v2504_v12  ;;  %1058 = vmatprep.subr.bf16.mxu0 %v2718_v0  ;;  %v2578_v4 = vld [vmem:[%s3413_s0 + $0x108] ss:$16 sps:$4 sm:$0xff]   ;;  %v2579_v5 = vld [vmem:[%s3413_s0 + $0x124] ss:$16 sps:$4 sm:$0xff]   ;;  %v2581_v6 = vld [vmem:[%s3413_s0 + $0x12c] ss:$16 sps:$4 sm:$0xff]  }
  0x18   :  { %1347 = vmatprep.subr.bf16.mxu1 %v2718_v0  ;;  %v2583_v7 = vld [vmem:[%s3413_s0 + $0x120] ss:$16 sps:$4 sm:$0xff]   ;;  %v2584_v8 = vld [vmem:[%s3413_s0 + $0x128] ss:$16 sps:$4 sm:$0xff]   ;;  %v2585_v9 = vld [vmem:[%s3413_s0 + $0x144] ss:$16 sps:$4 sm:$0xff]  }
  0x19   :  { %v2587_v10 = vld [vmem:[%s3413_s0 + $0x14c] ss:$16 sps:$4 sm:$0xff]   ;;  %v2589_v11 = vld [vmem:[%s3413_s0 + $0x140] ss:$16 sps:$4 sm:$0xff]   ;;  %v2590_v12 = vld [vmem:[%s3413_s0 + $0x148] ss:$16 sps:$4 sm:$0xff]  }
  0x1a   :  { %1059 = vmatpush1.bf16.msra.mxu0 %v2505_v13  ;;  %v2591_v13 = vld [vmem:[%s3413_s0 + $0x164] ss:$16 sps:$4 sm:$0xff]   ;;  %v2601_v19 = vld [vmem:[%s3413_s0 + $0x180] ss:$16 sps:$4 sm:$0xff]  }
  0x1b   :  { %1348 = vmatpush1.bf16.msra.mxu1 %v2506_v14  ;;  %1060 = vmatprep.subr.bf16.mxu0 %v2718_v0  ;;  %v2593_v14 = vld [vmem:[%s3413_s0 + $0x16c] ss:$16 sps:$4 sm:$0xff]   ;;  %v2603_v21 = vld [vmem:[%s3413_s0 + $0x1a4] ss:$16 sps:$4 sm:$0xff]  }
  0x1c   :  { %1349 = vmatprep.subr.bf16.mxu1 %v2718_v0 }
  0x1e   :  { %1061 = vmatpush1.bf16.msra.mxu0 %v2507_v15  ;;  %v2595_v15 = vld [vmem:[%s3413_s0 + $0x160] ss:$16 sps:$4 sm:$0xff]  }
  0x1f   :  { %1350 = vmatpush1.bf16.msra.mxu1 %v2508_v16  ;;  %1062 = vmatprep.subr.bf16.mxu0 %v2718_v0  ;;  %v2596_v16 = vld [vmem:[%s3413_s0 + $0x168] ss:$16 sps:$4 sm:$0xff]  }
  0x20   :  { %1351 = vmatprep.subr.bf16.mxu1 %v2718_v0 }
  0x22   :  { %1063 = vmatpush2.bf16.msra.mxu0 %v2509_v17  ;;  %v2597_v17 = vld [vmem:[%s3413_s0 + $0x184] ss:$16 sps:$4 sm:$0xff]  }
  0x23   :  { %1352 = vmatpush2.bf16.msra.mxu1 %v2510_v18  ;;  %1064 = vmatprep.subr.bf16.mxu0 %v2718_v0  ;;  %v2599_v18 = vld [vmem:[%s3413_s0 + $0x18c] ss:$16 sps:$4 sm:$0xff]  }
  0x24   :  { %1353 = vmatprep.subr.bf16.mxu1 %v2718_v0 }
  0x26   :  { %1065 = vmatpush2.bf16.msra.mxu0 %v2511_v20  ;;  %v2602_v20 = vld [vmem:[%s3413_s0 + $0x188] ss:$16 sps:$4 sm:$0xff]  }
  0x27   :  { %1354 = vmatpush2.bf16.msra.mxu1 %v2512_v22  ;;  %1066 = vmatprep.subr.bf16.mxu0 %v2718_v0  ;;  %v2605_v22 = vld [vmem:[%s3413_s0 + $0x1ac] ss:$16 sps:$4 sm:$0xff]  }
  0x28   :  { %1355 = vmatprep.subr.bf16.mxu1 %v2718_v0 }
  0x2a   :  { %1067 = vmatpush2.bf16.msra.mxu0 %v2513_v23  ;;  %v2607_v23 = vld [vmem:[%s3413_s0 + $0x1a0] ss:$16 sps:$4 sm:$0xff]  }
  0x2b   :  { %1356 = vmatpush2.bf16.msra.mxu1 %v2514_v24  ;;  %1068 = vmatprep.subr.bf16.mxu0 %v2718_v0  ;;  %v2608_v24 = vld [vmem:[%s3413_s0 + $0x1a8] ss:$16 sps:$4 sm:$0xff]  }
  0x2c   :  { %1357 = vmatprep.subr.bf16.mxu1 %v2718_v0 }
  0x2e   :  { %1069 = vmatpush2.bf16.msra.mxu0 %v2515_v25  ;;  %v2609_v25 = vld [vmem:[%s3413_s0 + $0x1c4] ss:$16 sps:$4 sm:$0xff]  }
  0x2f   :  { %1358 = vmatpush2.bf16.msra.mxu1 %v2516_v26  ;;  %1070 = vmatprep.subr.bf16.mxu0 %v2718_v0  ;;  %v2611_v26 = vld [vmem:[%s3413_s0 + $0x1cc] ss:$16 sps:$4 sm:$0xff]  }
  0x30   :  { %1359 = vmatprep.subr.bf16.mxu1 %v2718_v0 }
  0x32   :  { %1071 = vmatpush2.bf16.msra.mxu0 %v2517_v27  ;;  %v2613_v27 = vld [vmem:[%s3413_s0 + $0x1c0] ss:$16 sps:$4 sm:$0xff]  }
  0x33   :  { %1360 = vmatpush2.bf16.msra.mxu1 %v2518_v28  ;;  %1072 = vmatprep.subr.bf16.mxu0 %v2718_v0  ;;  %v2614_v28 = vld [vmem:[%s3413_s0 + $0x1c8] ss:$16 sps:$4 sm:$0xff]  }
  0x34   :  { %1361 = vmatprep.subr.bf16.mxu1 %v2718_v0 }
  0x36   :  { %1073 = vmatpush2.bf16.msra.mxu0 %v2519_v29  ;;  %v2615_v29 = vld [vmem:[%s3413_s0 + $0x1e4] ss:$16 sps:$4 sm:$0xff]  }
  0x37   :  { %1362 = vmatpush2.bf16.msra.mxu1 %v2520_v30  ;;  %1074 = vmatprep.subr.bf16.mxu0 %v2718_v0  ;;  %v2617_v30 = vld [vmem:[%s3413_s0 + $0x1ec] ss:$16 sps:$4 sm:$0xff]  }
  0x38   :  { %1363 = vmatprep.subr.bf16.mxu1 %v2718_v0 }
  0x3a   :  { %1075 = vmatpush2.bf16.msra.mxu0 %v2521_v31  ;;  %v2619_v31 = vld [vmem:[%s3413_s0 + $0x1e0] ss:$16 sps:$4 sm:$0xff]  }
  0x3b   :  { %1364 = vmatpush2.bf16.msra.mxu1 %v2522_v32  ;;  %1076 = vmatprep.subr.bf16.mxu0 %v2718_v0  ;;  %v2620_v32 = vld [vmem:[%s3413_s0 + $0x1e8] ss:$16 sps:$4 sm:$0xff]  }
  0x3c   :  { %1365 = vmatprep.subr.bf16.mxu1 %v2718_v0  ;;  %v2572_v0 = vld [vmem:[%s3413_s0 + $0xe8] ss:$16 sps:$4 sm:$0xff]  }
  0x3e   :  { %1077 = vmatpush2.bf16.msra.mxu0 %v2523_v33  ;;  %v2621_v33 = vld [vmem:[%s3413_s0 + $0x204] ss:$16 sps:$4 sm:$0xff]  }
  0x3f   :  { %1366 = vmatpush2.bf16.msra.mxu1 %v2524_v34  ;;  %v2623_v34 = vld [vmem:[%s3413_s0 + $0x20c] ss:$16 sps:$4 sm:$0xff]  }
  0x41   :  { %1079 = vmatmul.mubr.bf16.vlgmr.msra.gmra.mxu0 %v2525_v35  ;;  %v2625_v35 = vld [vmem:[%s3413_s0 + $0x200] ss:$16 sps:$4 sm:$0xff]  }
  0x42   :  { %1368 = vmatmul.mubr.bf16.vlgmr.msra.gmra.mxu1 %v2528_v36  ;;  %1086 = vmatprep.mubr.bf16.mxu0 %v2531_v37  ;;  %v2626_v36 = vld [vmem:[%s3413_s0 + $0x208] ss:$16 sps:$4 sm:$0xff]   ;;  %v2627_v37 = vld [vmem:[%s3413_s0 + $0x224] ss:$16 sps:$4 sm:$0xff]  }
  0x43   :  { %1375 = vmatprep.mubr.bf16.mxu1 %v2533_v38  ;;  %v2629_v38 = vld [vmem:[%s3413_s0 + $0x22c] ss:$16 sps:$4 sm:$0xff]  }
  0x49   :  { %1087 = vmatmul.mubr.bf16.gmra.mxu0 %v2535_v39  ;;  %v2631_v39 = vld [vmem:[%s3413_s0 + $0x220] ss:$16 sps:$4 sm:$0xff]  }
  0x4a   :  { %1376 = vmatmul.mubr.bf16.gmra.mxu1 %v2536_v40  ;;  %1094 = vmatprep.mubr.bf16.mxu0 %v2537_v41  ;;  %v2632_v40 = vld [vmem:[%s3413_s0 + $0x228] ss:$16 sps:$4 sm:$0xff]   ;;  %v2633_v41 = vld [vmem:[%s3413_s0 + $0x244] ss:$16 sps:$4 sm:$0xff]  }
  0x4b   :  { %1383 = vmatprep.mubr.bf16.mxu1 %v2539_v42  ;;  %v2635_v42 = vld [vmem:[%s3413_s0 + $0x24c] ss:$16 sps:$4 sm:$0xff]  }
  0x51   :  { %1095 = vmatmul.mubr.bf16.gmra.mxu0 %v2541_v43  ;;  %v2637_v43 = vld [vmem:[%s3413_s0 + $0x240] ss:$16 sps:$4 sm:$0xff]  }
  0x52   :  { %1384 = vmatmul.mubr.bf16.gmra.mxu1 %v2542_v44  ;;  %1102 = vmatprep.mubr.bf16.mxu0 %v2543_v45  ;;  %v2638_v44 = vld [vmem:[%s3413_s0 + $0x248] ss:$16 sps:$4 sm:$0xff]   ;;  %v2639_v45 = vld [vmem:[%s3413_s0 + $0x264] ss:$16 sps:$4 sm:$0xff]  }
  0x53   :  { %1391 = vmatprep.mubr.bf16.mxu1 %v2545_v46  ;;  %v2641_v46 = vld [vmem:[%s3413_s0 + $0x26c] ss:$16 sps:$4 sm:$0xff]  }
  0x59   :  { %1103 = vmatmul.mubr.bf16.gmra.mxu0 %v2547_v47  ;;  %v2643_v47 = vld [vmem:[%s3413_s0 + $0x260] ss:$16 sps:$4 sm:$0xff]  }
  0x5a   :  { %1392 = vmatmul.mubr.bf16.gmra.mxu1 %v2548_v48  ;;  %1110 = vmatprep.mubr.bf16.mxu0 %v2549_v49  ;;  %v2644_v48 = vld [vmem:[%s3413_s0 + $0x268] ss:$16 sps:$4 sm:$0xff]   ;;  %v2645_v49 = vld [vmem:[%s3413_s0 + $0x284] ss:$16 sps:$4 sm:$0xff]  }
  0x5b   :  { %1399 = vmatprep.mubr.bf16.mxu1 %v2551_v50  ;;  %v2647_v50 = vld [vmem:[%s3413_s0 + $0x28c] ss:$16 sps:$4 sm:$0xff]  }
  0x61   :  { %1111 = vmatmul.mubr.bf16.gmra.mxu0 %v2553_v51  ;;  %v2649_v51 = vld [vmem:[%s3413_s0 + $0x280] ss:$16 sps:$4 sm:$0xff]  }
  0x62   :  { %1400 = vmatmul.mubr.bf16.gmra.mxu1 %v2554_v52  ;;  %1118 = vmatprep.mubr.bf16.mxu0 %v2555_v53  ;;  %v2650_v52 = vld [vmem:[%s3413_s0 + $0x288] ss:$16 sps:$4 sm:$0xff]   ;;  %v2651_v53 = vld [vmem:[%s3413_s0 + $0x2a4] ss:$16 sps:$4 sm:$0xff]  }
  0x63   :  { %1407 = vmatprep.mubr.bf16.mxu1 %v2557_v54  ;;  %v2653_v54 = vld [vmem:[%s3413_s0 + $0x2ac] ss:$16 sps:$4 sm:$0xff]  }
  0x69   :  { %1119 = vmatmul.mubr.bf16.gmra.mxu0 %v2559_v55  ;;  %v2655_v55 = vld [vmem:[%s3413_s0 + $0x2a0] ss:$16 sps:$4 sm:$0xff]  }
  0x6a   :  { %1408 = vmatmul.mubr.bf16.gmra.mxu1 %v2560_v56  ;;  %1126 = vmatprep.mubr.bf16.mxu0 %v2561_v57  ;;  %v2656_v56 = vld [vmem:[%s3413_s0 + $0x2a8] ss:$16 sps:$4 sm:$0xff]   ;;  %v2657_v57 = vld [vmem:[%s3413_s0 + $0x2c4] ss:$16 sps:$4 sm:$0xff]  }
  0x6b   :  { %1415 = vmatprep.mubr.bf16.mxu1 %v2563_v58  ;;  %v2659_v58 = vld [vmem:[%s3413_s0 + $0x2cc] ss:$16 sps:$4 sm:$0xff]  }
  0x71   :  { %1127 = vmatmul.mubr.bf16.gmra.mxu0 %v2565_v59  ;;  %v2661_v59 = vld [vmem:[%s3413_s0 + $0x2c0] ss:$16 sps:$4 sm:$0xff]  }
  0x72   :  { %1416 = vmatmul.mubr.bf16.gmra.mxu1 %v2566_v60  ;;  %1134 = vmatprep.mubr.bf16.mxu0 %v2567_v61  ;;  %v2662_v60 = vld [vmem:[%s3413_s0 + $0x2c8] ss:$16 sps:$4 sm:$0xff]   ;;  %v2663_v61 = vld [vmem:[%s3413_s0 + $0x2e4] ss:$16 sps:$4 sm:$0xff]  }
  0x73   :  { %1423 = vmatprep.mubr.bf16.mxu1 %v2569_v62  ;;  %v2665_v62 = vld [vmem:[%s3413_s0 + $0x2ec] ss:$16 sps:$4 sm:$0xff]  }
  0x79   :  { %1135 = vmatmul.mubr.bf16.gmra.mxu0 %v2571_v63  ;;  %v2667_v63 = vld [vmem:[%s3413_s0 + $0x2e0] ss:$16 sps:$4 sm:$0xff]  }
  0x7a   :  { %1424 = vmatmul.mubr.bf16.gmra.mxu1 %v2572_v0  ;;  %1142 = vmatprep.mubr.bf16.mxu0 %v2573_v1  ;;  %v2668_v0 = vld [vmem:[%s3413_s0 + $0x2e8] ss:$16 sps:$4 sm:$0xff]   ;;  %v2669_v1 = vld [vmem:[%s3413_s0 + $0x304] ss:$16 sps:$4 sm:$0xff]  }
  0x7b   :  { %1431 = vmatprep.mubr.bf16.mxu1 %v2575_v2  ;;  %v2671_v2 = vld [vmem:[%s3413_s0 + $0x30c] ss:$16 sps:$4 sm:$0xff]  }
  0x81   :  { %1143 = vmatmul.mubr.bf16.gmra.mxu0 %v2577_v3  ;;  %v2673_v3 = vld [vmem:[%s3413_s0 + $0x300] ss:$16 sps:$4 sm:$0xff]  }
  0x82   :  { %1432 = vmatmul.mubr.bf16.gmra.mxu1 %v2578_v4  ;;  %1150 = vmatprep.mubr.bf16.mxu0 %v2579_v5  ;;  %v2674_v4 = vld [vmem:[%s3413_s0 + $0x308] ss:$16 sps:$4 sm:$0xff]   ;;  %v2675_v5 = vld [vmem:[%s3413_s0 + $0x324] ss:$16 sps:$4 sm:$0xff]  }
  0x83   :  { %1439 = vmatprep.mubr.bf16.mxu1 %v2581_v6  ;;  %v3173_v6 = vld [vmem:[%s3414_s2] ss:$0 sm:$0xff] }
  0x89   :  { %1151 = vmatmul.mubr.bf16.gmra.mxu0 %v2583_v7  ;;  %v2677_v7 = vld [vmem:[%s3413_s0 + $0x32c] ss:$16 sps:$4 sm:$0xff]  }
  0x8a   :  { %1440 = vmatmul.mubr.bf16.gmra.mxu1 %v2584_v8  ;;  %1158 = vmatprep.mubr.bf16.mxu0 %v2585_v9 }
  0x8b   :  { %1447 = vmatprep.mubr.bf16.mxu1 %v2587_v10 }
  0x91   :  { %1159 = vmatmul.mubr.bf16.gmra.mxu0 %v2589_v11 }
  0x92   :  { %1448 = vmatmul.mubr.bf16.gmra.mxu1 %v2590_v12  ;;  %1166 = vmatprep.mubr.bf16.mxu0 %v2591_v13 }
  0x93   :  { %1455 = vmatprep.mubr.bf16.mxu1 %v2593_v14  ;;  %v2679_v14 = vld [vmem:[%s3413_s0 + $0x320] ss:$16 sps:$4 sm:$0xff]  }
  0x99   :  { %1167 = vmatmul.mubr.bf16.gmra.mxu0 %v2595_v15 }
  0x9a   :  { %1456 = vmatmul.mubr.bf16.gmra.mxu1 %v2596_v16  ;;  %1174 = vmatprep.mubr.bf16.mxu0 %v2597_v17 }
  0x9b   :  { %1463 = vmatprep.mubr.bf16.mxu1 %v2599_v18  ;;  %v2680_v18 = vld [vmem:[%s3413_s0 + $0x328] ss:$16 sps:$4 sm:$0xff]  }
  0xa1   :  { %1175 = vmatmul.mubr.bf16.gmra.mxu0 %v2601_v19  ;;  %v2681_v19 = vld [vmem:[%s3413_s0 + $0x344] ss:$16 sps:$4 sm:$0xff]  }
  0xa2   :  { %1464 = vmatmul.mubr.bf16.gmra.mxu1 %v2602_v20  ;;  %1182 = vmatprep.mubr.bf16.mxu0 %v2603_v21  ;;  %v2683_v21 = vld [vmem:[%s3413_s0 + $0x34c] ss:$16 sps:$4 sm:$0xff]  }
  0xa3   :  { %1471 = vmatprep.mubr.bf16.mxu1 %v2605_v22 }
  0xa9   :  { %1183 = vmatmul.mubr.bf16.gmra.mxu0 %v2607_v23 }
  0xaa   :  { %1472 = vmatmul.mubr.bf16.gmra.mxu1 %v2608_v24  ;;  %1190 = vmatprep.mubr.bf16.mxu0 %v2609_v25 }
  0xab   :  { %1479 = vmatprep.mubr.bf16.mxu1 %v2611_v26 }
  0xb1   :  { %1191 = vmatmul.mubr.bf16.gmra.mxu0 %v2613_v27 }
  0xb2   :  { %1480 = vmatmul.mubr.bf16.gmra.mxu1 %v2614_v28  ;;  %1198 = vmatprep.mubr.bf16.mxu0 %v2615_v29 }
  0xb3   :  { %1487 = vmatprep.mubr.bf16.mxu1 %v2617_v30 }
  0xb9   :  { %1199 = vmatmul.mubr.bf16.gmra.mxu0 %v2619_v31 }
  0xba   :  { %1488 = vmatmul.mubr.bf16.gmra.mxu1 %v2620_v32  ;;  %1206 = vmatprep.mubr.bf16.mxu0 %v2621_v33  ;;  %v2685_v33 = vld [vmem:[%s3413_s0 + $0x340] ss:$16 sps:$4 sm:$0xff]  }
  0xbb   :  { %1495 = vmatprep.mubr.bf16.mxu1 %v2623_v34 }
  0xc1   :  { %1207 = vmatmul.mubr.bf16.gmra.mxu0 %v2625_v35 }
  0xc2   :  { %1496 = vmatmul.mubr.bf16.gmra.mxu1 %v2626_v36  ;;  %1214 = vmatprep.mubr.bf16.mxu0 %v2627_v37  ;;  %v2686_v37 = vld [vmem:[%s3413_s0 + $0x348] ss:$16 sps:$4 sm:$0xff]  }
  0xc3   :  { %1503 = vmatprep.mubr.bf16.mxu1 %v2629_v38  ;;  %v2687_v38 = vld [vmem:[%s3413_s0 + $0x364] ss:$16 sps:$4 sm:$0xff]  }
  0xc9   :  { %1215 = vmatmul.mubr.bf16.gmra.mxu0 %v2631_v39 }
  0xca   :  { %1504 = vmatmul.mubr.bf16.gmra.mxu1 %v2632_v40  ;;  %1222 = vmatprep.mubr.bf16.mxu0 %v2633_v41  ;;  %v2689_v40 = vld [vmem:[%s3413_s0 + $0x36c] ss:$16 sps:$4 sm:$0xff]  }
  0xcb   :  { %1511 = vmatprep.mubr.bf16.mxu1 %v2635_v42 }
  0xd1   :  { %1223 = vmatmul.mubr.bf16.gmra.mxu0 %v2637_v43 }
  0xd2   :  { %1512 = vmatmul.mubr.bf16.gmra.mxu1 %v2638_v44  ;;  %1230 = vmatprep.mubr.bf16.mxu0 %v2639_v45 }
  0xd3   :  { %1519 = vmatprep.mubr.bf16.mxu1 %v2641_v46 }
  0xd9   :  { %1231 = vmatmul.mubr.bf16.gmra.mxu0 %v2643_v47 }
  0xda   :  { %1520 = vmatmul.mubr.bf16.gmra.mxu1 %v2644_v48  ;;  %1238 = vmatprep.mubr.bf16.mxu0 %v2645_v49 }
  0xdb   :  { %1527 = vmatprep.mubr.bf16.mxu1 %v2647_v50 }
  0xe1   :  { %1239 = vmatmul.mubr.bf16.gmra.mxu0 %v2649_v51 }
  0xe2   :  { %1528 = vmatmul.mubr.bf16.gmra.mxu1 %v2650_v52  ;;  %1246 = vmatprep.mubr.bf16.mxu0 %v2651_v53  ;;  %v2691_v52 = vld [vmem:[%s3413_s0 + $0x360] ss:$16 sps:$4 sm:$0xff]  }
  0xe3   :  { %1535 = vmatprep.mubr.bf16.mxu1 %v2653_v54 }
  0xe9   :  { %1247 = vmatmul.mubr.bf16.gmra.mxu0 %v2655_v55 }
  0xea   :  { %1536 = vmatmul.mubr.bf16.gmra.mxu1 %v2656_v56  ;;  %1254 = vmatprep.mubr.bf16.mxu0 %v2657_v57  ;;  %v2692_v56 = vld [vmem:[%s3413_s0 + $0x368] ss:$16 sps:$4 sm:$0xff]   ;;  %v2695_v57 = vld [vmem:[%s3413_s0 + $0x384] ss:$16 sps:$4 sm:$0xff]  }
  0xeb   :  { %1543 = vmatprep.mubr.bf16.mxu1 %v2659_v58 }
  0xf1   :  { %1255 = vmatmul.mubr.bf16.gmra.mxu0 %v2661_v59  ;;  %v2698_v59 = vld [vmem:[%s3413_s0 + $0x38c] ss:$16 sps:$4 sm:$0xff]  }
  0xf2   :  { %1544 = vmatmul.mubr.bf16.gmra.mxu1 %v2662_v60  ;;  %1262 = vmatprep.mubr.bf16.mxu0 %v2663_v61 }
  0xf3   :  { %1551 = vmatprep.mubr.bf16.mxu1 %v2665_v62 }
  0xf9   :  { %1263 = vmatmul.mubr.bf16.gmra.mxu0 %v2667_v63 }
  0xfa   :  { %1552 = vmatmul.mubr.bf16.gmra.mxu1 %v2668_v0  ;;  %1270 = vmatprep.mubr.bf16.mxu0 %v2669_v1 }
  0xfb   :  { %1559 = vmatprep.mubr.bf16.mxu1 %v2671_v2 }
 0x101   :  { %v1080_v8 = vpop.f32.mrf.mxu0  ;;  %1271 = vmatmul.mubr.bf16.gmra.mxu0 %v2673_v3 }
 0x102   :  { %v1081_v9 = vadd.f32 %v3173_v6, %v1080_v8  ;;  %v1369_v10 = vpop.f32.mrf.mxu1  ;;  %1560 = vmatmul.mubr.bf16.gmra.mxu1 %v2674_v4  ;;  %1278 = vmatprep.mubr.bf16.mxu0 %v2675_v5  ;;  %v2693_v8 = vld [vmem:[%s3413_s0 + $0x380] ss:$16 sps:$4 sm:$0xff]  }
 0x103   :  { %v1082_v11 = vpop.f32.mrf.mxu0  ;;  %1567 = vmatprep.mubr.bf16.mxu1 %v2677_v7 }
 0x104   :  { %v1371_v12 = vpop.f32.mrf.mxu1  ;;  %v1370_v15 = vadd.f32 %v1369_v10, %v1081_v9 }
 0x105   :  { %v1083_v13 = vpop.f32.mrf.mxu0  ;;  %v2696_v12 = vld [vmem:[%s3413_s0 + $0x388] ss:$16 sps:$4 sm:$0xff]  }
 0x106   :  { %v1084_v16 = vadd.f32 %v3173_v6, %v1083_v13  ;;  %v1372_v17 = vpop.f32.mrf.mxu1  ;;  %v1624_v25 = vmax.f32 %v1370_v15, 0.0  ;;  %v2701_v13 = vld [vmem:[%s3413_s0 + $0x3a4] ss:$16 sps:$4 sm:$0xff]   ;;  %v2704_v15 = vld [vmem:[%s3413_s0 + $0x3ac] ss:$16 sps:$4 sm:$0xff]  }
 0x107   :  { %v1085_v20 = vpop.f32.mrf.mxu0 }
 0x108   :  { %v1373_v22 = vadd.f32 %v1372_v17, %v1084_v16  ;;  %v1374_v23 = vpop.f32.mrf.mxu1 }
 0x109   :  { %v1088_v24 = vpop.f32.mrf.mxu0  ;;  %1279 = vmatmul.mubr.bf16.gmra.mxu0 %v2679_v14 }
 0x10a   :  { %v1625_v26 = vmax.f32 %v1373_v22, 0.0  ;;  %v1089_v27 = vadd.f32 %v3173_v6, %v1088_v24  ;;  %v1377_v28 = vpop.f32.mrf.mxu1  ;;  %1568 = vmatmul.mubr.bf16.gmra.mxu1 %v2680_v18  ;;  %1286 = vmatprep.mubr.bf16.mxu0 %v2681_v19 }
 0x10b   :  { %v1090_v29 = vpop.f32.mrf.mxu0  ;;  %1575 = vmatprep.mubr.bf16.mxu1 %v2683_v21 }
 0x10c   :  { %v2304_v30 = vpack.c.bf16 %v1625_v26, %v1624_v25  ;;  %v1379_v31 = vpop.f32.mrf.mxu1  ;;  %v1378_v34 = vadd.f32 %v1377_v28, %v1089_v27  ;;  %v2699_v27 = vld [vmem:[%s3413_s0 + $0x3a0] ss:$16 sps:$4 sm:$0xff]  }
 0x10d   :  { %v1091_v32 = vpop.f32.mrf.mxu0  ;;  %v2702_v31 = vld [vmem:[%s3413_s0 + $0x3a8] ss:$16 sps:$4 sm:$0xff]  }
 0x10e   :  { %2305 = vst [vmem:[%s3415_s3] sm:$0xff] %v2304_v30   ;;  %v1092_v35 = vadd.f32 %v3173_v6, %v1091_v32  ;;  %v1380_v36 = vpop.f32.mrf.mxu1  ;;  %v1626_v44 = vmax.f32 %v1378_v34, 0.0  ;;  %v2707_v32 = vld [vmem:[%s3413_s0 + $0x3c4] ss:$16 sps:$4 sm:$0xff]   ;;  %v2710_v34 = vld [vmem:[%s3413_s0 + $0x3cc] ss:$16 sps:$4 sm:$0xff]  }
 0x10f   :  { %v1093_v39 = vpop.f32.mrf.mxu0 }
 0x110   :  { %v1381_v41 = vadd.f32 %v1380_v36, %v1092_v35  ;;  %v1382_v42 = vpop.f32.mrf.mxu1 }
 0x111   :  { %v1096_v43 = vpop.f32.mrf.mxu0  ;;  %1287 = vmatmul.mubr.bf16.gmra.mxu0 %v2685_v33 }
 0x112   :  { %v1627_v45 = vmax.f32 %v1381_v41, 0.0  ;;  %v1097_v46 = vadd.f32 %v3173_v6, %v1096_v43  ;;  %v1385_v47 = vpop.f32.mrf.mxu1  ;;  %1576 = vmatmul.mubr.bf16.gmra.mxu1 %v2686_v37  ;;  %1294 = vmatprep.mubr.bf16.mxu0 %v2687_v38 }
 0x113   :  { %v1098_v48 = vpop.f32.mrf.mxu0  ;;  %1583 = vmatprep.mubr.bf16.mxu1 %v2689_v40 }
 0x114   :  { %v2309_v49 = vpack.c.bf16 %v1627_v45, %v1626_v44  ;;  %v1387_v50 = vpop.f32.mrf.mxu1  ;;  %v1386_v53 = vadd.f32 %v1385_v47, %v1097_v46  ;;  %v2705_v46 = vld [vmem:[%s3413_s0 + $0x3c0] ss:$16 sps:$4 sm:$0xff]  }
 0x115   :  { %v1099_v51 = vpop.f32.mrf.mxu0  ;;  %v2708_v50 = vld [vmem:[%s3413_s0 + $0x3c8] ss:$16 sps:$4 sm:$0xff]  }
 0x116   :  { %2461 = vst [vmem:[%s3415_s3 + $0x8] sm:$0xff] %v2309_v49   ;;  %v1100_v54 = vadd.f32 %v3173_v6, %v1099_v51  ;;  %v1388_v55 = vpop.f32.mrf.mxu1  ;;  %v1628_v63 = vmax.f32 %v1386_v53, 0.0  ;;  %v2713_v51 = vld [vmem:[%s3413_s0 + $0x3e4] ss:$16 sps:$4 sm:$0xff]   ;;  %v2716_v53 = vld [vmem:[%s3413_s0 + $0x3ec] ss:$16 sps:$4 sm:$0xff]  }
 0x117   :  { %v1101_v58 = vpop.f32.mrf.mxu0 }
 0x118   :  { %v1389_v60 = vadd.f32 %v1388_v55, %v1100_v54  ;;  %v1390_v61 = vpop.f32.mrf.mxu1 }
 0x119   :  { %v1104_v62 = vpop.f32.mrf.mxu0  ;;  %1295 = vmatmul.mubr.bf16.gmra.mxu0 %v2691_v52 }
 0x11a   :  { %v1629_v0 = vmax.f32 %v1389_v60, 0.0  ;;  %v1105_v1 = vadd.f32 %v3173_v6, %v1104_v62  ;;  %v1393_v2 = vpop.f32.mrf.mxu1  ;;  %1584 = vmatmul.mubr.bf16.gmra.mxu1 %v2692_v56  ;;  %1302 = vmatprep.mubr.bf16.mxu0 %v2695_v57 }
 0x11b   :  { %v1106_v3 = vpop.f32.mrf.mxu0  ;;  %1591 = vmatprep.mubr.bf16.mxu1 %v2698_v59 }
 0x11c   :  { %v2314_v4 = vpack.c.bf16 %v1629_v0, %v1628_v63  ;;  %v1395_v5 = vpop.f32.mrf.mxu1  ;;  %v1394_v9 = vadd.f32 %v1393_v2, %v1105_v1  ;;  %v2711_v1 = vld [vmem:[%s3413_s0 + $0x3e0] ss:$16 sps:$4 sm:$0xff]  }
 0x11d   :  { %v1107_v7 = vpop.f32.mrf.mxu0  ;;  %v2714_v5 = vld [vmem:[%s3413_s0 + $0x3e8] ss:$16 sps:$4 sm:$0xff]  }
 0x11e   :  { %2462 = vst [vmem:[%s3415_s3 + $0x10] sm:$0xff] %v2314_v4   ;;  %v1108_v10 = vadd.f32 %v3173_v6, %v1107_v7  ;;  %v1396_v11 = vpop.f32.mrf.mxu1  ;;  %v1630_v19 = vmax.f32 %v1394_v9, 0.0 }
 0x11f   :  { %v1109_v14 = vpop.f32.mrf.mxu0 }
 0x120   :  { %v1397_v16 = vadd.f32 %v1396_v11, %v1108_v10  ;;  %v1398_v17 = vpop.f32.mrf.mxu1 }
 0x121   :  { %v1112_v18 = vpop.f32.mrf.mxu0  ;;  %1303 = vmatmul.mubr.bf16.gmra.mxu0 %v2693_v8 }
 0x122   :  { %v1631_v20 = vmax.f32 %v1397_v16, 0.0  ;;  %v1113_v21 = vadd.f32 %v3173_v6, %v1112_v18  ;;  %v1401_v22 = vpop.f32.mrf.mxu1  ;;  %1592 = vmatmul.mubr.bf16.gmra.mxu1 %v2696_v12  ;;  %1310 = vmatprep.mubr.bf16.mxu0 %v2701_v13 }
 0x123   :  { %v1114_v23 = vpop.f32.mrf.mxu0  ;;  %1599 = vmatprep.mubr.bf16.mxu1 %v2704_v15 }
 0x124   :  { %v2319_v24 = vpack.c.bf16 %v1631_v20, %v1630_v19  ;;  %v1403_v25 = vpop.f32.mrf.mxu1  ;;  %v1402_v28 = vadd.f32 %v1401_v22, %v1113_v21 }
 0x125   :  { %v1115_v26 = vpop.f32.mrf.mxu0 }
 0x126   :  { %2463 = vst [vmem:[%s3415_s3 + $0x18] sm:$0xff] %v2319_v24   ;;  %v1116_v29 = vadd.f32 %v3173_v6, %v1115_v26  ;;  %v1404_v30 = vpop.f32.mrf.mxu1  ;;  %v1632_v38 = vmax.f32 %v1402_v28, 0.0 }
 0x127   :  { %v1117_v33 = vpop.f32.mrf.mxu0 }
 0x128   :  { %v1405_v35 = vadd.f32 %v1404_v30, %v1116_v29  ;;  %v1406_v36 = vpop.f32.mrf.mxu1 }
 0x129   :  { %v1120_v37 = vpop.f32.mrf.mxu0  ;;  %1311 = vmatmul.mubr.bf16.gmra.mxu0 %v2699_v27 }
 0x12a   :  { %v1633_v39 = vmax.f32 %v1405_v35, 0.0  ;;  %v1121_v40 = vadd.f32 %v3173_v6, %v1120_v37  ;;  %v1409_v41 = vpop.f32.mrf.mxu1  ;;  %1600 = vmatmul.mubr.bf16.gmra.mxu1 %v2702_v31  ;;  %1318 = vmatprep.mubr.bf16.mxu0 %v2707_v32 }
 0x12b   :  { %v1122_v42 = vpop.f32.mrf.mxu0  ;;  %1607 = vmatprep.mubr.bf16.mxu1 %v2710_v34 }
 0x12c   :  { %v2324_v43 = vpack.c.bf16 %v1633_v39, %v1632_v38  ;;  %v1411_v44 = vpop.f32.mrf.mxu1  ;;  %v1410_v47 = vadd.f32 %v1409_v41, %v1121_v40 }
 0x12d   :  { %v1123_v45 = vpop.f32.mrf.mxu0 }
 0x12e   :  { %2464 = vst [vmem:[%s3415_s3 + $0x20] sm:$0xff] %v2324_v43   ;;  %v1124_v48 = vadd.f32 %v3173_v6, %v1123_v45  ;;  %v1412_v49 = vpop.f32.mrf.mxu1  ;;  %v1634_v57 = vmax.f32 %v1410_v47, 0.0 }
 0x12f   :  { %v1125_v52 = vpop.f32.mrf.mxu0 }
 0x130   :  { %v1413_v54 = vadd.f32 %v1412_v49, %v1124_v48  ;;  %v1414_v55 = vpop.f32.mrf.mxu1 }
 0x131   :  { %v1128_v56 = vpop.f32.mrf.mxu0  ;;  %1319 = vmatmul.mubr.bf16.gmra.mxu0 %v2705_v46 }
 0x132   :  { %v1635_v58 = vmax.f32 %v1413_v54, 0.0  ;;  %v1129_v59 = vadd.f32 %v3173_v6, %v1128_v56  ;;  %v1417_v60 = vpop.f32.mrf.mxu1  ;;  %1608 = vmatmul.mubr.bf16.gmra.mxu1 %v2708_v50  ;;  %1326 = vmatprep.mubr.bf16.mxu0 %v2713_v51 }
 0x133   :  { %v1130_v61 = vpop.f32.mrf.mxu0  ;;  %1615 = vmatprep.mubr.bf16.mxu1 %v2716_v53 }
 0x134   :  { %v2329_v62 = vpack.c.bf16 %v1635_v58, %v1634_v57  ;;  %v1419_v63 = vpop.f32.mrf.mxu1  ;;  %v1418_v2 = vadd.f32 %v1417_v60, %v1129_v59 }
 0x135   :  { %v1131_v0 = vpop.f32.mrf.mxu0 }
 0x136   :  { %2465 = vst [vmem:[%s3415_s3 + $0x28] sm:$0xff] %v2329_v62   ;;  %v1132_v3 = vadd.f32 %v3173_v6, %v1131_v0  ;;  %v1420_v4 = vpop.f32.mrf.mxu1  ;;  %v1636_v11 = vmax.f32 %v1418_v2, 0.0 }
 0x137   :  { %v1133_v7 = vpop.f32.mrf.mxu0 }
 0x138   :  { %v1421_v8 = vadd.f32 %v1420_v4, %v1132_v3  ;;  %v1422_v9 = vpop.f32.mrf.mxu1 }
 0x139   :  { %v1136_v10 = vpop.f32.mrf.mxu0  ;;  %1327 = vmatmul.mubr.bf16.gmra.mxu0 %v2711_v1 }
 0x13a   :  { %v1637_v12 = vmax.f32 %v1421_v8, 0.0  ;;  %v1137_v13 = vadd.f32 %v3173_v6, %v1136_v10  ;;  %v1425_v14 = vpop.f32.mrf.mxu1  ;;  %1616 = vmatmul.mubr.bf16.gmra.mxu1 %v2714_v5 }
 0x13b   :  { %v1138_v15 = vpop.f32.mrf.mxu0 }
 0x13c   :  { %v2334_v16 = vpack.c.bf16 %v1637_v12, %v1636_v11  ;;  %v1427_v17 = vpop.f32.mrf.mxu1  ;;  %v1426_v19 = vadd.f32 %v1425_v14, %v1137_v13 }
 0x13d   :  { %v1139_v18 = vpop.f32.mrf.mxu0 }
 0x13e   :  { %2466 = vst [vmem:[%s3415_s3 + $0x30] sm:$0xff] %v2334_v16   ;;  %v1140_v20 = vadd.f32 %v3173_v6, %v1139_v18  ;;  %v1428_v21 = vpop.f32.mrf.mxu1  ;;  %v1638_v26 = vmax.f32 %v1426_v19, 0.0 }
 0x13f   :  { %v1141_v22 = vpop.f32.mrf.mxu0 }
 0x140   :  { %v1429_v23 = vadd.f32 %v1428_v21, %v1140_v20  ;;  %v1430_v24 = vpop.f32.mrf.mxu1 }
 0x141   :  { %v1144_v25 = vpop.f32.mrf.mxu0 }
 0x142   :  { %v1639_v27 = vmax.f32 %v1429_v23, 0.0  ;;  %v1145_v28 = vadd.f32 %v3173_v6, %v1144_v25  ;;  %v1433_v29 = vpop.f32.mrf.mxu1 }
 0x143   :  { %v1146_v30 = vpop.f32.mrf.mxu0 }
 0x144   :  { %v2339_v31 = vpack.c.bf16 %v1639_v27, %v1638_v26  ;;  %v1435_v32 = vpop.f32.mrf.mxu1  ;;  %v1434_v34 = vadd.f32 %v1433_v29, %v1145_v28 }
 0x145   :  { %v1147_v33 = vpop.f32.mrf.mxu0 }
 0x146   :  { %2467 = vst [vmem:[%s3415_s3 + $0x38] sm:$0xff] %v2339_v31   ;;  %v1148_v35 = vadd.f32 %v3173_v6, %v1147_v33  ;;  %v1436_v36 = vpop.f32.mrf.mxu1  ;;  %v1640_v41 = vmax.f32 %v1434_v34, 0.0 }
 0x147   :  { %v1149_v37 = vpop.f32.mrf.mxu0 }
 0x148   :  { %v1437_v38 = vadd.f32 %v1436_v36, %v1148_v35  ;;  %v1438_v39 = vpop.f32.mrf.mxu1 }
 0x149   :  { %v1152_v40 = vpop.f32.mrf.mxu0 }
 0x14a   :  { %v1641_v42 = vmax.f32 %v1437_v38, 0.0  ;;  %v1153_v43 = vadd.f32 %v3173_v6, %v1152_v40  ;;  %v1441_v44 = vpop.f32.mrf.mxu1 }
 0x14b   :  { %v1154_v45 = vpop.f32.mrf.mxu0 }
 0x14c   :  { %v2344_v46 = vpack.c.bf16 %v1641_v42, %v1640_v41  ;;  %v1443_v47 = vpop.f32.mrf.mxu1  ;;  %v1442_v49 = vadd.f32 %v1441_v44, %v1153_v43 }
 0x14d   :  { %v1155_v48 = vpop.f32.mrf.mxu0 }
 0x14e   :  { %2468 = vst [vmem:[%s3415_s3 + $0x40] sm:$0xff] %v2344_v46   ;;  %v1156_v50 = vadd.f32 %v3173_v6, %v1155_v48  ;;  %v1444_v51 = vpop.f32.mrf.mxu1  ;;  %v1642_v56 = vmax.f32 %v1442_v49, 0.0 }
 0x14f   :  { %v1157_v52 = vpop.f32.mrf.mxu0 }
 0x150   :  { %v1445_v53 = vadd.f32 %v1444_v51, %v1156_v50  ;;  %v1446_v54 = vpop.f32.mrf.mxu1 }
 0x151   :  { %v1160_v55 = vpop.f32.mrf.mxu0 }
 0x152   :  { %v1643_v57 = vmax.f32 %v1445_v53, 0.0  ;;  %v1161_v58 = vadd.f32 %v3173_v6, %v1160_v55  ;;  %v1449_v59 = vpop.f32.mrf.mxu1 }
 0x153   :  { %v1162_v60 = vpop.f32.mrf.mxu0 }
 0x154   :  { %v2349_v61 = vpack.c.bf16 %v1643_v57, %v1642_v56  ;;  %v1451_v62 = vpop.f32.mrf.mxu1  ;;  %v1450_v0 = vadd.f32 %v1449_v59, %v1161_v58 }
 0x155   :  { %v1163_v63 = vpop.f32.mrf.mxu0 }
 0x156   :  { %2469 = vst [vmem:[%s3415_s3 + $0x48] sm:$0xff] %v2349_v61   ;;  %v1164_v1 = vadd.f32 %v3173_v6, %v1163_v63  ;;  %v1452_v2 = vpop.f32.mrf.mxu1  ;;  %v1644_v8 = vmax.f32 %v1450_v0, 0.0 }
 0x157   :  { %v1165_v3 = vpop.f32.mrf.mxu0 }
 0x158   :  { %v1453_v4 = vadd.f32 %v1452_v2, %v1164_v1  ;;  %v1454_v5 = vpop.f32.mrf.mxu1 }
 0x159   :  { %v1168_v7 = vpop.f32.mrf.mxu0 }
 0x15a   :  { %v1645_v9 = vmax.f32 %v1453_v4, 0.0  ;;  %v1169_v10 = vadd.f32 %v3173_v6, %v1168_v7  ;;  %v1457_v11 = vpop.f32.mrf.mxu1 }
 0x15b   :  { %v1170_v12 = vpop.f32.mrf.mxu0 }
 0x15c   :  { %v2354_v13 = vpack.c.bf16 %v1645_v9, %v1644_v8  ;;  %v1459_v14 = vpop.f32.mrf.mxu1  ;;  %v1458_v16 = vadd.f32 %v1457_v11, %v1169_v10 }
 0x15d   :  { %v1171_v15 = vpop.f32.mrf.mxu0 }
 0x15e   :  { %2470 = vst [vmem:[%s3415_s3 + $0x50] sm:$0xff] %v2354_v13   ;;  %v1172_v17 = vadd.f32 %v3173_v6, %v1171_v15  ;;  %v1460_v18 = vpop.f32.mrf.mxu1  ;;  %v1646_v23 = vmax.f32 %v1458_v16, 0.0 }
 0x15f   :  { %v1173_v19 = vpop.f32.mrf.mxu0 }
 0x160   :  { %v1461_v20 = vadd.f32 %v1460_v18, %v1172_v17  ;;  %v1462_v21 = vpop.f32.mrf.mxu1 }
 0x161   :  { %v1176_v22 = vpop.f32.mrf.mxu0 }
 0x162   :  { %v1647_v24 = vmax.f32 %v1461_v20, 0.0  ;;  %v1177_v25 = vadd.f32 %v3173_v6, %v1176_v22  ;;  %v1465_v26 = vpop.f32.mrf.mxu1 }
 0x163   :  { %v1178_v27 = vpop.f32.mrf.mxu0 }
 0x164   :  { %v2359_v28 = vpack.c.bf16 %v1647_v24, %v1646_v23  ;;  %v1467_v29 = vpop.f32.mrf.mxu1  ;;  %v1466_v31 = vadd.f32 %v1465_v26, %v1177_v25 }
 0x165   :  { %v1179_v30 = vpop.f32.mrf.mxu0 }
 0x166   :  { %2471 = vst [vmem:[%s3415_s3 + $0x58] sm:$0xff] %v2359_v28   ;;  %v1180_v32 = vadd.f32 %v3173_v6, %v1179_v30  ;;  %v1468_v33 = vpop.f32.mrf.mxu1  ;;  %v1648_v38 = vmax.f32 %v1466_v31, 0.0 }
 0x167   :  { %v1181_v34 = vpop.f32.mrf.mxu0 }
 0x168   :  { %v1469_v35 = vadd.f32 %v1468_v33, %v1180_v32  ;;  %v1470_v36 = vpop.f32.mrf.mxu1 }
 0x169   :  { %v1184_v37 = vpop.f32.mrf.mxu0 }
 0x16a   :  { %v1649_v39 = vmax.f32 %v1469_v35, 0.0  ;;  %v1185_v40 = vadd.f32 %v3173_v6, %v1184_v37  ;;  %v1473_v41 = vpop.f32.mrf.mxu1 }
 0x16b   :  { %v1186_v42 = vpop.f32.mrf.mxu0 }
 0x16c   :  { %v2364_v43 = vpack.c.bf16 %v1649_v39, %v1648_v38  ;;  %v1475_v44 = vpop.f32.mrf.mxu1  ;;  %v1474_v46 = vadd.f32 %v1473_v41, %v1185_v40 }
 0x16d   :  { %v1187_v45 = vpop.f32.mrf.mxu0 }
 0x16e   :  { %2472 = vst [vmem:[%s3415_s3 + $0x60] sm:$0xff] %v2364_v43   ;;  %v1188_v47 = vadd.f32 %v3173_v6, %v1187_v45  ;;  %v1476_v48 = vpop.f32.mrf.mxu1  ;;  %v1650_v53 = vmax.f32 %v1474_v46, 0.0 }
 0x16f   :  { %v1189_v49 = vpop.f32.mrf.mxu0 }
 0x170   :  { %v1477_v50 = vadd.f32 %v1476_v48, %v1188_v47  ;;  %v1478_v51 = vpop.f32.mrf.mxu1 }
 0x171   :  { %v1192_v52 = vpop.f32.mrf.mxu0 }
 0x172   :  { %v1651_v54 = vmax.f32 %v1477_v50, 0.0  ;;  %v1193_v55 = vadd.f32 %v3173_v6, %v1192_v52  ;;  %v1481_v56 = vpop.f32.mrf.mxu1 }
 0x173   :  { %v1194_v57 = vpop.f32.mrf.mxu0 }
 0x174   :  { %v2369_v58 = vpack.c.bf16 %v1651_v54, %v1650_v53  ;;  %v1483_v59 = vpop.f32.mrf.mxu1  ;;  %v1482_v61 = vadd.f32 %v1481_v56, %v1193_v55 }
 0x175   :  { %v1195_v60 = vpop.f32.mrf.mxu0 }
 0x176   :  { %2473 = vst [vmem:[%s3415_s3 + $0x68] sm:$0xff] %v2369_v58   ;;  %v1196_v62 = vadd.f32 %v3173_v6, %v1195_v60  ;;  %v1484_v63 = vpop.f32.mrf.mxu1  ;;  %v1652_v4 = vmax.f32 %v1482_v61, 0.0 }
 0x177   :  { %v1197_v0 = vpop.f32.mrf.mxu0 }
 0x178   :  { %v1485_v1 = vadd.f32 %v1484_v63, %v1196_v62  ;;  %v1486_v2 = vpop.f32.mrf.mxu1 }
 0x179   :  { %v1200_v3 = vpop.f32.mrf.mxu0 }
 0x17a   :  { %v1653_v5 = vmax.f32 %v1485_v1, 0.0  ;;  %v1201_v7 = vadd.f32 %v3173_v6, %v1200_v3  ;;  %v1489_v8 = vpop.f32.mrf.mxu1 }
 0x17b   :  { %v1202_v9 = vpop.f32.mrf.mxu0 }
 0x17c   :  { %v2374_v10 = vpack.c.bf16 %v1653_v5, %v1652_v4  ;;  %v1491_v11 = vpop.f32.mrf.mxu1  ;;  %v1490_v13 = vadd.f32 %v1489_v8, %v1201_v7 }
 0x17d   :  { %v1203_v12 = vpop.f32.mrf.mxu0 }
 0x17e   :  { %2474 = vst [vmem:[%s3415_s3 + $0x70] sm:$0xff] %v2374_v10   ;;  %v1204_v14 = vadd.f32 %v3173_v6, %v1203_v12  ;;  %v1492_v15 = vpop.f32.mrf.mxu1  ;;  %v1654_v20 = vmax.f32 %v1490_v13, 0.0 }
 0x17f   :  { %v1205_v16 = vpop.f32.mrf.mxu0 }
 0x180   :  { %v1493_v17 = vadd.f32 %v1492_v15, %v1204_v14  ;;  %v1494_v18 = vpop.f32.mrf.mxu1 }
 0x181   :  { %v1208_v19 = vpop.f32.mrf.mxu0 }
 0x182   :  { %v1655_v21 = vmax.f32 %v1493_v17, 0.0  ;;  %v1209_v22 = vadd.f32 %v3173_v6, %v1208_v19  ;;  %v1497_v23 = vpop.f32.mrf.mxu1 }
 0x183   :  { %v1210_v24 = vpop.f32.mrf.mxu0 }
 0x184   :  { %v2379_v25 = vpack.c.bf16 %v1655_v21, %v1654_v20  ;;  %v1499_v26 = vpop.f32.mrf.mxu1  ;;  %v1498_v28 = vadd.f32 %v1497_v23, %v1209_v22 }
 0x185   :  { %v1211_v27 = vpop.f32.mrf.mxu0 }
 0x186   :  { %2475 = vst [vmem:[%s3415_s3 + $0x78] sm:$0xff] %v2379_v25   ;;  %v1212_v29 = vadd.f32 %v3173_v6, %v1211_v27  ;;  %v1500_v30 = vpop.f32.mrf.mxu1  ;;  %v1656_v35 = vmax.f32 %v1498_v28, 0.0 }
 0x187   :  { %v1213_v31 = vpop.f32.mrf.mxu0 }
 0x188   :  { %v1501_v32 = vadd.f32 %v1500_v30, %v1212_v29  ;;  %v1502_v33 = vpop.f32.mrf.mxu1 }
 0x189   :  { %v1216_v34 = vpop.f32.mrf.mxu0 }
 0x18a   :  { %v1657_v36 = vmax.f32 %v1501_v32, 0.0  ;;  %v1217_v37 = vadd.f32 %v3173_v6, %v1216_v34  ;;  %v1505_v38 = vpop.f32.mrf.mxu1 }
 0x18b   :  { %v1218_v39 = vpop.f32.mrf.mxu0 }
 0x18c   :  { %v2384_v40 = vpack.c.bf16 %v1657_v36, %v1656_v35  ;;  %v1507_v41 = vpop.f32.mrf.mxu1  ;;  %v1506_v43 = vadd.f32 %v1505_v38, %v1217_v37 }
 0x18d   :  { %v1219_v42 = vpop.f32.mrf.mxu0 }
 0x18e   :  { %2476 = vst [vmem:[%s3415_s3 + $0x80] sm:$0xff] %v2384_v40   ;;  %v1220_v44 = vadd.f32 %v3173_v6, %v1219_v42  ;;  %v1508_v45 = vpop.f32.mrf.mxu1  ;;  %v1658_v50 = vmax.f32 %v1506_v43, 0.0 }
 0x18f   :  { %v1221_v46 = vpop.f32.mrf.mxu0 }
 0x190   :  { %v1509_v47 = vadd.f32 %v1508_v45, %v1220_v44  ;;  %v1510_v48 = vpop.f32.mrf.mxu1 }
 0x191   :  { %v1224_v49 = vpop.f32.mrf.mxu0 }
 0x192   :  { %v1659_v51 = vmax.f32 %v1509_v47, 0.0  ;;  %v1225_v52 = vadd.f32 %v3173_v6, %v1224_v49  ;;  %v1513_v53 = vpop.f32.mrf.mxu1 }
 0x193   :  { %v1226_v54 = vpop.f32.mrf.mxu0 }
 0x194   :  { %v2389_v55 = vpack.c.bf16 %v1659_v51, %v1658_v50  ;;  %v1515_v56 = vpop.f32.mrf.mxu1  ;;  %v1514_v58 = vadd.f32 %v1513_v53, %v1225_v52 }
 0x195   :  { %v1227_v57 = vpop.f32.mrf.mxu0 }
 0x196   :  { %2477 = vst [vmem:[%s3415_s3 + $0x88] sm:$0xff] %v2389_v55   ;;  %v1228_v59 = vadd.f32 %v3173_v6, %v1227_v57  ;;  %v1516_v60 = vpop.f32.mrf.mxu1  ;;  %v1660_v1 = vmax.f32 %v1514_v58, 0.0 }
 0x197   :  { %v1229_v61 = vpop.f32.mrf.mxu0 }
 0x198   :  { %v1517_v62 = vadd.f32 %v1516_v60, %v1228_v59  ;;  %v1518_v63 = vpop.f32.mrf.mxu1 }
 0x199   :  { %v1232_v0 = vpop.f32.mrf.mxu0 }
 0x19a   :  { %v1661_v2 = vmax.f32 %v1517_v62, 0.0  ;;  %v1233_v3 = vadd.f32 %v3173_v6, %v1232_v0  ;;  %v1521_v4 = vpop.f32.mrf.mxu1 }
 0x19b   :  { %v1234_v5 = vpop.f32.mrf.mxu0 }
 0x19c   :  { %v2394_v7 = vpack.c.bf16 %v1661_v2, %v1660_v1  ;;  %v1523_v8 = vpop.f32.mrf.mxu1  ;;  %v1522_v10 = vadd.f32 %v1521_v4, %v1233_v3 }
 0x19d   :  { %v1235_v9 = vpop.f32.mrf.mxu0 }
 0x19e   :  { %2478 = vst [vmem:[%s3415_s3 + $0x90] sm:$0xff] %v2394_v7   ;;  %v1236_v11 = vadd.f32 %v3173_v6, %v1235_v9  ;;  %v1524_v12 = vpop.f32.mrf.mxu1  ;;  %v1662_v17 = vmax.f32 %v1522_v10, 0.0 }
 0x19f   :  { %v1237_v13 = vpop.f32.mrf.mxu0 }
 0x1a0   :  { %v1525_v14 = vadd.f32 %v1524_v12, %v1236_v11  ;;  %v1526_v15 = vpop.f32.mrf.mxu1 }
 0x1a1   :  { %v1240_v16 = vpop.f32.mrf.mxu0 }
 0x1a2   :  { %v1663_v18 = vmax.f32 %v1525_v14, 0.0  ;;  %v1241_v19 = vadd.f32 %v3173_v6, %v1240_v16  ;;  %v1529_v20 = vpop.f32.mrf.mxu1 }
 0x1a3   :  { %v1242_v21 = vpop.f32.mrf.mxu0 }
 0x1a4   :  { %v2399_v22 = vpack.c.bf16 %v1663_v18, %v1662_v17  ;;  %v1531_v23 = vpop.f32.mrf.mxu1  ;;  %v1530_v25 = vadd.f32 %v1529_v20, %v1241_v19 }
 0x1a5   :  { %v1243_v24 = vpop.f32.mrf.mxu0 }
 0x1a6   :  { %2479 = vst [vmem:[%s3415_s3 + $0x98] sm:$0xff] %v2399_v22   ;;  %v1244_v26 = vadd.f32 %v3173_v6, %v1243_v24  ;;  %v1532_v27 = vpop.f32.mrf.mxu1  ;;  %v1664_v32 = vmax.f32 %v1530_v25, 0.0 }
 0x1a7   :  { %v1245_v28 = vpop.f32.mrf.mxu0 }
 0x1a8   :  { %v1533_v29 = vadd.f32 %v1532_v27, %v1244_v26  ;;  %v1534_v30 = vpop.f32.mrf.mxu1 }
 0x1a9   :  { %v1248_v31 = vpop.f32.mrf.mxu0 }
 0x1aa   :  { %v1665_v33 = vmax.f32 %v1533_v29, 0.0  ;;  %v1249_v34 = vadd.f32 %v3173_v6, %v1248_v31  ;;  %v1537_v35 = vpop.f32.mrf.mxu1 }
 0x1ab   :  { %v1250_v36 = vpop.f32.mrf.mxu0 }
 0x1ac   :  { %v2404_v37 = vpack.c.bf16 %v1665_v33, %v1664_v32  ;;  %v1539_v38 = vpop.f32.mrf.mxu1  ;;  %v1538_v40 = vadd.f32 %v1537_v35, %v1249_v34 }
 0x1ad   :  { %v1251_v39 = vpop.f32.mrf.mxu0 }
 0x1ae   :  { %2480 = vst [vmem:[%s3415_s3 + $0xa0] sm:$0xff] %v2404_v37   ;;  %v1252_v41 = vadd.f32 %v3173_v6, %v1251_v39  ;;  %v1540_v42 = vpop.f32.mrf.mxu1  ;;  %v1666_v47 = vmax.f32 %v1538_v40, 0.0 }
 0x1af   :  { %v1253_v43 = vpop.f32.mrf.mxu0 }
 0x1b0   :  { %v1541_v44 = vadd.f32 %v1540_v42, %v1252_v41  ;;  %v1542_v45 = vpop.f32.mrf.mxu1 }
 0x1b1   :  { %v1256_v46 = vpop.f32.mrf.mxu0 }
 0x1b2   :  { %v1667_v48 = vmax.f32 %v1541_v44, 0.0  ;;  %v1257_v49 = vadd.f32 %v3173_v6, %v1256_v46  ;;  %v1545_v50 = vpop.f32.mrf.mxu1 }
 0x1b3   :  { %v1258_v51 = vpop.f32.mrf.mxu0 }
 0x1b4   :  { %v2409_v52 = vpack.c.bf16 %v1667_v48, %v1666_v47  ;;  %v1547_v53 = vpop.f32.mrf.mxu1  ;;  %v1546_v55 = vadd.f32 %v1545_v50, %v1257_v49 }
 0x1b5   :  { %v1259_v54 = vpop.f32.mrf.mxu0 }
 0x1b6   :  { %2481 = vst [vmem:[%s3415_s3 + $0xa8] sm:$0xff] %v2409_v52   ;;  %v1260_v56 = vadd.f32 %v3173_v6, %v1259_v54  ;;  %v1548_v57 = vpop.f32.mrf.mxu1  ;;  %v1668_v62 = vmax.f32 %v1546_v55, 0.0 }
 0x1b7   :  { %v1261_v58 = vpop.f32.mrf.mxu0 }
 0x1b8   :  { %v1549_v59 = vadd.f32 %v1548_v57, %v1260_v56  ;;  %v1550_v60 = vpop.f32.mrf.mxu1 }
 0x1b9   :  { %v1264_v61 = vpop.f32.mrf.mxu0 }
 0x1ba   :  { %v1669_v63 = vmax.f32 %v1549_v59, 0.0  ;;  %v1265_v0 = vadd.f32 %v3173_v6, %v1264_v61  ;;  %v1553_v1 = vpop.f32.mrf.mxu1 }
 0x1bb   :  { %v1266_v2 = vpop.f32.mrf.mxu0 }
 0x1bc   :  { %v2414_v3 = vpack.c.bf16 %v1669_v63, %v1668_v62  ;;  %v1555_v4 = vpop.f32.mrf.mxu1  ;;  %v1554_v7 = vadd.f32 %v1553_v1, %v1265_v0 }
 0x1bd   :  { %v1267_v5 = vpop.f32.mrf.mxu0 }
 0x1be   :  { %2482 = vst [vmem:[%s3415_s3 + $0xb0] sm:$0xff] %v2414_v3   ;;  %v1268_v8 = vadd.f32 %v3173_v6, %v1267_v5  ;;  %v1556_v9 = vpop.f32.mrf.mxu1  ;;  %v1670_v14 = vmax.f32 %v1554_v7, 0.0 }
 0x1bf   :  { %v1269_v10 = vpop.f32.mrf.mxu0 }
 0x1c0   :  { %v1557_v11 = vadd.f32 %v1556_v9, %v1268_v8  ;;  %v1558_v12 = vpop.f32.mrf.mxu1 }
 0x1c1   :  { %v1272_v13 = vpop.f32.mrf.mxu0 }
 0x1c2   :  { %v1671_v15 = vmax.f32 %v1557_v11, 0.0  ;;  %v1273_v16 = vadd.f32 %v3173_v6, %v1272_v13  ;;  %v1561_v17 = vpop.f32.mrf.mxu1 }
 0x1c3   :  { %v1274_v18 = vpop.f32.mrf.mxu0 }
 0x1c4   :  { %v2419_v19 = vpack.c.bf16 %v1671_v15, %v1670_v14  ;;  %v1563_v20 = vpop.f32.mrf.mxu1  ;;  %v1562_v22 = vadd.f32 %v1561_v17, %v1273_v16 }
 0x1c5   :  { %v1275_v21 = vpop.f32.mrf.mxu0  ;;  %v2717_v20 = vld [vmem:[%s3414_s2] ss:$0 sm:$0xff] }
 0x1c6   :  { %2483 = vst [vmem:[%s3415_s3 + $0xb8] sm:$0xff] %v2419_v19   ;;  %v1276_v23 = vadd.f32 %v3173_v6, %v1275_v21  ;;  %v1564_v24 = vpop.f32.mrf.mxu1  ;;  %v1672_v29 = vmax.f32 %v1562_v22, 0.0 }
 0x1c7   :  { %v1277_v25 = vpop.f32.mrf.mxu0 }
 0x1c8   :  { %v1565_v26 = vadd.f32 %v1564_v24, %v1276_v23  ;;  %v1566_v27 = vpop.f32.mrf.mxu1 }
 0x1c9   :  { %v1280_v28 = vpop.f32.mrf.mxu0 }
 0x1ca   :  { %v1673_v30 = vmax.f32 %v1565_v26, 0.0  ;;  %v1281_v31 = vadd.f32 %v3173_v6, %v1280_v28  ;;  %v1569_v32 = vpop.f32.mrf.mxu1 }
 0x1cb   :  { %v1282_v33 = vpop.f32.mrf.mxu0 }
 0x1cc   :  { %v2424_v34 = vpack.c.bf16 %v1673_v30, %v1672_v29  ;;  %v1571_v35 = vpop.f32.mrf.mxu1  ;;  %v1570_v37 = vadd.f32 %v1569_v32, %v1281_v31 }
 0x1cd   :  { %v1283_v36 = vpop.f32.mrf.mxu0 }
 0x1ce   :  { %2484 = vst [vmem:[%s3415_s3 + $0xc0] sm:$0xff] %v2424_v34   ;;  %v1284_v38 = vadd.f32 %v3173_v6, %v1283_v36  ;;  %v1572_v39 = vpop.f32.mrf.mxu1  ;;  %v1674_v44 = vmax.f32 %v1570_v37, 0.0 }
 0x1cf   :  { %v1285_v40 = vpop.f32.mrf.mxu0 }
 0x1d0   :  { %v1573_v41 = vadd.f32 %v1572_v39, %v1284_v38  ;;  %v1574_v42 = vpop.f32.mrf.mxu1 }
 0x1d1   :  { %v1288_v43 = vpop.f32.mrf.mxu0 }
 0x1d2   :  { %v1675_v45 = vmax.f32 %v1573_v41, 0.0  ;;  %v1289_v46 = vadd.f32 %v3173_v6, %v1288_v43  ;;  %v1577_v47 = vpop.f32.mrf.mxu1 }
 0x1d3   :  { %v1290_v48 = vpop.f32.mrf.mxu0 }
 0x1d4   :  { %v2429_v49 = vpack.c.bf16 %v1675_v45, %v1674_v44  ;;  %v1579_v50 = vpop.f32.mrf.mxu1  ;;  %v1578_v52 = vadd.f32 %v1577_v47, %v1289_v46 }
 0x1d5   :  { %v1291_v51 = vpop.f32.mrf.mxu0 }
 0x1d6   :  { %2485 = vst [vmem:[%s3415_s3 + $0xc8] sm:$0xff] %v2429_v49   ;;  %v1292_v53 = vadd.f32 %v3173_v6, %v1291_v51  ;;  %v1580_v54 = vpop.f32.mrf.mxu1  ;;  %v1676_v59 = vmax.f32 %v1578_v52, 0.0 }
 0x1d7   :  { %v1293_v55 = vpop.f32.mrf.mxu0 }
 0x1d8   :  { %v1581_v56 = vadd.f32 %v1580_v54, %v1292_v53  ;;  %v1582_v57 = vpop.f32.mrf.mxu1 }
 0x1d9   :  { %v1296_v58 = vpop.f32.mrf.mxu0 }
 0x1da   :  { %v1677_v60 = vmax.f32 %v1581_v56, 0.0  ;;  %v1297_v61 = vadd.f32 %v3173_v6, %v1296_v58  ;;  %v1585_v62 = vpop.f32.mrf.mxu1 }
 0x1db   :  { %v1298_v63 = vpop.f32.mrf.mxu0 }
 0x1dc   :  { %v2434_v0 = vpack.c.bf16 %v1677_v60, %v1676_v59  ;;  %v1587_v1 = vpop.f32.mrf.mxu1  ;;  %v1586_v3 = vadd.f32 %v1585_v62, %v1297_v61 }
 0x1dd   :  { %v1299_v2 = vpop.f32.mrf.mxu0 }
 0x1de   :  { %2486 = vst [vmem:[%s3415_s3 + $0xd0] sm:$0xff] %v2434_v0   ;;  %v1300_v4 = vadd.f32 %v3173_v6, %v1299_v2  ;;  %v1588_v5 = vpop.f32.mrf.mxu1  ;;  %v1678_v11 = vmax.f32 %v1586_v3, 0.0 }
 0x1df   :  { %v1301_v7 = vpop.f32.mrf.mxu0 }
 0x1e0   :  { %v1589_v8 = vadd.f32 %v1588_v5, %v1300_v4  ;;  %v1590_v9 = vpop.f32.mrf.mxu1 }
 0x1e1   :  { %v1304_v10 = vpop.f32.mrf.mxu0 }
 0x1e2   :  { %v1679_v12 = vmax.f32 %v1589_v8, 0.0  ;;  %v1305_v13 = vadd.f32 %v3173_v6, %v1304_v10  ;;  %v1593_v14 = vpop.f32.mrf.mxu1 }
 0x1e3   :  { %v1306_v15 = vpop.f32.mrf.mxu0 }
 0x1e4   :  { %v2439_v16 = vpack.c.bf16 %v1679_v12, %v1678_v11  ;;  %v1595_v17 = vpop.f32.mrf.mxu1  ;;  %v1594_v19 = vadd.f32 %v1593_v14, %v1305_v13 }
 0x1e5   :  { %v1307_v18 = vpop.f32.mrf.mxu0 }
 0x1e6   :  { %2487 = vst [vmem:[%s3415_s3 + $0xd8] sm:$0xff] %v2439_v16   ;;  %v1308_v21 = vadd.f32 %v2717_v20, %v1307_v18  ;;  %v1596_v22 = vpop.f32.mrf.mxu1  ;;  %v1680_v26 = vmax.f32 %v1594_v19, 0.0 }
 0x1e7   :  { %v1309_v23 = vpop.f32.mrf.mxu0 }
 0x1e8   :  { %v1597_v24 = vadd.f32 %v1596_v22, %v1308_v21  ;;  %v1598_v25 = vpop.f32.mrf.mxu1 }
 0x1e9   :  { %v1312_v6 = vpop.f32.mrf.mxu0 }
 0x1ea   :  { %v1681_v27 = vmax.f32 %v1597_v24, 0.0  ;;  %v1313_v28 = vadd.f32 %v2717_v20, %v1312_v6  ;;  %v1601_v29 = vpop.f32.mrf.mxu1 }
 0x1eb   :  { %v1314_v30 = vpop.f32.mrf.mxu0 }
 0x1ec   :  { %v2444_v31 = vpack.c.bf16 %v1681_v27, %v1680_v26  ;;  %v1603_v32 = vpop.f32.mrf.mxu1  ;;  %v1602_v34 = vadd.f32 %v1601_v29, %v1313_v28 }
 0x1ed   :  { %v1315_v33 = vpop.f32.mrf.mxu0 }
 0x1ee   :  { %2488 = vst [vmem:[%s3415_s3 + $0xe0] sm:$0xff] %v2444_v31   ;;  %v1316_v35 = vadd.f32 %v2717_v20, %v1315_v33  ;;  %v1604_v36 = vpop.f32.mrf.mxu1  ;;  %v1682_v41 = vmax.f32 %v1602_v34, 0.0 }
 0x1ef   :  { %v1317_v37 = vpop.f32.mrf.mxu0 }
 0x1f0   :  { %v1605_v38 = vadd.f32 %v1604_v36, %v1316_v35  ;;  %v1606_v39 = vpop.f32.mrf.mxu1 }
 0x1f1   :  { %v1320_v40 = vpop.f32.mrf.mxu0 }
 0x1f2   :  { %v1683_v42 = vmax.f32 %v1605_v38, 0.0  ;;  %v1321_v43 = vadd.f32 %v2717_v20, %v1320_v40  ;;  %v1609_v44 = vpop.f32.mrf.mxu1 }
 0x1f3   :  { %v1322_v45 = vpop.f32.mrf.mxu0 }
 0x1f4   :  { %v2449_v46 = vpack.c.bf16 %v1683_v42, %v1682_v41  ;;  %v1611_v47 = vpop.f32.mrf.mxu1  ;;  %v1610_v49 = vadd.f32 %v1609_v44, %v1321_v43 }
 0x1f5   :  { %v1323_v48 = vpop.f32.mrf.mxu0 }
 0x1f6   :  { %2489 = vst [vmem:[%s3415_s3 + $0xe8] sm:$0xff] %v2449_v46   ;;  %v1324_v50 = vadd.f32 %v2717_v20, %v1323_v48  ;;  %v1612_v51 = vpop.f32.mrf.mxu1  ;;  %v1684_v56 = vmax.f32 %v1610_v49, 0.0 }
 0x1f7   :  { %v1325_v52 = vpop.f32.mrf.mxu0 }
 0x1f8   :  { %v1613_v53 = vadd.f32 %v1612_v51, %v1324_v50  ;;  %v1614_v54 = vpop.f32.mrf.mxu1 }
 0x1f9   :  { %v1328_v55 = vpop.f32.mrf.mxu0 }
 0x1fa   :  { %v1685_v57 = vmax.f32 %v1613_v53, 0.0  ;;  %v1329_v58 = vadd.f32 %v2717_v20, %v1328_v55  ;;  %v1617_v59 = vpop.f32.mrf.mxu1 }
 0x1fb   :  { %v1330_v60 = vpop.f32.mrf.mxu0 }
 0x1fc   :  { %v2454_v61 = vpack.c.bf16 %v1685_v57, %v1684_v56  ;;  %v1619_v62 = vpop.f32.mrf.mxu1  ;;  %v1618_v0 = vadd.f32 %v1617_v59, %v1329_v58 }
 0x1fd   :  { %v1331_v63 = vpop.f32.mrf.mxu0 }
 0x1fe   :  { %2490 = vst [vmem:[%s3415_s3 + $0xf0] sm:$0xff] %v2454_v61   ;;  %v1332_v1 = vadd.f32 %v2717_v20, %v1331_v63  ;;  %v1620_v2 = vpop.f32.mrf.mxu1  ;;  %v1686_v7 = vmax.f32 %v1618_v0, 0.0 }
 0x1ff   :  { %v1333_v3 = vpop.f32.mrf.mxu0 }
 0x200   :  { %v1621_v4 = vadd.f32 %v1620_v2, %v1332_v1  ;;  %v1622_v5 = vpop.f32.mrf.mxu1 }
 0x202   :  { %v1687_v8 = vmax.f32 %v1621_v4, 0.0 }
 0x204   :  { %v2459_v9 = vpack.c.bf16 %v1687_v8, %v1686_v7 }
 0x206   :  { %2491 = vst [vmem:[%s3415_s3 + $0xf8] sm:$0xff] %v2459_v9  }

</bundles_post_ra>
